<compile_context>
chip_gen: v6e
topology: v6e:2x2x1
jax: 0.10.0
libtpu: 0.0.40
codegen_flags: <defaults>
</compile_context>

<pallas_src>
import functools

import jax
import jax.numpy as jnp
from jax import lax
from jax.experimental import pallas as pl
from jax.experimental.pallas import tpu as pltpu

KKPAD = 32            # per-sub-pixel logit block padded 25 -> 32 (aligned slices)
_NEG = -1e30          # bias of padded logit rows -> softmax weight exactly 0


# --------------------------------------------------------------------------- #
# Fused kernel: comp (1x1 conv + SiLU) -> enc conv -> softmax -> reassembly,
# all on one row-halo'd, width-zero-padded tile resident in VMEM.
# --------------------------------------------------------------------------- #
def _carafe_fused_kernel(k_up, k_enc, wp, rpad,
                         x_ref, w1_ref, b1_ref, wenc_ref, benc_ref,
                         out_ref, y1_ref, col_ref):
    """Layout: channels on sublanes, flat (row, col) pixels on lanes.

      x_ref    (C, (th+2*rpad)*wp)      f32   halo'd, width-padded input tile
      w1_ref   (c_mid, C)               f32   folded comp conv
      b1_ref   (c_mid, 1)               f32
      wenc_ref (n_sub*KKPAD, 9*c_mid)   bf16  packed encoder conv
      benc_ref (n_sub*KKPAD, 1)         f32   (-1e30 on the padded logit rows)
      out_ref  (n_sub, C, th*wp)        f32
      y1_ref   (c_mid, (th+2*rpad)*wp)  bf16  scratch
      col_ref  (9*c_mid, th*wp)         bf16  scratch (im2col of y1, K = 576)
    """
    q, p = k_up // 2, k_enc // 2
    kk = k_up * k_up
    n_sub, c, m = out_ref.shape
    c_mid = y1_ref.shape[0]
    base = rpad * wp                    # flat offset of the first output row

    # ---- comp: 1x1 conv (+ folded BN) + SiLU over the whole halo'd tile (MXU).
    y = jnp.dot(w1_ref[...], x_ref[...], preferred_element_type=jnp.float32)
    y = y + b1_ref[...]
    y1_ref[...] = (y * jax.nn.sigmoid(y)).astype(y1_ref.dtype)

    # ---- im2col of y1: k_enc^2 shifted (c_mid, m) slabs stacked along K.
    for t in range(k_enc * k_enc):
        di, dj = divmod(t, k_enc)
        off = base + (di - p) * wp + (dj - p)
        col_ref[pl.ds(t * c_mid, c_mid), :] = y1_ref[:, pl.ds(off, m)]

    # ---- enc conv: ONE deep-K (K = 9*c_mid) bf16 MXU matmul + bias.
    e = jnp.dot(wenc_ref[...], col_ref[...],
                preferred_element_type=jnp.float32) + benc_ref[...]

    # ---- reassembly taps of x, read once and shared by all n_sub sub-pixels.
    xtaps = []
    for k in range(kk):
        ki, kj = divmod(k, k_up)
        off = base + (ki - q) * wp + (kj - q)
        xtaps.append(x_ref[:, pl.ds(off, m)])

    # ---- per-sub-pixel softmax over the kk taps + weighted reassembly.
    for pq in range(n_sub):
        lg = e[pq * KKPAD:(pq + 1) * KKPAD, :]
        ex = jnp.exp(lg - jnp.max(lg, axis=0, keepdims=True))
        s = jnp.sum(ex, axis=0, keepdims=True)
        inv = pl.reciprocal(s, approx=True)       # EUP vrcp
        inv = inv * (2.0 - s * inv)               # one Newton step -> ~f32 exact
        wm = ex * inv                             # (KKPAD, m); padded rows == 0
        acc = wm[0:1, :] * xtaps[0]
        for k in range(1, kk):
            acc = acc + wm[k:k + 1, :] * xtaps[k]
        out_ref[pq] = acc.astype(out_ref.dtype)


def _carafe_pallas(x_tiles, w1, b1, wenc, benc, *, k_up, k_enc, scale,
                   th, wp, rpad, vmem_limit_bytes):
    nt, c, mt = x_tiles.shape
    c_mid = w1.shape[0]
    n_out, kcol = wenc.shape
    n_sub = scale * scale
    m = th * wp
    kern = functools.partial(_carafe_fused_kernel, k_up, k_enc, wp, rpad)
    return pl.pallas_call(
        kern,
        out_shape=jax.ShapeDtypeStruct((nt, n_sub, c, m), jnp.float32),
        grid_spec=pltpu.PrefetchScalarGridSpec(
            num_scalar_prefetch=0,
            grid=(nt,),
            in_specs=[
                pl.BlockSpec((None, c, mt), lambda i: (i, 0, 0)),   # x tile
                pl.BlockSpec((c_mid, c), lambda i: (0, 0)),         # w1
                pl.BlockSpec((c_mid, 1), lambda i: (0, 0)),         # b1
                pl.BlockSpec((n_out, kcol), lambda i: (0, 0)),      # wenc (packed)
                pl.BlockSpec((n_out, 1), lambda i: (0, 0)),         # benc (packed)
            ],
            out_specs=pl.BlockSpec((None, n_sub, c, m), lambda i: (i, 0, 0, 0)),
            scratch_shapes=[
                pltpu.VMEM((c_mid, mt), jnp.bfloat16),              # y1
                pltpu.VMEM((kcol, m), jnp.bfloat16),                # y1 im2col
            ],
        ),
        compiler_params=pltpu.CompilerParams(
            dimension_semantics=("parallel",),
            vmem_limit_bytes=vmem_limit_bytes),
    )(x_tiles, w1, b1, wenc, benc)


# --------------------------------------------------------------------------- #
# Host-side helpers
# --------------------------------------------------------------------------- #
def _vmem_capacity_bytes():
    try:
        cap = int(pltpu.get_tpu_info().vmem_capacity_bytes)
        if cap > 0:
            return cap
    except Exception:
        pass
    return 64 * 1024 * 1024           # conservative: v7x per-core physical VMEM


def _tile_vmem_bytes(th, *, w, c, c_mid, k_up, k_enc, scale):
    """Rough live-VMEM bytes of one row tile (used only to size th)."""
    q = k_up // 2
    rpad = q + 1
    wp = w + 2 * q
    n_sub = scale * scale
    mt = (th + 2 * rpad) * wp
    m = th * wp
    byt = 0
    byt += 2 * 4 * c * mt                      # x block (f32, double-buffered)
    byt += 2 * c_mid * mt                      # y1 scratch (bf16)
    byt += 2 * k_enc * k_enc * c_mid * m       # y1 im2col scratch (bf16)
    byt += 4 * n_sub * KKPAD * m               # encoder logits (f32 value)
    byt += 4 * c * k_up * k_up * m             # hoisted reassembly taps (f32)
    byt += 2 * 4 * n_sub * c * m               # output block (f32, double-buffered)
    byt += 4 * 3 * KKPAD * m                   # softmax temporaries
    return byt


def _pick_tile_rows(h, batch, *, w, c, c_mid, k_up, k_enc, scale, budget):
    """Largest divisor of h whose tile fits the VMEM budget (prefer even nt)."""
    fits = [th for th in range(1, h + 1)
            if h % th == 0 and _tile_vmem_bytes(
                th, w=w, c=c, c_mid=c_mid, k_up=k_up, k_enc=k_enc,
                scale=scale) <= budget]
    if not fits:
        return 1
    even = [th for th in fits if (batch * (h // th)) % 2 == 0]   # both v7x TCs busy
    return max(even) if even else max(fits)


def init_params(key, c, *, c_mid=64, k_up=5, k_enc=3, scale=2, bn_eps=1e-3):
    k1, k2 = jax.random.split(key)
    kk = k_up * k_up
    n_sub = scale * scale
    c_enc = n_sub * kk
    w_comp = jax.random.normal(k1, (c_mid, c), jnp.float32) / (c ** 0.5)
    w_enc = jax.random.normal(k2, (c_enc, c_mid, k_enc, k_enc), jnp.float32) / (
        (c_mid * k_enc * k_enc) ** 0.5)
    # BatchNorm2d (eval, default stats: mean=0, var=1, gamma=1, beta=0) folds
    # to a scalar scale 1/sqrt(1+eps) and zero bias.
    s = 1.0 / jnp.sqrt(1.0 + bn_eps)
    w1 = w_comp * s                                              # (c_mid, c)
    b1 = jnp.zeros((c_mid, 1), jnp.float32)
    # Keep the encoder weights bf16-representable so the kernel (bf16 MXU) and
    # the f32 reference use identical weights.
    wenc4 = (w_enc * s).astype(jnp.bfloat16).astype(jnp.float32)  # OIHW
    benc_flat = jnp.zeros((c_enc,), jnp.float32)
    # Pack for the kernel: rows = (pq, k) with k padded 25->KKPAD, cols =
    # (tap t = kh*k_enc + kw, c_mid) -- matches the in-kernel im2col order.
    w4 = wenc4.reshape(kk, n_sub, c_mid, k_enc, k_enc)
    w4 = jnp.transpose(w4, (1, 0, 3, 4, 2)).reshape(n_sub, kk,
                                                    k_enc * k_enc * c_mid)
    wflat = jnp.zeros((n_sub, KKPAD, k_enc * k_enc * c_mid), jnp.float32)
    wflat = wflat.at[:, :kk].set(w4)
    wenc = wflat.reshape(n_sub * KKPAD, k_enc * k_enc * c_mid).astype(jnp.bfloat16)
    bflat = jnp.full((n_sub, KKPAD), _NEG, jnp.float32)
    bflat = bflat.at[:, :kk].set(benc_flat.reshape(kk, n_sub).T)
    benc = bflat.reshape(n_sub * KKPAD, 1)
    return dict(w1=w1, b1=b1, wenc=wenc, benc=benc,
                wenc4=wenc4, benc_flat=benc_flat)


# --------------------------------------------------------------------------- #
# Forward (NCHW in / NCHW out)
# --------------------------------------------------------------------------- #
def carafe_forward(x_nchw, params, *, scale=2, k_up=5, k_enc=3):
    b, c, h, w = x_nchw.shape
    q, p = k_up // 2, k_enc // 2
    assert q >= max(1, p), "width pad (k_up//2) must cover the encoder reach"
    c_mid = params["w1"].shape[0]
    rpad = q + 1                      # row halo; +1 keeps all flat taps in-bounds
    wp = w + 2 * q                    # width-padded row stride (real zero pad)

    cap = _vmem_capacity_bytes()
    budget = int(0.40 * cap)
    th = _pick_tile_rows(h, b, w=w, c=c, c_mid=c_mid, k_up=k_up, k_enc=k_enc,
                         scale=scale, budget=budget)
    n_rt = h // th
    vmem_limit = int(max(32 * 1024 * 1024,
                         min(0.75 * cap, cap - 8 * 1024 * 1024)))

    # TODO(synk): the zero padding of y1 (halo rows + width-pad columns) relies
    # on the folded comp bias being exactly 0 (SiLU(0) = 0).  With trained BN
    # stats (b1 != 0) the padded y1 pixels would have to be explicitly zeroed
    # before the encoder conv.

    x_f32 = x_nchw.astype(jnp.float32)
    xp = jnp.pad(x_f32, ((0, 0), (0, 0), (rpad, rpad), (q, q)))
    tiles = jnp.stack(
        [xp[:, :, t * th: t * th + th + 2 * rpad, :] for t in range(n_rt)],
        axis=1)
    x_tiles = tiles.reshape(b * n_rt, c, (th + 2 * rpad) * wp)

    out = _carafe_pallas(x_tiles, params["w1"], params["b1"],
                         params["wenc"], params["benc"],
                         k_up=k_up, k_enc=k_enc, scale=scale,
                         th=th, wp=wp, rpad=rpad,
                         vmem_limit_bytes=vmem_limit)

    # (b*n_rt, n_sub, c, th*wp) -> (b, c, h*scale, w*scale); drop width-pad cols.
    out = out.reshape(b, n_rt, scale, scale, c, th, wp)[..., q:q + w]
    out = jnp.transpose(out, (0, 4, 1, 5, 2, 6, 3))
    return out.reshape(b, c, h * scale, w * scale)


# --------------------------------------------------------------------------- #
# Pure-JAX reference (follows the PyTorch ops literally) for validation
# --------------------------------------------------------------------------- #
def carafe_reference(x, params, *, scale=2, k_up=5, k_enc=3):
    b, c, h, w = x.shape
    h_, w_ = h * scale, w * scale
    kk = k_up * k_up
    # comp
    y1 = jnp.einsum('bchw,mc->bmhw', x, params['w1'])
    y1 = y1 + params['b1'][:, 0][None, :, None, None]
    y1 = y1 * jax.nn.sigmoid(y1)
    # enc
    p = k_enc // 2
    e = lax.conv_general_dilated(
        y1, params['wenc4'], (1, 1), padding=((p, p), (p, p)),
        dimension_numbers=('NCHW', 'OIHW', 'NCHW'))
    e = e + params['benc_flat'][None, :, None, None]
    # pixel shuffle + softmax
    W = e.reshape(b, kk, scale, scale, h, w)
    W = jnp.transpose(W, (0, 1, 4, 2, 5, 3)).reshape(b, kk, h_, w_)
    W = jax.nn.softmax(W, axis=1)
    # nearest upsample + unfold(k_up, dilation=scale, padding=k_up//2*scale)
    xu = jnp.repeat(jnp.repeat(x, scale, axis=2), scale, axis=3)
    pad = (k_up // 2) * scale
    xup = jnp.pad(xu, ((0, 0), (0, 0), (pad, pad), (pad, pad)))
    cols = [xup[:, :, ki * scale:ki * scale + h_, kj * scale:kj * scale + w_]
            for ki in range(k_up) for kj in range(k_up)]
    Xn = jnp.stack(cols, axis=2)  # (b, c, kk, h_, w_)
    return jnp.einsum('bkhw,bckhw->bchw', W, Xn)


if __name__ == "__main__":
    B, C, H, W = 2, 4, 16, 16
    C_MID, K_UP, K_ENC, SCALE = 64, 5, 3, 2

    key = jax.random.PRNGKey(0)
    kx, kp = jax.random.split(key)
    x = jax.random.normal(kx, (B, C, H, W), jnp.float32)
    params = init_params(kp, C, c_mid=C_MID, k_up=K_UP, k_enc=K_ENC, scale=SCALE)

    out = carafe_forward(x, params, scale=SCALE, k_up=K_UP, k_enc=K_ENC)
    out = jax.block_until_ready(out)
    assert out.shape == (B, C, H * SCALE, W * SCALE), out.shape

    ref = carafe_reference(x, params, scale=SCALE, k_up=K_UP, k_enc=K_ENC)
    # Tolerance covers the intentional bf16 encoder-conv path (y1 stored bf16);
    # everything else (comp, softmax, reassembly) is f32.
    max_err = float(jnp.max(jnp.abs(out - ref)))
    assert max_err < 2e-2, f"max abs error {max_err}"

    print("KERNEL_OK")
</pallas_src>

<mosaic_0001>
module attributes {stable_mosaic.version = 11 : i64} {
  func.func @_carafe_fused_kernel(%arg0: i32, %arg1: memref<1x4x440xf32, #tpu.memory_space<vmem>>, %arg2: memref<64x4xf32, #tpu.memory_space<vmem>>, %arg3: memref<64x1xf32, #tpu.memory_space<vmem>>, %arg4: memref<128x576xbf16, #tpu.memory_space<vmem>>, %arg5: memref<128x1xf32, #tpu.memory_space<vmem>>, %arg6: memref<1x4x4x320xf32, #tpu.memory_space<vmem>>, %arg7: memref<64x440xbf16, #tpu.memory_space<vmem>>, %arg8: memref<576x320xbf16, #tpu.memory_space<vmem>>) attributes {dimension_semantics = [#tpu.dimension_semantics<parallel>], iteration_bounds = array<i64: 2>, scalar_prefetch = 0 : i64, scratch_operands = 2 : i64, tpu.core_type = #tpu.core_type<tc>, window_params = [{transform_indices = @transform_0, window_bounds = array<i64: 1, 4, 440>}, {pipeline_mode = #tpu.pipeline_mode<synchronous>, transform_indices = @transform_1, window_bounds = array<i64: 64, 4>}, {pipeline_mode = #tpu.pipeline_mode<synchronous>, transform_indices = @transform_2, window_bounds = array<i64: 64, 1>}, {pipeline_mode = #tpu.pipeline_mode<synchronous>, transform_indices = @transform_3, window_bounds = array<i64: 128, 576>}, {pipeline_mode = #tpu.pipeline_mode<synchronous>, transform_indices = @transform_4, window_bounds = array<i64: 128, 1>}, {transform_indices = @transform_5, window_bounds = array<i64: 1, 4, 4, 320>}]} {
    %c0 = arith.constant 0 : index
    %c0_0 = arith.constant 0 : index
    %0 = vector.load %arg2[%c0, %c0_0] : memref<64x4xf32, #tpu.memory_space<vmem>>, vector<64x4xf32>
    %c0_1 = arith.constant 0 : index
    %c0_2 = arith.constant 0 : index
    %c0_3 = arith.constant 0 : index
    %1 = vector.load %arg1[%c0_1, %c0_2, %c0_3] : memref<1x4x440xf32, #tpu.memory_space<vmem>>, vector<1x4x440xf32>
    %2 = vector.shape_cast %1 : vector<1x4x440xf32> to vector<4x440xf32>
    %cst = arith.constant dense<0.000000e+00> : vector<64x440xf32>
    %3 = tpu.matmul %0, %2, %cst {dimension_numbers = #tpu.dot_dimension_numbers<[1], [0], [0], [1], [0, 0, 1, 1], [], []>} : vector<64x4xf32>, vector<4x440xf32>, vector<64x440xf32> -> vector<64x440xf32>
    %c0_4 = arith.constant 0 : index
    %c0_5 = arith.constant 0 : index
    %4 = vector.load %arg3[%c0_4, %c0_5] : memref<64x1xf32, #tpu.memory_space<vmem>>, vector<64x1xf32>
    %5 = vector.broadcast %4 : vector<64x1xf32> to vector<64x440xf32>
    %6 = arith.addf %3, %5 : vector<64x440xf32>
    %7 = arith.negf %6 : vector<64x440xf32>
    %8 = math.exp %7 : vector<64x440xf32>
    %cst_6 = arith.constant 1.000000e+00 : f32
    %9 = vector.broadcast %cst_6 : f32 to vector<64x440xf32>
    %10 = arith.addf %9, %8 : vector<64x440xf32>
    %11 = arith.divf %9, %10 : vector<64x440xf32>
    %12 = arith.mulf %6, %11 : vector<64x440xf32>
    %13 = arith.truncf %12 : vector<64x440xf32> to vector<64x440xbf16>
    %c0_7 = arith.constant 0 : index
    %c0_8 = arith.constant 0 : index
    %14 = vector.load %arg7[%c0_7, %c0_8] : memref<64x440xbf16, #tpu.memory_space<vmem>>, vector<64x440xbf16>
    tpu.vector_store %arg7[%c0_7, %c0_8], %13 {strides = array<i32>} : memref<64x440xbf16, #tpu.memory_space<vmem>>, vector<64x440xbf16>,
    %c0_9 = arith.constant 0 : index
    %c39 = arith.constant 39 : index
    %15 = vector.load %arg7[%c0_9, %c39] : memref<64x440xbf16, #tpu.memory_space<vmem>>, vector<64x320xbf16>
    %c0_10 = arith.constant 0 : index
    %c0_11 = arith.constant 0 : index
    %16 = vector.load %arg8[%c0_10, %c0_11] : memref<576x320xbf16, #tpu.memory_space<vmem>>, vector<64x320xbf16>
    tpu.vector_store %arg8[%c0_10, %c0_11], %15 {strides = array<i32>} : memref<576x320xbf16, #tpu.memory_space<vmem>>, vector<64x320xbf16>,
    %c0_12 = arith.constant 0 : index
    %c40 = arith.constant 40 : index
    %17 = vector.load %arg7[%c0_12, %c40] : memref<64x440xbf16, #tpu.memory_space<vmem>>, vector<64x320xbf16>
    %c64 = arith.constant 64 : index
    %c0_13 = arith.constant 0 : index
    %18 = vector.load %arg8[%c64, %c0_13] : memref<576x320xbf16, #tpu.memory_space<vmem>>, vector<64x320xbf16>
    tpu.vector_store %arg8[%c64, %c0_13], %17 {strides = array<i32>} : memref<576x320xbf16, #tpu.memory_space<vmem>>, vector<64x320xbf16>,
    %c0_14 = arith.constant 0 : index
    %c41 = arith.constant 41 : index
    %19 = vector.load %arg7[%c0_14, %c41] : memref<64x440xbf16, #tpu.memory_space<vmem>>, vector<64x320xbf16>
    %c128 = arith.constant 128 : index
    %c0_15 = arith.constant 0 : index
    %20 = vector.load %arg8[%c128, %c0_15] : memref<576x320xbf16, #tpu.memory_space<vmem>>, vector<64x320xbf16>
    tpu.vector_store %arg8[%c128, %c0_15], %19 {strides = array<i32>} : memref<576x320xbf16, #tpu.memory_space<vmem>>, vector<64x320xbf16>,
    %c0_16 = arith.constant 0 : index
    %c59 = arith.constant 59 : index
    %21 = vector.load %arg7[%c0_16, %c59] : memref<64x440xbf16, #tpu.memory_space<vmem>>, vector<64x320xbf16>
    %c192 = arith.constant 192 : index
    %c0_17 = arith.constant 0 : index
    %22 = vector.load %arg8[%c192, %c0_17] : memref<576x320xbf16, #tpu.memory_space<vmem>>, vector<64x320xbf16>
    tpu.vector_store %arg8[%c192, %c0_17], %21 {strides = array<i32>} : memref<576x320xbf16, #tpu.memory_space<vmem>>, vector<64x320xbf16>,
    %c0_18 = arith.constant 0 : index
    %c60 = arith.constant 60 : index
    %23 = vector.load %arg7[%c0_18, %c60] : memref<64x440xbf16, #tpu.memory_space<vmem>>, vector<64x320xbf16>
    %c256 = arith.constant 256 : index
    %c0_19 = arith.constant 0 : index
    %24 = vector.load %arg8[%c256, %c0_19] : memref<576x320xbf16, #tpu.memory_space<vmem>>, vector<64x320xbf16>
    tpu.vector_store %arg8[%c256, %c0_19], %23 {strides = array<i32>} : memref<576x320xbf16, #tpu.memory_space<vmem>>, vector<64x320xbf16>,
    %c0_20 = arith.constant 0 : index
    %c61 = arith.constant 61 : index
    %25 = vector.load %arg7[%c0_20, %c61] : memref<64x440xbf16, #tpu.memory_space<vmem>>, vector<64x320xbf16>
    %c320 = arith.constant 320 : index
    %c0_21 = arith.constant 0 : index
    %26 = vector.load %arg8[%c320, %c0_21] : memref<576x320xbf16, #tpu.memory_space<vmem>>, vector<64x320xbf16>
    tpu.vector_store %arg8[%c320, %c0_21], %25 {strides = array<i32>} : memref<576x320xbf16, #tpu.memory_space<vmem>>, vector<64x320xbf16>,
    %c0_22 = arith.constant 0 : index
    %c79 = arith.constant 79 : index
    %27 = vector.load %arg7[%c0_22, %c79] : memref<64x440xbf16, #tpu.memory_space<vmem>>, vector<64x320xbf16>
    %c384 = arith.constant 384 : index
    %c0_23 = arith.constant 0 : index
    %28 = vector.load %arg8[%c384, %c0_23] : memref<576x320xbf16, #tpu.memory_space<vmem>>, vector<64x320xbf16>
    tpu.vector_store %arg8[%c384, %c0_23], %27 {strides = array<i32>} : memref<576x320xbf16, #tpu.memory_space<vmem>>, vector<64x320xbf16>,
    %c0_24 = arith.constant 0 : index
    %c80 = arith.constant 80 : index
    %29 = vector.load %arg7[%c0_24, %c80] : memref<64x440xbf16, #tpu.memory_space<vmem>>, vector<64x320xbf16>
    %c448 = arith.constant 448 : index
    %c0_25 = arith.constant 0 : index
    %30 = vector.load %arg8[%c448, %c0_25] : memref<576x320xbf16, #tpu.memory_space<vmem>>, vector<64x320xbf16>
    tpu.vector_store %arg8[%c448, %c0_25], %29 {strides = array<i32>} : memref<576x320xbf16, #tpu.memory_space<vmem>>, vector<64x320xbf16>,
    %c0_26 = arith.constant 0 : index
    %c81 = arith.constant 81 : index
    %31 = vector.load %arg7[%c0_26, %c81] : memref<64x440xbf16, #tpu.memory_space<vmem>>, vector<64x320xbf16>
    %c512 = arith.constant 512 : index
    %c0_27 = arith.constant 0 : index
    %32 = vector.load %arg8[%c512, %c0_27] : memref<576x320xbf16, #tpu.memory_space<vmem>>, vector<64x320xbf16>
    tpu.vector_store %arg8[%c512, %c0_27], %31 {strides = array<i32>} : memref<576x320xbf16, #tpu.memory_space<vmem>>, vector<64x320xbf16>,
    %c0_28 = arith.constant 0 : index
    %c0_29 = arith.constant 0 : index
    %33 = vector.load %arg4[%c0_28, %c0_29] : memref<128x576xbf16, #tpu.memory_space<vmem>>, vector<128x576xbf16>
    %c0_30 = arith.constant 0 : index
    %c0_31 = arith.constant 0 : index
    %34 = vector.load %arg8[%c0_30, %c0_31] : memref<576x320xbf16, #tpu.memory_space<vmem>>, vector<576x320xbf16>
    %cst_32 = arith.constant dense<0.000000e+00> : vector<128x320xf32>
    %35 = tpu.matmul %33, %34, %cst_32 {dimension_numbers = #tpu.dot_dimension_numbers<[1], [0], [0], [1], [0, 0, 1, 1], [], []>} : vector<128x576xbf16>, vector<576x320xbf16>, vector<128x320xf32> -> vector<128x320xf32>
    %c0_33 = arith.constant 0 : index
    %c0_34 = arith.constant 0 : index
    %36 = vector.load %arg5[%c0_33, %c0_34] : memref<128x1xf32, #tpu.memory_space<vmem>>, vector<128x1xf32>
    %37 = vector.broadcast %36 : vector<128x1xf32> to vector<128x320xf32>
    %38 = arith.addf %35, %37 : vector<128x320xf32>
    %c0_35 = arith.constant 0 : index
    %c0_36 = arith.constant 0 : index
    %c18 = arith.constant 18 : index
    %39 = vector.load %arg1[%c0_35, %c0_36, %c18] : memref<1x4x440xf32, #tpu.memory_space<vmem>>, vector<1x4x320xf32>
    %40 = vector.shape_cast %39 : vector<1x4x320xf32> to vector<4x320xf32>
    %c0_37 = arith.constant 0 : index
    %c0_38 = arith.constant 0 : index
    %c19 = arith.constant 19 : index
    %41 = vector.load %arg1[%c0_37, %c0_38, %c19] : memref<1x4x440xf32, #tpu.memory_space<vmem>>, vector<1x4x320xf32>
    %42 = vector.shape_cast %41 : vector<1x4x320xf32> to vector<4x320xf32>
    %c0_39 = arith.constant 0 : index
    %c0_40 = arith.constant 0 : index
    %c20 = arith.constant 20 : index
    %43 = vector.load %arg1[%c0_39, %c0_40, %c20] : memref<1x4x440xf32, #tpu.memory_space<vmem>>, vector<1x4x320xf32>
    %44 = vector.shape_cast %43 : vector<1x4x320xf32> to vector<4x320xf32>
    %c0_41 = arith.constant 0 : index
    %c0_42 = arith.constant 0 : index
    %c21 = arith.constant 21 : index
    %45 = vector.load %arg1[%c0_41, %c0_42, %c21] : memref<1x4x440xf32, #tpu.memory_space<vmem>>, vector<1x4x320xf32>
    %46 = vector.shape_cast %45 : vector<1x4x320xf32> to vector<4x320xf32>
    %c0_43 = arith.constant 0 : index
    %c0_44 = arith.constant 0 : index
    %c22 = arith.constant 22 : index
    %47 = vector.load %arg1[%c0_43, %c0_44, %c22] : memref<1x4x440xf32, #tpu.memory_space<vmem>>, vector<1x4x320xf32>
    %48 = vector.shape_cast %47 : vector<1x4x320xf32> to vector<4x320xf32>
    %c0_45 = arith.constant 0 : index
    %c0_46 = arith.constant 0 : index
    %c38 = arith.constant 38 : index
    %49 = vector.load %arg1[%c0_45, %c0_46, %c38] : memref<1x4x440xf32, #tpu.memory_space<vmem>>, vector<1x4x320xf32>
    %50 = vector.shape_cast %49 : vector<1x4x320xf32> to vector<4x320xf32>
    %c0_47 = arith.constant 0 : index
    %c0_48 = arith.constant 0 : index
    %c39_49 = arith.constant 39 : index
    %51 = vector.load %arg1[%c0_47, %c0_48, %c39_49] : memref<1x4x440xf32, #tpu.memory_space<vmem>>, vector<1x4x320xf32>
    %52 = vector.shape_cast %51 : vector<1x4x320xf32> to vector<4x320xf32>
    %c0_50 = arith.constant 0 : index
    %c0_51 = arith.constant 0 : index
    %c40_52 = arith.constant 40 : index
    %53 = vector.load %arg1[%c0_50, %c0_51, %c40_52] : memref<1x4x440xf32, #tpu.memory_space<vmem>>, vector<1x4x320xf32>
    %54 = vector.shape_cast %53 : vector<1x4x320xf32> to vector<4x320xf32>
    %c0_53 = arith.constant 0 : index
    %c0_54 = arith.constant 0 : index
    %c41_55 = arith.constant 41 : index
    %55 = vector.load %arg1[%c0_53, %c0_54, %c41_55] : memref<1x4x440xf32, #tpu.memory_space<vmem>>, vector<1x4x320xf32>
    %56 = vector.shape_cast %55 : vector<1x4x320xf32> to vector<4x320xf32>
    %c0_56 = arith.constant 0 : index
    %c0_57 = arith.constant 0 : index
    %c42 = arith.constant 42 : index
    %57 = vector.load %arg1[%c0_56, %c0_57, %c42] : memref<1x4x440xf32, #tpu.memory_space<vmem>>, vector<1x4x320xf32>
    %58 = vector.shape_cast %57 : vector<1x4x320xf32> to vector<4x320xf32>
    %c0_58 = arith.constant 0 : index
    %c0_59 = arith.constant 0 : index
    %c58 = arith.constant 58 : index
    %59 = vector.load %arg1[%c0_58, %c0_59, %c58] : memref<1x4x440xf32, #tpu.memory_space<vmem>>, vector<1x4x320xf32>
    %60 = vector.shape_cast %59 : vector<1x4x320xf32> to vector<4x320xf32>
    %c0_60 = arith.constant 0 : index
    %c0_61 = arith.constant 0 : index
    %c59_62 = arith.constant 59 : index
    %61 = vector.load %arg1[%c0_60, %c0_61, %c59_62] : memref<1x4x440xf32, #tpu.memory_space<vmem>>, vector<1x4x320xf32>
    %62 = vector.shape_cast %61 : vector<1x4x320xf32> to vector<4x320xf32>
    %c0_63 = arith.constant 0 : index
    %c0_64 = arith.constant 0 : index
    %c60_65 = arith.constant 60 : index
    %63 = vector.load %arg1[%c0_63, %c0_64, %c60_65] : memref<1x4x440xf32, #tpu.memory_space<vmem>>, vector<1x4x320xf32>
    %64 = vector.shape_cast %63 : vector<1x4x320xf32> to vector<4x320xf32>
    %c0_66 = arith.constant 0 : index
    %c0_67 = arith.constant 0 : index
    %c61_68 = arith.constant 61 : index
    %65 = vector.load %arg1[%c0_66, %c0_67, %c61_68] : memref<1x4x440xf32, #tpu.memory_space<vmem>>, vector<1x4x320xf32>
    %66 = vector.shape_cast %65 : vector<1x4x320xf32> to vector<4x320xf32>
    %c0_69 = arith.constant 0 : index
    %c0_70 = arith.constant 0 : index
    %c62 = arith.constant 62 : index
    %67 = vector.load %arg1[%c0_69, %c0_70, %c62] : memref<1x4x440xf32, #tpu.memory_space<vmem>>, vector<1x4x320xf32>
    %68 = vector.shape_cast %67 : vector<1x4x320xf32> to vector<4x320xf32>
    %c0_71 = arith.constant 0 : index
    %c0_72 = arith.constant 0 : index
    %c78 = arith.constant 78 : index
    %69 = vector.load %arg1[%c0_71, %c0_72, %c78] : memref<1x4x440xf32, #tpu.memory_space<vmem>>, vector<1x4x320xf32>
    %70 = vector.shape_cast %69 : vector<1x4x320xf32> to vector<4x320xf32>
    %c0_73 = arith.constant 0 : index
    %c0_74 = arith.constant 0 : index
    %c79_75 = arith.constant 79 : index
    %71 = vector.load %arg1[%c0_73, %c0_74, %c79_75] : memref<1x4x440xf32, #tpu.memory_space<vmem>>, vector<1x4x320xf32>
    %72 = vector.shape_cast %71 : vector<1x4x320xf32> to vector<4x320xf32>
    %c0_76 = arith.constant 0 : index
    %c0_77 = arith.constant 0 : index
    %c80_78 = arith.constant 80 : index
    %73 = vector.load %arg1[%c0_76, %c0_77, %c80_78] : memref<1x4x440xf32, #tpu.memory_space<vmem>>, vector<1x4x320xf32>
    %74 = vector.shape_cast %73 : vector<1x4x320xf32> to vector<4x320xf32>
    %c0_79 = arith.constant 0 : index
    %c0_80 = arith.constant 0 : index
    %c81_81 = arith.constant 81 : index
    %75 = vector.load %arg1[%c0_79, %c0_80, %c81_81] : memref<1x4x440xf32, #tpu.memory_space<vmem>>, vector<1x4x320xf32>
    %76 = vector.shape_cast %75 : vector<1x4x320xf32> to vector<4x320xf32>
    %c0_82 = arith.constant 0 : index
    %c0_83 = arith.constant 0 : index
    %c82 = arith.constant 82 : index
    %77 = vector.load %arg1[%c0_82, %c0_83, %c82] : memref<1x4x440xf32, #tpu.memory_space<vmem>>, vector<1x4x320xf32>
    %78 = vector.shape_cast %77 : vector<1x4x320xf32> to vector<4x320xf32>
    %c0_84 = arith.constant 0 : index
    %c0_85 = arith.constant 0 : index
    %c98 = arith.constant 98 : index
    %79 = vector.load %arg1[%c0_84, %c0_85, %c98] : memref<1x4x440xf32, #tpu.memory_space<vmem>>, vector<1x4x320xf32>
    %80 = vector.shape_cast %79 : vector<1x4x320xf32> to vector<4x320xf32>
    %c0_86 = arith.constant 0 : index
    %c0_87 = arith.constant 0 : index
    %c99 = arith.constant 99 : index
    %81 = vector.load %arg1[%c0_86, %c0_87, %c99] : memref<1x4x440xf32, #tpu.memory_space<vmem>>, vector<1x4x320xf32>
    %82 = vector.shape_cast %81 : vector<1x4x320xf32> to vector<4x320xf32>
    %c0_88 = arith.constant 0 : index
    %c0_89 = arith.constant 0 : index
    %c100 = arith.constant 100 : index
    %83 = vector.load %arg1[%c0_88, %c0_89, %c100] : memref<1x4x440xf32, #tpu.memory_space<vmem>>, vector<1x4x320xf32>
    %84 = vector.shape_cast %83 : vector<1x4x320xf32> to vector<4x320xf32>
    %c0_90 = arith.constant 0 : index
    %c0_91 = arith.constant 0 : index
    %c101 = arith.constant 101 : index
    %85 = vector.load %arg1[%c0_90, %c0_91, %c101] : memref<1x4x440xf32, #tpu.memory_space<vmem>>, vector<1x4x320xf32>
    %86 = vector.shape_cast %85 : vector<1x4x320xf32> to vector<4x320xf32>
    %c0_92 = arith.constant 0 : index
    %c0_93 = arith.constant 0 : index
    %c102 = arith.constant 102 : index
    %87 = vector.load %arg1[%c0_92, %c0_93, %c102] : memref<1x4x440xf32, #tpu.memory_space<vmem>>, vector<1x4x320xf32>
    %88 = vector.shape_cast %87 : vector<1x4x320xf32> to vector<4x320xf32>
    %89 = vector.extract_strided_slice %38 {offsets = [0, 0], sizes = [32, 320], strides = [1, 1]} : vector<128x320xf32> to vector<32x320xf32>
    %cst_94 = arith.constant dense<0xFF800000> : vector<320xf32>
    %90 = vector.multi_reduction <maximumf>, %89, %cst_94 [0] : vector<32x320xf32> to vector<320xf32>
    %91 = vector.shape_cast %90 : vector<320xf32> to vector<1x320xf32>
    %92 = vector.broadcast %91 : vector<1x320xf32> to vector<32x320xf32>
    %93 = arith.subf %89, %92 : vector<32x320xf32>
    %94 = math.exp %93 : vector<32x320xf32>
    %cst_95 = arith.constant dense<0.000000e+00> : vector<320xf32>
    %95 = vector.multi_reduction <add>, %94, %cst_95 [0] : vector<32x320xf32> to vector<320xf32>
    %96 = vector.shape_cast %95 : vector<320xf32> to vector<1x320xf32>
    %97 = tpu.reciprocal %96 {approx = true} : vector<1x320xf32> -> vector<1x320xf32>
    %98 = arith.mulf %96, %97 : vector<1x320xf32>
    %cst_96 = arith.constant 2.000000e+00 : f32
    %99 = vector.broadcast %cst_96 : f32 to vector<1x320xf32>
    %100 = arith.subf %99, %98 : vector<1x320xf32>
    %101 = arith.mulf %97, %100 : vector<1x320xf32>
    %102 = vector.broadcast %101 : vector<1x320xf32> to vector<32x320xf32>
    %103 = arith.mulf %94, %102 : vector<32x320xf32>
    %104 = vector.extract_strided_slice %103 {offsets = [0, 0], sizes = [1, 320], strides = [1, 1]} : vector<32x320xf32> to vector<1x320xf32>
    %105 = vector.broadcast %104 : vector<1x320xf32> to vector<4x320xf32>
    %106 = arith.mulf %105, %40 : vector<4x320xf32>
    %107 = vector.extract_strided_slice %103 {offsets = [1, 0], sizes = [1, 320], strides = [1, 1]} : vector<32x320xf32> to vector<1x320xf32>
    %108 = vector.broadcast %107 : vector<1x320xf32> to vector<4x320xf32>
    %109 = arith.mulf %108, %42 : vector<4x320xf32>
    %110 = arith.addf %106, %109 : vector<4x320xf32>
    %111 = vector.extract_strided_slice %103 {offsets = [2, 0], sizes = [1, 320], strides = [1, 1]} : vector<32x320xf32> to vector<1x320xf32>
    %112 = vector.broadcast %111 : vector<1x320xf32> to vector<4x320xf32>
    %113 = arith.mulf %112, %44 : vector<4x320xf32>
    %114 = arith.addf %110, %113 : vector<4x320xf32>
    %115 = vector.extract_strided_slice %103 {offsets = [3, 0], sizes = [1, 320], strides = [1, 1]} : vector<32x320xf32> to vector<1x320xf32>
    %116 = vector.broadcast %115 : vector<1x320xf32> to vector<4x320xf32>
    %117 = arith.mulf %116, %46 : vector<4x320xf32>
    %118 = arith.addf %114, %117 : vector<4x320xf32>
    %119 = vector.extract_strided_slice %103 {offsets = [4, 0], sizes = [1, 320], strides = [1, 1]} : vector<32x320xf32> to vector<1x320xf32>
    %120 = vector.broadcast %119 : vector<1x320xf32> to vector<4x320xf32>
    %121 = arith.mulf %120, %48 : vector<4x320xf32>
    %122 = arith.addf %118, %121 : vector<4x320xf32>
    %123 = vector.extract_strided_slice %103 {offsets = [5, 0], sizes = [1, 320], strides = [1, 1]} : vector<32x320xf32> to vector<1x320xf32>
    %124 = vector.broadcast %123 : vector<1x320xf32> to vector<4x320xf32>
    %125 = arith.mulf %124, %50 : vector<4x320xf32>
    %126 = arith.addf %122, %125 : vector<4x320xf32>
    %127 = vector.extract_strided_slice %103 {offsets = [6, 0], sizes = [1, 320], strides = [1, 1]} : vector<32x320xf32> to vector<1x320xf32>
    %128 = vector.broadcast %127 : vector<1x320xf32> to vector<4x320xf32>
    %129 = arith.mulf %128, %52 : vector<4x320xf32>
    %130 = arith.addf %126, %129 : vector<4x320xf32>
    %131 = vector.extract_strided_slice %103 {offsets = [7, 0], sizes = [1, 320], strides = [1, 1]} : vector<32x320xf32> to vector<1x320xf32>
    %132 = vector.broadcast %131 : vector<1x320xf32> to vector<4x320xf32>
    %133 = arith.mulf %132, %54 : vector<4x320xf32>
    %134 = arith.addf %130, %133 : vector<4x320xf32>
    %135 = vector.extract_strided_slice %103 {offsets = [8, 0], sizes = [1, 320], strides = [1, 1]} : vector<32x320xf32> to vector<1x320xf32>
    %136 = vector.broadcast %135 : vector<1x320xf32> to vector<4x320xf32>
    %137 = arith.mulf %136, %56 : vector<4x320xf32>
    %138 = arith.addf %134, %137 : vector<4x320xf32>
    %139 = vector.extract_strided_slice %103 {offsets = [9, 0], sizes = [1, 320], strides = [1, 1]} : vector<32x320xf32> to vector<1x320xf32>
    %140 = vector.broadcast %139 : vector<1x320xf32> to vector<4x320xf32>
    %141 = arith.mulf %140, %58 : vector<4x320xf32>
    %142 = arith.addf %138, %141 : vector<4x320xf32>
    %143 = vector.extract_strided_slice %103 {offsets = [10, 0], sizes = [1, 320], strides = [1, 1]} : vector<32x320xf32> to vector<1x320xf32>
    %144 = vector.broadcast %143 : vector<1x320xf32> to vector<4x320xf32>
    %145 = arith.mulf %144, %60 : vector<4x320xf32>
    %146 = arith.addf %142, %145 : vector<4x320xf32>
    %147 = vector.extract_strided_slice %103 {offsets = [11, 0], sizes = [1, 320], strides = [1, 1]} : vector<32x320xf32> to vector<1x320xf32>
    %148 = vector.broadcast %147 : vector<1x320xf32> to vector<4x320xf32>
    %149 = arith.mulf %148, %62 : vector<4x320xf32>
    %150 = arith.addf %146, %149 : vector<4x320xf32>
    %151 = vector.extract_strided_slice %103 {offsets = [12, 0], sizes = [1, 320], strides = [1, 1]} : vector<32x320xf32> to vector<1x320xf32>
    %152 = vector.broadcast %151 : vector<1x320xf32> to vector<4x320xf32>
    %153 = arith.mulf %152, %64 : vector<4x320xf32>
    %154 = arith.addf %150, %153 : vector<4x320xf32>
    %155 = vector.extract_strided_slice %103 {offsets = [13, 0], sizes = [1, 320], strides = [1, 1]} : vector<32x320xf32> to vector<1x320xf32>
    %156 = vector.broadcast %155 : vector<1x320xf32> to vector<4x320xf32>
    %157 = arith.mulf %156, %66 : vector<4x320xf32>
    %158 = arith.addf %154, %157 : vector<4x320xf32>
    %159 = vector.extract_strided_slice %103 {offsets = [14, 0], sizes = [1, 320], strides = [1, 1]} : vector<32x320xf32> to vector<1x320xf32>
    %160 = vector.broadcast %159 : vector<1x320xf32> to vector<4x320xf32>
    %161 = arith.mulf %160, %68 : vector<4x320xf32>
    %162 = arith.addf %158, %161 : vector<4x320xf32>
    %163 = vector.extract_strided_slice %103 {offsets = [15, 0], sizes = [1, 320], strides = [1, 1]} : vector<32x320xf32> to vector<1x320xf32>
    %164 = vector.broadcast %163 : vector<1x320xf32> to vector<4x320xf32>
    %165 = arith.mulf %164, %70 : vector<4x320xf32>
    %166 = arith.addf %162, %165 : vector<4x320xf32>
    %167 = vector.extract_strided_slice %103 {offsets = [16, 0], sizes = [1, 320], strides = [1, 1]} : vector<32x320xf32> to vector<1x320xf32>
    %168 = vector.broadcast %167 : vector<1x320xf32> to vector<4x320xf32>
    %169 = arith.mulf %168, %72 : vector<4x320xf32>
    %170 = arith.addf %166, %169 : vector<4x320xf32>
    %171 = vector.extract_strided_slice %103 {offsets = [17, 0], sizes = [1, 320], strides = [1, 1]} : vector<32x320xf32> to vector<1x320xf32>
    %172 = vector.broadcast %171 : vector<1x320xf32> to vector<4x320xf32>
    %173 = arith.mulf %172, %74 : vector<4x320xf32>
    %174 = arith.addf %170, %173 : vector<4x320xf32>
    %175 = vector.extract_strided_slice %103 {offsets = [18, 0], sizes = [1, 320], strides = [1, 1]} : vector<32x320xf32> to vector<1x320xf32>
    %176 = vector.broadcast %175 : vector<1x320xf32> to vector<4x320xf32>
    %177 = arith.mulf %176, %76 : vector<4x320xf32>
    %178 = arith.addf %174, %177 : vector<4x320xf32>
    %179 = vector.extract_strided_slice %103 {offsets = [19, 0], sizes = [1, 320], strides = [1, 1]} : vector<32x320xf32> to vector<1x320xf32>
    %180 = vector.broadcast %179 : vector<1x320xf32> to vector<4x320xf32>
    %181 = arith.mulf %180, %78 : vector<4x320xf32>
    %182 = arith.addf %178, %181 : vector<4x320xf32>
    %183 = vector.extract_strided_slice %103 {offsets = [20, 0], sizes = [1, 320], strides = [1, 1]} : vector<32x320xf32> to vector<1x320xf32>
    %184 = vector.broadcast %183 : vector<1x320xf32> to vector<4x320xf32>
    %185 = arith.mulf %184, %80 : vector<4x320xf32>
    %186 = arith.addf %182, %185 : vector<4x320xf32>
    %187 = vector.extract_strided_slice %103 {offsets = [21, 0], sizes = [1, 320], strides = [1, 1]} : vector<32x320xf32> to vector<1x320xf32>
    %188 = vector.broadcast %187 : vector<1x320xf32> to vector<4x320xf32>
    %189 = arith.mulf %188, %82 : vector<4x320xf32>
    %190 = arith.addf %186, %189 : vector<4x320xf32>
    %191 = vector.extract_strided_slice %103 {offsets = [22, 0], sizes = [1, 320], strides = [1, 1]} : vector<32x320xf32> to vector<1x320xf32>
    %192 = vector.broadcast %191 : vector<1x320xf32> to vector<4x320xf32>
    %193 = arith.mulf %192, %84 : vector<4x320xf32>
    %194 = arith.addf %190, %193 : vector<4x320xf32>
    %195 = vector.extract_strided_slice %103 {offsets = [23, 0], sizes = [1, 320], strides = [1, 1]} : vector<32x320xf32> to vector<1x320xf32>
    %196 = vector.broadcast %195 : vector<1x320xf32> to vector<4x320xf32>
    %197 = arith.mulf %196, %86 : vector<4x320xf32>
    %198 = arith.addf %194, %197 : vector<4x320xf32>
    %199 = vector.extract_strided_slice %103 {offsets = [24, 0], sizes = [1, 320], strides = [1, 1]} : vector<32x320xf32> to vector<1x320xf32>
    %200 = vector.broadcast %199 : vector<1x320xf32> to vector<4x320xf32>
    %201 = arith.mulf %200, %88 : vector<4x320xf32>
    %202 = arith.addf %198, %201 : vector<4x320xf32>
    %c0_97 = arith.constant 0 : index
    %c0_98 = arith.constant 0 : index
    %c0_99 = arith.constant 0 : index
    %c0_100 = arith.constant 0 : index
    %203 = vector.load %arg6[%c0_97, %c0_98, %c0_99, %c0_100] : memref<1x4x4x320xf32, #tpu.memory_space<vmem>>, vector<1x1x4x320xf32>
    %204 = vector.shape_cast %203 : vector<1x1x4x320xf32> to vector<4x320xf32>
    %205 = vector.shape_cast %202 : vector<4x320xf32> to vector<1x1x4x320xf32>
    tpu.vector_store %arg6[%c0_97, %c0_98, %c0_99, %c0_100], %205 {strides = array<i32>} : memref<1x4x4x320xf32, #tpu.memory_space<vmem>>, vector<1x1x4x320xf32>,
    %206 = vector.extract_strided_slice %38 {offsets = [32, 0], sizes = [32, 320], strides = [1, 1]} : vector<128x320xf32> to vector<32x320xf32>
    %cst_101 = arith.constant dense<0xFF800000> : vector<320xf32>
    %207 = vector.multi_reduction <maximumf>, %206, %cst_101 [0] : vector<32x320xf32> to vector<320xf32>
    %208 = vector.shape_cast %207 : vector<320xf32> to vector<1x320xf32>
    %209 = vector.broadcast %208 : vector<1x320xf32> to vector<32x320xf32>
    %210 = arith.subf %206, %209 : vector<32x320xf32>
    %211 = math.exp %210 : vector<32x320xf32>
    %cst_102 = arith.constant dense<0.000000e+00> : vector<320xf32>
    %212 = vector.multi_reduction <add>, %211, %cst_102 [0] : vector<32x320xf32> to vector<320xf32>
    %213 = vector.shape_cast %212 : vector<320xf32> to vector<1x320xf32>
    %214 = tpu.reciprocal %213 {approx = true} : vector<1x320xf32> -> vector<1x320xf32>
    %215 = arith.mulf %213, %214 : vector<1x320xf32>
    %cst_103 = arith.constant 2.000000e+00 : f32
    %216 = vector.broadcast %cst_103 : f32 to vector<1x320xf32>
    %217 = arith.subf %216, %215 : vector<1x320xf32>
    %218 = arith.mulf %214, %217 : vector<1x320xf32>
    %219 = vector.broadcast %218 : vector<1x320xf32> to vector<32x320xf32>
    %220 = arith.mulf %211, %219 : vector<32x320xf32>
    %221 = vector.extract_strided_slice %220 {offsets = [0, 0], sizes = [1, 320], strides = [1, 1]} : vector<32x320xf32> to vector<1x320xf32>
    %222 = vector.broadcast %221 : vector<1x320xf32> to vector<4x320xf32>
    %223 = arith.mulf %222, %40 : vector<4x320xf32>
    %224 = vector.extract_strided_slice %220 {offsets = [1, 0], sizes = [1, 320], strides = [1, 1]} : vector<32x320xf32> to vector<1x320xf32>
    %225 = vector.broadcast %224 : vector<1x320xf32> to vector<4x320xf32>
    %226 = arith.mulf %225, %42 : vector<4x320xf32>
    %227 = arith.addf %223, %226 : vector<4x320xf32>
    %228 = vector.extract_strided_slice %220 {offsets = [2, 0], sizes = [1, 320], strides = [1, 1]} : vector<32x320xf32> to vector<1x320xf32>
    %229 = vector.broadcast %228 : vector<1x320xf32> to vector<4x320xf32>
    %230 = arith.mulf %229, %44 : vector<4x320xf32>
    %231 = arith.addf %227, %230 : vector<4x320xf32>
    %232 = vector.extract_strided_slice %220 {offsets = [3, 0], sizes = [1, 320], strides = [1, 1]} : vector<32x320xf32> to vector<1x320xf32>
    %233 = vector.broadcast %232 : vector<1x320xf32> to vector<4x320xf32>
    %234 = arith.mulf %233, %46 : vector<4x320xf32>
    %235 = arith.addf %231, %234 : vector<4x320xf32>
    %236 = vector.extract_strided_slice %220 {offsets = [4, 0], sizes = [1, 320], strides = [1, 1]} : vector<32x320xf32> to vector<1x320xf32>
    %237 = vector.broadcast %236 : vector<1x320xf32> to vector<4x320xf32>
    %238 = arith.mulf %237, %48 : vector<4x320xf32>
    %239 = arith.addf %235, %238 : vector<4x320xf32>
    %240 = vector.extract_strided_slice %220 {offsets = [5, 0], sizes = [1, 320], strides = [1, 1]} : vector<32x320xf32> to vector<1x320xf32>
    %241 = vector.broadcast %240 : vector<1x320xf32> to vector<4x320xf32>
    %242 = arith.mulf %241, %50 : vector<4x320xf32>
    %243 = arith.addf %239, %242 : vector<4x320xf32>
    %244 = vector.extract_strided_slice %220 {offsets = [6, 0], sizes = [1, 320], strides = [1, 1]} : vector<32x320xf32> to vector<1x320xf32>
    %245 = vector.broadcast %244 : vector<1x320xf32> to vector<4x320xf32>
    %246 = arith.mulf %245, %52 : vector<4x320xf32>
    %247 = arith.addf %243, %246 : vector<4x320xf32>
    %248 = vector.extract_strided_slice %220 {offsets = [7, 0], sizes = [1, 320], strides = [1, 1]} : vector<32x320xf32> to vector<1x320xf32>
    %249 = vector.broadcast %248 : vector<1x320xf32> to vector<4x320xf32>
    %250 = arith.mulf %249, %54 : vector<4x320xf32>
    %251 = arith.addf %247, %250 : vector<4x320xf32>
    %252 = vector.extract_strided_slice %220 {offsets = [8, 0], sizes = [1, 320], strides = [1, 1]} : vector<32x320xf32> to vector<1x320xf32>
    %253 = vector.broadcast %252 : vector<1x320xf32> to vector<4x320xf32>
    %254 = arith.mulf %253, %56 : vector<4x320xf32>
    %255 = arith.addf %251, %254 : vector<4x320xf32>
    %256 = vector.extract_strided_slice %220 {offsets = [9, 0], sizes = [1, 320], strides = [1, 1]} : vector<32x320xf32> to vector<1x320xf32>
    %257 = vector.broadcast %256 : vector<1x320xf32> to vector<4x320xf32>
    %258 = arith.mulf %257, %58 : vector<4x320xf32>
    %259 = arith.addf %255, %258 : vector<4x320xf32>
    %260 = vector.extract_strided_slice %220 {offsets = [10, 0], sizes = [1, 320], strides = [1, 1]} : vector<32x320xf32> to vector<1x320xf32>
    %261 = vector.broadcast %260 : vector<1x320xf32> to vector<4x320xf32>
    %262 = arith.mulf %261, %60 : vector<4x320xf32>
    %263 = arith.addf %259, %262 : vector<4x320xf32>
    %264 = vector.extract_strided_slice %220 {offsets = [11, 0], sizes = [1, 320], strides = [1, 1]} : vector<32x320xf32> to vector<1x320xf32>
    %265 = vector.broadcast %264 : vector<1x320xf32> to vector<4x320xf32>
    %266 = arith.mulf %265, %62 : vector<4x320xf32>
    %267 = arith.addf %263, %266 : vector<4x320xf32>
    %268 = vector.extract_strided_slice %220 {offsets = [12, 0], sizes = [1, 320], strides = [1, 1]} : vector<32x320xf32> to vector<1x320xf32>
    %269 = vector.broadcast %268 : vector<1x320xf32> to vector<4x320xf32>
    %270 = arith.mulf %269, %64 : vector<4x320xf32>
    %271 = arith.addf %267, %270 : vector<4x320xf32>
    %272 = vector.extract_strided_slice %220 {offsets = [13, 0], sizes = [1, 320], strides = [1, 1]} : vector<32x320xf32> to vector<1x320xf32>
    %273 = vector.broadcast %272 : vector<1x320xf32> to vector<4x320xf32>
    %274 = arith.mulf %273, %66 : vector<4x320xf32>
    %275 = arith.addf %271, %274 : vector<4x320xf32>
    %276 = vector.extract_strided_slice %220 {offsets = [14, 0], sizes = [1, 320], strides = [1, 1]} : vector<32x320xf32> to vector<1x320xf32>
    %277 = vector.broadcast %276 : vector<1x320xf32> to vector<4x320xf32>
    %278 = arith.mulf %277, %68 : vector<4x320xf32>
    %279 = arith.addf %275, %278 : vector<4x320xf32>
    %280 = vector.extract_strided_slice %220 {offsets = [15, 0], sizes = [1, 320], strides = [1, 1]} : vector<32x320xf32> to vector<1x320xf32>
    %281 = vector.broadcast %280 : vector<1x320xf32> to vector<4x320xf32>
    %282 = arith.mulf %281, %70 : vector<4x320xf32>
    %283 = arith.addf %279, %282 : vector<4x320xf32>
    %284 = vector.extract_strided_slice %220 {offsets = [16, 0], sizes = [1, 320], strides = [1, 1]} : vector<32x320xf32> to vector<1x320xf32>
    %285 = vector.broadcast %284 : vector<1x320xf32> to vector<4x320xf32>
    %286 = arith.mulf %285, %72 : vector<4x320xf32>
    %287 = arith.addf %283, %286 : vector<4x320xf32>
    %288 = vector.extract_strided_slice %220 {offsets = [17, 0], sizes = [1, 320], strides = [1, 1]} : vector<32x320xf32> to vector<1x320xf32>
    %289 = vector.broadcast %288 : vector<1x320xf32> to vector<4x320xf32>
    %290 = arith.mulf %289, %74 : vector<4x320xf32>
    %291 = arith.addf %287, %290 : vector<4x320xf32>
    %292 = vector.extract_strided_slice %220 {offsets = [18, 0], sizes = [1, 320], strides = [1, 1]} : vector<32x320xf32> to vector<1x320xf32>
    %293 = vector.broadcast %292 : vector<1x320xf32> to vector<4x320xf32>
    %294 = arith.mulf %293, %76 : vector<4x320xf32>
    %295 = arith.addf %291, %294 : vector<4x320xf32>
    %296 = vector.extract_strided_slice %220 {offsets = [19, 0], sizes = [1, 320], strides = [1, 1]} : vector<32x320xf32> to vector<1x320xf32>
    %297 = vector.broadcast %296 : vector<1x320xf32> to vector<4x320xf32>
    %298 = arith.mulf %297, %78 : vector<4x320xf32>
    %299 = arith.addf %295, %298 : vector<4x320xf32>
    %300 = vector.extract_strided_slice %220 {offsets = [20, 0], sizes = [1, 320], strides = [1, 1]} : vector<32x320xf32> to vector<1x320xf32>
    %301 = vector.broadcast %300 : vector<1x320xf32> to vector<4x320xf32>
    %302 = arith.mulf %301, %80 : vector<4x320xf32>
    %303 = arith.addf %299, %302 : vector<4x320xf32>
    %304 = vector.extract_strided_slice %220 {offsets = [21, 0], sizes = [1, 320], strides = [1, 1]} : vector<32x320xf32> to vector<1x320xf32>
    %305 = vector.broadcast %304 : vector<1x320xf32> to vector<4x320xf32>
    %306 = arith.mulf %305, %82 : vector<4x320xf32>
    %307 = arith.addf %303, %306 : vector<4x320xf32>
    %308 = vector.extract_strided_slice %220 {offsets = [22, 0], sizes = [1, 320], strides = [1, 1]} : vector<32x320xf32> to vector<1x320xf32>
    %309 = vector.broadcast %308 : vector<1x320xf32> to vector<4x320xf32>
    %310 = arith.mulf %309, %84 : vector<4x320xf32>
    %311 = arith.addf %307, %310 : vector<4x320xf32>
    %312 = vector.extract_strided_slice %220 {offsets = [23, 0], sizes = [1, 320], strides = [1, 1]} : vector<32x320xf32> to vector<1x320xf32>
    %313 = vector.broadcast %312 : vector<1x320xf32> to vector<4x320xf32>
    %314 = arith.mulf %313, %86 : vector<4x320xf32>
    %315 = arith.addf %311, %314 : vector<4x320xf32>
    %316 = vector.extract_strided_slice %220 {offsets = [24, 0], sizes = [1, 320], strides = [1, 1]} : vector<32x320xf32> to vector<1x320xf32>
    %317 = vector.broadcast %316 : vector<1x320xf32> to vector<4x320xf32>
    %318 = arith.mulf %317, %88 : vector<4x320xf32>
    %319 = arith.addf %315, %318 : vector<4x320xf32>
    %c0_104 = arith.constant 0 : index
    %c1 = arith.constant 1 : index
    %c0_105 = arith.constant 0 : index
    %c0_106 = arith.constant 0 : index
    %320 = vector.load %arg6[%c0_104, %c1, %c0_105, %c0_106] : memref<1x4x4x320xf32, #tpu.memory_space<vmem>>, vector<1x1x4x320xf32>
    %321 = vector.shape_cast %320 : vector<1x1x4x320xf32> to vector<4x320xf32>
    %322 = vector.shape_cast %319 : vector<4x320xf32> to vector<1x1x4x320xf32>
    tpu.vector_store %arg6[%c0_104, %c1, %c0_105, %c0_106], %322 {strides = array<i32>} : memref<1x4x4x320xf32, #tpu.memory_space<vmem>>, vector<1x1x4x320xf32>,
    %323 = vector.extract_strided_slice %38 {offsets = [64, 0], sizes = [32, 320], strides = [1, 1]} : vector<128x320xf32> to vector<32x320xf32>
    %cst_107 = arith.constant dense<0xFF800000> : vector<320xf32>
    %324 = vector.multi_reduction <maximumf>, %323, %cst_107 [0] : vector<32x320xf32> to vector<320xf32>
    %325 = vector.shape_cast %324 : vector<320xf32> to vector<1x320xf32>
    %326 = vector.broadcast %325 : vector<1x320xf32> to vector<32x320xf32>
    %327 = arith.subf %323, %326 : vector<32x320xf32>
    %328 = math.exp %327 : vector<32x320xf32>
    %cst_108 = arith.constant dense<0.000000e+00> : vector<320xf32>
    %329 = vector.multi_reduction <add>, %328, %cst_108 [0] : vector<32x320xf32> to vector<320xf32>
    %330 = vector.shape_cast %329 : vector<320xf32> to vector<1x320xf32>
    %331 = tpu.reciprocal %330 {approx = true} : vector<1x320xf32> -> vector<1x320xf32>
    %332 = arith.mulf %330, %331 : vector<1x320xf32>
    %cst_109 = arith.constant 2.000000e+00 : f32
    %333 = vector.broadcast %cst_109 : f32 to vector<1x320xf32>
    %334 = arith.subf %333, %332 : vector<1x320xf32>
    %335 = arith.mulf %331, %334 : vector<1x320xf32>
    %336 = vector.broadcast %335 : vector<1x320xf32> to vector<32x320xf32>
    %337 = arith.mulf %328, %336 : vector<32x320xf32>
    %338 = vector.extract_strided_slice %337 {offsets = [0, 0], sizes = [1, 320], strides = [1, 1]} : vector<32x320xf32> to vector<1x320xf32>
    %339 = vector.broadcast %338 : vector<1x320xf32> to vector<4x320xf32>
    %340 = arith.mulf %339, %40 : vector<4x320xf32>
    %341 = vector.extract_strided_slice %337 {offsets = [1, 0], sizes = [1, 320], strides = [1, 1]} : vector<32x320xf32> to vector<1x320xf32>
    %342 = vector.broadcast %341 : vector<1x320xf32> to vector<4x320xf32>
    %343 = arith.mulf %342, %42 : vector<4x320xf32>
    %344 = arith.addf %340, %343 : vector<4x320xf32>
    %345 = vector.extract_strided_slice %337 {offsets = [2, 0], sizes = [1, 320], strides = [1, 1]} : vector<32x320xf32> to vector<1x320xf32>
    %346 = vector.broadcast %345 : vector<1x320xf32> to vector<4x320xf32>
    %347 = arith.mulf %346, %44 : vector<4x320xf32>
    %348 = arith.addf %344, %347 : vector<4x320xf32>
    %349 = vector.extract_strided_slice %337 {offsets = [3, 0], sizes = [1, 320], strides = [1, 1]} : vector<32x320xf32> to vector<1x320xf32>
    %350 = vector.broadcast %349 : vector<1x320xf32> to vector<4x320xf32>
    %351 = arith.mulf %350, %46 : vector<4x320xf32>
    %352 = arith.addf %348, %351 : vector<4x320xf32>
    %353 = vector.extract_strided_slice %337 {offsets = [4, 0], sizes = [1, 320], strides = [1, 1]} : vector<32x320xf32> to vector<1x320xf32>
    %354 = vector.broadcast %353 : vector<1x320xf32> to vector<4x320xf32>
    %355 = arith.mulf %354, %48 : vector<4x320xf32>
    %356 = arith.addf %352, %355 : vector<4x320xf32>
    %357 = vector.extract_strided_slice %337 {offsets = [5, 0], sizes = [1, 320], strides = [1, 1]} : vector<32x320xf32> to vector<1x320xf32>
    %358 = vector.broadcast %357 : vector<1x320xf32> to vector<4x320xf32>
    %359 = arith.mulf %358, %50 : vector<4x320xf32>
    %360 = arith.addf %356, %359 : vector<4x320xf32>
    %361 = vector.extract_strided_slice %337 {offsets = [6, 0], sizes = [1, 320], strides = [1, 1]} : vector<32x320xf32> to vector<1x320xf32>
    %362 = vector.broadcast %361 : vector<1x320xf32> to vector<4x320xf32>
    %363 = arith.mulf %362, %52 : vector<4x320xf32>
    %364 = arith.addf %360, %363 : vector<4x320xf32>
    %365 = vector.extract_strided_slice %337 {offsets = [7, 0], sizes = [1, 320], strides = [1, 1]} : vector<32x320xf32> to vector<1x320xf32>
    %366 = vector.broadcast %365 : vector<1x320xf32> to vector<4x320xf32>
    %367 = arith.mulf %366, %54 : vector<4x320xf32>
    %368 = arith.addf %364, %367 : vector<4x320xf32>
    %369 = vector.extract_strided_slice %337 {offsets = [8, 0], sizes = [1, 320], strides = [1, 1]} : vector<32x320xf32> to vector<1x320xf32>
    %370 = vector.broadcast %369 : vector<1x320xf32> to vector<4x320xf32>
    %371 = arith.mulf %370, %56 : vector<4x320xf32>
    %372 = arith.addf %368, %371 : vector<4x320xf32>
    %373 = vector.extract_strided_slice %337 {offsets = [9, 0], sizes = [1, 320], strides = [1, 1]} : vector<32x320xf32> to vector<1x320xf32>
    %374 = vector.broadcast %373 : vector<1x320xf32> to vector<4x320xf32>
    %375 = arith.mulf %374, %58 : vector<4x320xf32>
    %376 = arith.addf %372, %375 : vector<4x320xf32>
    %377 = vector.extract_strided_slice %337 {offsets = [10, 0], sizes = [1, 320], strides = [1, 1]} : vector<32x320xf32> to vector<1x320xf32>
    %378 = vector.broadcast %377 : vector<1x320xf32> to vector<4x320xf32>
    %379 = arith.mulf %378, %60 : vector<4x320xf32>
    %380 = arith.addf %376, %379 : vector<4x320xf32>
    %381 = vector.extract_strided_slice %337 {offsets = [11, 0], sizes = [1, 320], strides = [1, 1]} : vector<32x320xf32> to vector<1x320xf32>
    %382 = vector.broadcast %381 : vector<1x320xf32> to vector<4x320xf32>
    %383 = arith.mulf %382, %62 : vector<4x320xf32>
    %384 = arith.addf %380, %383 : vector<4x320xf32>
    %385 = vector.extract_strided_slice %337 {offsets = [12, 0], sizes = [1, 320], strides = [1, 1]} : vector<32x320xf32> to vector<1x320xf32>
    %386 = vector.broadcast %385 : vector<1x320xf32> to vector<4x320xf32>
    %387 = arith.mulf %386, %64 : vector<4x320xf32>
    %388 = arith.addf %384, %387 : vector<4x320xf32>
    %389 = vector.extract_strided_slice %337 {offsets = [13, 0], sizes = [1, 320], strides = [1, 1]} : vector<32x320xf32> to vector<1x320xf32>
    %390 = vector.broadcast %389 : vector<1x320xf32> to vector<4x320xf32>
    %391 = arith.mulf %390, %66 : vector<4x320xf32>
    %392 = arith.addf %388, %391 : vector<4x320xf32>
    %393 = vector.extract_strided_slice %337 {offsets = [14, 0], sizes = [1, 320], strides = [1, 1]} : vector<32x320xf32> to vector<1x320xf32>
    %394 = vector.broadcast %393 : vector<1x320xf32> to vector<4x320xf32>
    %395 = arith.mulf %394, %68 : vector<4x320xf32>
    %396 = arith.addf %392, %395 : vector<4x320xf32>
    %397 = vector.extract_strided_slice %337 {offsets = [15, 0], sizes = [1, 320], strides = [1, 1]} : vector<32x320xf32> to vector<1x320xf32>
    %398 = vector.broadcast %397 : vector<1x320xf32> to vector<4x320xf32>
    %399 = arith.mulf %398, %70 : vector<4x320xf32>
    %400 = arith.addf %396, %399 : vector<4x320xf32>
    %401 = vector.extract_strided_slice %337 {offsets = [16, 0], sizes = [1, 320], strides = [1, 1]} : vector<32x320xf32> to vector<1x320xf32>
    %402 = vector.broadcast %401 : vector<1x320xf32> to vector<4x320xf32>
    %403 = arith.mulf %402, %72 : vector<4x320xf32>
    %404 = arith.addf %400, %403 : vector<4x320xf32>
    %405 = vector.extract_strided_slice %337 {offsets = [17, 0], sizes = [1, 320], strides = [1, 1]} : vector<32x320xf32> to vector<1x320xf32>
    %406 = vector.broadcast %405 : vector<1x320xf32> to vector<4x320xf32>
    %407 = arith.mulf %406, %74 : vector<4x320xf32>
    %408 = arith.addf %404, %407 : vector<4x320xf32>
    %409 = vector.extract_strided_slice %337 {offsets = [18, 0], sizes = [1, 320], strides = [1, 1]} : vector<32x320xf32> to vector<1x320xf32>
    %410 = vector.broadcast %409 : vector<1x320xf32> to vector<4x320xf32>
    %411 = arith.mulf %410, %76 : vector<4x320xf32>
    %412 = arith.addf %408, %411 : vector<4x320xf32>
    %413 = vector.extract_strided_slice %337 {offsets = [19, 0], sizes = [1, 320], strides = [1, 1]} : vector<32x320xf32> to vector<1x320xf32>
    %414 = vector.broadcast %413 : vector<1x320xf32> to vector<4x320xf32>
    %415 = arith.mulf %414, %78 : vector<4x320xf32>
    %416 = arith.addf %412, %415 : vector<4x320xf32>
    %417 = vector.extract_strided_slice %337 {offsets = [20, 0], sizes = [1, 320], strides = [1, 1]} : vector<32x320xf32> to vector<1x320xf32>
    %418 = vector.broadcast %417 : vector<1x320xf32> to vector<4x320xf32>
    %419 = arith.mulf %418, %80 : vector<4x320xf32>
    %420 = arith.addf %416, %419 : vector<4x320xf32>
    %421 = vector.extract_strided_slice %337 {offsets = [21, 0], sizes = [1, 320], strides = [1, 1]} : vector<32x320xf32> to vector<1x320xf32>
    %422 = vector.broadcast %421 : vector<1x320xf32> to vector<4x320xf32>
    %423 = arith.mulf %422, %82 : vector<4x320xf32>
    %424 = arith.addf %420, %423 : vector<4x320xf32>
    %425 = vector.extract_strided_slice %337 {offsets = [22, 0], sizes = [1, 320], strides = [1, 1]} : vector<32x320xf32> to vector<1x320xf32>
    %426 = vector.broadcast %425 : vector<1x320xf32> to vector<4x320xf32>
    %427 = arith.mulf %426, %84 : vector<4x320xf32>
    %428 = arith.addf %424, %427 : vector<4x320xf32>
    %429 = vector.extract_strided_slice %337 {offsets = [23, 0], sizes = [1, 320], strides = [1, 1]} : vector<32x320xf32> to vector<1x320xf32>
    %430 = vector.broadcast %429 : vector<1x320xf32> to vector<4x320xf32>
    %431 = arith.mulf %430, %86 : vector<4x320xf32>
    %432 = arith.addf %428, %431 : vector<4x320xf32>
    %433 = vector.extract_strided_slice %337 {offsets = [24, 0], sizes = [1, 320], strides = [1, 1]} : vector<32x320xf32> to vector<1x320xf32>
    %434 = vector.broadcast %433 : vector<1x320xf32> to vector<4x320xf32>
    %435 = arith.mulf %434, %88 : vector<4x320xf32>
    %436 = arith.addf %432, %435 : vector<4x320xf32>
    %c0_110 = arith.constant 0 : index
    %c2 = arith.constant 2 : index
    %c0_111 = arith.constant 0 : index
    %c0_112 = arith.constant 0 : index
    %437 = vector.load %arg6[%c0_110, %c2, %c0_111, %c0_112] : memref<1x4x4x320xf32, #tpu.memory_space<vmem>>, vector<1x1x4x320xf32>
    %438 = vector.shape_cast %437 : vector<1x1x4x320xf32> to vector<4x320xf32>
    %439 = vector.shape_cast %436 : vector<4x320xf32> to vector<1x1x4x320xf32>
    tpu.vector_store %arg6[%c0_110, %c2, %c0_111, %c0_112], %439 {strides = array<i32>} : memref<1x4x4x320xf32, #tpu.memory_space<vmem>>, vector<1x1x4x320xf32>,
    %440 = vector.extract_strided_slice %38 {offsets = [96, 0], sizes = [32, 320], strides = [1, 1]} : vector<128x320xf32> to vector<32x320xf32>
    %cst_113 = arith.constant dense<0xFF800000> : vector<320xf32>
    %441 = vector.multi_reduction <maximumf>, %440, %cst_113 [0] : vector<32x320xf32> to vector<320xf32>
    %442 = vector.shape_cast %441 : vector<320xf32> to vector<1x320xf32>
    %443 = vector.broadcast %442 : vector<1x320xf32> to vector<32x320xf32>
    %444 = arith.subf %440, %443 : vector<32x320xf32>
    %445 = math.exp %444 : vector<32x320xf32>
    %cst_114 = arith.constant dense<0.000000e+00> : vector<320xf32>
    %446 = vector.multi_reduction <add>, %445, %cst_114 [0] : vector<32x320xf32> to vector<320xf32>
    %447 = vector.shape_cast %446 : vector<320xf32> to vector<1x320xf32>
    %448 = tpu.reciprocal %447 {approx = true} : vector<1x320xf32> -> vector<1x320xf32>
    %449 = arith.mulf %447, %448 : vector<1x320xf32>
    %cst_115 = arith.constant 2.000000e+00 : f32
    %450 = vector.broadcast %cst_115 : f32 to vector<1x320xf32>
    %451 = arith.subf %450, %449 : vector<1x320xf32>
    %452 = arith.mulf %448, %451 : vector<1x320xf32>
    %453 = vector.broadcast %452 : vector<1x320xf32> to vector<32x320xf32>
    %454 = arith.mulf %445, %453 : vector<32x320xf32>
    %455 = vector.extract_strided_slice %454 {offsets = [0, 0], sizes = [1, 320], strides = [1, 1]} : vector<32x320xf32> to vector<1x320xf32>
    %456 = vector.broadcast %455 : vector<1x320xf32> to vector<4x320xf32>
    %457 = arith.mulf %456, %40 : vector<4x320xf32>
    %458 = vector.extract_strided_slice %454 {offsets = [1, 0], sizes = [1, 320], strides = [1, 1]} : vector<32x320xf32> to vector<1x320xf32>
    %459 = vector.broadcast %458 : vector<1x320xf32> to vector<4x320xf32>
    %460 = arith.mulf %459, %42 : vector<4x320xf32>
    %461 = arith.addf %457, %460 : vector<4x320xf32>
    %462 = vector.extract_strided_slice %454 {offsets = [2, 0], sizes = [1, 320], strides = [1, 1]} : vector<32x320xf32> to vector<1x320xf32>
    %463 = vector.broadcast %462 : vector<1x320xf32> to vector<4x320xf32>
    %464 = arith.mulf %463, %44 : vector<4x320xf32>
    %465 = arith.addf %461, %464 : vector<4x320xf32>
    %466 = vector.extract_strided_slice %454 {offsets = [3, 0], sizes = [1, 320], strides = [1, 1]} : vector<32x320xf32> to vector<1x320xf32>
    %467 = vector.broadcast %466 : vector<1x320xf32> to vector<4x320xf32>
    %468 = arith.mulf %467, %46 : vector<4x320xf32>
    %469 = arith.addf %465, %468 : vector<4x320xf32>
    %470 = vector.extract_strided_slice %454 {offsets = [4, 0], sizes = [1, 320], strides = [1, 1]} : vector<32x320xf32> to vector<1x320xf32>
    %471 = vector.broadcast %470 : vector<1x320xf32> to vector<4x320xf32>
    %472 = arith.mulf %471, %48 : vector<4x320xf32>
    %473 = arith.addf %469, %472 : vector<4x320xf32>
    %474 = vector.extract_strided_slice %454 {offsets = [5, 0], sizes = [1, 320], strides = [1, 1]} : vector<32x320xf32> to vector<1x320xf32>
    %475 = vector.broadcast %474 : vector<1x320xf32> to vector<4x320xf32>
    %476 = arith.mulf %475, %50 : vector<4x320xf32>
    %477 = arith.addf %473, %476 : vector<4x320xf32>
    %478 = vector.extract_strided_slice %454 {offsets = [6, 0], sizes = [1, 320], strides = [1, 1]} : vector<32x320xf32> to vector<1x320xf32>
    %479 = vector.broadcast %478 : vector<1x320xf32> to vector<4x320xf32>
    %480 = arith.mulf %479, %52 : vector<4x320xf32>
    %481 = arith.addf %477, %480 : vector<4x320xf32>
    %482 = vector.extract_strided_slice %454 {offsets = [7, 0], sizes = [1, 320], strides = [1, 1]} : vector<32x320xf32> to vector<1x320xf32>
    %483 = vector.broadcast %482 : vector<1x320xf32> to vector<4x320xf32>
    %484 = arith.mulf %483, %54 : vector<4x320xf32>
    %485 = arith.addf %481, %484 : vector<4x320xf32>
    %486 = vector.extract_strided_slice %454 {offsets = [8, 0], sizes = [1, 320], strides = [1, 1]} : vector<32x320xf32> to vector<1x320xf32>
    %487 = vector.broadcast %486 : vector<1x320xf32> to vector<4x320xf32>
    %488 = arith.mulf %487, %56 : vector<4x320xf32>
    %489 = arith.addf %485, %488 : vector<4x320xf32>
    %490 = vector.extract_strided_slice %454 {offsets = [9, 0], sizes = [1, 320], strides = [1, 1]} : vector<32x320xf32> to vector<1x320xf32>
    %491 = vector.broadcast %490 : vector<1x320xf32> to vector<4x320xf32>
    %492 = arith.mulf %491, %58 : vector<4x320xf32>
    %493 = arith.addf %489, %492 : vector<4x320xf32>
    %494 = vector.extract_strided_slice %454 {offsets = [10, 0], sizes = [1, 320], strides = [1, 1]} : vector<32x320xf32> to vector<1x320xf32>
    %495 = vector.broadcast %494 : vector<1x320xf32> to vector<4x320xf32>
    %496 = arith.mulf %495, %60 : vector<4x320xf32>
    %497 = arith.addf %493, %496 : vector<4x320xf32>
    %498 = vector.extract_strided_slice %454 {offsets = [11, 0], sizes = [1, 320], strides = [1, 1]} : vector<32x320xf32> to vector<1x320xf32>
    %499 = vector.broadcast %498 : vector<1x320xf32> to vector<4x320xf32>
    %500 = arith.mulf %499, %62 : vector<4x320xf32>
    %501 = arith.addf %497, %500 : vector<4x320xf32>
    %502 = vector.extract_strided_slice %454 {offsets = [12, 0], sizes = [1, 320], strides = [1, 1]} : vector<32x320xf32> to vector<1x320xf32>
    %503 = vector.broadcast %502 : vector<1x320xf32> to vector<4x320xf32>
    %504 = arith.mulf %503, %64 : vector<4x320xf32>
    %505 = arith.addf %501, %504 : vector<4x320xf32>
    %506 = vector.extract_strided_slice %454 {offsets = [13, 0], sizes = [1, 320], strides = [1, 1]} : vector<32x320xf32> to vector<1x320xf32>
    %507 = vector.broadcast %506 : vector<1x320xf32> to vector<4x320xf32>
    %508 = arith.mulf %507, %66 : vector<4x320xf32>
    %509 = arith.addf %505, %508 : vector<4x320xf32>
    %510 = vector.extract_strided_slice %454 {offsets = [14, 0], sizes = [1, 320], strides = [1, 1]} : vector<32x320xf32> to vector<1x320xf32>
    %511 = vector.broadcast %510 : vector<1x320xf32> to vector<4x320xf32>
    %512 = arith.mulf %511, %68 : vector<4x320xf32>
    %513 = arith.addf %509, %512 : vector<4x320xf32>
    %514 = vector.extract_strided_slice %454 {offsets = [15, 0], sizes = [1, 320], strides = [1, 1]} : vector<32x320xf32> to vector<1x320xf32>
    %515 = vector.broadcast %514 : vector<1x320xf32> to vector<4x320xf32>
    %516 = arith.mulf %515, %70 : vector<4x320xf32>
    %517 = arith.addf %513, %516 : vector<4x320xf32>
    %518 = vector.extract_strided_slice %454 {offsets = [16, 0], sizes = [1, 320], strides = [1, 1]} : vector<32x320xf32> to vector<1x320xf32>
    %519 = vector.broadcast %518 : vector<1x320xf32> to vector<4x320xf32>
    %520 = arith.mulf %519, %72 : vector<4x320xf32>
    %521 = arith.addf %517, %520 : vector<4x320xf32>
    %522 = vector.extract_strided_slice %454 {offsets = [17, 0], sizes = [1, 320], strides = [1, 1]} : vector<32x320xf32> to vector<1x320xf32>
    %523 = vector.broadcast %522 : vector<1x320xf32> to vector<4x320xf32>
    %524 = arith.mulf %523, %74 : vector<4x320xf32>
    %525 = arith.addf %521, %524 : vector<4x320xf32>
    %526 = vector.extract_strided_slice %454 {offsets = [18, 0], sizes = [1, 320], strides = [1, 1]} : vector<32x320xf32> to vector<1x320xf32>
    %527 = vector.broadcast %526 : vector<1x320xf32> to vector<4x320xf32>
    %528 = arith.mulf %527, %76 : vector<4x320xf32>
    %529 = arith.addf %525, %528 : vector<4x320xf32>
    %530 = vector.extract_strided_slice %454 {offsets = [19, 0], sizes = [1, 320], strides = [1, 1]} : vector<32x320xf32> to vector<1x320xf32>
    %531 = vector.broadcast %530 : vector<1x320xf32> to vector<4x320xf32>
    %532 = arith.mulf %531, %78 : vector<4x320xf32>
    %533 = arith.addf %529, %532 : vector<4x320xf32>
    %534 = vector.extract_strided_slice %454 {offsets = [20, 0], sizes = [1, 320], strides = [1, 1]} : vector<32x320xf32> to vector<1x320xf32>
    %535 = vector.broadcast %534 : vector<1x320xf32> to vector<4x320xf32>
    %536 = arith.mulf %535, %80 : vector<4x320xf32>
    %537 = arith.addf %533, %536 : vector<4x320xf32>
    %538 = vector.extract_strided_slice %454 {offsets = [21, 0], sizes = [1, 320], strides = [1, 1]} : vector<32x320xf32> to vector<1x320xf32>
    %539 = vector.broadcast %538 : vector<1x320xf32> to vector<4x320xf32>
    %540 = arith.mulf %539, %82 : vector<4x320xf32>
    %541 = arith.addf %537, %540 : vector<4x320xf32>
    %542 = vector.extract_strided_slice %454 {offsets = [22, 0], sizes = [1, 320], strides = [1, 1]} : vector<32x320xf32> to vector<1x320xf32>
    %543 = vector.broadcast %542 : vector<1x320xf32> to vector<4x320xf32>
    %544 = arith.mulf %543, %84 : vector<4x320xf32>
    %545 = arith.addf %541, %544 : vector<4x320xf32>
    %546 = vector.extract_strided_slice %454 {offsets = [23, 0], sizes = [1, 320], strides = [1, 1]} : vector<32x320xf32> to vector<1x320xf32>
    %547 = vector.broadcast %546 : vector<1x320xf32> to vector<4x320xf32>
    %548 = arith.mulf %547, %86 : vector<4x320xf32>
    %549 = arith.addf %545, %548 : vector<4x320xf32>
    %550 = vector.extract_strided_slice %454 {offsets = [24, 0], sizes = [1, 320], strides = [1, 1]} : vector<32x320xf32> to vector<1x320xf32>
    %551 = vector.broadcast %550 : vector<1x320xf32> to vector<4x320xf32>
    %552 = arith.mulf %551, %88 : vector<4x320xf32>
    %553 = arith.addf %549, %552 : vector<4x320xf32>
    %c0_116 = arith.constant 0 : index
    %c3 = arith.constant 3 : index
    %c0_117 = arith.constant 0 : index
    %c0_118 = arith.constant 0 : index
    %554 = vector.load %arg6[%c0_116, %c3, %c0_117, %c0_118] : memref<1x4x4x320xf32, #tpu.memory_space<vmem>>, vector<1x1x4x320xf32>
    %555 = vector.shape_cast %554 : vector<1x1x4x320xf32> to vector<4x320xf32>
    %556 = vector.shape_cast %553 : vector<4x320xf32> to vector<1x1x4x320xf32>
    tpu.vector_store %arg6[%c0_116, %c3, %c0_117, %c0_118], %556 {strides = array<i32>} : memref<1x4x4x320xf32, #tpu.memory_space<vmem>>, vector<1x1x4x320xf32>,
    return
  }
  func.func @transform_0(%arg0: i32) -> (i32, i32, i32) {
    %c0_i32 = arith.constant 0 : i32
    %c0_i32_0 = arith.constant 0 : i32
    %c0_i32_1 = arith.constant 0 : i32
    return %arg0, %c0_i32, %c0_i32_0 : i32, i32, i32
  }
  func.func @transform_1(%arg0: i32) -> (i32, i32) {
    %c0_i32 = arith.constant 0 : i32
    %c0_i32_0 = arith.constant 0 : i32
    %c0_i32_1 = arith.constant 0 : i32
    return %c0_i32, %c0_i32_0 : i32, i32
  }
  func.func @transform_2(%arg0: i32) -> (i32, i32) {
    %c0_i32 = arith.constant 0 : i32
    %c0_i32_0 = arith.constant 0 : i32
    %c0_i32_1 = arith.constant 0 : i32
    return %c0_i32, %c0_i32_0 : i32, i32
  }
  func.func @transform_3(%arg0: i32) -> (i32, i32) {
    %c0_i32 = arith.constant 0 : i32
    %c0_i32_0 = arith.constant 0 : i32
    %c0_i32_1 = arith.constant 0 : i32
    return %c0_i32, %c0_i32_0 : i32, i32
  }
  func.func @transform_4(%arg0: i32) -> (i32, i32) {
    %c0_i32 = arith.constant 0 : i32
    %c0_i32_0 = arith.constant 0 : i32
    %c0_i32_1 = arith.constant 0 : i32
    return %c0_i32, %c0_i32_0 : i32, i32
  }
  func.func @transform_5(%arg0: i32) -> (i32, i32, i32, i32) {
    %c0_i32 = arith.constant 0 : i32
    %c0_i32_0 = arith.constant 0 : i32
    %c0_i32_1 = arith.constant 0 : i32
    %c0_i32_2 = arith.constant 0 : i32
    return %arg0, %c0_i32, %c0_i32_0, %c0_i32_1 : i32, i32, i32, i32
  }
}

</mosaic_0001>

<bundles_post_ra>
// kernel: tpu_custom_call.1
= control target key start
LH: loop header
LB: loop body
LE: loop exit
PB: predicated region body
PF: predicated region fallthrough
CT: control target
= control target key end

     0   :  { %10 = vsyncpa [#allocation5], 0  ;;  %s11727_s0 = inlined_call_operand.vmem [shape: f32[2,4,440], index: 0, kind: input, shape index: {}]   ;;  %s11728_s1 = inlined_call_operand.vmem [shape: f32[64,4], index: 1, kind: input, shape index: {}]   ;;  %s11729_s2 = inlined_call_operand.vmem [shape: f32[64,1], index: 2, kind: input, shape index: {}]   ;;  %s11730_s3 = inlined_call_operand.vmem [shape: bf16[128,576], index: 3, kind: input, shape index: {}]   ;;  %s11731_s4 = inlined_call_operand.vmem [shape: f32[128,1], index: 4, kind: input, shape index: {}]   ;;  %s11732_s5 = inlined_call_operand.hbm [shape: f32[2,4,4,320], index: 5, kind: output, shape index: {}]  }
   0x1   :  { %12 = vsyncpa [#allocation5 + $0x1], 0  ;;  %s7516_s18 = smov 0   ;;  %s7518_s19 = smov 0  }
   0x2   :  { %s7520_s20 = smov 0   ;;  %s7522_s21 = smov 0  }
   0x3 LB: > { %s7537_s22 = sadd.s32 4294967295, %s7454_s21   ;;  %s6507_s23 = sadd.s32 4294967294, %s7454_s21   ;;  %s7454_s21 = sphi %s7522_s21, %s12555_s21   ;;  %s7450_s20 = sphi %s7520_s20, %s12554_s20   ;;  %s7446_s19 = sphi %s7518_s19, %s12553_s19   ;;  %s7442_s18 = sphi %s7516_s18, %s12552_s18  }
   0x4   : > { %s7541_s24 = sadd.s32 1, %s7454_s21   ;;  %s135_s25 = sadd.s32 1, %s7450_s20 }
   0x5   : > { %s132_s26 = ssub.s32 %s7454_s21, %s7541_s24  ;;  %p145_p0 = scmp.ne.s32.totalorder %s7450_s20, %s7446_s19 }
   0x6   : > { %p133_p1 = scmp.eq.s32.totalorder %s132_s26, 0  ;;  %p146_p2 = scmp.eq.s32.totalorder %s7537_s22, 1 }
   0x7   : > { %p151_p3 = scmp.ne.s32.totalorder %s7446_s19, %s7442_s18  ;;  %p152_p4 = scmp.eq.s32.totalorder %s6507_s23, 1 }
   0x8   : > { %s7552_s27 = scalar_select %p133_p1, %s7450_s20, %s135_s25  }
   0x9   : > { %p7554_p5 = por %p146_p2, %p145_p0  ;;  %p7558_p6 = por %p152_p4, %p151_p3 }
   0xa   : > { %p6510_p7 = scmp.ge.s32.totalorder %s7454_s21, 1  ;;  %p190_p8 = scmp.lt.s32.totalorder %s7454_s21, 3 }
   0xc   : > { %p191_p9 = pnand %p6510_p7, %p190_p8 }
   0xe   : > { %194 = sbr.rel (%p191_p9) target bundleno = 1370 (0x55a), region = 40 }
  0x13   : > { %p218_p10 = scmp.lt.s32.totalorder %s7537_s22, 1  ;;  %v7456_v0 = vmov 0.0   ;;  %v11733_v1 = vmov 0   ;;  %v240_v2 = vld [vmem:[%s11729_s2 + $0x30] sm:$0xff]  ;;  %v238_v3 = vld [vmem:[%s11729_s2 + $0x20] sm:$0xff]  ;;  %v241_v4 = vld [vmem:[%s11729_s2 + $0x38] sm:$0xff] }
  0x14   : > { %384 = vmatprep.mubr.f32.mxu0 %v7456_v0  ;;  %497 = vmatprep.mubr.f32.mxu1 %v7456_v0  ;;  %vm311_vm0 = vcmask 1043456   ;;  %v224_v7 = vld [vmem:[%s11728_s1] sm:$0xff]  ;;  %vm286_vm1 = vcmask 31744   ;;  %v236_v10 = vld [vmem:[%s11729_s2 + $0x10] sm:$0xff]  ;;  %v239_v11 = vld [vmem:[%s11729_s2 + $0x28] sm:$0xff]  ;;  %vm867_vm2 = vcmask 457732  }
  0x15   : > { %s219_s30 = scalar_select %p218_p10, %s7537_s22, 1  ;;  %7021 = vset.pattern.permute.xlu0 %v11733_v1  ;;  %7022 = vset.pattern.permute.xlu1 %v11733_v1  ;;  %v225_v12 = vld [vmem:[%s11728_s1 + $0x8] sm:$0xff]  ;;  %v234_v13 = vld [vmem:[%s11729_s2] sm:$0xff]  ;;  %v237_v14 = vld [vmem:[%s11729_s2 + $0x18] sm:$0xff]  ;;  %vm11741_vm4 = vcmask 519168   ;;  %vm1096_vm5 = vcmask 719872  }
  0x16   : > { %274 = vperm.xlu0 %7021, %v240_v2   ;;  %264 = vperm.xlu1 %7022, %v238_v3   ;;  %v226_v15 = vld [vmem:[%s11728_s1 + $0x10] sm:$0xff]  ;;  %v235_v16 = vld [vmem:[%s11729_s2 + $0x8] sm:$0xff]  ;;  %v227_v17 = vld [vmem:[%s11728_s1 + $0x18] sm:$0xff]  ;;  %s7458_s11 = smov 88   ;;  %s7459_s12 = smov 67   ;;  %vm1612_vm6 = vcmask 547840  }
  0x17   : > { %s6754_s8 = sshll.u32 %s219_s30, 4  ;;  %v228_v18 = vld [vmem:[%s11728_s1 + $0x20] sm:$0xff]  ;;  %v229_v19 = vld [vmem:[%s11728_s1 + $0x28] sm:$0xff]  ;;  %v230_v20 = vld [vmem:[%s11728_s1 + $0x30] sm:$0xff]  ;;  %s7460_s14 = smov 89   ;;  %vm966_vm7 = vcmask 728064  }
  0x18   : > { %s7579_s13 = scalar_lea.vmem %s11727_s0, %s6754_s8  ;;  %v231_v21 = vld [vmem:[%s11728_s1 + $0x38] sm:$0xff]  ;;  %vm7767_vm3 = vmor %vm867_vm2, %vm311_vm0  ;;  %s7461_s15 = smov 68   ;;  %vm1483_vm8 = vcmask 556032   ;;  %vm1354_vm9 = vcmask 564224   ;;  %vm11747_vm10 = vcmask 392192   ;;  %vm1225_vm11 = vcmask 711680  }
  0x19   : > { %v232_v5 = vld [vmem:[%s7579_s13] sm:$0xff]  ;;  %v3792_v6 = vld [vmem:[%s7579_s13 + $0x8] sm:$0xff]  ;;  %s7462_s16 = smov 69   ;;  %s7463_s17 = smov 48   ;;  %vm1741_vm12 = vcmask 400384   ;;  %vm11746_vm13 = vcmask 384000  }
  0x1a   : > { %v7589_v8 = vcombine.high %v232_v5, %v232_v5  ;;  %v7591_v9 = vcombine.high %v3792_v6, %v3792_v6  ;;  %279 = vperm.xlu0 %7021, %v241_v4   ;;  %269 = vperm.xlu1 %7022, %v239_v11   ;;  %s7464_s23 = smov 87   ;;  %s7465_s25 = smov 49   ;;  %vm3135_vm14 = vcmask 523264   ;;  %vm3936_vm15 = vcmask 900096  }
  0x1b   : > { %s7466_s26 = smov 47   ;;  %s7467_s30 = smov 110   ;;  %vm4023_vm2 = vcmask 875520  }
  0x1c   : > { %6513 = vmatprep.subr.msk.mxu0 %vm311_vm0, %v7589_v8  ;;  %6523 = vmatprep.subr.msk.mxu1 %vm311_vm0, %v7591_v9  ;;  %s7468_s6 = smov 109   ;;  %s7469_s7 = smov 108  }
  0x1d   : > { %6514 = vmatpush1.msk.msra.mxu0 %vm311_vm0, %v232_v5  ;;  %6524 = vmatpush1.msk.msra.mxu1 %vm311_vm0, %v3792_v6  ;;  %s7470_s8 = smov 107   ;;  %s7471_s9 = smov 106  }
  0x1e   : > { %6515 = vmatmul.mubr.msk.f32.vlgmr.msra.gmra.mxu0 %vm286_vm1, %v224_v7  ;;  %6525 = vmatmul.mubr.msk.f32.vlgmr.msra.gmra.mxu1 %vm286_vm1, %v224_v7  ;;  %s7472_s10 = smov 90  }
  0x1f   : > { %390 = vmatprep.mubr.f32.mxu0 %v7456_v0  ;;  %503 = vmatprep.mubr.f32.mxu1 %v7456_v0 }
  0x20   : > { %254 = vperm.xlu0 %7021, %v236_v10   ;;  %259 = vperm.xlu1 %7022, %v237_v14  }
  0x22   : > { %6516 = vmatmul.mubr.msk.f32.gmra.mxu0 %vm286_vm1, %v225_v12  ;;  %6526 = vmatmul.mubr.msk.f32.gmra.mxu1 %vm286_vm1, %v225_v12 }
  0x23   : > { %396 = vmatprep.mubr.f32.mxu0 %v7456_v0  ;;  %509 = vmatprep.mubr.f32.mxu1 %v7456_v0 }
  0x24   : > { %244 = vperm.xlu0 %7021, %v234_v13   ;;  %249 = vperm.xlu1 %7022, %v235_v16  }
  0x26   : > { %6517 = vmatmul.mubr.msk.f32.gmra.mxu0 %vm286_vm1, %v226_v15  ;;  %6527 = vmatmul.mubr.msk.f32.gmra.mxu1 %vm286_vm1, %v226_v15 }
  0x27   : > { %402 = vmatprep.mubr.f32.mxu0 %v7456_v0  ;;  %515 = vmatprep.mubr.f32.mxu1 %v7456_v0 }
  0x2a   : > { %6518 = vmatmul.mubr.msk.f32.gmra.mxu0 %vm286_vm1, %v227_v17  ;;  %6528 = vmatmul.mubr.msk.f32.gmra.mxu1 %vm286_vm1, %v227_v17 }
  0x2b   : > { %408 = vmatprep.mubr.f32.mxu0 %v7456_v0  ;;  %521 = vmatprep.mubr.f32.mxu1 %v7456_v0 }
  0x2e   : > { %6519 = vmatmul.mubr.msk.f32.gmra.mxu0 %vm286_vm1, %v228_v18  ;;  %6529 = vmatmul.mubr.msk.f32.gmra.mxu1 %vm286_vm1, %v228_v18 }
  0x2f   : > { %414 = vmatprep.mubr.f32.mxu0 %v7456_v0  ;;  %527 = vmatprep.mubr.f32.mxu1 %v7456_v0 }
  0x32   : > { %6520 = vmatmul.mubr.msk.f32.gmra.mxu0 %vm286_vm1, %v229_v19  ;;  %6530 = vmatmul.mubr.msk.f32.gmra.mxu1 %vm286_vm1, %v229_v19 }
  0x33   : > { %420 = vmatprep.mubr.f32.mxu0 %v7456_v0  ;;  %533 = vmatprep.mubr.f32.mxu1 %v7456_v0 }
  0x36   : > { %6521 = vmatmul.mubr.msk.f32.gmra.mxu0 %vm286_vm1, %v230_v20  ;;  %6531 = vmatmul.mubr.msk.f32.gmra.mxu1 %vm286_vm1, %v230_v20 }
  0x37   : > { %426 = vmatprep.mubr.f32.mxu0 %v7456_v0  ;;  %539 = vmatprep.mubr.f32.mxu1 %v7456_v0 }
  0x3a   : > { %6522 = vmatmul.mubr.msk.f32.gmra.mxu0 %vm286_vm1, %v231_v21  ;;  %6532 = vmatmul.mubr.msk.f32.gmra.mxu1 %vm286_vm1, %v231_v21  ;;  %vm3993_vm1 = vcmask 883712  }
  0x91   : > { %v7665_v22 = vpop.permute.xlu0 %274  ;;  %v7667_v23 = vpop.permute.xlu1 %264 }
  0x95   : > { %v7669_v24 = vpop.permute.xlu0 %279  ;;  %v7671_v25 = vpop.permute.xlu1 %269 }
  0x9b   : > { %v255_v26 = vpop.permute.xlu0 %254  ;;  %v260_v27 = vpop.permute.xlu1 %259 }
  0x9f   : > { %v245_v28 = vpop.permute.xlu0 %244  ;;  %v250_v33 = vpop.permute.xlu1 %249 }
  0xde   : > { %v386_v29 = vpop.f32.mrf.mxu0  ;;  %v499_v30 = vpop.f32.mrf.mxu1 }
  0xdf   : > { %v7673_v31 = vadd.f32 %v386_v29, %v245_v28  ;;  %v7675_v32 = vadd.f32 %v499_v30, %v245_v28 }
  0xe0   : > { %v388_v34 = vpop.f32.mrf.mxu0  ;;  %v501_v35 = vpop.f32.mrf.mxu1 }
  0xe1   : > { %v6533_v36 = vmul.f32 -1.442695, %v7673_v31  ;;  %v6535_v37 = vmul.f32 -1.442695, %v7675_v32  ;;  %v7679_v38 = vadd.f32 %v388_v34, %v245_v28  ;;  %v7681_v39 = vadd.f32 %v501_v35, %v245_v28 }
  0xe2   : > { %v392_v40 = vpop.f32.mrf.mxu0  ;;  %v505_v41 = vpop.f32.mrf.mxu1 }
  0xe3   : > { %7141 = vpow2.f32 %v6533_v36  ;;  %v6534_v42 = vmul.f32 -1.442695, %v7679_v38  ;;  %v6536_v43 = vmul.f32 -1.442695, %v7681_v39  ;;  %v7685_v44 = vadd.f32 %v392_v40, %v250_v33 }
  0xe4   : > { %7143 = vpow2.f32 %v6535_v37  ;;  %v7687_v45 = vadd.f32 %v505_v41, %v250_v33  ;;  %v394_v46 = vpop.f32.mrf.mxu0  ;;  %v507_v47 = vpop.f32.mrf.mxu1 }
  0xe5   : > { %7145 = vpow2.f32 %v6534_v42  ;;  %v6537_v48 = vmul.f32 -1.442695, %v7685_v44  ;;  %v7690_v49 = vadd.f32 %v394_v46, %v250_v33  ;;  %v7692_v50 = vadd.f32 %v507_v47, %v250_v33 }
  0xe6   : > { %7147 = vpow2.f32 %v6536_v43  ;;  %v6539_v51 = vmul.f32 -1.442695, %v7687_v45  ;;  %v398_v52 = vpop.f32.mrf.mxu0  ;;  %v511_v53 = vpop.f32.mrf.mxu1 }
  0xe7   : > { %7149 = vpow2.f32 %v6537_v48  ;;  %v6538_v54 = vmul.f32 -1.442695, %v7690_v49  ;;  %v6540_v55 = vmul.f32 -1.442695, %v7692_v50  ;;  %v7697_v56 = vadd.f32 %v398_v52, %v255_v26 }
  0xe8   : > { %7151 = vpow2.f32 %v6539_v51  ;;  %v7699_v57 = vadd.f32 %v511_v53, %v255_v26  ;;  %v400_v58 = vpop.f32.mrf.mxu0  ;;  %v513_v59 = vpop.f32.mrf.mxu1 }
  0xe9   : > { %7153 = vpow2.f32 %v6538_v54  ;;  %v6541_v60 = vmul.f32 -1.442695, %v7697_v56  ;;  %v7702_v61 = vadd.f32 %v400_v58, %v255_v26  ;;  %v7704_v62 = vadd.f32 %v513_v59, %v255_v26 }
  0xea   : > { %7155 = vpow2.f32 %v6540_v55  ;;  %v6543_v63 = vmul.f32 -1.442695, %v7699_v57  ;;  %v404_v0 = vpop.f32.mrf.mxu0  ;;  %v517_v2 = vpop.f32.mrf.mxu1 }
  0xeb   : > { %7157 = vpow2.f32 %v6541_v60  ;;  %v6542_v3 = vmul.f32 -1.442695, %v7702_v61  ;;  %v6544_v4 = vmul.f32 -1.442695, %v7704_v62  ;;  %v7709_v5 = vadd.f32 %v404_v0, %v260_v27 }
  0xec   : > { %7159 = vpow2.f32 %v6543_v63  ;;  %v7711_v6 = vadd.f32 %v517_v2, %v260_v27  ;;  %v406_v7 = vpop.f32.mrf.mxu0  ;;  %v519_v10 = vpop.f32.mrf.mxu1 }
  0xed   : > { %7161 = vpow2.f32 %v6542_v3  ;;  %v6545_v11 = vmul.f32 -1.442695, %v7709_v5  ;;  %v7714_v12 = vadd.f32 %v406_v7, %v260_v27  ;;  %v7716_v13 = vadd.f32 %v519_v10, %v260_v27 }
  0xee   : > { %7163 = vpow2.f32 %v6544_v4  ;;  %v6547_v14 = vmul.f32 -1.442695, %v7711_v6  ;;  %v410_v15 = vpop.f32.mrf.mxu0  ;;  %v523_v16 = vpop.f32.mrf.mxu1 }
  0xef   : > { %7165 = vpow2.f32 %v6545_v11  ;;  %v6546_v17 = vmul.f32 -1.442695, %v7714_v12  ;;  %v6548_v18 = vmul.f32 -1.442695, %v7716_v13  ;;  %v7722_v2 = vadd.f32 %v410_v15, %v7667_v23 }
  0xf0   : > { %v7142_v19 = vpop.eup %7141  ;;  %7167 = vpow2.f32 %v6547_v14  ;;  %v412_v20 = vpop.f32.mrf.mxu0  ;;  %v7725_v10 = vadd.f32 %v523_v16, %v7667_v23 }
  0xf1   : > { %v525_v21 = vpop.f32.mrf.mxu1  ;;  %v7144_v26 = vpop.eup %7143  ;;  %v642_v28 = vadd.f32 1.0, %v7142_v19  ;;  %7169 = vpow2.f32 %v6546_v17  ;;  %v7728_v17 = vadd.f32 %v412_v20, %v7667_v23 }
  0xf2   : > { %v7146_v29 = vpop.eup %7145  ;;  %v644_v27 = vadd.f32 1.0, %v7144_v26  ;;  %7171 = vpow2.f32 %v6548_v18  ;;  %v416_v30 = vpop.f32.mrf.mxu0  ;;  %v7731_v18 = vadd.f32 %v525_v21, %v7667_v23 }
  0xf3   : > { %v7148_v33 = vpop.eup %7147  ;;  %7173 = vrcp.f32 %v642_v28  ;;  %v643_v34 = vadd.f32 1.0, %v7146_v29  ;;  %v529_v35 = vpop.f32.mrf.mxu1  ;;  %v7734_v26 = vadd.f32 %v416_v30, %v7671_v25 }
  0xf4   : > { %v7150_v36 = vpop.eup %7149  ;;  %7175 = vrcp.f32 %v644_v27  ;;  %v645_v37 = vadd.f32 1.0, %v7148_v33  ;;  %v418_v46 = vpop.f32.mrf.mxu0  ;;  %v7737_v28 = vadd.f32 %v529_v35, %v7671_v25  ;;  %v6549_v33 = vmul.f32 -1.442695, %v7722_v2 }
  0xf5   : > { %v7152_v40 = vpop.eup %7151  ;;  %7177 = vrcp.f32 %v643_v34  ;;  %v646_v41 = vadd.f32 1.0, %v7150_v36  ;;  %v531_v51 = vpop.f32.mrf.mxu1  ;;  %v7741_v20 = vadd.f32 %v418_v46, %v7671_v25  ;;  %v6551_v36 = vmul.f32 -1.442695, %v7725_v10 }
  0xf6   : > { %v7154_v42 = vpop.eup %7153  ;;  %7179 = vrcp.f32 %v645_v37  ;;  %v648_v43 = vadd.f32 1.0, %v7152_v40  ;;  %v422_v60 = vpop.f32.mrf.mxu0  ;;  %v7745_v30 = vadd.f32 %v531_v51, %v7671_v25  ;;  %v6550_v37 = vmul.f32 -1.442695, %v7728_v17 }
  0xf7   : > { %v7156_v47 = vpop.eup %7155  ;;  %7181 = vrcp.f32 %v646_v41  ;;  %v647_v48 = vadd.f32 1.0, %v7154_v42  ;;  %v535_v3 = vpop.f32.mrf.mxu1  ;;  %v6552_v40 = vmul.f32 -1.442695, %v7731_v18  ;;  %v7750_v41 = vadd.f32 %v422_v60, %v7665_v22 }
  0xf8   : > { %v7158_v52 = vpop.eup %7157  ;;  %7183 = vrcp.f32 %v648_v43  ;;  %v649_v53 = vadd.f32 1.0, %v7156_v47  ;;  %v424_v16 = vpop.f32.mrf.mxu0  ;;  %v6553_v43 = vmul.f32 -1.442695, %v7734_v26  ;;  %v6555_v46 = vmul.f32 -1.442695, %v7737_v28 }
  0xf9   : > { %v7160_v54 = vpop.eup %7159  ;;  %7185 = vrcp.f32 %v647_v48  ;;  %v650_v55 = vadd.f32 1.0, %v7158_v52  ;;  %v537_v23 = vpop.f32.mrf.mxu1  ;;  %v7755_v47 = vadd.f32 %v535_v3, %v7665_v22  ;;  %v6556_v60 = vmul.f32 -1.442695, %v7745_v30 }
  0xfa   : > { %v7162_v58 = vpop.eup %7161  ;;  %7187 = vrcp.f32 %v649_v53  ;;  %v652_v59 = vadd.f32 1.0, %v7160_v54  ;;  %v428_v25 = vpop.f32.mrf.mxu0  ;;  %v6554_v53 = vmul.f32 -1.442695, %v7741_v20  ;;  %v7773_v3 = vadd.f32 %v424_v16, %v7665_v22 }
  0xfb   : > { %v7164_v63 = vpop.eup %7163  ;;  %7189 = vrcp.f32 %v650_v55  ;;  %v651_v0 = vadd.f32 1.0, %v7162_v58  ;;  %v541_v54 = vpop.f32.mrf.mxu1  ;;  %v7783_v16 = vadd.f32 %v428_v25, %v7669_v24 }
  0xfc   : > { %v7166_v4 = vpop.eup %7165  ;;  %7191 = vrcp.f32 %v652_v59  ;;  %v653_v7 = vadd.f32 1.0, %v7164_v63 }
  0xfd   : > { %v7168_v11 = vpop.eup %7167  ;;  %7193 = vrcp.f32 %v651_v0  ;;  %v654_v14 = vadd.f32 1.0, %v7166_v4  ;;  %v6559_v4 = vmul.f32 -1.442695, %v7755_v47 }
  0xfe   : > { %v7170_v19 = vpop.eup %7169  ;;  %7195 = vrcp.f32 %v653_v7  ;;  %v656_v15 = vadd.f32 1.0, %v7168_v11  ;;  %v7777_v7 = vadd.f32 %v537_v23, %v7665_v22  ;;  %v430_v11 = vpop.f32.mrf.mxu0 }
  0xff   : > { %v7172_v29 = vpop.eup %7171  ;;  %7197 = vrcp.f32 %v654_v14  ;;  %v655_v27 = vadd.f32 1.0, %v7170_v19 }
 0x100   : > { %v7174_v21 = vpop.eup %7173  ;;  %7199 = vrcp.f32 %v656_v15  ;;  %v657_v34 = vadd.f32 1.0, %v7172_v29  ;;  %v543_v29 = vpop.f32.mrf.mxu1 }
 0x101   : > { %v7176_v35 = vpop.eup %7175  ;;  %7201 = vrcp.f32 %v655_v27  ;;  %v738_v51 = vmul.f32 %v7174_v21, %v7673_v31  ;;  %v6558_v21 = vmul.f32 -1.442695, %v7773_v3 }
 0x102   : > { %v7178_v42 = vpop.eup %7177  ;;  %7203 = vrcp.f32 %v657_v34  ;;  %v740_v58 = vmul.f32 %v7176_v35, %v7675_v32  ;;  %v7798_v34 = vadd.f32 %v430_v11, %v7669_v24 }
 0x103   : > { %v7180_v48 = vpop.eup %7179  ;;  %v739_v52 = vmul.f32 %v7178_v42, %v7679_v38  ;;  %7205 = vpow2.f32 %v6549_v33  ;;  %v6557_v38 = vmul.f32 -1.442695, %v7750_v41 }
 0x104   : > { %v7182_v55 = vpop.eup %7181  ;;  %v741_v59 = vmul.f32 %v7180_v48, %v7681_v39  ;;  %7207 = vpow2.f32 %v6551_v36 }
 0x105   : > { %v7184_v63 = vpop.eup %7183  ;;  %v7763_v0 = vpack.c.bf16 %v739_v52, %v738_v51  ;;  %7209 = vpow2.f32 %v6550_v37  ;;  %v742_v19 = vmul.f32 %v7182_v55, %v7685_v44  ;;  %v7792_v44 = vadd.f32 %v541_v54, %v7669_v24 }
 0x106   : > { %v7186_v32 = vpop.eup %7185  ;;  %v6756_v39 = vpack.c.bf16 %v741_v59, %v740_v58  ;;  %7211 = vpow2.f32 %v6552_v40  ;;  %v744_v22 = vmul.f32 %v7184_v63, %v7687_v45  ;;  %v6560_v45 = vmul.f32 -1.442695, %v7777_v7 }
 0x107   : > { %v7188_v14 = vpop.eup %7187  ;;  %866 = vst [vmem:[#allocation2] sm:$0xff] %v7763_v0  ;;  %v743_v15 = vmul.f32 %v7186_v32, %v7690_v49  ;;  %7213 = vpow2.f32 %v6553_v43  ;;  %1047 = vrot.lane.b32.xlu0 %v7763_v0, %s7458_s11  ;;  %v6561_v43 = vmul.f32 -1.442695, %v7783_v16  ;;  %v6562_v51 = vmul.f32 -1.442695, %v7798_v34 }
 0x108   : > { %v7190_v27 = vpop.eup %7189  ;;  %869 = vst.msk [vmem:[#allocation2 + $0x8] sm:$0xff] %vm7767_vm3, %v6756_v39  ;;  %v745_v33 = vmul.f32 %v7188_v14, %v7692_v50  ;;  %7215 = vpow2.f32 %v6555_v46  ;;  %v7802_v50 = vadd.f32 %v543_v29, %v7669_v24 }
 0x109   : > { %v7192_v49 = vpop.eup %7191  ;;  %v7794_v23 = vpack.c.bf16 %v743_v15, %v742_v19  ;;  %7217 = vpow2.f32 %v6554_v53  ;;  %v746_v40 = vmul.f32 %v7190_v27, %v7697_v56  ;;  %v6563_v56 = vmul.f32 -1.442695, %v7792_v44 }
 0x10a   : > { %v7194_v36 = vpop.eup %7193  ;;  %v6758_v35 = vpack.c.bf16 %v745_v33, %v744_v22  ;;  %7219 = vpow2.f32 %v6556_v60  ;;  %v748_v24 = vmul.f32 %v7192_v49, %v7699_v57  ;;  %v6564_v54 = vmul.f32 -1.442695, %v7802_v50 }
 0x10b   : > { %v7196_v37 = vpop.eup %7195  ;;  %870 = vst [vmem:[#allocation2 + $0x10] sm:$0xff] %v7794_v23  ;;  %v747_v42 = vmul.f32 %v7194_v36, %v7702_v61  ;;  %7221 = vpow2.f32 %v6557_v38  ;;  %1563 = vrot.lane.b32.xlu0 %v7763_v0, %s7459_s12 }
 0x10c   : > { %v7198_v46 = vpop.eup %7197  ;;  %871 = vst.msk [vmem:[#allocation2 + $0x18] sm:$0xff] %vm7767_vm3, %v6758_v35  ;;  %v749_v25 = vmul.f32 %v7196_v37, %v7704_v62  ;;  %7223 = vpow2.f32 %v6559_v4 }
 0x10d   : > { %v7200_v48 = vpop.eup %7199  ;;  %v7815_v61 = vpack.c.bf16 %v747_v42, %v746_v40  ;;  %7225 = vpow2.f32 %v6558_v21  ;;  %v750_v57 = vmul.f32 %v7198_v46, %v7709_v5 }
 0x10e   : > { %v7202_v52 = vpop.eup %7201  ;;  %v6760_v53 = vpack.c.bf16 %v749_v25, %v748_v24  ;;  %7227 = vpow2.f32 %v6560_v45  ;;  %v752_v60 = vmul.f32 %v7200_v48, %v7711_v6 }
 0x10f   : > { %v7204_v55 = vpop.eup %7203  ;;  %872 = vst [vmem:[#allocation2 + $0x20] sm:$0xff] %v7815_v61  ;;  %v751_v62 = vmul.f32 %v7202_v52, %v7714_v12  ;;  %7229 = vpow2.f32 %v6561_v43  ;;  %v1016_v58 = vld [vmem:[#allocation2 + $0x8] sm:$0xf]  ;;  %916 = vrot.lane.b32.xlu0 %v7763_v0, %s7460_s14 }
 0x110   : > { %v7206_v59 = vpop.eup %7205  ;;  %873 = vst.msk [vmem:[#allocation2 + $0x28] sm:$0xff] %vm7767_vm3, %v6760_v53  ;;  %v753_v63 = vmul.f32 %v7204_v55, %v7716_v13  ;;  %7231 = vpow2.f32 %v6563_v56  ;;  %1049 = vrot.lane.b32.xlu1 %v1016_v58, %s7458_s11  ;;  %v1532_v6 = vld [vmem:[#allocation2 + $0x8] sm:$0xf] }
 0x111   : > { %v7208_v5 = vpop.eup %7207  ;;  %v7829_v38 = vpack.c.bf16 %v751_v62, %v750_v57  ;;  %v658_v12 = vadd.f32 1.0, %v7206_v59  ;;  %7233 = vpow2.f32 %v6562_v51  ;;  %v885_v21 = vld [vmem:[#allocation2 + $0x8] sm:$0xf] }
 0x112   : > { %v7210_v32 = vpop.eup %7209  ;;  %v6762_v39 = vpack.c.bf16 %v753_v63, %v752_v60  ;;  %v660_v4 = vadd.f32 1.0, %v7208_v5  ;;  %7235 = vpow2.f32 %v6564_v54  ;;  %v1403_v24 = vld [vmem:[#allocation2 + $0x8] sm:$0xf] }
 0x113   : > { %v7212_v11 = vpop.eup %7211  ;;  %874 = vst [vmem:[#allocation2 + $0x30] sm:$0xff] %v7829_v38  ;;  %7237 = vrcp.f32 %v658_v12  ;;  %v659_v14 = vadd.f32 1.0, %v7210_v32  ;;  %1434 = vrot.lane.b32.xlu0 %v7763_v0, %s7461_s15  ;;  %v1274_v57 = vld [vmem:[#allocation2 + $0x8] sm:$0xf] }
 0x114   : > { %v7214_v13 = vpop.eup %7213  ;;  %875 = vst.msk [vmem:[#allocation2 + $0x38] sm:$0xff] %vm7767_vm3, %v6762_v39  ;;  %7239 = vrcp.f32 %v660_v4  ;;  %v661_v19 = vadd.f32 1.0, %v7212_v11  ;;  %1565 = vrot.lane.b32.xlu1 %v1532_v6, %s7459_s12  ;;  %v1798_v12 = vld [vmem:[#allocation2 + $0x8] sm:$0xff] }
 0x115   : > { %v7216_v15 = vpop.eup %7215  ;;  %7241 = vrcp.f32 %v659_v14  ;;  %v662_v29 = vadd.f32 1.0, %v7214_v13 }
 0x116   : > { %v7218_v27 = vpop.eup %7217  ;;  %7243 = vrcp.f32 %v661_v19  ;;  %v664_v22 = vadd.f32 1.0, %v7216_v15  ;;  %v1018_v15 = vld [vmem:[#allocation2 + $0x18] sm:$0xf] }
 0x117   : > { %v7220_v33 = vpop.eup %7219  ;;  %7245 = vrcp.f32 %v662_v29  ;;  %v663_v49 = vadd.f32 1.0, %v7218_v27  ;;  %1305 = vrot.lane.b32.xlu0 %v7763_v0, %s7462_s16  ;;  %v1536_v31 = vld [vmem:[#allocation2 + $0x28] sm:$0xf] }
 0x118   : > { %v7222_v36 = vpop.eup %7221  ;;  %7247 = vrcp.f32 %v664_v22  ;;  %v665_v35 = vadd.f32 1.0, %v7220_v33  ;;  %918 = vrot.lane.b32.xlu1 %v885_v21, %s7460_s14 }
 0x119   : > { %v7224_v45 = vpop.eup %7223  ;;  %7249 = vrcp.f32 %v663_v49  ;;  %v666_v37 = vadd.f32 1.0, %v7222_v36  ;;  %v1534_v36 = vld [vmem:[#allocation2 + $0x18] sm:$0xf] }
 0x11a   : > { %v7226_v40 = vpop.eup %7225  ;;  %7251 = vrcp.f32 %v665_v35  ;;  %v668_v42 = vadd.f32 1.0, %v7224_v45 }
 0x11b   : > { %v7228_v43 = vpop.eup %7227  ;;  %7253 = vrcp.f32 %v666_v37  ;;  %v667_v46 = vadd.f32 1.0, %v7226_v40  ;;  %1829 = vrot.lane.b32.xlu0 %v7763_v0, %s7463_s17 }
 0x11c   : > { %v7230_v25 = vpop.eup %7229  ;;  %7255 = vrcp.f32 %v668_v42  ;;  %v669_v56 = vadd.f32 1.0, %v7228_v43  ;;  %1436 = vrot.lane.b32.xlu1 %v1403_v24, %s7461_s15 }
 0x11d   : > { %v7232_v48 = vpop.eup %7231  ;;  %7257 = vrcp.f32 %v667_v46  ;;  %v670_v51 = vadd.f32 1.0, %v7230_v25  ;;  %v887_v46 = vld [vmem:[#allocation2 + $0x18] sm:$0xf] }
 0x11e   : > { %v7234_v52 = vpop.eup %7233  ;;  %7259 = vrcp.f32 %v669_v56  ;;  %v672_v53 = vadd.f32 1.0, %v7232_v48  ;;  %v1407_v56 = vld [vmem:[#allocation2 + $0x28] sm:$0xf] }
 0x11f   : > { %v7236_v54 = vpop.eup %7235  ;;  %7261 = vrcp.f32 %v670_v51  ;;  %v671_v55 = vadd.f32 1.0, %v7234_v52  ;;  %1051 = vrot.lane.b32.xlu0 %v7794_v23, %s7458_s11  ;;  %v1278_v48 = vld [vmem:[#allocation2 + $0x28] sm:$0xf] }
 0x120   : > { %v7238_v62 = vpop.eup %7237  ;;  %7263 = vrcp.f32 %v672_v53  ;;  %v673_v0 = vadd.f32 1.0, %v7236_v54  ;;  %1307 = vrot.lane.b32.xlu1 %v1274_v57, %s7462_s16  ;;  %v7921_v51 = vld [vmem:[#allocation2 + $0x28] sm:$0xff]  ;;  %v1022_v53 = vld [vmem:[#allocation2 + $0x38] sm:$0xf] }
 0x121   : > { %v7240_v58 = vpop.eup %7239  ;;  %7265 = vrcp.f32 %v671_v55  ;;  %v754_v63 = vmul.f32 %v7238_v62, %v7722_v2  ;;  %v1149_v52 = vld [vmem:[#allocation2 + $0x28] sm:$0xf]  ;;  %v891_v54 = vld [vmem:[#allocation2 + $0x38] sm:$0xf] }
 0x122   : > { %v7242_v59 = vpop.eup %7241  ;;  %7267 = vrcp.f32 %v673_v0  ;;  %v756_v39 = vmul.f32 %v7240_v58, %v7725_v10  ;;  %v1409_v55 = vld [vmem:[#allocation2 + $0x38] sm:$0xf] }
 0x123   : > { %v7244_v60 = vpop.eup %7243  ;;  %v755_v5 = vmul.f32 %v7242_v59, %v7728_v17  ;;  %1567 = vrot.lane.b32.xlu0 %v7794_v23, %s7459_s12  ;;  %v1280_v57 = vld [vmem:[#allocation2 + $0x38] sm:$0xf] }
 0x124   : > { %v7246_v32 = vpop.eup %7245  ;;  %v757_v4 = vmul.f32 %v7244_v60, %v7731_v18  ;;  %1831 = vrot.lane.b32.xlu1 %v1798_v12, %s7463_s17  ;;  %v7945_v62 = vld [vmem:[#allocation2 + $0x38] sm:$0xff] }
 0x125   : > { %v7248_v11 = vpop.eup %7247  ;;  %v7853_v14 = vpack.c.bf16 %v755_v5, %v754_v63  ;;  %v758_v2 = vmul.f32 %v7246_v32, %v7734_v26 }
 0x126   : > { %v7250_v6 = vpop.eup %7249  ;;  %v6764_v13 = vpack.c.bf16 %v757_v4, %v756_v39  ;;  %v760_v18 = vmul.f32 %v7248_v11, %v7737_v28 }
 0x127   : > { %v7252_v19 = vpop.eup %7251  ;;  %876 = vst [vmem:[#allocation2 + $0x40] sm:$0xff] %v7853_v14  ;;  %v759_v17 = vmul.f32 %v7250_v6, %v7741_v20  ;;  %920 = vrot.lane.b32.xlu0 %v7794_v23, %s7460_s14 }
 0x128   : > { %v7254_v10 = vpop.eup %7253  ;;  %877 = vst.msk [vmem:[#allocation2 + $0x48] sm:$0xff] %vm7767_vm3, %v6764_v13  ;;  %v761_v29 = vmul.f32 %v7252_v19, %v7745_v30  ;;  %1053 = vrot.lane.b32.xlu1 %v1018_v15, %s7458_s11 }
 0x129   : > { %v7256_v27 = vpop.eup %7255  ;;  %v7865_v22 = vpack.c.bf16 %v759_v17, %v758_v2  ;;  %v762_v49 = vmul.f32 %v7254_v10, %v7750_v41 }
 0x12a   : > { %v7258_v26 = vpop.eup %7257  ;;  %v6766_v33 = vpack.c.bf16 %v761_v29, %v760_v18  ;;  %v764_v30 = vmul.f32 %v7256_v27, %v7755_v47 }
 0x12b   : > { %v7260_v20 = vpop.eup %7259  ;;  %878 = vst [vmem:[#allocation2 + $0x50] sm:$0xff] %v7865_v22  ;;  %v763_v21 = vmul.f32 %v7258_v26, %v7773_v3  ;;  %1438 = vrot.lane.b32.xlu0 %v7794_v23, %s7461_s15 }
 0x12c   : > { %v7262_v28 = vpop.eup %7261  ;;  %879 = vst.msk [vmem:[#allocation2 + $0x58] sm:$0xff] %vm7767_vm3, %v6766_v33  ;;  %v765_v35 = vmul.f32 %v7260_v20, %v7777_v7  ;;  %1569 = vrot.lane.b32.xlu1 %v1534_v36, %s7459_s12 }
 0x12d   : > { %v7264_v45 = vpop.eup %7263  ;;  %v7877_v37 = vpack.c.bf16 %v763_v21, %v762_v49  ;;  %v766_v42 = vmul.f32 %v7262_v28, %v7783_v16  ;;  %v1405_v16 = vld [vmem:[#allocation2 + $0x18] sm:$0xf] }
 0x12e   : > { %v7266_v41 = vpop.eup %7265  ;;  %v6768_v40 = vpack.c.bf16 %v765_v35, %v764_v30  ;;  %v768_v47 = vmul.f32 %v7264_v45, %v7792_v44  ;;  %v7900_v44 = vld [vmem:[#allocation2 + $0x18] sm:$0xff] }
 0x12f   : > { %v7268_v3 = vpop.eup %7267  ;;  %880 = vst [vmem:[#allocation2 + $0x60] sm:$0xff] %v7877_v37  ;;  %v767_v43 = vmul.f32 %v7266_v41, %v7798_v34  ;;  %1309 = vrot.lane.b32.xlu0 %v7794_v23, %s7462_s16  ;;  %v1276_v34 = vld [vmem:[#allocation2 + $0x18] sm:$0xf]  ;;  %v1024_v0 = vld [vmem:[#allocation2 + $0x48] sm:$0xf] }
 0x130   : > { %881 = vst.msk [vmem:[#allocation2 + $0x68] sm:$0xff] %vm7767_vm3, %v6768_v40  ;;  %v769_v7 = vmul.f32 %v7268_v3, %v7802_v50  ;;  %922 = vrot.lane.b32.xlu1 %v887_v46, %s7460_s14  ;;  %v889_v50 = vld [vmem:[#allocation2 + $0x28] sm:$0xf] }
 0x131   : > { %v7889_v24 = vpack.c.bf16 %v767_v43, %v766_v42  ;;  %v893_v59 = vld [vmem:[#allocation2 + $0x48] sm:$0xf] }
 0x132   : > { %v6770_v25 = vpack.c.bf16 %v769_v7, %v768_v47  ;;  %v1411_v63 = vld [vmem:[#allocation2 + $0x48] sm:$0xf] }
 0x133   : > { %882 = vst [vmem:[#allocation2 + $0x70] sm:$0xff] %v7889_v24  ;;  %1833 = vrot.lane.b32.xlu0 %v7794_v23, %s7463_s17  ;;  %v1020_v23 = vld [vmem:[#allocation2 + $0x28] sm:$0xf]  ;;  %v1026_v45 = vld [vmem:[#allocation2 + $0x58] sm:$0xf] }
 0x134   : > { %883 = vst.msk [vmem:[#allocation2 + $0x78] sm:$0xff] %vm7767_vm3, %v6770_v25  ;;  %1440 = vrot.lane.b32.xlu1 %v1405_v16, %s7461_s15  ;;  %v1282_v4 = vld [vmem:[#allocation2 + $0x48] sm:$0xf]  ;;  %v1542_v47 = vld [vmem:[#allocation2 + $0x58] sm:$0xf]  ;;  %vm4053_vm3 = vcmask 867328  }
 0x135   : > { %v7970_v15 = vld [vmem:[#allocation2 + $0x48] sm:$0xff] }
 0x136   : > { %v1153_v20 = vld [vmem:[#allocation2 + $0x48] sm:$0xf] }
 0x137   : > { %1055 = vrot.lane.b32.xlu0 %v7815_v61, %s7458_s11 }
 0x138   : > { %1311 = vrot.lane.b32.xlu1 %v1276_v34, %s7462_s16 }
 0x13b   : > { %1571 = vrot.lane.b32.xlu0 %v7815_v61, %s7459_s12 }
 0x13c   : > { %1835 = vrot.lane.b32.xlu1 %v7900_v44, %s7463_s17 }
 0x13f   : > { %924 = vrot.lane.b32.xlu0 %v7815_v61, %s7460_s14 }
 0x140   : > { %1057 = vrot.lane.b32.xlu1 %v1020_v23, %s7458_s11 }
 0x143   : > { %1442 = vrot.lane.b32.xlu0 %v7815_v61, %s7461_s15 }
 0x144   : > { %1573 = vrot.lane.b32.xlu1 %v1536_v31, %s7459_s12 }
 0x147   : > { %1313 = vrot.lane.b32.xlu0 %v7815_v61, %s7462_s16 }
 0x148   : > { %926 = vrot.lane.b32.xlu1 %v889_v50, %s7460_s14  ;;  %v895_v50 = vld [vmem:[#allocation2 + $0x58] sm:$0xf] }
 0x14b   : > { %1837 = vrot.lane.b32.xlu0 %v7815_v61, %s7463_s17 }
 0x14c   : > { %1444 = vrot.lane.b32.xlu1 %v1407_v56, %s7461_s15 }
 0x14f   : > { %1184 = vrot.lane.b32.xlu0 %v7815_v61, %s7464_s23  ;;  %v1538_v61 = vld [vmem:[#allocation2 + $0x38] sm:$0xf] }
 0x150   : > { %1315 = vrot.lane.b32.xlu1 %v1278_v48, %s7462_s16 }
 0x153   : > { %1059 = vrot.lane.b32.xlu0 %v7829_v38, %s7458_s11 }
 0x154   : > { %1839 = vrot.lane.b32.xlu1 %v7921_v51, %s7463_s17 }
 0x157   : > { %1575 = vrot.lane.b32.xlu0 %v7829_v38, %s7459_s12 }
 0x158   : > { %1186 = vrot.lane.b32.xlu1 %v1149_v52, %s7464_s23 }
 0x15b   : > { %928 = vrot.lane.b32.xlu0 %v7829_v38, %s7460_s14 }
 0x15c   : > { %1061 = vrot.lane.b32.xlu1 %v1022_v53, %s7458_s11 }
 0x15f   : > { %1446 = vrot.lane.b32.xlu0 %v7829_v38, %s7461_s15 }
 0x160   : > { %1577 = vrot.lane.b32.xlu1 %v1538_v61, %s7459_s12 }
 0x163   : > { %1317 = vrot.lane.b32.xlu0 %v7829_v38, %s7462_s16 }
 0x164   : > { %930 = vrot.lane.b32.xlu1 %v891_v54, %s7460_s14 }
 0x167   : > { %1841 = vrot.lane.b32.xlu0 %v7829_v38, %s7463_s17  ;;  %v1540_v38 = vld [vmem:[#allocation2 + $0x48] sm:$0xf] }
 0x168   : > { %1448 = vrot.lane.b32.xlu1 %v1409_v55, %s7461_s15 }
 0x16b   : > { %1063 = vrot.lane.b32.xlu0 %v7853_v14, %s7458_s11 }
 0x16c   : > { %1319 = vrot.lane.b32.xlu1 %v1280_v57, %s7462_s16  ;;  %v1413_v57 = vld [vmem:[#allocation2 + $0x58] sm:$0xf] }
 0x16f   : > { %1579 = vrot.lane.b32.xlu0 %v7853_v14, %s7459_s12 }
 0x170   : > { %1843 = vrot.lane.b32.xlu1 %v7945_v62, %s7463_s17 }
 0x173   : > { %932 = vrot.lane.b32.xlu0 %v7853_v14, %s7460_s14 }
 0x174   : > { %1065 = vrot.lane.b32.xlu1 %v1024_v0, %s7458_s11 }
 0x177   : > { %1450 = vrot.lane.b32.xlu0 %v7853_v14, %s7461_s15 }
 0x178   : > { %1581 = vrot.lane.b32.xlu1 %v1540_v38, %s7459_s12 }
 0x179   : > { %v1048_v58 = vpop.permute.xlu0 %1047 }
 0x17a   : > { %v1079_v39 = vrot.slane %v1048_v58, 4 }
 0x17b   : > { %1321 = vrot.lane.b32.xlu0 %v7853_v14, %s7462_s16 }
 0x17c   : > { %934 = vrot.lane.b32.xlu1 %v893_v59, %s7460_s14 }
 0x17d   : > { %v1564_v60 = vpop.permute.xlu0 %1563 }
 0x17e   : > { %v1595_v17 = vrot.slane %v1564_v60, 4 }
 0x17f   : > { %1845 = vrot.lane.b32.xlu0 %v7853_v14, %s7463_s17 }
 0x180   : > { %1452 = vrot.lane.b32.xlu1 %v1411_v63, %s7461_s15 }
 0x181   : > { %v917_v5 = vpop.permute.xlu0 %916 }
 0x182   : > { %v1050_v12 = vpop.permute.xlu1 %1049  ;;  %v948_v33 = vrot.slane %v917_v5, 4 }
 0x183   : > { %v1080_v32 = vrot.slane %v1050_v12, 4  ;;  %1129 = vst.msk [vmem:[#allocation3 + $0x68] sm:$0xf] %vm11741_vm4, %v1050_v12  ;;  %1192 = vrot.lane.b32.xlu0 %v7853_v14, %s7464_s23 }
 0x184   : > { %1323 = vrot.lane.b32.xlu1 %v1282_v4, %s7462_s16 }
 0x185   : > { %v1095_v11 = vsel %vm311_vm0, %v1079_v39, %v1080_v32  ;;  %v1435_v6 = vpop.permute.xlu0 %1434 }
 0x186   : > { %v1097_v13 = vsel %vm1096_vm5, %v1048_v58, %v1095_v11  ;;  %v1566_v19 = vpop.permute.xlu1 %1565  ;;  %v1466_v35 = vrot.slane %v1435_v6, 4 }
 0x187   : > { %1128 = vst [vmem:[#allocation3 + $0x60] sm:$0xff] %v1097_v13  ;;  %v1596_v2 = vrot.slane %v1566_v19, 4  ;;  %1645 = vst.msk [vmem:[#allocation3 + $0x1e8] sm:$0xf] %vm11741_vm4, %v1566_v19  ;;  %1067 = vrot.lane.b32.xlu0 %v7865_v22, %s7458_s11  ;;  %v8016_v13 = vld [vmem:[#allocation2 + $0x58] sm:$0xff] }
 0x188   : > { %1847 = vrot.lane.b32.xlu1 %v7970_v15, %s7463_s17 }
 0x189   : > { %v1611_v10 = vsel %vm311_vm0, %v1595_v17, %v1596_v2  ;;  %v1306_v18 = vpop.permute.xlu0 %1305 }
 0x18a   : > { %v1613_v29 = vsel %vm1612_vm6, %v1564_v60, %v1611_v10  ;;  %v919_v27 = vpop.permute.xlu1 %918  ;;  %v1337_v46 = vrot.slane %v1306_v18, 4 }
 0x18b   : > { %1644 = vst [vmem:[#allocation3 + $0x1e0] sm:$0xff] %v1613_v29  ;;  %v949_v26 = vrot.slane %v919_v27, 4  ;;  %1000 = vst.msk [vmem:[#allocation3 + $0x8] sm:$0xf] %vm11741_vm4, %v919_v27  ;;  %1583 = vrot.lane.b32.xlu0 %v7865_v22, %s7459_s12  ;;  %v1155_v27 = vld [vmem:[#allocation2 + $0x58] sm:$0xf] }
 0x18c   : > { %1194 = vrot.lane.b32.xlu1 %v1153_v20, %s7464_s23 }
 0x18d   : > { %v965_v49 = vsel %vm311_vm0, %v948_v33, %v949_v26  ;;  %v1830_v21 = vpop.permute.xlu0 %1829 }
 0x18e   : > { %v967_v36 = vsel %vm966_vm7, %v917_v5, %v965_v49  ;;  %v1437_v28 = vpop.permute.xlu1 %1436  ;;  %v1861_v31 = vrot.slane %v1830_v21, 4  ;;  %v1284_v5 = vld [vmem:[#allocation2 + $0x58] sm:$0xf] }
 0x18f   : > { %998 = vst [vmem:[#allocation3] sm:$0xff] %v967_v36  ;;  %v1467_v30 = vrot.slane %v1437_v28, 4  ;;  %1516 = vst.msk [vmem:[#allocation3 + $0x188] sm:$0xf] %vm11741_vm4, %v1437_v28  ;;  %936 = vrot.lane.b32.xlu0 %v7865_v22, %s7460_s14  ;;  %v1028_v28 = vld [vmem:[#allocation2 + $0x68] sm:$0xf] }
 0x190   : > { %1069 = vrot.lane.b32.xlu1 %v1026_v45, %s7458_s11 }
 0x191   : > { %v1482_v41 = vsel %vm311_vm0, %v1466_v35, %v1467_v30  ;;  %v1052_v40 = vpop.permute.xlu0 %1051 }
 0x192   : > { %v1484_v3 = vsel %vm1483_vm8, %v1435_v6, %v1482_v41  ;;  %v1308_v42 = vpop.permute.xlu1 %1307  ;;  %v1081_v55 = vrot.slane %v1052_v40, 4 }
 0x193   : > { %1515 = vst [vmem:[#allocation3 + $0x180] sm:$0xff] %v1484_v3  ;;  %v1338_v43 = vrot.slane %v1308_v42, 4  ;;  %1387 = vst.msk [vmem:[#allocation3 + $0x128] sm:$0xf] %vm11741_vm4, %v1308_v42  ;;  %1454 = vrot.lane.b32.xlu0 %v7865_v22, %s7461_s15  ;;  %v1544_v42 = vld [vmem:[#allocation2 + $0x68] sm:$0xf] }
 0x194   : > { %1585 = vrot.lane.b32.xlu1 %v1542_v47, %s7459_s12 }
 0x195   : > { %v1353_v7 = vsel %vm311_vm0, %v1337_v46, %v1338_v43  ;;  %v1568_v25 = vpop.permute.xlu0 %1567 }
 0x196   : > { %v1355_v16 = vsel %vm1354_vm9, %v1306_v18, %v1353_v7  ;;  %v1832_v34 = vpop.permute.xlu1 %1831  ;;  %v1597_v63 = vrot.slane %v1568_v25, 4 }
 0x197   : > { %1386 = vst [vmem:[#allocation3 + $0x120] sm:$0xff] %v1355_v16  ;;  %v1862_v23 = vrot.slane %v1832_v34, 4  ;;  %1325 = vrot.lane.b32.xlu0 %v7865_v22, %s7462_s16 }
 0x198   : > { %938 = vrot.lane.b32.xlu1 %v895_v50, %s7460_s14 }
 0x199   : > { %v1880_v56 = vsel %vm11747_vm10, %v1832_v34, %v1862_v23  ;;  %v1877_v48 = vsel %vm311_vm0, %v1861_v31, %v1862_v23  ;;  %v921_v52 = vpop.permute.xlu0 %920  ;;  %v897_v23 = vld [vmem:[#allocation2 + $0x68] sm:$0xf] }
 0x19a   : > { %1919 = vst.msk [vmem:[#allocation3 + $0x2a8] sm:$0xf] %vm11741_vm4, %v1880_v56  ;;  %v1879_v53 = vsel %vm11747_vm10, %v1830_v21, %v1877_v48  ;;  %v1054_v61 = vpop.permute.xlu1 %1053  ;;  %v950_v6 = vrot.slane %v921_v52, 4 }
 0x19b   : > { %1918 = vst [vmem:[#allocation3 + $0x2a0] sm:$0xff] %v1879_v53  ;;  %v1082_v54 = vrot.slane %v1054_v61, 4  ;;  %1131 = vst.msk [vmem:[#allocation3 + $0x74] sm:$0xf] %vm11741_vm4, %v1054_v61  ;;  %1849 = vrot.lane.b32.xlu0 %v7865_v22, %s7463_s17  ;;  %v1415_v61 = vld [vmem:[#allocation2 + $0x68] sm:$0xf] }
 0x19c   : > { %1456 = vrot.lane.b32.xlu1 %v1413_v57, %s7461_s15 }
 0x19d   : > { %v1098_v0 = vsel %vm311_vm0, %v1081_v55, %v1082_v54  ;;  %v1439_v38 = vpop.permute.xlu0 %1438 }
 0x19e   : > { %v1099_v58 = vsel %vm1096_vm5, %v1052_v40, %v1098_v0  ;;  %v1570_v59 = vpop.permute.xlu1 %1569  ;;  %v1468_v29 = vrot.slane %v1439_v38, 4 }
 0x19f   : > { %1130 = vst [vmem:[#allocation3 + $0x6c] sm:$0xff] %v1099_v58  ;;  %v1598_v60 = vrot.slane %v1570_v59, 4  ;;  %1647 = vst.msk [vmem:[#allocation3 + $0x1f4] sm:$0xf] %vm11741_vm4, %v1570_v59  ;;  %1196 = vrot.lane.b32.xlu0 %v7865_v22, %s7464_s23  ;;  %v1286_v59 = vld [vmem:[#allocation2 + $0x68] sm:$0xf] }
 0x1a0   : > { %1327 = vrot.lane.b32.xlu1 %v1284_v5, %s7462_s16 }
 0x1a1   : > { %v1614_v12 = vsel %vm311_vm0, %v1597_v63, %v1598_v60  ;;  %v1310_v32 = vpop.permute.xlu0 %1309 }
 0x1a2   : > { %v1615_v39 = vsel %vm1612_vm6, %v1568_v25, %v1614_v12  ;;  %v923_v4 = vpop.permute.xlu1 %922  ;;  %v1339_v36 = vrot.slane %v1310_v32, 4 }
 0x1a3   : > { %1646 = vst [vmem:[#allocation3 + $0x1ec] sm:$0xff] %v1615_v39  ;;  %v951_v11 = vrot.slane %v923_v4, 4  ;;  %1002 = vst.msk [vmem:[#allocation3 + $0x14] sm:$0xf] %vm11741_vm4, %v923_v4  ;;  %1071 = vrot.lane.b32.xlu0 %v7877_v37, %s7458_s11  ;;  %v8064_v4 = vld [vmem:[#allocation2 + $0x68] sm:$0xff] }
 0x1a4   : > { %1851 = vrot.lane.b32.xlu1 %v8016_v13, %s7463_s17 }
 0x1a5   : > { %v968_v19 = vsel %vm311_vm0, %v950_v6, %v951_v11  ;;  %v1834_v2 = vpop.permute.xlu0 %1833 }
 0x1a6   : > { %v969_v17 = vsel %vm966_vm7, %v921_v52, %v968_v19  ;;  %v1441_v10 = vpop.permute.xlu1 %1440  ;;  %v1863_v3 = vrot.slane %v1834_v2, 4 }
 0x1a7   : > { %1001 = vst [vmem:[#allocation3 + $0xc] sm:$0xff] %v969_v17  ;;  %v1469_v18 = vrot.slane %v1441_v10, 4  ;;  %1518 = vst.msk [vmem:[#allocation3 + $0x194] sm:$0xf] %vm11741_vm4, %v1441_v10  ;;  %1587 = vrot.lane.b32.xlu0 %v7877_v37, %s7459_s12 }
 0x1a8   : > { %1198 = vrot.lane.b32.xlu1 %v1155_v27, %s7464_s23 }
 0x1a9   : > { %v1485_v26 = vsel %vm311_vm0, %v1468_v29, %v1469_v18  ;;  %v1056_v33 = vpop.permute.xlu0 %1055  ;;  %v1157_v18 = vld [vmem:[#allocation2 + $0x68] sm:$0xf] }
 0x1aa   : > { %v1486_v20 = vsel %vm1483_vm8, %v1439_v38, %v1485_v26  ;;  %v1312_v49 = vpop.permute.xlu1 %1311  ;;  %v1083_v34 = vrot.slane %v1056_v33, 4 }
 0x1ab   : > { %1517 = vst [vmem:[#allocation3 + $0x18c] sm:$0xff] %v1486_v20  ;;  %v1340_v21 = vrot.slane %v1312_v49, 4  ;;  %1389 = vst.msk [vmem:[#allocation3 + $0x134] sm:$0xf] %vm11741_vm4, %v1312_v49  ;;  %940 = vrot.lane.b32.xlu0 %v7877_v37, %s7460_s14 }
 0x1ac   : > { %1073 = vrot.lane.b32.xlu1 %v1028_v28, %s7458_s11 }
 0x1ad   : > { %v1356_v30 = vsel %vm311_vm0, %v1339_v36, %v1340_v21  ;;  %v1572_v35 = vpop.permute.xlu0 %1571 }
 0x1ae   : > { %v1357_v45 = vsel %vm1354_vm9, %v1310_v32, %v1356_v30  ;;  %v1836_v41 = vpop.permute.xlu1 %1835  ;;  %v1599_v53 = vrot.slane %v1572_v35, 4 }
 0x1af   : > { %1388 = vst [vmem:[#allocation3 + $0x12c] sm:$0xff] %v1357_v45  ;;  %v1864_v40 = vrot.slane %v1836_v41, 4  ;;  %1458 = vrot.lane.b32.xlu0 %v7877_v37, %s7461_s15 }
 0x1b0   : > { %1589 = vrot.lane.b32.xlu1 %v1544_v42, %s7459_s12 }
 0x1b1   : > { %v1883_v43 = vsel %vm11747_vm10, %v1836_v41, %v1864_v40  ;;  %v1881_v46 = vsel %vm311_vm0, %v1863_v3, %v1864_v40  ;;  %v925_v47 = vpop.permute.xlu0 %924  ;;  %v1030_v40 = vld [vmem:[#allocation2 + $0x78] sm:$0xf] }
 0x1b2   : > { %1921 = vst.msk [vmem:[#allocation3 + $0x2b4] sm:$0xf] %vm11741_vm4, %v1883_v43  ;;  %v1882_v7 = vsel %vm11747_vm10, %v1834_v2, %v1881_v46  ;;  %v1058_v25 = vpop.permute.xlu1 %1057  ;;  %v952_v58 = vrot.slane %v925_v47, 4 }
 0x1b3   : > { %1920 = vst [vmem:[#allocation3 + $0x2ac] sm:$0xff] %v1882_v7  ;;  %v1084_v16 = vrot.slane %v1058_v25, 4  ;;  %1133 = vst.msk [vmem:[#allocation3 + $0x80] sm:$0xf] %vm11741_vm4, %v1058_v25  ;;  %1329 = vrot.lane.b32.xlu0 %v7877_v37, %s7462_s16  ;;  %v1546_v25 = vld [vmem:[#allocation2 + $0x78] sm:$0xf] }
 0x1b4   : > { %942 = vrot.lane.b32.xlu1 %v897_v23, %s7460_s14 }
 0x1b5   : > { %v1100_v31 = vsel %vm311_vm0, %v1083_v34, %v1084_v16  ;;  %v1443_v50 = vpop.permute.xlu0 %1442 }
 0x1b6   : > { %v8049_v56 = vsel %vm1096_vm5, %v1056_v33, %v1100_v31  ;;  %v1574_v48 = vpop.permute.xlu1 %1573  ;;  %v1470_v39 = vrot.slane %v1443_v50, 4 }
 0x1b7   : > { %v1600_v52 = vrot.slane %v1574_v48, 4  ;;  %1649 = vst.msk [vmem:[#allocation3 + $0x200] sm:$0xf] %vm11741_vm4, %v1574_v48  ;;  %1853 = vrot.lane.b32.xlu0 %v7877_v37, %s7463_s17 }
 0x1b8   : > { %1460 = vrot.lane.b32.xlu1 %v1415_v61, %s7461_s15 }
 0x1b9   : > { %v1616_v54 = vsel %vm311_vm0, %v1599_v53, %v1600_v52  ;;  %v1314_v55 = vpop.permute.xlu0 %1313  ;;  %v1151_v52 = vld [vmem:[#allocation2 + $0x38] sm:$0xf] }
 0x1ba   : > { %v1617_v57 = vsel %vm1612_vm6, %v1572_v35, %v1616_v54  ;;  %v927_v0 = vpop.permute.xlu1 %926  ;;  %v1341_v10 = vrot.slane %v1314_v55, 4  ;;  %v8086_v35 = vld [vmem:[#allocation2 + $0x30] sm:$0xff] }
 0x1bb   : > { %1648 = vst [vmem:[#allocation3 + $0x1f8] sm:$0xff] %v1617_v57  ;;  %v953_v38 = vrot.slane %v927_v0, 4  ;;  %1004 = vst.msk [vmem:[#allocation3 + $0x20] sm:$0xf] %vm11741_vm4, %v927_v0  ;;  %1200 = vrot.lane.b32.xlu0 %v7877_v37, %s7464_s23 }
 0x1bc   : > { %1331 = vrot.lane.b32.xlu1 %v1286_v59, %s7462_s16 }
 0x1bd   : > { %v970_v60 = vsel %vm311_vm0, %v952_v58, %v953_v38  ;;  %v1838_v63 = vpop.permute.xlu0 %1837 }
 0x1be   : > { %v971_v5 = vsel %vm966_vm7, %v925_v47, %v970_v60  ;;  %v1445_v12 = vpop.permute.xlu1 %1444  ;;  %v1865_v20 = vrot.slane %v1838_v63, 4 }
 0x1bf   : > { %1003 = vst [vmem:[#allocation3 + $0x18] sm:$0xff] %v971_v5  ;;  %v1471_v32 = vrot.slane %v1445_v12, 4  ;;  %1520 = vst.msk [vmem:[#allocation3 + $0x1a0] sm:$0xf] %vm11741_vm4, %v1445_v12  ;;  %1716 = vrot.lane.b32.xlu0 %v7877_v37, %s7465_s25 }
 0x1c0   : > { %1855 = vrot.lane.b32.xlu1 %v8064_v4, %s7463_s17 }
 0x1c1   : > { %v1487_v11 = vsel %vm311_vm0, %v1470_v39, %v1471_v32  ;;  %v1185_v6 = vpop.permute.xlu0 %1184  ;;  %v899_v32 = vld [vmem:[#allocation2 + $0x78] sm:$0xf] }
 0x1c2   : > { %v1488_v19 = vsel %vm1483_vm8, %v1443_v50, %v1487_v11  ;;  %v1316_v2 = vpop.permute.xlu1 %1315  ;;  %v1212_v41 = vrot.slane %v1185_v6, 4 }
 0x1c3   : > { %1519 = vst [vmem:[#allocation3 + $0x198] sm:$0xff] %v1488_v19  ;;  %v1342_v17 = vrot.slane %v1316_v2, 4  ;;  %1391 = vst.msk [vmem:[#allocation3 + $0x140] sm:$0xf] %vm11741_vm4, %v1316_v2  ;;  %1075 = vrot.lane.b32.xlu0 %v7889_v24, %s7458_s11  ;;  %v8131_v2 = vld [vmem:[#allocation2] sm:$0xff] }
 0x1c4   : > { %1202 = vrot.lane.b32.xlu1 %v1157_v18, %s7464_s23  ;;  %v1417_v18 = vld [vmem:[#allocation2 + $0x78] sm:$0xf] }
 0x1c5   : > { %v1358_v37 = vsel %vm311_vm0, %v1341_v10, %v1342_v17  ;;  %v1060_v29 = vpop.permute.xlu0 %1059 }
 0x1c6   : > { %v1359_v27 = vsel %vm1354_vm9, %v1314_v55, %v1358_v37  ;;  %v1840_v26 = vpop.permute.xlu1 %1839  ;;  %v1085_v7 = vrot.slane %v1060_v29, 4 }
 0x1c7   : > { %1390 = vst [vmem:[#allocation3 + $0x138] sm:$0xff] %v1359_v27  ;;  %v1866_v33 = vrot.slane %v1840_v26, 4  ;;  %1591 = vrot.lane.b32.xlu0 %v7889_v24, %s7459_s12 }
 0x1c8   : > { %1718 = vrot.lane.b32.xlu1 %v8064_v4, %s7465_s25 }
 0x1c9   : > { %v1886_v49 = vsel %vm11747_vm10, %v1840_v26, %v1866_v33  ;;  %v1884_v21 = vsel %vm311_vm0, %v1865_v20, %v1866_v33  ;;  %v1576_v36 = vpop.permute.xlu0 %1575 }
 0x1ca   : > { %1923 = vst.msk [vmem:[#allocation3 + $0x2c0] sm:$0xf] %vm11741_vm4, %v1886_v49  ;;  %v1885_v28 = vsel %vm11747_vm10, %v1838_v63, %v1884_v21  ;;  %v1187_v30 = vpop.permute.xlu1 %1186  ;;  %v1601_v48 = vrot.slane %v1576_v36, 4 }
 0x1cb   : > { %1922 = vst [vmem:[#allocation3 + $0x2b8] sm:$0xff] %v1885_v28  ;;  %v1213_v45 = vrot.slane %v1187_v30, 4  ;;  %1262 = vst.msk [vmem:[#allocation3 + $0xe0] sm:$0xf] %vm11741_vm4, %v1187_v30  ;;  %1188 = vrot.lane.b32.xlu0 %v8086_v35, %s7464_s23 }
 0x1cc   : > { %1077 = vrot.lane.b32.xlu1 %v1030_v40, %s7458_s11 }
 0x1cd   : > { %v1229_v3 = vsel %vm311_vm0, %v1212_v41, %v1213_v45  ;;  %v929_v42 = vpop.permute.xlu0 %928  ;;  %v1145_v41 = vld [vmem:[#allocation2 + $0x8] sm:$0xf] }
 0x1ce   : > { %v1230_v43 = vsel %vm1225_vm11, %v1185_v6, %v1229_v3  ;;  %v1062_v46 = vpop.permute.xlu1 %1061  ;;  %v954_v38 = vrot.slane %v929_v42, 4 }
 0x1cf   : > { %1261 = vst [vmem:[#allocation3 + $0xd8] sm:$0xff] %v1230_v43  ;;  %v1086_v47 = vrot.slane %v1062_v46, 4  ;;  %1135 = vst.msk [vmem:[#allocation3 + $0x8c] sm:$0xf] %vm11741_vm4, %v1062_v46  ;;  %1708 = vrot.lane.b32.xlu0 %v7853_v14, %s7465_s25  ;;  %v8155_v46 = vld [vmem:[#allocation2 + $0x10] sm:$0xff] }
 0x1d0   : > { %1593 = vrot.lane.b32.xlu1 %v1546_v25, %s7459_s12  ;;  %v1288_v25 = vld [vmem:[#allocation2 + $0x78] sm:$0xf] }
 0x1d1   : > { %v1102_v16 = vsel %vm311_vm0, %v1085_v7, %v1086_v47  ;;  %v1447_v34 = vpop.permute.xlu0 %1446 }
 0x1d2   : > { %v8100_v23 = vsel %vm1096_vm5, %v1060_v29, %v1102_v16  ;;  %v1578_v31 = vpop.permute.xlu1 %1577  ;;  %v1472_v12 = vrot.slane %v1447_v34, 4 }
 0x1d3   : > { %v1602_v50 = vrot.slane %v1578_v31, 4  ;;  %1651 = vst.msk [vmem:[#allocation3 + $0x20c] sm:$0xf] %vm11741_vm4, %v1578_v31  ;;  %944 = vrot.lane.b32.xlu0 %v7889_v24, %s7460_s14  ;;  %v6636_v14 = vcombine.low %v8049_v56, %v8100_v23  ;;  %v6637_v53 = vcombine.high %v8049_v56, %v8100_v23  ;;  %v7030_v23 = vld [vmem:[#allocation3 + $0x1e4] ss:$12 sps:$4 sm:$0xff]  }
 0x1d4   : > { %1190 = vrot.lane.b32.xlu1 %v1151_v52, %s7464_s23 }
 0x1d5   : > { %v1618_v61 = vsel %vm311_vm0, %v1601_v48, %v1602_v50  ;;  %v1318_v54 = vpop.permute.xlu0 %1317  ;;  %v8165_v50 = vld [vmem:[#allocation2 + $0x20] sm:$0xff] }
 0x1d6   : > { %v8112_v55 = vsel %vm1612_vm6, %v1576_v36, %v1618_v61  ;;  %v931_v57 = vpop.permute.xlu1 %930  ;;  %v1343_v10 = vrot.slane %v1318_v54, 4  ;;  %v8168_v61 = vld [vmem:[#allocation2 + $0x78] sm:$0xff] }
 0x1d7   : > { %v955_v0 = vrot.slane %v931_v57, 4  ;;  %1006 = vst.msk [vmem:[#allocation3 + $0x2c] sm:$0xf] %vm11741_vm4, %v931_v57  ;;  %1462 = vrot.lane.b32.xlu0 %v7889_v24, %s7461_s15 }
 0x1d8   : > { %1710 = vrot.lane.b32.xlu1 %v7970_v15, %s7465_s25 }
 0x1d9   : > { %v972_v58 = vsel %vm311_vm0, %v954_v38, %v955_v0  ;;  %v1842_v59 = vpop.permute.xlu0 %1841 }
 0x1da   : > { %v8121_v60 = vsel %vm966_vm7, %v929_v42, %v972_v58  ;;  %v1449_v63 = vpop.permute.xlu1 %1448  ;;  %v1867_v33 = vrot.slane %v1842_v59, 4  ;;  %v8178_v58 = vld [vmem:[#allocation2 + $0x70] sm:$0xff] }
 0x1db   : > { %v1473_v5 = vrot.slane %v1449_v63, 4  ;;  %1522 = vst.msk [vmem:[#allocation3 + $0x1ac] sm:$0xf] %vm11741_vm4, %v1449_v63  ;;  %1712 = vrot.lane.b32.xlu0 %v7865_v22, %s7465_s25 }
 0x1dc   : > { %946 = vrot.lane.b32.xlu1 %v899_v32, %s7460_s14 }
 0x1dd   : > { %v1489_v39 = vsel %vm311_vm0, %v1472_v12, %v1473_v5  ;;  %v1064_v11 = vpop.permute.xlu0 %1063  ;;  %v1147_v5 = vld [vmem:[#allocation2 + $0x18] sm:$0xf] }
 0x1de   : > { %v8129_v6 = vsel %vm1483_vm8, %v1447_v34, %v1489_v39  ;;  %v1320_v19 = vpop.permute.xlu1 %1319  ;;  %v1087_v45 = vrot.slane %v1064_v11, 4 }
 0x1df   : > { %v1344_v17 = vrot.slane %v1320_v19, 4  ;;  %1393 = vst.msk [vmem:[#allocation3 + $0x14c] sm:$0xf] %vm11741_vm4, %v1320_v19  ;;  %1176 = vrot.lane.b32.xlu0 %v8131_v2, %s7464_s23 }
 0x1e0   : > { %1464 = vrot.lane.b32.xlu1 %v1417_v18, %s7461_s15 }
 0x1e1   : > { %v1360_v22 = vsel %vm311_vm0, %v1343_v10, %v1344_v17  ;;  %v1580_v37 = vpop.permute.xlu0 %1579 }
 0x1e2   : > { %v1361_v29 = vsel %vm1354_vm9, %v1318_v54, %v1360_v22  ;;  %v1844_v27 = vpop.permute.xlu1 %1843  ;;  %v1603_v7 = vrot.slane %v1580_v37, 4 }
 0x1e3   : > { %1392 = vst [vmem:[#allocation3 + $0x144] sm:$0xff] %v1361_v29  ;;  %v1868_v26 = vrot.slane %v1844_v27, 4  ;;  %1333 = vrot.lane.b32.xlu0 %v7889_v24, %s7462_s16 }
 0x1e4   : > { %1714 = vrot.lane.b32.xlu1 %v8016_v13, %s7465_s25 }
 0x1e5   : > { %v1889_v20 = vsel %vm11747_vm10, %v1844_v27, %v1868_v26  ;;  %v1887_v49 = vsel %vm311_vm0, %v1867_v33, %v1868_v26  ;;  %v933_v21 = vpop.permute.xlu0 %932  ;;  %v1159_v26 = vld [vmem:[#allocation2 + $0x78] sm:$0xf] }
 0x1e6   : > { %1925 = vst.msk [vmem:[#allocation3 + $0x2cc] sm:$0xf] %vm11741_vm4, %v1889_v20  ;;  %v1888_v36 = vsel %vm11747_vm10, %v1842_v59, %v1887_v49  ;;  %v1066_v28 = vpop.permute.xlu1 %1065  ;;  %v956_v52 = vrot.slane %v933_v21, 4 }
 0x1e7   : > { %1924 = vst [vmem:[#allocation3 + $0x2c4] sm:$0xff] %v1888_v36  ;;  %v1088_v30 = vrot.slane %v1066_v28, 4  ;;  %1137 = vst.msk [vmem:[#allocation3 + $0x98] sm:$0xf] %vm11741_vm4, %v1066_v28  ;;  %1857 = vrot.lane.b32.xlu0 %v7889_v24, %s7463_s17 }
 0x1e8   : > { %1178 = vrot.lane.b32.xlu1 %v1145_v41, %s7464_s23 }
 0x1e9   : > { %v1104_v40 = vsel %vm311_vm0, %v1087_v45, %v1088_v30  ;;  %v1451_v3 = vpop.permute.xlu0 %1450 }
 0x1ea   : > { %v8153_v42 = vsel %vm1096_vm5, %v1064_v11, %v1104_v40  ;;  %v1582_v43 = vpop.permute.xlu1 %1581  ;;  %v1474_v63 = vrot.slane %v1451_v3, 4 }
 0x1eb   : > { %v1604_v47 = vrot.slane %v1582_v43, 4  ;;  %1653 = vst.msk [vmem:[#allocation3 + $0x218] sm:$0xf] %vm11741_vm4, %v1582_v43  ;;  %1180 = vrot.lane.b32.xlu0 %v8155_v46, %s7464_s23 }
 0x1ec   : > { %1335 = vrot.lane.b32.xlu1 %v1288_v25, %s7462_s16 }
 0x1ed   : > { %v1620_v24 = vsel %vm311_vm0, %v1603_v7, %v1604_v47  ;;  %v1322_v16 = vpop.permute.xlu0 %1321 }
 0x1ee   : > { %v8163_v34 = vsel %vm1612_vm6, %v1580_v37, %v1620_v24  ;;  %v935_v31 = vpop.permute.xlu1 %934  ;;  %v1345_v17 = vrot.slane %v1322_v16, 4 }
 0x1ef   : > { %v957_v48 = vrot.slane %v935_v31, 4  ;;  %1008 = vst.msk [vmem:[#allocation3 + $0x38] sm:$0xf] %vm11741_vm4, %v935_v31  ;;  %1700 = vrot.lane.b32.xlu0 %v8165_v50, %s7465_s25 }
 0x1f0   : > { %1859 = vrot.lane.b32.xlu1 %v8168_v61, %s7463_s17 }
 0x1f1   : > { %v974_v54 = vsel %vm311_vm0, %v956_v52, %v957_v48  ;;  %v1846_v57 = vpop.permute.xlu0 %1845  ;;  %v8225_v52 = vld [vmem:[#allocation2 + $0x8] sm:$0xff] }
 0x1f2   : > { %v8176_v0 = vsel %vm966_vm7, %v933_v21, %v974_v54  ;;  %v1453_v38 = vpop.permute.xlu1 %1452  ;;  %v1869_v27 = vrot.slane %v1846_v57, 4 }
 0x1f3   : > { %v1475_v59 = vrot.slane %v1453_v38, 4  ;;  %1524 = vst.msk [vmem:[#allocation3 + $0x1b8] sm:$0xf] %vm11741_vm4, %v1453_v38  ;;  %1204 = vrot.lane.b32.xlu0 %v8178_v58, %s7464_s23 }
 0x1f4   : > { %1182 = vrot.lane.b32.xlu1 %v1147_v5, %s7464_s23 }
 0x1f5   : > { %v1491_v12 = vsel %vm311_vm0, %v1474_v63, %v1475_v59  ;;  %v1193_v32 = vpop.permute.xlu0 %1192  ;;  %v1942_v63 = vld [vmem:[#allocation2 + $0x40] sm:$0xff] }
 0x1f6   : > { %v8186_v39 = vsel %vm1483_vm8, %v1451_v3, %v1491_v12  ;;  %v1324_v11 = vpop.permute.xlu1 %1323  ;;  %v1216_v28 = vrot.slane %v1193_v32, 4 }
 0x1f7   : > { %v1346_v19 = vrot.slane %v1324_v11, 4  ;;  %1395 = vst.msk [vmem:[#allocation3 + $0x158] sm:$0xf] %vm11741_vm4, %v1324_v11  ;;  %1720 = vrot.lane.b32.xlu0 %v8178_v58, %s7465_s25 }
 0x1f8   : > { %1702 = vrot.lane.b32.xlu1 %v7921_v51, %s7465_s25 }
 0x1f9   : > { %v1362_v10 = vsel %vm311_vm0, %v1345_v17, %v1346_v19  ;;  %v1068_v18 = vpop.permute.xlu0 %1067 }
 0x1fa   : > { %v8195_v22 = vsel %vm1354_vm9, %v1322_v16, %v1362_v10  ;;  %v1848_v37 = vpop.permute.xlu1 %1847  ;;  %v1089_v43 = vrot.slane %v1068_v18, 4  ;;  %v1946_v16 = vld [vmem:[#allocation2 + $0x60] sm:$0xff] }
 0x1fb   : > { %v1870_v29 = vrot.slane %v1848_v37, 4  ;;  %1704 = vrot.lane.b32.xlu0 %v8086_v35, %s7465_s25 }
 0x1fc   : > { %1206 = vrot.lane.b32.xlu1 %v1159_v26, %s7464_s23 }
 0x1fd   : > { %v1892_v33 = vsel %vm11747_vm10, %v1848_v37, %v1870_v29  ;;  %v1890_v20 = vsel %vm311_vm0, %v1869_v27, %v1870_v29  ;;  %v1584_v51 = vpop.permute.xlu0 %1583  ;;  %v7051_v27 = vld [vmem:[%s11730_s3 + $0x4] ss:$20 sps:$4 sm:$0xff]  }
 0x1fe   : > { %1927 = vst.msk [vmem:[#allocation3 + $0x2d8] sm:$0xf] %vm11741_vm4, %v1892_v33  ;;  %v8204_v49 = vsel %vm11747_vm10, %v1846_v57, %v1890_v20  ;;  %v1195_v21 = vpop.permute.xlu1 %1194  ;;  %v1605_v48 = vrot.slane %v1584_v51, 4  ;;  %3192 = vmatprep.mubr.bf16.mxu0 %v7051_v27 }
 0x1ff   : > { %v1217_v36 = vrot.slane %v1195_v21, 4  ;;  %1266 = vst.msk [vmem:[#allocation3 + $0xf8] sm:$0xf] %vm11741_vm4, %v1195_v21  ;;  %1692 = vrot.lane.b32.xlu0 %v8131_v2, %s7465_s25 }
 0x200   : > { %1722 = vrot.lane.b32.xlu1 %v8168_v61, %s7465_s25 }
 0x201   : > { %v1233_v30 = vsel %vm311_vm0, %v1216_v28, %v1217_v36  ;;  %v937_v45 = vpop.permute.xlu0 %936 }
 0x202   : > { %v8213_v41 = vsel %vm1225_vm11, %v1193_v32, %v1233_v30  ;;  %v1070_v40 = vpop.permute.xlu1 %1069  ;;  %v958_v12 = vrot.slane %v937_v45, 4  ;;  %v7055_v30 = vld [vmem:[%s11730_s3 + $0xc] ss:$20 sps:$4 sm:$0xff]  }
 0x203   : > { %v1090_v3 = vrot.slane %v1070_v40, 4  ;;  %1139 = vst.msk [vmem:[#allocation3 + $0xa4] sm:$0xf] %vm11741_vm4, %v1070_v40  ;;  %1696 = vrot.lane.b32.xlu0 %v8155_v46, %s7465_s25  ;;  %3305 = vmatprep.mubr.bf16.mxu1 %v7055_v30 }
 0x204   : > { %1706 = vrot.lane.b32.xlu1 %v7945_v62, %s7465_s25 }
 0x205   : > { %v1106_v47 = vsel %vm311_vm0, %v1089_v43, %v1090_v3  ;;  %v1455_v7 = vpop.permute.xlu0 %1454 }
 0x206   : > { %v8222_v25 = vsel %vm1096_vm5, %v1068_v18, %v1106_v47  ;;  %v1586_v24 = vpop.permute.xlu1 %1585  ;;  %v1476_v37 = vrot.slane %v1455_v7, 4 }
 0x207   : > { %v1606_v31 = vrot.slane %v1586_v24, 4  ;;  %1655 = vst.msk [vmem:[#allocation3 + $0x224] sm:$0xf] %vm11741_vm4, %v1586_v24  ;;  %1990 = vrot.lane.b32.xlu0 %v1946_v16, %s7466_s26  ;;  %v6639_v62 = vcombine.low %v8153_v42, %v8222_v25 }
 0x208   : > { %1694 = vrot.lane.b32.xlu1 %v8225_v52, %s7465_s25 }
 0x209   : > { %v1622_v54 = vsel %vm311_vm0, %v1605_v48, %v1606_v31  ;;  %v1326_v57 = vpop.permute.xlu0 %1325 }
 0x20a   : > { %v8234_v38 = vsel %vm1612_vm6, %v1584_v51, %v1622_v54  ;;  %v939_v59 = vpop.permute.xlu1 %938  ;;  %v1944_v51 = vld [vmem:[#allocation2 + $0x50] sm:$0xff]  ;;  %v1347_v36 = vrot.slane %v1326_v57, 4 }
 0x20b   : > { %v959_v5 = vrot.slane %v939_v59, 4  ;;  %1010 = vst.msk [vmem:[#allocation3 + $0x44] sm:$0xf] %vm11741_vm4, %v939_v59  ;;  %1982 = vrot.lane.b32.xlu0 %v1942_v63, %s7466_s26  ;;  %v6687_v32 = vcombine.low %v8163_v34, %v8234_v38 }
 0x20c   : > { %1698 = vrot.lane.b32.xlu1 %v7900_v44, %s7465_s25 }
 0x20d   : > { %v976_v11 = vsel %vm311_vm0, %v958_v12, %v959_v5  ;;  %v1850_v19 = vpop.permute.xlu0 %1849 }
 0x20e   : > { %v8244_v17 = vsel %vm966_vm7, %v937_v45, %v976_v11  ;;  %v1457_v10 = vpop.permute.xlu1 %1456 }
 0x20f   : > { %v1477_v18 = vrot.slane %v1457_v10, 4  ;;  %1526 = vst.msk [vmem:[#allocation3 + $0x1c4] sm:$0xf] %vm11741_vm4, %v1457_v10  ;;  %1994 = vrot.lane.b32.xlu0 %v8178_v58, %s7466_s26  ;;  %v6627_v29 = vcombine.low %v8176_v0, %v8244_v17  ;;  %v6628_v44 = vcombine.high %v8176_v0, %v8244_v17  ;;  %v7033_v17 = vld [vmem:[#allocation3 + $0x4] ss:$12 sps:$4 sm:$0xff]  }
 0x210   : > { %1992 = vrot.lane.b32.xlu1 %v8064_v4, %s7466_s26 }
 0x211   : > { %v1493_v26 = vsel %vm311_vm0, %v1476_v37, %v1477_v18  ;;  %v1197_v33 = vpop.permute.xlu0 %1196  ;;  %v1939_v18 = vld [vmem:[#allocation2 + $0x28] sm:$0xff] }
 0x212   : > { %v8260_v20 = vsel %vm1483_vm8, %v1455_v7, %v1493_v26  ;;  %v1328_v58 = vpop.permute.xlu1 %1327  ;;  %v1871_v7 = vrot.slane %v1850_v19, 4  ;;  %v1218_v59 = vrot.slane %v1197_v33, 4 }
 0x213   : > { %v1348_v21 = vrot.slane %v1328_v58, 4  ;;  %1397 = vst.msk [vmem:[#allocation3 + $0x164] sm:$0xf] %vm11741_vm4, %v1328_v58  ;;  %1986 = vrot.lane.b32.xlu0 %v1944_v51, %s7466_s26  ;;  %v6675_v28 = vcombine.low %v8186_v39, %v8260_v20  ;;  %v6676_v4 = vcombine.high %v8186_v39, %v8260_v20 }
 0x214   : > { %1984 = vrot.lane.b32.xlu1 %v7970_v15, %s7466_s26 }
 0x215   : > { %v1364_v45 = vsel %vm311_vm0, %v1347_v36, %v1348_v21  ;;  %v1072_v40 = vpop.permute.xlu0 %1071  ;;  %v2263_v36 = vld [vmem:[%s11731_s4] sm:$0xff] }
 0x216   : > { %v8275_v3 = vsel %vm1354_vm9, %v1326_v57, %v1364_v45  ;;  %v1852_v43 = vpop.permute.xlu1 %1851 }
 0x217   : > { %v1872_v47 = vrot.slane %v1852_v43, 4  ;;  %1974 = vrot.lane.b32.xlu0 %v8165_v50, %s7466_s26  ;;  %v6663_v24 = vcombine.low %v8195_v22, %v8275_v3  ;;  %v6664_v16 = vcombine.high %v8195_v22, %v8275_v3 }
 0x218   : > { %1996 = vrot.lane.b32.xlu1 %v8168_v61, %s7466_s26 }
 0x219   : > { %v1895_v15 = vsel %vm11747_vm10, %v1852_v43, %v1872_v47  ;;  %v1893_v31 = vsel %vm311_vm0, %v1871_v7, %v1872_v47  ;;  %v1588_v48 = vpop.permute.xlu0 %1587 }
 0x21a   : > { %1929 = vst.msk [vmem:[#allocation3 + $0x2e4] sm:$0xf] %vm11741_vm4, %v1895_v15  ;;  %v8289_v54 = vsel %vm11747_vm10, %v1850_v19, %v1893_v31  ;;  %v1199_v50 = vpop.permute.xlu1 %1198  ;;  %v1607_v21 = vrot.slane %v1588_v48, 4 }
 0x21b   : > { %v1219_v57 = vrot.slane %v1199_v50, 4  ;;  %1268 = vst.msk [vmem:[#allocation3 + $0x104] sm:$0xf] %vm11741_vm4, %v1199_v50  ;;  %1978 = vrot.lane.b32.xlu0 %v8086_v35, %s7466_s26  ;;  %v6711_v61 = vcombine.low %v8204_v49, %v8289_v54  ;;  %v6712_v63 = vcombine.high %v8204_v49, %v8289_v54  ;;  %v1091_v35 = vrot.slane %v1072_v40, 4 }
 0x21c   : > { %1988 = vrot.lane.b32.xlu1 %v8016_v13, %s7466_s26 }
 0x21d   : > { %v1235_v5 = vsel %vm311_vm0, %v1218_v59, %v1219_v57  ;;  %v941_v12 = vpop.permute.xlu0 %940 }
 0x21e   : > { %v8302_v11 = vsel %vm1225_vm11, %v1197_v33, %v1235_v5  ;;  %v1074_v19 = vpop.permute.xlu1 %1073  ;;  %v960_v7 = vrot.slane %v941_v12, 4  ;;  %v1937_v5 = vld [vmem:[#allocation2 + $0x18] sm:$0xff] }
 0x21f   : > { %v1092_v10 = vrot.slane %v1074_v19, 4  ;;  %1141 = vst.msk [vmem:[#allocation3 + $0xb0] sm:$0xf] %vm11741_vm4, %v1074_v19  ;;  %1966 = vrot.lane.b32.xlu0 %v8131_v2, %s7466_s26  ;;  %v6651_v37 = vcombine.low %v8213_v41, %v8302_v11  ;;  %v6652_v13 = vcombine.high %v8213_v41, %v8302_v11  ;;  %v1941_v2 = vld [vmem:[#allocation2 + $0x38] sm:$0xff] }
 0x220   : > { %1976 = vrot.lane.b32.xlu1 %v1939_v18, %s7466_s26 }
 0x221   : > { %v1108_v27 = vsel %vm311_vm0, %v1091_v35, %v1092_v10  ;;  %v1459_v26 = vpop.permute.xlu0 %1458 }
 0x222   : > { %v8314_v33 = vsel %vm1096_vm5, %v1072_v40, %v1108_v27  ;;  %v1590_v58 = vpop.permute.xlu1 %1589  ;;  %v1478_v59 = vrot.slane %v1459_v26, 4 }
 0x223   : > { %v1608_v51 = vrot.slane %v1590_v58, 4  ;;  %1657 = vst.msk [vmem:[#allocation3 + $0x230] sm:$0xf] %vm11741_vm4, %v1590_v58  ;;  %1970 = vrot.lane.b32.xlu0 %v8155_v46, %s7466_s26  ;;  %v2265_v46 = vld [vmem:[%s11731_s4 + $0x10] sm:$0xff] }
 0x224   : > { %1980 = vrot.lane.b32.xlu1 %v1941_v2, %s7466_s26  ;;  %v2266_v2 = vld [vmem:[%s11731_s4 + $0x18] sm:$0xff] }
 0x225   : > { %v1624_v30 = vsel %vm311_vm0, %v1607_v21, %v1608_v51  ;;  %v1330_v45 = vpop.permute.xlu0 %1329  ;;  %v2269_v51 = vld [vmem:[%s11731_s4 + $0x30] sm:$0xff] }
 0x226   : > { %v8325_v40 = vsel %vm1612_vm6, %v1588_v48, %v1624_v30  ;;  %v943_v43 = vpop.permute.xlu1 %942  ;;  %v1349_v58 = vrot.slane %v1330_v45, 4 }
 0x227   : > { %v961_v47 = vrot.slane %v943_v43, 4  ;;  %1012 = vst.msk [vmem:[#allocation3 + $0x50] sm:$0xf] %vm11741_vm4, %v943_v43  ;;  %2281 = vperm.xlu0 %7021, %v2263_v36  }
 0x228   : > { %1968 = vrot.lane.b32.xlu1 %v8225_v52, %s7466_s26  ;;  %v2267_v52 = vld [vmem:[%s11731_s4 + $0x20] sm:$0xff] }
 0x229   : > { %v978_v15 = vsel %vm311_vm0, %v960_v7, %v961_v47  ;;  %v1854_v31 = vpop.permute.xlu0 %1853  ;;  %v2271_v7 = vld [vmem:[%s11731_s4 + $0x40] sm:$0xff] }
 0x22a   : > { %v8335_v50 = vsel %vm966_vm7, %v941_v12, %v978_v15  ;;  %v1461_v48 = vpop.permute.xlu1 %1460  ;;  %v2264_v12 = vld [vmem:[%s11731_s4 + $0x8] sm:$0xff]  ;;  %v1873_v47 = vrot.slane %v1854_v31, 4 }
 0x22b   : > { %v1479_v57 = vrot.slane %v1461_v48, 4  ;;  %1528 = vst.msk [vmem:[#allocation3 + $0x1d0] sm:$0xf] %vm11741_vm4, %v1461_v48  ;;  %2291 = vperm.xlu0 %7021, %v2265_v46   ;;  %v2268_v48 = vld [vmem:[%s11731_s4 + $0x28] sm:$0xff] }
 0x22c   : > { %1972 = vrot.lane.b32.xlu1 %v1937_v5, %s7466_s26 }
 0x22d   : > { %v1495_v19 = vsel %vm311_vm0, %v1478_v59, %v1479_v57  ;;  %v1201_v10 = vpop.permute.xlu0 %1200 }
 0x22e   : > { %v8347_v35 = vsel %vm1483_vm8, %v1459_v26, %v1495_v19  ;;  %v1332_v18 = vpop.permute.xlu1 %1331  ;;  %v2273_v19 = vld [vmem:[%s11731_s4 + $0x50] sm:$0xff] }
 0x22f   : > { %v1350_v27 = vrot.slane %v1332_v18, 4  ;;  %1399 = vst.msk [vmem:[#allocation3 + $0x170] sm:$0xf] %vm11741_vm4, %v1332_v18  ;;  %2301 = vperm.xlu0 %7021, %v2267_v52   ;;  %v1220_v52 = vrot.slane %v1201_v10, 4  ;;  %v2270_v18 = vld [vmem:[%s11731_s4 + $0x38] sm:$0xff] }
 0x230   : > { %2286 = vperm.xlu1 %7022, %v2264_v12  }
 0x231   : > { %v1366_v21 = vsel %vm311_vm0, %v1349_v58, %v1350_v27  ;;  %v1717_v36 = vpop.permute.xlu0 %1716 }
 0x232   : > { %v8358_v26 = vsel %vm1354_vm9, %v1330_v45, %v1366_v21  ;;  %v1856_v30 = vpop.permute.xlu1 %1855  ;;  %v1736_v21 = vrot.slane %v1717_v36, 4 }
 0x233   : > { %v1874_v43 = vrot.slane %v1856_v30, 4  ;;  %2311 = vperm.xlu0 %7021, %v2269_v51  }
 0x234   : > { %2296 = vperm.xlu1 %7022, %v2266_v2   ;;  %v2275_v2 = vld [vmem:[%s11731_s4 + $0x60] sm:$0xff] }
 0x235   : > { %v1898_v46 = vsel %vm11747_vm10, %v1856_v30, %v1874_v43  ;;  %v1896_v15 = vsel %vm311_vm0, %v1873_v47, %v1874_v43  ;;  %v1076_v57 = vpop.permute.xlu0 %1075  ;;  %v2272_v47 = vld [vmem:[%s11731_s4 + $0x48] sm:$0xff] }
 0x236   : > { %1931 = vst.msk [vmem:[#allocation3 + $0x2f0] sm:$0xf] %vm11741_vm4, %v1898_v46  ;;  %v8370_v45 = vsel %vm11747_vm10, %v1854_v31, %v1896_v15  ;;  %v1203_v59 = vpop.permute.xlu1 %1202 }
 0x237   : > { %v1221_v5 = vrot.slane %v1203_v59, 4  ;;  %1270 = vst.msk [vmem:[#allocation3 + $0x110] sm:$0xf] %vm11741_vm4, %v1203_v59  ;;  %2321 = vperm.xlu0 %7021, %v2271_v7   ;;  %v2277_v59 = vld [vmem:[%s11731_s4 + $0x70] sm:$0xff] }
 0x238   : > { %2306 = vperm.xlu1 %7022, %v2268_v48   ;;  %v1093_v48 = vrot.slane %v1076_v57, 4 }
 0x239   : > { %v1237_v12 = vsel %vm311_vm0, %v1220_v52, %v1221_v5  ;;  %v1592_v27 = vpop.permute.xlu0 %1591  ;;  %v2274_v52 = vld [vmem:[%s11731_s4 + $0x58] sm:$0xff] }
 0x23a   : > { %v8381_v31 = vsel %vm1225_vm11, %v1201_v10, %v1237_v12  ;;  %v1719_v58 = vpop.permute.xlu1 %1718 }
 0x23b   : > { %v1737_v51 = vrot.slane %v1719_v58, 4  ;;  %2331 = vperm.xlu0 %7021, %v2273_v19  }
 0x23c   : > { %2316 = vperm.xlu1 %7022, %v2270_v18  }
 0x23d   : > { %v1761_v30 = vsel %vm1741_vm12, %v1719_v58, %v1737_v51  ;;  %v1759_v43 = vsel %vm311_vm0, %v1736_v21, %v1737_v51  ;;  %v1189_v10 = vpop.permute.xlu0 %1188  ;;  %v1609_v58 = vrot.slane %v1592_v27, 4 }
 0x23e   : > { %1794 = vst.msk [vmem:[#allocation3 + $0x290] sm:$0xf] %vm11741_vm4, %v1761_v30  ;;  %v8393_v7 = vsel %vm1741_vm12, %v1717_v36, %v1759_v43  ;;  %v1078_v46 = vpop.permute.xlu1 %1077  ;;  %v2276_v30 = vld [vmem:[%s11731_s4 + $0x68] sm:$0xff] }
 0x23f   : > { %v1094_v15 = vrot.slane %v1078_v46, 4  ;;  %1143 = vst.msk [vmem:[#allocation3 + $0xbc] sm:$0xf] %vm11741_vm4, %v1078_v46  ;;  %2341 = vperm.xlu0 %7021, %v2275_v2  }
 0x240   : > { %2326 = vperm.xlu1 %7022, %v2272_v47  }
 0x241   : > { %v1110_v5 = vsel %vm311_vm0, %v1093_v48, %v1094_v15  ;;  %v1709_v19 = vpop.permute.xlu0 %1708 }
 0x242   : > { %v1111_v36 = vsel %vm1096_vm5, %v1076_v57, %v1110_v5  ;;  %v1594_v12 = vpop.permute.xlu1 %1593  ;;  %v6640_v57 = vcombine.high %v8153_v42, %v8222_v25 }
 0x243   : > { %v1610_v18 = vrot.slane %v1594_v12, 4  ;;  %1659 = vst.msk [vmem:[#allocation3 + $0x23c] sm:$0xf] %vm11741_vm4, %v1594_v12  ;;  %2351 = vperm.xlu0 %7021, %v2277_v59   ;;  %v6642_v51 = vcombine.low %v8314_v33, %v1111_v36  ;;  %v6643_v21 = vcombine.high %v8314_v33, %v1111_v36  ;;  %v1214_v33 = vrot.slane %v1189_v10, 4  ;;  %v8424_v12 = vld [vmem:[%s7579_s13] sm:$0xff] }
 0x244   : > { %2336 = vperm.xlu1 %7022, %v2274_v52   ;;  %v2278_v52 = vld [vmem:[%s11731_s4 + $0x78] sm:$0xff]  ;;  %v6688_v36 = vcombine.high %v8163_v34, %v8234_v38 }
 0x245   : > { %v1626_v2 = vsel %vm311_vm0, %v1609_v58, %v1610_v18  ;;  %3160 = vmatprep.subr.bf16.mxu0 %v6643_v21  ;;  %v945_v43 = vpop.permute.xlu0 %944  ;;  %v8429_v18 = vld [vmem:[%s7579_s13 + $0x8] sm:$0xf]  ;;  %v1732_v21 = vrot.slane %v1709_v19, 4 }
 0x246   : > { %v1627_v47 = vsel %vm1612_vm6, %v1592_v27, %v1626_v2  ;;  %v1191_v46 = vpop.permute.xlu1 %1190  ;;  %3161 = vmatpush1.bf16.msra.mxu0 %v6642_v51  ;;  %v2203_v2 = vld [vmem:[#allocation3 + $0x1f8] sm:$0xff] }
 0x247   : > { %v1215_v15 = vrot.slane %v1191_v46, 4  ;;  %1264 = vst.msk [vmem:[#allocation3 + $0xec] sm:$0xf] %vm11741_vm4, %v1191_v46  ;;  %3162 = vmatprep.subr.bf16.mxu0 %v6640_v57  ;;  %v6690_v48 = vcombine.low %v8325_v40, %v1627_v47  ;;  %v6691_v59 = vcombine.high %v8325_v40, %v1627_v47  ;;  %3930 = vrot.lane.b32.xlu0 %v8424_v12, %s7467_s30  ;;  %v7027_v47 = vld [vmem:[#allocation3 + $0x64] ss:$12 sps:$4 sm:$0xff]  }
 0x248   : > { %2346 = vperm.xlu1 %7022, %v2276_v30   ;;  %v6685_v46 = vcombine.high %v2203_v2, %v8112_v55 }
 0x249   : > { %v1231_v5 = vsel %vm311_vm0, %v1214_v33, %v1215_v15  ;;  %3273 = vmatprep.subr.bf16.mxu1 %v6691_v59  ;;  %v1463_v27 = vpop.permute.xlu0 %1462  ;;  %v7025_v15 = vld [vmem:[#allocation3 + $0x60] ss:$12 sps:$4 sm:$0xff]   ;;  %v6684_v33 = vcombine.low %v2203_v2, %v8112_v55  ;;  %v2123_v2 = vld [vmem:[#allocation3 + $0x18] sm:$0xff] }
 0x24a   : > { %v8432_v40 = vsel %vm1225_vm11, %v1189_v10, %v1231_v5  ;;  %v1711_v58 = vpop.permute.xlu1 %1710  ;;  %3163 = vmatpush1.bf16.msra.mxu0 %v6639_v62  ;;  %3274 = vmatpush1.bf16.msra.mxu1 %v6690_v48  ;;  %v962_v62 = vrot.slane %v945_v43, 4  ;;  %v7028_v59 = vld [vmem:[#allocation3 + $0x1e0] ss:$12 sps:$4 sm:$0xff]  }
 0x24b   : > { %v1733_v51 = vrot.slane %v1711_v58, 4  ;;  %3164 = vmatprep.subr.bf16.mxu0 %v6637_v53  ;;  %3275 = vmatprep.subr.bf16.mxu1 %v6688_v36 }
 0x24c   : > { %2356 = vperm.xlu1 %7022, %v2278_v52   ;;  %3934 = vrot.lane.b32.xlu0 %v8429_v18, %s7467_s30 }
 0x24d   : > { %v1755_v30 = vsel %vm1741_vm12, %v1711_v58, %v1733_v51  ;;  %v1753_v10 = vsel %vm311_vm0, %v1732_v21, %v1733_v51  ;;  %v1713_v57 = vpop.permute.xlu0 %1712 }
 0x24e   : > { %1790 = vst.msk [vmem:[#allocation3 + $0x278] sm:$0xf] %vm11741_vm4, %v1755_v30  ;;  %v8447_v42 = vsel %vm1741_vm12, %v1709_v19, %v1753_v10  ;;  %v947_v53 = vpop.permute.xlu1 %946  ;;  %3165 = vmatpush1.bf16.msra.mxu0 %v6636_v14  ;;  %3276 = vmatpush1.bf16.msra.mxu1 %v6687_v32  ;;  %v1480_v32 = vrot.slane %v1463_v27, 4  ;;  %v1734_v51 = vrot.slane %v1713_v57, 4 }
 0x24f   : > { %v963_v25 = vrot.slane %v947_v53, 4  ;;  %1014 = vst.msk [vmem:[#allocation3 + $0x5c] sm:$0xf] %vm11741_vm4, %v947_v53  ;;  %3166 = vmatprep.subr.bf16.mxu0 %v7027_v47  ;;  %3277 = vmatprep.subr.bf16.mxu1 %v6685_v46  ;;  %v6625_v47 = vcombine.high %v2123_v2, %v8121_v60 }
 0x250   : > { %3932 = vrot.lane.b32.xlu1 %v7589_v8, %s7467_s30  ;;  %3959 = vrot.lane.b32.xlu0 %v7589_v8, %s7468_s6  ;;  %s7473_s30 = smov 86  }
 0x251   : > { %v980_v19 = vsel %vm311_vm0, %v962_v62, %v963_v25  ;;  %v1177_v56 = vpop.permute.xlu0 %1176  ;;  %v6624_v25 = vcombine.low %v2123_v2, %v8121_v60  ;;  %v2187_v62 = vld [vmem:[#allocation3 + $0x198] sm:$0xff] }
 0x252   : > { %v981_v14 = vsel %vm966_vm7, %v945_v43, %v980_v19  ;;  %v1465_v34 = vpop.permute.xlu1 %1464  ;;  %3167 = vmatpush1.bf16.msra.mxu0 %v7025_v15  ;;  %3278 = vmatpush1.bf16.msra.mxu1 %v6684_v33  ;;  %v1208_v53 = vrot.slane %v1177_v56, 4  ;;  %v7031_v19 = vld [vmem:[#allocation3] ss:$12 sps:$4 sm:$0xff]   ;;  %v7039_v2 = vld [vmem:[#allocation3 + $0x13c] ss:$12 sps:$4 sm:$0xff]  }
 0x253   : > { %v1481_v38 = vrot.slane %v1465_v34, 4  ;;  %1530 = vst.msk [vmem:[#allocation3 + $0x1dc] sm:$0xf] %vm11741_vm4, %v1465_v34  ;;  %3279 = vmatprep.subr.bf16.mxu1 %v7030_v23  ;;  %v6630_v55 = vcombine.low %v8335_v50, %v981_v14  ;;  %v6631_v48 = vcombine.high %v8335_v50, %v981_v14  ;;  %v6672_v23 = vcombine.low %v2187_v62, %v8129_v6  ;;  %v7036_v34 = vld [vmem:[#allocation3 + $0x184] ss:$12 sps:$4 sm:$0xff]  }
 0x254   : > { %3957 = vrot.lane.b32.xlu1 %v8424_v12, %s7468_s6  ;;  %3987 = vrot.lane.b32.xlu0 %v8424_v12, %s7469_s7 }
 0x255   : > { %v1497_v5 = vsel %vm311_vm0, %v1480_v32, %v1481_v38  ;;  %3168 = vmatprep.subr.bf16.mxu0 %v6631_v48  ;;  %v1334_v52 = vpop.permute.xlu0 %1333 }
 0x256   : > { %v1498_v43 = vsel %vm1483_vm8, %v1463_v27, %v1497_v5  ;;  %v1715_v36 = vpop.permute.xlu1 %1714  ;;  %3169 = vmatpush1.bf16.msra.mxu0 %v6630_v55  ;;  %3280 = vmatpush1.bf16.msra.mxu1 %v7028_v59  ;;  %v7034_v55 = vld [vmem:[#allocation3 + $0x180] ss:$12 sps:$4 sm:$0xff]  }
 0x257   : > { %v1735_v58 = vrot.slane %v1715_v36, 4  ;;  %3170 = vmatprep.subr.bf16.mxu0 %v6628_v44  ;;  %v6678_v50 = vcombine.low %v8347_v35, %v1498_v43  ;;  %v6679_v21 = vcombine.high %v8347_v35, %v1498_v43 }
 0x258   : > { %3961 = vrot.lane.b32.xlu1 %v8429_v18, %s7468_s6  ;;  %3991 = vrot.lane.b32.xlu0 %v8429_v18, %s7469_s7 }
 0x259   : > { %v1758_v30 = vsel %vm1741_vm12, %v1715_v36, %v1735_v58  ;;  %v1756_v27 = vsel %vm311_vm0, %v1734_v51, %v1735_v58  ;;  %3281 = vmatprep.subr.bf16.mxu1 %v6679_v21  ;;  %v1858_v10 = vpop.permute.xlu0 %1857 }
 0x25a   : > { %1792 = vst.msk [vmem:[#allocation3 + $0x284] sm:$0xf] %vm11741_vm4, %v1758_v30  ;;  %v8483_v44 = vsel %vm1741_vm12, %v1713_v57, %v1756_v27  ;;  %v1179_v35 = vpop.permute.xlu1 %1178  ;;  %3171 = vmatpush1.bf16.msra.mxu0 %v6627_v29  ;;  %3282 = vmatpush1.bf16.msra.mxu1 %v6678_v50  ;;  %v6673_v29 = vcombine.high %v2187_v62, %v8129_v6  ;;  %v1875_v38 = vrot.slane %v1858_v10, 4  ;;  %v7040_v62 = vld [vmem:[#allocation3 + $0x120] ss:$12 sps:$4 sm:$0xff]  }
 0x25b   : > { %v1209_v46 = vrot.slane %v1179_v35, 4  ;;  %1258 = vst.msk [vmem:[#allocation3 + $0xc8] sm:$0xf] %vm11741_vm4, %v1179_v35  ;;  %3172 = vmatprep.subr.bf16.mxu0 %v6625_v47  ;;  %3283 = vmatprep.subr.bf16.mxu1 %v6676_v4  ;;  %v1351_v4 = vrot.slane %v1334_v52, 4 }
 0x25c   : > { %3989 = vrot.lane.b32.xlu1 %v7589_v8, %s7469_s7  ;;  %4019 = vrot.lane.b32.xlu0 %v7589_v8, %s7470_s8  ;;  %s7475_s7 = smov 66  }
 0x25d   : > { %v1224_v57 = vsel %vm311_vm0, %v1208_v53, %v1209_v46  ;;  %v1181_v0 = vpop.permute.xlu0 %1180  ;;  %v7042_v53 = vld [vmem:[#allocation3 + $0x124] ss:$12 sps:$4 sm:$0xff]  }
 0x25e   : > { %v8499_v15 = vsel %vm1225_vm11, %v1177_v56, %v1224_v57  ;;  %v1336_v33 = vpop.permute.xlu1 %1335  ;;  %3173 = vmatpush1.bf16.msra.mxu0 %v6624_v25  ;;  %3284 = vmatpush1.bf16.msra.mxu1 %v6675_v28  ;;  %v7045_v25 = vld [vmem:[#allocation3 + $0x2bc] ss:$12 sps:$4 sm:$0xff]   ;;  %v7043_v57 = vld [vmem:[#allocation3 + $0x2b8] ss:$12 sps:$4 sm:$0xff]  }
 0x25f   : > { %v1352_v60 = vrot.slane %v1336_v33, 4  ;;  %1401 = vst.msk [vmem:[#allocation3 + $0x17c] sm:$0xf] %vm11741_vm4, %v1336_v33  ;;  %3174 = vmatprep.subr.bf16.mxu0 %v7033_v17  ;;  %3285 = vmatprep.subr.bf16.mxu1 %v6673_v29  ;;  %v7048_v29 = vld [vmem:[#allocation3 + $0x2a4] ss:$12 sps:$4 sm:$0xff]  }
 0x260   : > { %4017 = vrot.lane.b32.xlu1 %v8424_v12, %s7470_s8  ;;  %4047 = vrot.lane.b32.xlu0 %v8424_v12, %s7471_s9 }
 0x261   : > { %v1368_v56 = vsel %vm311_vm0, %v1351_v4, %v1352_v60  ;;  %v1701_v14 = vpop.permute.xlu0 %1700 }
 0x262   : > { %v1369_v39 = vsel %vm1354_vm9, %v1334_v52, %v1368_v56  ;;  %v1860_v20 = vpop.permute.xlu1 %1859  ;;  %3175 = vmatpush1.bf16.msra.mxu0 %v7031_v19  ;;  %3286 = vmatpush1.bf16.msra.mxu1 %v6672_v23  ;;  %v7046_v19 = vld [vmem:[#allocation3 + $0x2a0] ss:$12 sps:$4 sm:$0xff]  }
 0x263   : > { %v1876_v28 = vrot.slane %v1860_v20, 4  ;;  %3287 = vmatprep.subr.bf16.mxu1 %v7036_v34  ;;  %v6666_v32 = vcombine.low %v8358_v26, %v1369_v39  ;;  %v6667_v6 = vcombine.high %v8358_v26, %v1369_v39  ;;  %v1210_v26 = vrot.slane %v1181_v0, 4 }
 0x264   : > { %4021 = vrot.lane.b32.xlu1 %v8429_v18, %s7470_s8  ;;  %4051 = vrot.lane.b32.xlu0 %v8429_v18, %s7471_s9 }
 0x265   : > { %v1901_v48 = vsel %vm11747_vm10, %v1860_v20, %v1876_v28  ;;  %v1899_v59 = vsel %vm311_vm0, %v1875_v38, %v1876_v28  ;;  %3176 = vmatprep.subr.bf16.mxu0 %v6667_v6  ;;  %v1205_v5 = vpop.permute.xlu0 %1204 }
 0x266   : > { %1933 = vst.msk [vmem:[#allocation3 + $0x2fc] sm:$0xf] %vm11741_vm4, %v1901_v48  ;;  %v1900_v52 = vsel %vm11747_vm10, %v1858_v10, %v1899_v59  ;;  %v1183_v43 = vpop.permute.xlu1 %1182  ;;  %3177 = vmatpush2.bf16.msra.mxu0 %v6666_v32  ;;  %3288 = vmatpush1.bf16.msra.mxu1 %v7034_v55  ;;  %v7037_v10 = vld [vmem:[#allocation3 + $0x138] ss:$12 sps:$4 sm:$0xff]   ;;  %vm4233_vm10 = vcmask 572416  }
 0x267   : > { %v1211_v36 = vrot.slane %v1183_v43, 4  ;;  %1260 = vst.msk [vmem:[#allocation3 + $0xd4] sm:$0xf] %vm11741_vm4, %v1183_v43  ;;  %3178 = vmatprep.subr.bf16.mxu0 %v6664_v16  ;;  %v6714_v58 = vcombine.low %v8370_v45, %v1900_v52  ;;  %v6715_v51 = vcombine.high %v8370_v45, %v1900_v52  ;;  %v1728_v45 = vrot.slane %v1701_v14, 4  ;;  %v2155_v32 = vld [vmem:[#allocation3 + $0xd8] sm:$0xff] }
 0x268   : > { %4049 = vrot.lane.b32.xlu1 %v7589_v8, %s7471_s9  ;;  %4079 = vrot.lane.b32.xlu0 %v7589_v8, %s7472_s10  ;;  %v6649_v6 = vcombine.high %v2155_v32, %v8432_v40 }
 0x269   : > { %v1227_v50 = vsel %vm311_vm0, %v1210_v26, %v1211_v36  ;;  %3289 = vmatprep.subr.bf16.mxu1 %v6715_v51  ;;  %v1721_v21 = vpop.permute.xlu0 %1720  ;;  %v6648_v36 = vcombine.low %v2155_v32, %v8432_v40  ;;  %v6699_v26 = vcombine.low %v8447_v42, %v8483_v44  ;;  %v8665_v32 = vld [vmem:[%s11730_s3 + $0x30] ss:$20 sps:$4 sm:$0xff]  }
 0x26a   : > { %v8528_v30 = vsel %vm1225_vm11, %v1181_v0, %v1227_v50  ;;  %v1703_v27 = vpop.permute.xlu1 %1702  ;;  %3179 = vmatpush2.bf16.msra.mxu0 %v6663_v24  ;;  %3290 = vmatpush2.bf16.msra.mxu1 %v6714_v58  ;;  %v1738_v33 = vrot.slane %v1721_v21, 4 }
 0x26b   : > { %v1729_v16 = vrot.slane %v1703_v27, 4  ;;  %3180 = vmatprep.subr.bf16.mxu0 %v7039_v2  ;;  %3291 = vmatprep.subr.bf16.mxu1 %v6712_v63  ;;  %v1222_v63 = vrot.slane %v1205_v5, 4  ;;  %v6646_v41 = vcombine.high %v8499_v15, %v8528_v30 }
 0x26c   : > { %4077 = vrot.lane.b32.xlu1 %v8424_v12, %s7472_s10  ;;  %4107 = vrot.lane.b32.xlu0 %v8424_v12, %s7460_s14 }
 0x26d   : > { %v1749_v47 = vsel %vm1741_vm12, %v1703_v27, %v1729_v16  ;;  %v1747_v35 = vsel %vm311_vm0, %v1728_v45, %v1729_v16  ;;  %v1705_v46 = vpop.permute.xlu0 %1704 }
 0x26e   : > { %1786 = vst.msk [vmem:[#allocation3 + $0x260] sm:$0xf] %vm11741_vm4, %v1749_v47  ;;  %v8543_v22 = vsel %vm1741_vm12, %v1701_v14, %v1747_v35  ;;  %v1207_v3 = vpop.permute.xlu1 %1206  ;;  %3181 = vmatpush2.bf16.msra.mxu0 %v7037_v10  ;;  %3292 = vmatpush2.bf16.msra.mxu1 %v6711_v61  ;;  %v1730_v20 = vrot.slane %v1705_v46, 4  ;;  %v8607_v10 = vld [vmem:[%s11730_s3] ss:$20 sps:$4 sm:$0xff]  }
 0x26f   : > { %v1223_v24 = vrot.slane %v1207_v3, 4  ;;  %1272 = vst.msk [vmem:[#allocation3 + $0x11c] sm:$0xf] %vm11741_vm4, %v1207_v3  ;;  %3182 = vmatprep.subr.bf16.mxu0 %v7042_v53  ;;  %3293 = vmatprep.subr.bf16.mxu1 %v7045_v25  ;;  %v8616_v47 = vld [vmem:[%s11730_s3 + $0x2c] ss:$20 sps:$4 sm:$0xff]  }
 0x270   : > { %4081 = vrot.lane.b32.xlu1 %v8429_v18, %s7472_s10  ;;  %4111 = vrot.lane.b32.xlu0 %v8429_v18, %s7460_s14  ;;  %s7481_s10 = smov 27  }
 0x271   : > { %v1239_v0 = vsel %vm311_vm0, %v1222_v63, %v1223_v24  ;;  %v1693_v17 = vpop.permute.xlu0 %1692  ;;  %v7052_v63 = vld [vmem:[#allocation3 + $0x170] ss:$12 sps:$4 sm:$0xff]  }
 0x272   : > { %v1240_v49 = vsel %vm1225_vm11, %v1205_v5, %v1239_v0  ;;  %v1723_v54 = vpop.permute.xlu1 %1722  ;;  %3183 = vmatpush2.bf16.msra.mxu0 %v7040_v62  ;;  %3294 = vmatpush2.bf16.msra.mxu1 %v7043_v57  ;;  %v6700_v5 = vcombine.high %v8447_v42, %v8483_v44  ;;  %v1724_v43 = vrot.slane %v1693_v17, 4  ;;  %v8626_v62 = vld [vmem:[%s11730_s3 + $0x8] ss:$20 sps:$4 sm:$0xff]  }
 0x273   : > { %v1739_v61 = vrot.slane %v1723_v54, 4  ;;  %3295 = vmatprep.subr.bf16.mxu1 %v7048_v29  ;;  %v6654_v60 = vcombine.low %v8381_v31, %v1240_v49  ;;  %v6655_v4 = vcombine.high %v8381_v31, %v1240_v49 }
 0x274   : > { %4109 = vrot.lane.b32.xlu1 %v7589_v8, %s7460_s14  ;;  %4139 = vrot.lane.b32.xlu0 %v7589_v8, %s7458_s11 }
 0x275   : > { %v1764_v23 = vsel %vm1741_vm12, %v1723_v54, %v1739_v61  ;;  %v1762_v56 = vsel %vm311_vm0, %v1738_v33, %v1739_v61  ;;  %3184 = vmatprep.subr.bf16.mxu0 %v6655_v4  ;;  %v1697_v14 = vpop.permute.xlu0 %1696  ;;  %v7056_v54 = vld [vmem:[#allocation3 + $0xb0] ss:$12 sps:$4 sm:$0xff]  }
 0x276   : > { %1796 = vst.msk [vmem:[#allocation3 + $0x29c] sm:$0xf] %vm11741_vm4, %v1764_v23  ;;  %v1763_v34 = vsel %vm1741_vm12, %v1721_v21, %v1762_v56  ;;  %v1707_v39 = vpop.permute.xlu1 %1706  ;;  %3185 = vmatpush2.bf16.msra.mxu0 %v6654_v60  ;;  %3296 = vmatpush2.bf16.msra.mxu1 %v7046_v19  ;;  %v1726_v44 = vrot.slane %v1697_v14, 4  ;;  %v6645_v21 = vcombine.low %v8499_v15, %v8528_v30  ;;  %v7057_v60 = vld [vmem:[#allocation3 + $0x158] ss:$12 sps:$4 sm:$0xff]  }
 0x277   : > { %v1731_v31 = vrot.slane %v1707_v39, 4  ;;  %3186 = vmatprep.subr.bf16.mxu0 %v6652_v13  ;;  %v6702_v28 = vcombine.low %v8393_v7, %v1763_v34  ;;  %v6703_v38 = vcombine.high %v8393_v7, %v1763_v34  ;;  %v8645_v4 = vld [vmem:[%s11730_s3 + $0x28] ss:$20 sps:$4 sm:$0xff]  }
 0x278   : > { %4137 = vrot.lane.b32.xlu1 %v8424_v12, %s7458_s11  ;;  %4167 = vrot.lane.b32.xlu0 %v8424_v12, %s7464_s23 }
 0x279   : > { %v1752_v55 = vsel %vm1741_vm12, %v1707_v39, %v1731_v31  ;;  %v1750_v48 = vsel %vm311_vm0, %v1730_v20, %v1731_v31  ;;  %3297 = vmatprep.subr.bf16.mxu1 %v6703_v38  ;;  %v1991_v59 = vpop.permute.xlu0 %1990  ;;  %v7061_v31 = vld [vmem:[#allocation3 + $0x98] ss:$12 sps:$4 sm:$0xff]   ;;  %v7062_v38 = vld [vmem:[#allocation3 + $0x140] ss:$12 sps:$4 sm:$0xff]  }
 0x27a   : > { %1788 = vst.msk [vmem:[#allocation3 + $0x26c] sm:$0xf] %vm11741_vm4, %v1752_v55  ;;  %v1751_v13 = vsel %vm1741_vm12, %v1705_v46, %v1750_v48  ;;  %v1695_v7 = vpop.permute.xlu1 %1694  ;;  %3187 = vmatpush2.bf16.msra.mxu0 %v6651_v37  ;;  %3298 = vmatpush2.bf16.msra.mxu1 %v6702_v28  ;;  %v2010_v46 = vrot.slane %v1991_v59, 4 }
 0x27b   : > { %v1725_v52 = vrot.slane %v1695_v7, 4  ;;  %3188 = vmatprep.subr.bf16.mxu0 %v6649_v6  ;;  %3299 = vmatprep.subr.bf16.mxu1 %v6700_v5  ;;  %v6697_v11 = vcombine.high %v8543_v22, %v1751_v13  ;;  %v6696_v2 = vcombine.low %v8543_v22, %v1751_v13 }
 0x27c   : > { %4141 = vrot.lane.b32.xlu1 %v8429_v18, %s7458_s11  ;;  %4171 = vrot.lane.b32.xlu0 %v8429_v18, %s7464_s23  ;;  %s7474_s11 = smov 70  }
 0x27d   : > { %v1743_v58 = vsel %vm1741_vm12, %v1695_v7, %v1725_v52  ;;  %v1740_v51 = vsel %vm311_vm0, %v1724_v43, %v1725_v52  ;;  %v1983_v50 = vpop.permute.xlu0 %1982  ;;  %v8673_v7 = vld [vmem:[%s11730_s3 + $0x5c] ss:$20 sps:$4 sm:$0xff]   ;;  %v7066_v43 = vld [vmem:[#allocation3 + $0x80] ss:$12 sps:$4 sm:$0xff]  }
 0x27e   : > { %1782 = vst.msk [vmem:[#allocation3 + $0x248] sm:$0xf] %vm11741_vm4, %v1743_v58  ;;  %v1742_v37 = vsel %vm1741_vm12, %v1693_v17, %v1740_v51  ;;  %v1699_v40 = vpop.permute.xlu1 %1698  ;;  %3189 = vmatpush2.bf16.msra.mxu0 %v6648_v36  ;;  %3300 = vmatpush2.bf16.msra.mxu1 %v6699_v26  ;;  %v8634_v17 = vld [vmem:[%s11730_s3 + $0x34] ss:$20 sps:$4 sm:$0xff]   ;;  %v2006_v49 = vrot.slane %v1983_v50, 4 }
 0x27f   : > { %v1727_v42 = vrot.slane %v1699_v40, 4  ;;  %3190 = vmatprep.subr.bf16.mxu0 %v6646_v41  ;;  %3301 = vmatprep.subr.bf16.mxu1 %v6697_v11  ;;  %v7067_v58 = vld [vmem:[#allocation3 + $0x128] ss:$12 sps:$4 sm:$0xff]   ;;  %v8685_v51 = vld [vmem:[%s11730_s3 + $0x50] ss:$20 sps:$4 sm:$0xff]  }
 0x280   : > { %4169 = vrot.lane.b32.xlu1 %v7589_v8, %s7464_s23  ;;  %4199 = vrot.lane.b32.xlu0 %v7589_v8, %s7473_s30  ;;  %s7476_s23 = smov 50  }
 0x281   : > { %v1746_v27 = vsel %vm1741_vm12, %v1699_v40, %v1727_v42  ;;  %v1744_v16 = vsel %vm311_vm0, %v1726_v44, %v1727_v42  ;;  %v1995_v45 = vpop.permute.xlu0 %1994  ;;  %v8695_v44 = vld [vmem:[%s11730_s3 + $0x7c] ss:$20 sps:$4 sm:$0xff]  }
 0x282   : > { %1784 = vst.msk [vmem:[#allocation3 + $0x254] sm:$0xf] %vm11741_vm4, %v1746_v27  ;;  %v1745_v15 = vsel %vm1741_vm12, %v1697_v14, %v1744_v16  ;;  %v1993_v30 = vpop.permute.xlu1 %1992  ;;  %3191 = vmatpush2.bf16.msra.mxu0 %v6645_v21  ;;  %3302 = vmatpush2.bf16.msra.mxu1 %v6696_v2  ;;  %v8655_v14 = vld [vmem:[%s11730_s3 + $0x54] ss:$20 sps:$4 sm:$0xff]   ;;  %v2012_v39 = vrot.slane %v1995_v45, 4 }
 0x283   : > { %v2011_v35 = vrot.slane %v1993_v30, 4  ;;  %v6693_v53 = vcombine.low %v1742_v37, %v1745_v15  ;;  %v6694_v25 = vcombine.high %v1742_v37, %v1745_v15  ;;  %v7071_v21 = vld [vmem:[#allocation3 + $0x68] ss:$12 sps:$4 sm:$0xff]   ;;  %v7072_v16 = vld [vmem:[#allocation3 + $0x110] ss:$12 sps:$4 sm:$0xff]  }
 0x284   : > { %4197 = vrot.lane.b32.xlu1 %v8424_v12, %s7473_s30  ;;  %4227 = vrot.lane.b32.xlu0 %v8424_v12, %s7474_s11 }
 0x285   : > { %v2035_v22 = vsel %vm11746_vm13, %v1993_v30, %v2011_v35  ;;  %v2033_v3 = vsel %vm311_vm0, %v2010_v46, %v2011_v35  ;;  %3193 = vmatmul.mubr.bf16.vlgmr.msra.gmra.mxu0 %v8607_v10  ;;  %3303 = vmatprep.subr.bf16.mxu1 %v6694_v25  ;;  %v1987_v24 = vpop.permute.xlu0 %1986  ;;  %v8714_v46 = vld [vmem:[%s11730_s3 + $0x84] ss:$20 sps:$4 sm:$0xff]  }
 0x286   : > { %2068 = vst.msk [vmem:[#allocation3 + $0x350] sm:$0xf] %vm11741_vm4, %v2035_v22  ;;  %v2034_v57 = vsel %vm11746_vm13, %v1991_v59, %v2033_v3  ;;  %v1985_v0 = vpop.permute.xlu1 %1984  ;;  %3304 = vmatpush2.bf16.msra.mxu1 %v6693_v53  ;;  %3202 = vmatprep.mubr.bf16.mxu0 %v8616_v47  ;;  %v2008_v59 = vrot.slane %v1987_v24, 4  ;;  %v7076_v22 = vld [vmem:[#allocation3 + $0x50] ss:$12 sps:$4 sm:$0xff]  }
 0x287   : > { %v2007_v29 = vrot.slane %v1985_v0, 4  ;;  %6771 = vmatprep.subr.bf16.mxu1 %v7052_v63  ;;  %v7077_v63 = vld [vmem:[#allocation3 + $0xf8] ss:$12 sps:$4 sm:$0xff]  }
 0x288   : > { %4201 = vrot.lane.b32.xlu1 %v8429_v18, %s7473_s30  ;;  %4231 = vrot.lane.b32.xlu0 %v8429_v18, %s7474_s11 }
 0x289   : > { %v2029_v61 = vsel %vm11746_vm13, %v1985_v0, %v2007_v29  ;;  %v2027_v33 = vsel %vm311_vm0, %v2006_v49, %v2007_v29  ;;  %3306 = vmatmul.mubr.bf16.vlgmr.msra.gmra.mxu1 %v8626_v62  ;;  %v1975_v56 = vpop.permute.xlu0 %1974 }
 0x28a   : > { %2064 = vst.msk [vmem:[#allocation3 + $0x338] sm:$0xf] %vm11741_vm4, %v2029_v61  ;;  %v8649_v19 = vsel %vm11746_vm13, %v1983_v50, %v2027_v33  ;;  %v1997_v23 = vpop.permute.xlu1 %1996  ;;  %6772 = vmatpush3.bf16.msra.mxu1 %v7056_v54  ;;  %3315 = vmatprep.mubr.bf16.mxu1 %v8634_v17  ;;  %v2002_v37 = vrot.slane %v1975_v56, 4 }
 0x28b   : > { %v2013_v34 = vrot.slane %v1997_v23, 4  ;;  %6773 = vmatprep.subr.bf16.mxu1 %v7057_v60  ;;  %v8735_v60 = vld [vmem:[%s11730_s3 + $0xa4] ss:$20 sps:$4 sm:$0xff]  }
 0x28c   : > { %4229 = vrot.lane.b32.xlu1 %v7589_v8, %s7474_s11  ;;  %4259 = vrot.lane.b32.xlu0 %v7589_v8, %s7462_s16  ;;  %s7482_s11 = smov 26  }
 0x28d   : > { %v2038_v20 = vsel %vm11746_vm13, %v1997_v23, %v2013_v34  ;;  %v2036_v28 = vsel %vm311_vm0, %v2012_v39, %v2013_v34  ;;  %3203 = vmatmul.mubr.bf16.gmra.mxu0 %v8645_v4  ;;  %v1979_v52 = vpop.permute.xlu0 %1978  ;;  %v7081_v23 = vld [vmem:[#allocation3 + $0x38] ss:$12 sps:$4 sm:$0xff]  }
 0x28e   : > { %2070 = vst.msk [vmem:[#allocation3 + $0x35c] sm:$0xf] %vm11741_vm4, %v2038_v20  ;;  %v2037_v6 = vsel %vm11746_vm13, %v1995_v45, %v2036_v28  ;;  %v1989_v55 = vpop.permute.xlu1 %1988  ;;  %6774 = vmatpush3.bf16.msra.mxu1 %v7061_v31  ;;  %3212 = vmatprep.mubr.bf16.mxu0 %v8655_v14  ;;  %v8707_v45 = vld [vmem:[%s11730_s3 + $0x58] ss:$20 sps:$4 sm:$0xff]   ;;  %v2004_v25 = vrot.slane %v1979_v52, 4 }
 0x28f   : > { %v2009_v48 = vrot.slane %v1989_v55, 4  ;;  %6775 = vmatprep.subr.bf16.mxu1 %v7062_v38  ;;  %v6726_v5 = vcombine.low %v2034_v57, %v2037_v6  ;;  %v6727_v13 = vcombine.high %v2034_v57, %v2037_v6  ;;  %v8727_v57 = vld [vmem:[%s11730_s3 + $0x78] ss:$20 sps:$4 sm:$0xff]  }
 0x290   : > { %4257 = vrot.lane.b32.xlu1 %v8424_v12, %s7462_s16  ;;  %4287 = vrot.lane.b32.xlu0 %v8424_v12, %s7461_s15  ;;  %v7082_v31 = vld [vmem:[#allocation3 + $0xe0] ss:$12 sps:$4 sm:$0xff]  }
 0x291   : > { %v2032_v36 = vsel %vm11746_vm13, %v1989_v55, %v2009_v48  ;;  %v2030_v26 = vsel %vm311_vm0, %v2008_v59, %v2009_v48  ;;  %3316 = vmatmul.mubr.bf16.gmra.mxu1 %v8665_v32  ;;  %3394 = vmatprep.subr.bf16.mxu0 %v6727_v13  ;;  %v1967_v35 = vpop.permute.xlu0 %1966  ;;  %v8754_v38 = vld [vmem:[%s11730_s3 + $0xac] ss:$20 sps:$4 sm:$0xff]   ;;  %v7087_v13 = vld [vmem:[#allocation3 + $0xc8] ss:$12 sps:$4 sm:$0xff]  }
 0x292   : > { %2066 = vst.msk [vmem:[#allocation3 + $0x344] sm:$0xf] %vm11741_vm4, %v2032_v36  ;;  %v2031_v50 = vsel %vm11746_vm13, %v1987_v24, %v2030_v26  ;;  %v1977_v41 = vpop.permute.xlu1 %1976  ;;  %3395 = vmatpush1.bf16.msra.mxu0 %v6726_v5  ;;  %6776 = vmatpush3.bf16.msra.mxu1 %v7066_v43  ;;  %v1998_v54 = vrot.slane %v1967_v35, 4  ;;  %v7086_v48 = vld [vmem:[#allocation3 + $0x20] ss:$12 sps:$4 sm:$0xff]  }
 0x293   : > { %v2003_v11 = vrot.slane %v1977_v41, 4  ;;  %6777 = vmatprep.subr.bf16.mxu1 %v7067_v58  ;;  %v6723_v40 = vcombine.low %v8649_v19, %v2031_v50  ;;  %v6724_v42 = vcombine.high %v8649_v19, %v2031_v50  ;;  %3325 = vmatprep.mubr.bf16.mxu1 %v8673_v7  ;;  %v7091_v50 = vld [vmem:[#allocation3 + $0x8] ss:$12 sps:$4 sm:$0xff]  }
 0x294   : > { %4261 = vrot.lane.b32.xlu1 %v8429_v18, %s7462_s16  ;;  %4291 = vrot.lane.b32.xlu0 %v8429_v18, %s7461_s15 }
 0x295   : > { %v2023_v2 = vsel %vm11746_vm13, %v1977_v41, %v2003_v11  ;;  %v2021_v27 = vsel %vm311_vm0, %v2002_v37, %v2003_v11  ;;  %3213 = vmatmul.mubr.bf16.gmra.mxu0 %v8685_v51  ;;  %3396 = vmatprep.subr.bf16.mxu0 %v6724_v42  ;;  %v1971_v19 = vpop.permute.xlu0 %1970  ;;  %v8776_v41 = vld [vmem:[%s11730_s3 + $0xa8] ss:$20 sps:$4 sm:$0xff]   ;;  %v8781_v11 = vld [vmem:[%s11730_s3 + $0xcc] ss:$20 sps:$4 sm:$0xff]  }
 0x296   : > { %2060 = vst.msk [vmem:[#allocation3 + $0x320] sm:$0xf] %vm11741_vm4, %v2023_v2  ;;  %v2022_v15 = vsel %vm11746_vm13, %v1975_v56, %v2021_v27  ;;  %v1981_v30 = vpop.permute.xlu1 %1980  ;;  %3397 = vmatpush1.bf16.msra.mxu0 %v6723_v40  ;;  %6778 = vmatpush3.bf16.msra.mxu1 %v7071_v21  ;;  %v8740_v56 = vld [vmem:[%s11730_s3 + $0x80] ss:$20 sps:$4 sm:$0xff]   ;;  %v2000_v55 = vrot.slane %v1971_v19, 4 }
 0x297   : > { %v2005_v53 = vrot.slane %v1981_v30, 4  ;;  %6779 = vmatprep.subr.bf16.mxu1 %v7072_v16  ;;  %3222 = vmatprep.mubr.bf16.mxu0 %v8695_v44  ;;  %v7092_v37 = vld [vmem:[#allocation3 + $0x2f0] ss:$12 sps:$4 sm:$0xff]   ;;  %v8791_v42 = vld [vmem:[%s11730_s3 + $0xd4] ss:$20 sps:$4 sm:$0xff]  }
 0x298   : > { %4289 = vrot.lane.b32.xlu1 %v7589_v8, %s7461_s15  ;;  %4319 = vrot.lane.b32.xlu0 %v7589_v8, %s7459_s12  ;;  %v8808_v2 = vld [vmem:[%s11730_s3 + $0xf4] ss:$20 sps:$4 sm:$0xff]  }
 0x299   : > { %v2026_v3 = vsel %vm11746_vm13, %v1981_v30, %v2005_v53  ;;  %v2024_v24 = vsel %vm311_vm0, %v2004_v25, %v2005_v53  ;;  %3326 = vmatmul.mubr.bf16.gmra.mxu1 %v8707_v45  ;;  %v8813_v16 = vld [vmem:[%s7579_s13 + $0x8] sm:$0xff]  ;;  %v8839_v25 = vld [vmem:[%s11730_s3 + $0xf0] ss:$20 sps:$4 sm:$0xff]  }
 0x29a   : > { %2062 = vst.msk [vmem:[#allocation3 + $0x32c] sm:$0xf] %vm11741_vm4, %v2026_v3  ;;  %v2025_v0 = vsel %vm11746_vm13, %v1979_v52, %v2024_v24  ;;  %v1969_v29 = vpop.permute.xlu1 %1968  ;;  %6780 = vmatpush3.bf16.msra.mxu1 %v7076_v22  ;;  %3335 = vmatprep.mubr.bf16.mxu1 %v8714_v46  ;;  %v8766_v52 = vld [vmem:[%s11730_s3 + $0xa0] ss:$20 sps:$4 sm:$0xff]   ;;  %v8849_v3 = vld [vmem:[%s11730_s3 + $0x11c] ss:$20 sps:$4 sm:$0xff]  }
 0x29b   : > { %v1999_v49 = vrot.slane %v1969_v29, 4  ;;  %6781 = vmatprep.subr.bf16.mxu1 %v7077_v63  ;;  %v6720_v61 = vcombine.low %v2022_v15, %v2025_v0  ;;  %v6721_v33 = vcombine.high %v2022_v15, %v2025_v0  ;;  %v8820_v15 = vld [vmem:[%s11730_s3 + $0xd0] ss:$20 sps:$4 sm:$0xff]   ;;  %v8859_v63 = vld [vmem:[%s11730_s3 + $0xf8] ss:$20 sps:$4 sm:$0xff]  }
 0x29c   : > { %4317 = vrot.lane.b32.xlu1 %v8424_v12, %s7459_s12  ;;  %4347 = vrot.lane.b32.xlu0 %v8424_v12, %s7475_s7 }
 0x29d   : > { %v2017_v34 = vsel %vm11746_vm13, %v1969_v29, %v1999_v49  ;;  %v2014_v39 = vsel %vm311_vm0, %v1998_v54, %v1999_v49  ;;  %3223 = vmatmul.mubr.bf16.gmra.mxu0 %v8727_v57  ;;  %3398 = vmatprep.subr.bf16.mxu0 %v6721_v33  ;;  %v8869_v29 = vld [vmem:[%s11730_s3 + $0x124] ss:$20 sps:$4 sm:$0xff]  }
 0x29e   : > { %2056 = vst.msk [vmem:[#allocation3 + $0x308] sm:$0xf] %vm11741_vm4, %v2017_v34  ;;  %v2016_v20 = vsel %vm11746_vm13, %v1967_v35, %v2014_v39  ;;  %v1973_v28 = vpop.permute.xlu1 %1972  ;;  %3399 = vmatpush1.bf16.msra.mxu0 %v6720_v61  ;;  %6782 = vmatpush3.bf16.msra.mxu1 %v7081_v23  ;;  %v8829_v35 = vld [vmem:[%s11730_s3 + $0xfc] ss:$20 sps:$4 sm:$0xff]   ;;  %v8879_v54 = vld [vmem:[%s11730_s3 + $0x118] ss:$20 sps:$4 sm:$0xff]  }
 0x29f   : > { %v2001_v6 = vrot.slane %v1973_v28, 4  ;;  %6783 = vmatprep.subr.bf16.mxu1 %v7082_v31  ;;  %3232 = vmatprep.mubr.bf16.mxu0 %v8735_v60  ;;  %v8904_v34 = vld [vmem:[%s7579_s13] sm:$0xff]  ;;  %s7477_s13 = smov 46  }
 0x2a0   : > { %4321 = vrot.lane.b32.xlu1 %v8429_v18, %s7459_s12  ;;  %4351 = vrot.lane.b32.xlu0 %v8429_v18, %s7475_s7  ;;  %v8799_v18 = vld [vmem:[%s11730_s3 + $0xc8] ss:$20 sps:$4 sm:$0xff]   ;;  %v8912_v39 = vld [vmem:[%s11730_s3 + $0x10] ss:$20 sps:$4 sm:$0xff]   ;;  %s7480_s12 = smov 28  }
 0x2a1   : > { %v2020_v59 = vsel %vm11746_vm13, %v1973_v28, %v2001_v6  ;;  %v2018_v5 = vsel %vm311_vm0, %v2000_v55, %v2001_v6  ;;  %3336 = vmatmul.mubr.bf16.gmra.mxu1 %v8740_v56  ;;  %v7392_v31 = vld [vmem:[%s11730_s3 + $0x4] ss:$20 sps:$4 sm:$0xff]   ;;  %v7115_v6 = vld [vmem:[#allocation3 + $0x230] ss:$12 sps:$4 sm:$0xff]   ;;  %vm3963_vm0 = vcmask 891904  }
 0x2a2   : > { %2058 = vst.msk [vmem:[#allocation3 + $0x314] sm:$0xf] %vm11741_vm4, %v2020_v59  ;;  %v2019_v43 = vsel %vm11746_vm13, %v1971_v19, %v2018_v5  ;;  %6784 = vmatpush3.bf16.msra.mxu1 %v7086_v48  ;;  %v8770_v36 = vpop.permute.xlu0 %2281  ;;  %3345 = vmatprep.mubr.bf16.mxu1 %v8754_v38  ;;  %v7116_v55 = vld [vmem:[#allocation3 + $0x2d8] ss:$12 sps:$4 sm:$0xff]   ;;  %vm4083_vm4 = vcmask 736256   ;;  %vm4203_vm13 = vcmask 703488  }
 0x2a3   : > { %6785 = vmatprep.subr.bf16.mxu1 %v7087_v13  ;;  %v6717_v26 = vcombine.low %v2016_v20, %v2019_v43  ;;  %v6718_v58 = vcombine.high %v2016_v20, %v2019_v43  ;;  %v7117_v5 = vld [vmem:[#allocation3 + $0x218] ss:$12 sps:$4 sm:$0xff]   ;;  %v7118_v13 = vld [vmem:[#allocation3 + $0x2c0] ss:$12 sps:$4 sm:$0xff]  }
 0x2a4   : > { %4349 = vrot.lane.b32.xlu1 %v7589_v8, %s7475_s7  ;;  %4381 = vrot.lane.b32.xlu0 %v7589_v8, %s7476_s23  ;;  %v8937_v43 = vld [vmem:[%s11730_s3 + $0x38] ss:$20 sps:$4 sm:$0xff]   ;;  %s7479_s7 = smov 29  }
 0x2a5   : > { %3233 = vmatmul.mubr.bf16.gmra.mxu0 %v8766_v52  ;;  %3400 = vmatprep.subr.bf16.mxu0 %v6718_v58 }
 0x2a6   : > { %3401 = vmatpush1.bf16.msra.mxu0 %v6717_v26  ;;  %6786 = vmatpush3.bf16.msra.mxu1 %v7091_v50  ;;  %v8786_v40 = vpop.permute.xlu0 %2291  ;;  %v7120_v50 = vld [vmem:[#allocation3 + $0x200] ss:$12 sps:$4 sm:$0xff]  }
 0x2a7   : > { %6835 = vmatprep.subr.bf16.mxu0 %v7092_v37  ;;  %6935 = vmatprep.subr.bf16.mxu1 %v7092_v37  ;;  %v7121_v37 = vld [vmem:[#allocation3 + $0x2a8] ss:$12 sps:$4 sm:$0xff]  }
 0x2a8   : > { %3242 = vmatprep.mubr.bf16.mxu0 %v8781_v11  ;;  %4379 = vrot.lane.b32.xlu1 %v8424_v12, %s7476_s23 }
 0x2a9   : > { %3346 = vmatmul.mubr.bf16.gmra.mxu1 %v8776_v41  ;;  %4385 = vrot.lane.b32.xlu0 %v7591_v9, %s7476_s23 }
 0x2aa   : > { %v8802_v21 = vpop.permute.xlu0 %2301  ;;  %3355 = vmatprep.mubr.bf16.mxu1 %v8791_v42 }
 0x2ab   : > { %11945 = vst [vmem:[#allocation7_spill] sm:$0xff] %v8802_v21  ;;  %v8810_v27 = vpop.permute.xlu1 %2286 }
 0x2ac   : > { %4383 = vrot.lane.b32.xlu1 %v8813_v16, %s7476_s23 }
 0x2ad   : > { %3243 = vmatmul.mubr.bf16.gmra.mxu0 %v8799_v18  ;;  %4414 = vrot.lane.b32.xlu0 %v7589_v8, %s7465_s25 }
 0x2ae   : > { %v8823_v30 = vpop.permute.xlu0 %2311  ;;  %3252 = vmatprep.mubr.bf16.mxu0 %v8808_v2 }
 0x2af   : > { %11946 = vst [vmem:[#allocation8_spill] sm:$0xff] %v8823_v30  ;;  %v8831_v53 = vpop.permute.xlu1 %2296 }
 0x2b0   : > { %4412 = vrot.lane.b32.xlu1 %v8424_v12, %s7465_s25 }
 0x2b1   : > { %3356 = vmatmul.mubr.bf16.gmra.mxu1 %v8820_v15  ;;  %4418 = vrot.lane.b32.xlu0 %v7591_v9, %s7465_s25 }
 0x2b2   : > { %v8843_v22 = vpop.permute.xlu0 %2321  ;;  %3365 = vmatprep.mubr.bf16.mxu1 %v8829_v35 }
 0x2b3   : > { %11947 = vst [vmem:[#allocation9_spill] sm:$0xff] %v8843_v22  ;;  %v8851_v24 = vpop.permute.xlu1 %2306 }
 0x2b4   : > { %11948 = vst [vmem:[#allocation10_spill] sm:$0xff] %v8851_v24  ;;  %4416 = vrot.lane.b32.xlu1 %v8813_v16, %s7465_s25 }
 0x2b5   : > { %3253 = vmatmul.mubr.bf16.gmra.mxu0 %v8839_v25  ;;  %4447 = vrot.lane.b32.xlu0 %v7589_v8, %s7463_s17 }
 0x2b6   : > { %v8863_v0 = vpop.permute.xlu0 %2331  ;;  %3262 = vmatprep.mubr.bf16.mxu0 %v8849_v3 }
 0x2b7   : > { %11949 = vst [vmem:[#allocation11_spill] sm:$0xff] %v8863_v0  ;;  %v8871_v49 = vpop.permute.xlu1 %2316 }
 0x2b8   : > { %11950 = vst [vmem:[#allocation12_spill] sm:$0xff] %v8871_v49  ;;  %4445 = vrot.lane.b32.xlu1 %v8424_v12, %s7463_s17  ;;  %v8894_v12 = vld [vmem:[%s11730_s3 + $0x120] ss:$20 sps:$4 sm:$0xff]  }
 0x2b9   : > { %3366 = vmatmul.mubr.bf16.gmra.mxu1 %v8859_v63  ;;  %4451 = vrot.lane.b32.xlu0 %v7591_v9, %s7463_s17 }
 0x2ba   : > { %v8883_v61 = vpop.permute.xlu0 %2341  ;;  %3375 = vmatprep.mubr.bf16.mxu1 %v8869_v29 }
 0x2bb   : > { %11951 = vst [vmem:[#allocation13_spill] sm:$0xff] %v8883_v61  ;;  %v8886_v33 = vpop.permute.xlu1 %2326 }
 0x2bc   : > { %11952 = vst [vmem:[#allocation14_spill] sm:$0xff] %v8886_v33  ;;  %4449 = vrot.lane.b32.xlu1 %v8813_v16, %s7463_s17 }
 0x2bd   : > { %3263 = vmatmul.mubr.bf16.gmra.mxu0 %v8879_v54  ;;  %4480 = vrot.lane.b32.xlu0 %v7589_v8, %s7466_s26 }
 0x2be   : > { %v8898_v19 = vpop.permute.xlu0 %2351  ;;  %3418 = vmatprep.mubr.bf16.mxu0 %v11733_v1 }
 0x2bf   : > { %11953 = vst [vmem:[#allocation15_spill] sm:$0xff] %v8898_v19  ;;  %v8901_v23 = vpop.permute.xlu1 %2336  ;;  %v7131_v19 = vld [vmem:[#allocation3 + $0x248] ss:$12 sps:$4 sm:$0xff]  }
 0x2c0   : > { %11954 = vst [vmem:[#allocation16_spill] sm:$0xff] %v8901_v23  ;;  %4478 = vrot.lane.b32.xlu1 %v8904_v34, %s7466_s26 }
 0x2c1   : > { %3376 = vmatmul.mubr.bf16.gmra.mxu1 %v8894_v12  ;;  %4484 = vrot.lane.b32.xlu0 %v7591_v9, %s7466_s26 }
 0x2c2   : > { %3531 = vmatprep.mubr.bf16.mxu1 %v7392_v31  ;;  %v3931_v20 = vpop.permute.xlu0 %3930 }
 0x2c3   : > { %v8919_v28 = vpop.permute.xlu1 %2346 }
 0x2c4   : > { %11955 = vst [vmem:[#allocation17_spill] sm:$0xff] %v8919_v28  ;;  %4482 = vrot.lane.b32.xlu1 %v8813_v16, %s7466_s26  ;;  %s7478_s26 = smov 30  }
 0x2c5   : > { %6729 = vmatmul.mubr.msk.bf16.vlgmr.msra.gmra.mxu0 %vm3135_vm14, %v8912_v39  ;;  %4513 = vrot.lane.b32.xlu0 %v7589_v8, %s7477_s13 }
 0x2c6   : > { %6836 = vmatpush3.bf16.msra.mxu0 %v7115_v6  ;;  %3428 = vmatprep.mubr.bf16.mxu0 %v11733_v1  ;;  %v8928_v48 = vpop.permute.xlu0 %3934 }
 0x2c7   : > { %11956 = vst [vmem:[#allocation18_spill] sm:$0xff] %v8928_v48  ;;  %v8930_v59 = vpop.permute.xlu1 %2356  ;;  %6837 = vmatprep.subr.bf16.mxu0 %v7116_v55 }
 0x2c8   : > { %11957 = vst [vmem:[#allocation19_spill] sm:$0xff] %v8930_v59  ;;  %4511 = vrot.lane.b32.xlu1 %v8904_v34, %s7477_s13 }
 0x2c9   : > { %3532 = vmatmul.mubr.bf16.vlgmr.msra.gmra.mxu1 %v8607_v10  ;;  %4517 = vrot.lane.b32.xlu0 %v7591_v9, %s7477_s13 }
 0x2ca   : > { %6943 = vmatpush3.bf16.msra.mxu1 %v7115_v6  ;;  %6838 = vmatpush3.bf16.msra.mxu0 %v7117_v5  ;;  %v8940_v26 = vpop.permute.xlu0 %3959 }
 0x2cb   : > { %6936 = vmatprep.subr.bf16.mxu1 %v7116_v55  ;;  %6839 = vmatprep.subr.bf16.mxu0 %v7118_v13  ;;  %v8942_v58 = vpop.permute.xlu1 %3932  ;;  %v7123_v55 = vld [vmem:[#allocation3 + $0x290] ss:$12 sps:$4 sm:$0xff]  }
 0x2cc   : > { %3539 = vmatprep.mubr.bf16.mxu1 %v8616_v47  ;;  %v8947_v10 = vsel %vm3936_vm15, %v3931_v20, %v8942_v58  ;;  %4515 = vrot.lane.b32.xlu1 %v8813_v16, %s7477_s13  ;;  %v7122_v47 = vld [vmem:[#allocation3 + $0x1e8] ss:$12 sps:$4 sm:$0xff]  }
 0x2cd   : > { %11958 = vst [vmem:[#allocation20_spill] sm:$0xff] %v8947_v10  ;;  %6730 = vmatmul.mubr.msk.bf16.gmra.mxu0 %vm3135_vm14, %v8937_v43  ;;  %4546 = vrot.lane.b32.xlu0 %v7589_v8, %s7478_s26  ;;  %v11962_v10 = vmov 0  }
 0x2ce   : > { %6944 = vmatpush3.bf16.msra.mxu1 %v7117_v5  ;;  %6840 = vmatpush3.bf16.msra.mxu0 %v7120_v50  ;;  %v3988_v31 = vpop.permute.xlu0 %3987  ;;  %v8963_v5 = vld [vmem:[%s11730_s3 + $0x60] ss:$20 sps:$4 sm:$0xff]  }
 0x2cf   : > { %6937 = vmatprep.subr.bf16.mxu1 %v7118_v13  ;;  %6841 = vmatprep.subr.bf16.mxu0 %v7121_v37  ;;  %v3958_v6 = vpop.permute.xlu1 %3957 }
 0x2d0   : > { %3438 = vmatprep.mubr.bf16.mxu0 %v11733_v1  ;;  %v8956_v20 = vsel %vm3963_vm0, %v3958_v6, %v8940_v26  ;;  %4544 = vrot.lane.b32.xlu1 %v8904_v34, %s7478_s26  ;;  %v7125_v1 = vld [vmem:[#allocation3 + $0x1d0] ss:$12 sps:$4 sm:$0xff]  }
 0x2d1   : > { %11959 = vst [vmem:[#allocation21_spill] sm:$0xff] %v8956_v20  ;;  %3540 = vmatmul.mubr.bf16.gmra.mxu1 %v8645_v4  ;;  %v7126_v4 = vld [vmem:[#allocation3 + $0x278] ss:$12 sps:$4 sm:$0xff]   ;;  %4550 = vrot.lane.b32.xlu0 %v7591_v9, %s7478_s26 }
 0x2d2   : > { %6945 = vmatpush3.bf16.msra.mxu1 %v7120_v50  ;;  %6842 = vmatpush3.bf16.msra.mxu0 %v7122_v47  ;;  %v8966_v13 = vpop.permute.xlu0 %3991  ;;  %v7127_v20 = vld [vmem:[#allocation3 + $0x1b8] ss:$12 sps:$4 sm:$0xff]  }
 0x2d3   : > { %11960 = vst [vmem:[#allocation22_spill] sm:$0xff] %v8966_v13  ;;  %6938 = vmatprep.subr.bf16.mxu1 %v7121_v37  ;;  %6843 = vmatprep.subr.bf16.mxu0 %v7123_v55  ;;  %v8968_v6 = vpop.permute.xlu1 %3961 }
 0x2d4   : > { %11961 = vst [vmem:[#allocation23_spill] sm:$0xff] %v8968_v6  ;;  %3547 = vmatprep.mubr.bf16.mxu1 %v8655_v14  ;;  %4548 = vrot.lane.b32.xlu1 %v8813_v16, %s7478_s26 }
 0x2d5   : > { %6731 = vmatmul.mubr.msk.bf16.gmra.mxu0 %vm3135_vm14, %v8963_v5  ;;  %4579 = vrot.lane.b32.xlu0 %v7589_v8, %s7479_s7 }
 0x2d6   : > { %6946 = vmatpush3.bf16.msra.mxu1 %v7122_v47  ;;  %6844 = vmatpush3.bf16.msra.mxu0 %v7125_v1  ;;  %v8975_v50 = vpop.permute.xlu0 %4019  ;;  %v7128_v47 = vld [vmem:[#allocation3 + $0x260] ss:$12 sps:$4 sm:$0xff]  }
 0x2d7   : > { %6939 = vmatprep.subr.bf16.mxu1 %v7123_v55  ;;  %6845 = vmatprep.subr.bf16.mxu0 %v7126_v4  ;;  %v8977_v37 = vpop.permute.xlu1 %3989  ;;  %v8989_v55 = vld [vmem:[%s11730_s3 + $0x88] ss:$20 sps:$4 sm:$0xff]  }
 0x2d8   : > { %3448 = vmatprep.mubr.bf16.mxu0 %v11962_v10  ;;  %v8982_v14 = vsel %vm3993_vm1, %v3988_v31, %v8977_v37  ;;  %4577 = vrot.lane.b32.xlu1 %v8904_v34, %s7479_s7 }
 0x2d9   : > { %11963 = vst [vmem:[#allocation24_spill] sm:$0xff] %v8982_v14  ;;  %3548 = vmatmul.mubr.bf16.gmra.mxu1 %v8685_v51  ;;  %v7130_v14 = vld [vmem:[#allocation3 + $0x1a0] ss:$12 sps:$4 sm:$0xff]   ;;  %4583 = vrot.lane.b32.xlu0 %v7591_v9, %s7479_s7 }
 0x2da   : > { %6947 = vmatpush3.bf16.msra.mxu1 %v7125_v1  ;;  %6846 = vmatpush3.bf16.msra.mxu0 %v7127_v20  ;;  %v4048_v59 = vpop.permute.xlu0 %4047 }
 0x2db   : > { %6940 = vmatprep.subr.bf16.mxu1 %v7126_v4  ;;  %6847 = vmatprep.subr.bf16.mxu0 %v7128_v47  ;;  %v4018_v31 = vpop.permute.xlu1 %4017 }
 0x2dc   : > { %3555 = vmatprep.mubr.bf16.mxu1 %v8695_v44  ;;  %v8995_v51 = vsel %vm4023_vm2, %v4018_v31, %v8975_v50  ;;  %4581 = vrot.lane.b32.xlu1 %v8813_v16, %s7479_s7  ;;  %v7132_v44 = vld [vmem:[#allocation3 + $0x188] ss:$12 sps:$4 sm:$0xff]   ;;  %v9011_v31 = vld [vmem:[%s11730_s3 + $0xb0] ss:$20 sps:$4 sm:$0xff]   ;;  %s215_s7 = sand.u32 1, %s7446_s19  }
 0x2dd   : > { %11964 = vst [vmem:[#allocation25_spill] sm:$0xff] %v8995_v51  ;;  %6732 = vmatmul.mubr.msk.bf16.gmra.mxu0 %vm3135_vm14, %v8989_v55  ;;  %4612 = vrot.lane.b32.xlu0 %v7589_v8, %s7480_s12  ;;  %v7134_v51 = vld [vmem:[#allocation3 + $0x350] ss:$12 sps:$4 sm:$0xff]   ;;  %s10761_s16 = smul.u32 48, %s215_s7  ;;  %s11687_s17 = scalar_lea.sflag [#allocation5], %s215_s7 }
 0x2de   : > { %6948 = vmatpush3.bf16.msra.mxu1 %v7127_v20  ;;  %6848 = vmatpush3.bf16.msra.mxu0 %v7130_v14  ;;  %v9001_v1 = vpop.permute.xlu0 %4051 }
 0x2df   : > { %11965 = vst [vmem:[#allocation26_spill] sm:$0xff] %v9001_v1  ;;  %6941 = vmatprep.subr.bf16.mxu1 %v7128_v47  ;;  %6849 = vmatprep.subr.bf16.mxu0 %v7131_v19  ;;  %v9003_v4 = vpop.permute.xlu1 %4021  ;;  %s10803_s8 = scalar_lea.vmem [#allocation4], %s10761_s16 }
 0x2e0   : > { %11966 = vst [vmem:[#allocation27_spill] sm:$0xff] %v9003_v4  ;;  %3458 = vmatprep.mubr.bf16.mxu0 %v11962_v10  ;;  %4610 = vrot.lane.b32.xlu1 %v8904_v34, %s7480_s12  ;;  %s6445_s25 = sshll.u32 %s10803_s8, 4  ;;  %s11675_s25 = int_to_ptr.vmem [resolvable:$true] %s6445_s25 }
 0x2e1   : > { %3556 = vmatmul.mubr.bf16.gmra.mxu1 %v8727_v57  ;;  %4616 = vrot.lane.b32.xlu0 %v7591_v9, %s7480_s12 }
 0x2e2   : > { %6949 = vmatpush3.bf16.msra.mxu1 %v7130_v14  ;;  %6850 = vmatpush3.bf16.msra.mxu0 %v7132_v44  ;;  %v9014_v20 = vpop.permute.xlu0 %4079 }
 0x2e3   : > { %6942 = vmatprep.subr.bf16.mxu1 %v7131_v19  ;;  %3563 = vmatprep.mubr.bf16.mxu1 %v8735_v60  ;;  %v9017_v47 = vpop.permute.xlu1 %4049 }
 0x2e4   : > { %v9021_v57 = vsel %vm4053_vm3, %v4048_v59, %v9017_v47  ;;  %4614 = vrot.lane.b32.xlu1 %v8813_v16, %s7480_s12  ;;  %v9037_v59 = vld [vmem:[%s11730_s3 + $0xd8] ss:$20 sps:$4 sm:$0xff]   ;;  %s6952_s12 = smul.u32 768, %s7537_s22  ;;  %s7394_s22 = scalar_lea.vmem %s11675_s25, 768 }
 0x2e5   : > { %11967 = vst [vmem:[#allocation28_spill] sm:$0xff] %v9021_v57  ;;  %6733 = vmatmul.mubr.msk.bf16.gmra.mxu0 %vm3135_vm14, %v9011_v31  ;;  %4645 = vrot.lane.b32.xlu0 %v7589_v8, %s7481_s10  ;;  %p7395_p11 = scmp.ne.s32.totalorder %s11675_s25, %s7394_s22 }
 0x2e6   : > { %6950 = vmatpush3.bf16.msra.mxu1 %v7132_v44  ;;  %3468 = vmatprep.mubr.bf16.mxu0 %v11962_v10  ;;  %v4108_v19 = vpop.permute.xlu0 %4107  ;;  %s11681_s15 = scalar_lea.hbm %s11732_s5, %s6952_s12 }
 0x2e7   : > { %6911 = vmatprep.subr.bf16.mxu1 %v7134_v51  ;;  %v4078_v60 = vpop.permute.xlu1 %4077  ;;  %p7396_p12 = pnand %p7395_p11, %p7554_p5 }
 0x2e8   : > { %v9030_v14 = vsel %vm4083_vm4, %v4078_v60, %v9014_v20  ;;  %4643 = vrot.lane.b32.xlu1 %v8904_v34, %s7481_s10 }
 0x2e9   : > { %11968 = vst [vmem:[#allocation29_spill] sm:$0xff] %v9030_v14  ;;  %3564 = vmatmul.mubr.bf16.gmra.mxu1 %v8766_v52  ;;  %4649 = vrot.lane.b32.xlu0 %v7591_v9, %s7481_s10  ;;  %v9063_v14 = vld [vmem:[%s11730_s3 + $0x100] ss:$20 sps:$4 sm:$0xff]   ;;  %p7397_p13 = pneg %p7396_p12 }
 0x2ea   : > { %3571 = vmatprep.mubr.bf16.mxu1 %v8781_v11  ;;  %v9041_v44 = vpop.permute.xlu0 %4111 }
 0x2eb   : > { %11969 = vst [vmem:[#allocation30_spill] sm:$0xff] %v9041_v44  ;;  %v9043_v57 = vpop.permute.xlu1 %4081 }
 0x2ec   : > { %11970 = vst [vmem:[#allocation31_spill] sm:$0xff] %v9043_v57  ;;  %4647 = vrot.lane.b32.xlu1 %v8813_v16, %s7481_s10 }
 0x2ed   : > { %6734 = vmatmul.mubr.msk.bf16.gmra.mxu0 %vm3135_vm14, %v9037_v59  ;;  %4678 = vrot.lane.b32.xlu0 %v7589_v8, %s7482_s11 }
 0x2ee   : > { %3478 = vmatprep.mubr.bf16.mxu0 %v11962_v10  ;;  %v9050_v52 = vpop.permute.xlu0 %4139 }
 0x2ef   : > { %v9052_v60 = vpop.permute.xlu1 %4109 }
 0x2f0   : > { %v9056_v11 = vsel %vm966_vm7, %v4108_v19, %v9052_v60  ;;  %4676 = vrot.lane.b32.xlu1 %v8904_v34, %s7482_s11 }
 0x2f1   : > { %11971 = vst [vmem:[#allocation32_spill] sm:$0xff] %v9056_v11  ;;  %3572 = vmatmul.mubr.bf16.gmra.mxu1 %v8799_v18  ;;  %4682 = vrot.lane.b32.xlu0 %v7591_v9, %s7482_s11 }
 0x2f2   : > { %3579 = vmatprep.mubr.bf16.mxu1 %v8808_v2  ;;  %v4168_v28 = vpop.permute.xlu0 %4167  ;;  %v7137_v2 = vld [vmem:[%s11730_s3 + $0x128] ss:$20 sps:$4 sm:$0xff]  }
 0x2f3   : > { %v4138_v61 = vpop.permute.xlu1 %4137 }
 0x2f4   : > { %v9069_v19 = vsel %vm1096_vm5, %v4138_v61, %v9050_v52  ;;  %4680 = vrot.lane.b32.xlu1 %v8813_v16, %s7482_s11  ;;  %s7483_s11 = smov [#allocation4]  }
 0x2f5   : > { %11972 = vst [vmem:[#allocation33_spill] sm:$0xff] %v9069_v19  ;;  %6735 = vmatmul.mubr.msk.bf16.gmra.mxu0 %vm3135_vm14, %v9063_v14  ;;  %s7398_s13 = sshll.u32 %s7483_s11, 4  ;;  %s7399_s13 = int_to_ptr.vmem [resolvable:$false] %s7398_s13 }
 0x2f6   : > { %3488 = vmatprep.mubr.bf16.mxu0 %v11962_v10  ;;  %v9076_v18 = vpop.permute.xlu0 %4171  ;;  %s7400_s14 = scalar_lea.vmem %s7399_s13, 1536  ;;  %p7401_p0 = scmp.lt.s32.totalorder %s11675_s25, %s7399_s13 }
 0x2f7   : > { %11973 = vst [vmem:[#allocation34_spill] sm:$0xff] %v9076_v18  ;;  %v9078_v8 = vpop.permute.xlu1 %4141  ;;  %p7402_p1 = scmp.lt.s32.totalorder %s7400_s14, %s7394_s22 }
 0x2f8   : > { %11974 = vst [vmem:[#allocation35_spill] sm:$0xff] %v9078_v8 }
 0x2f9   : > { %3580 = vmatmul.mubr.bf16.gmra.mxu1 %v8839_v25  ;;  %v7393_v25 = vld [vmem:[%s11730_s3 + $0xc] ss:$20 sps:$4 sm:$0xff]   ;;  %p7403_p2 = por %p7402_p1, %p7401_p0 }
 0x2fa   : > { %3587 = vmatprep.mubr.bf16.mxu1 %v8849_v3  ;;  %v9085_v16 = vpop.permute.xlu0 %4199 }
 0x2fb   : > { %v9087_v61 = vpop.permute.xlu1 %4169  ;;  %p7404_p3 = pnand %p7403_p2, %p7397_p13 }
 0x2fc   : > { %v9091_v9 = vsel %vm1225_vm11, %v4168_v28, %v9087_v61 }
 0x2fd   : > { %11975 = vst [vmem:[#allocation36_spill] sm:$0xff] %v9091_v9  ;;  %6736 = vmatmul.mubr.msk.bf16.gmra.mxu0 %vm3135_vm14, %v7137_v2 }
 0x2fe   : > { %3628 = vmatprep.mubr.bf16.mxu0 %v7393_v25  ;;  %v4228_v10 = vpop.permute.xlu0 %4227 }
 0x2ff   : > { %v4198_v34 = vpop.permute.xlu1 %4197 }
 0x300   : > { %v9099_v3 = vsel %vm4203_vm13, %v4198_v34, %v9085_v16 }
 0x301   : > { %11976 = vst [vmem:[#allocation37_spill] sm:$0xff] %v9099_v3  ;;  %3588 = vmatmul.mubr.bf16.gmra.mxu1 %v8879_v54  ;;  %v7138_v54 = vld [vmem:[#allocation3 + $0x338] ss:$12 sps:$4 sm:$0xff]  }
 0x302   : > { %3676 = vmatprep.mubr.bf16.mxu1 %v8829_v35  ;;  %v9106_v9 = vpop.permute.xlu0 %4231 }
 0x303   : > { %v9103_v28 = vpop.permute.xlu1 %4201  ;;  %11978 = vst [vmem:[#allocation39_spill] sm:$0xff] %v9106_v9 }
 0x304   : > { %11977 = vst [vmem:[#allocation38_spill] sm:$0xff] %v9103_v28 }
 0x305   : > { %3629 = vmatmul.mubr.bf16.vlgmr.msra.gmra.mxu0 %v8626_v62 }
 0x306   : > { %3636 = vmatprep.mubr.bf16.mxu0 %v8634_v17  ;;  %v9117_v62 = vpop.permute.xlu0 %4259  ;;  %v7139_v17 = vld [vmem:[#allocation3 + $0x320] ss:$12 sps:$4 sm:$0xff]  }
 0x307   : > { %v9109_v25 = vpop.permute.xlu1 %4229 }
 0x308   : > { %v9113_v19 = vsel %vm4233_vm10, %v4228_v10, %v9109_v25 }
 0x309   : > { %11979 = vst [vmem:[#allocation40_spill] sm:$0xff] %v9113_v19  ;;  %3677 = vmatmul.mubr.bf16.vlgmr.msra.gmra.mxu1 %v8859_v63 }
 0x30a   : > { %6912 = vmatpush3.bf16.msra.mxu1 %v7134_v51  ;;  %3684 = vmatprep.mubr.bf16.mxu1 %v8869_v29  ;;  %v7140_v29 = vld [vmem:[#allocation3 + $0x308] ss:$12 sps:$4 sm:$0xff]   ;;  %v4288_v51 = vpop.permute.xlu0 %4287 }
 0x30b   : > { %6913 = vmatprep.subr.bf16.mxu1 %v7138_v54  ;;  %v4258_v35 = vpop.permute.xlu1 %4257 }
 0x30c   : > { %v9121_v34 = vsel %vm1354_vm9, %v4258_v35, %v9117_v62 }
 0x30d   : > { %11980 = vst [vmem:[#allocation41_spill] sm:$0xff] %v9121_v34  ;;  %3637 = vmatmul.mubr.bf16.gmra.mxu0 %v8665_v32 }
 0x30e   : > { %6914 = vmatpush3.bf16.msra.mxu1 %v7138_v54  ;;  %3644 = vmatprep.mubr.bf16.mxu0 %v8673_v7 }
 0x30f   : > { %6915 = vmatprep.subr.bf16.mxu1 %v7139_v17  ;;  %v9125_v63 = vpop.permute.xlu1 %4261 }
 0x310   : > { %11981 = vst [vmem:[#allocation42_spill] sm:$0xff] %v9125_v63 }
 0x311   : > { %3685 = vmatmul.mubr.bf16.gmra.mxu1 %v8894_v12 }
 0x312   : > { %6916 = vmatpush3.bf16.msra.mxu1 %v7139_v17  ;;  %6919 = vmatprep.mubr.msk.bf16.mxu1 %vm3135_vm14, %v8912_v39 }
 0x313   : > { %6917 = vmatprep.subr.bf16.mxu1 %v7140_v29  ;;  %v9130_v10 = vpop.permute.xlu1 %4289 }
 0x314   : > { %v9134_v32 = vsel %vm1483_vm8, %v4288_v51, %v9130_v10 }
 0x315   : > { %11982 = vst [vmem:[#allocation43_spill] sm:$0xff] %v9134_v32  ;;  %3645 = vmatmul.mubr.bf16.gmra.mxu0 %v8707_v45 }
 0x316   : > { %6918 = vmatpush3.bf16.msra.mxu1 %v7140_v29  ;;  %3652 = vmatprep.mubr.bf16.mxu0 %v8714_v46 }
 0x319   : > { %6920 = vmatmul.mubr.msk.bf16.vlgmr.msra.gmra.mxu1 %vm3135_vm14, %v8937_v43 }
 0x31a   : > { %6923 = vmatprep.mubr.msk.bf16.mxu1 %vm3135_vm14, %v8963_v5 }
 0x31d   : > { %3653 = vmatmul.mubr.bf16.gmra.mxu0 %v8740_v56 }
 0x31e   : > { %3660 = vmatprep.mubr.bf16.mxu0 %v8754_v38 }
 0x321   : > { %6924 = vmatmul.mubr.msk.bf16.gmra.mxu1 %vm3135_vm14, %v8989_v55 }
 0x322   : > { %6927 = vmatprep.mubr.msk.bf16.mxu1 %vm3135_vm14, %v9011_v31 }
 0x325   : > { %3661 = vmatmul.mubr.bf16.gmra.mxu0 %v8776_v41 }
 0x326   : > { %3668 = vmatprep.mubr.bf16.mxu0 %v8791_v42 }
 0x329   : > { %6928 = vmatmul.mubr.msk.bf16.gmra.mxu1 %vm3135_vm14, %v9037_v59 }
 0x32a   : > { %6931 = vmatprep.mubr.msk.bf16.mxu1 %vm3135_vm14, %v9063_v14 }
 0x32d   : > { %3669 = vmatmul.mubr.bf16.gmra.mxu0 %v8820_v15 }
 0x331   : > { %6932 = vmatmul.mubr.msk.bf16.gmra.mxu1 %vm3135_vm14, %v7137_v2 }
 0x345   : > { %v9156_v7 = vpop.f32.mrf.mxu0 }
 0x347   : > { %v9158_v45 = vpop.f32.mrf.mxu0 }
 0x349   : > { %v9160_v46 = vpop.f32.mrf.mxu0  ;;  %v9162_v56 = vpop.f32.mrf.mxu1 }
 0x34b   : > { %v9164_v38 = vpop.f32.mrf.mxu0  ;;  %v9166_v41 = vpop.f32.mrf.mxu1 }
 0x34d   : > { %v9168_v42 = vpop.f32.mrf.mxu0  ;;  %v9170_v12 = vpop.f32.mrf.mxu1 }
 0x34f   : > { %v9172_v39 = vpop.f32.mrf.mxu0  ;;  %v9174_v15 = vpop.f32.mrf.mxu1 }
 0x351   : > { %v9176_v43 = vpop.f32.mrf.mxu0  ;;  %v9178_v5 = vpop.f32.mrf.mxu1 }
 0x353   : > { %v9180_v55 = vpop.f32.mrf.mxu0  ;;  %v9182_v31 = vpop.f32.mrf.mxu1 }
 0x355   : > { %v9184_v14 = vpop.f32.mrf.mxu0  ;;  %v9186_v59 = vpop.f32.mrf.mxu1 }
 0x357   : > { %v9188_v2 = vpop.f32.mrf.mxu0  ;;  %v9190_v54 = vpop.f32.mrf.mxu1 }
 0x359   : > { %v9192_v35 = vpop.f32.mrf.mxu0  ;;  %v9194_v17 = vpop.f32.mrf.mxu1 }
 0x35a   : > { %11983 = vst [vmem:[#allocation44_spill] sm:$0xff] %v9192_v35  ;;  %11984 = vst [vmem:[#allocation45_spill] sm:$0xff] %v9194_v17 }
 0x35b   : > { %v9196_v29 = vpop.f32.mrf.mxu0  ;;  %v9198_v51 = vpop.f32.mrf.mxu1 }
 0x35c   : > { %11985 = vst [vmem:[#allocation46_spill] sm:$0xff] %v9196_v29  ;;  %11986 = vst [vmem:[#allocation47_spill] sm:$0xff] %v9198_v51 }
 0x35d   : > { %v9200_v32 = vpop.f32.mrf.mxu0  ;;  %v9202_v34 = vpop.f32.mrf.mxu1 }
 0x35e   : > { %11987 = vst [vmem:[#allocation48_spill] sm:$0xff] %v9200_v32  ;;  %11988 = vst [vmem:[#allocation49_spill] sm:$0xff] %v9202_v34 }
 0x35f   : > { %v9204_v19 = vpop.f32.mrf.mxu0  ;;  %v9206_v3 = vpop.f32.mrf.mxu1 }
 0x360   : > { %11989 = vst [vmem:[#allocation50_spill] sm:$0xff] %v9204_v19  ;;  %11990 = vst [vmem:[#allocation51_spill] sm:$0xff] %v9206_v3 }
 0x361   : > { %v9208_v11 = vpop.f32.mrf.mxu0  ;;  %v9210_v23 = vpop.f32.mrf.mxu1 }
 0x362   : > { %11991 = vst [vmem:[#allocation52_spill] sm:$0xff] %v9208_v11  ;;  %11992 = vst [vmem:[#allocation53_spill] sm:$0xff] %v9210_v23 }
 0x363   : > { %v9212_v0 = vpop.f32.mrf.mxu0  ;;  %v9214_v33 = vpop.f32.mrf.mxu1 }
 0x364   : > { %11993 = vst [vmem:[#allocation54_spill] sm:$0xff] %v9212_v0  ;;  %11994 = vst [vmem:[#allocation55_spill] sm:$0xff] %v9214_v33  ;;  %v9236_v33 = vpop.permute.xlu0 %4291 }
 0x365   : > { %v9216_v22 = vpop.f32.mrf.mxu0  ;;  %v9218_v49 = vpop.f32.mrf.mxu1  ;;  %12005 = vst [vmem:[#allocation66_spill] sm:$0xff] %v9236_v33 }
 0x366   : > { %11995 = vst [vmem:[#allocation56_spill] sm:$0xff] %v9216_v22  ;;  %11996 = vst [vmem:[#allocation57_spill] sm:$0xff] %v9218_v49 }
 0x367   : > { %v9220_v30 = vpop.f32.mrf.mxu0  ;;  %v9222_v32 = vpop.f32.mrf.mxu1 }
 0x368   : > { %11997 = vst [vmem:[#allocation58_spill] sm:$0xff] %v9220_v30  ;;  %11998 = vst [vmem:[#allocation59_spill] sm:$0xff] %v9222_v32  ;;  %v4318_v30 = vpop.permute.xlu1 %4317 }
 0x369   : > { %v9224_v34 = vpop.f32.mrf.mxu0  ;;  %v9226_v19 = vpop.f32.mrf.mxu1 }
 0x36a   : > { %11999 = vst [vmem:[#allocation60_spill] sm:$0xff] %v9224_v34  ;;  %12000 = vst [vmem:[#allocation61_spill] sm:$0xff] %v9226_v19 }
 0x36b   : > { %v9228_v3 = vpop.f32.mrf.mxu0  ;;  %v9230_v11 = vpop.f32.mrf.mxu1 }
 0x36c   : > { %12001 = vst [vmem:[#allocation62_spill] sm:$0xff] %v9228_v3  ;;  %12002 = vst [vmem:[#allocation63_spill] sm:$0xff] %v9230_v11  ;;  %v4320_v11 = vpop.permute.xlu0 %4319 }
 0x36d   : > { %v9232_v23 = vpop.f32.mrf.mxu0  ;;  %v9234_v0 = vpop.f32.mrf.mxu1 }
 0x36e   : > { %12003 = vst [vmem:[#allocation64_spill] sm:$0xff] %v9232_v23  ;;  %12004 = vst [vmem:[#allocation65_spill] sm:$0xff] %v9234_v0  ;;  %v9254_v0 = vpop.permute.xlu1 %4321 }
 0x36f   : > { %v9238_v22 = vpop.f32.mrf.mxu0  ;;  %v9240_v49 = vpop.f32.mrf.mxu1  ;;  %12014 = vst [vmem:[#allocation75_spill] sm:$0xff] %v9254_v0 }
 0x370   : > { %12006 = vst [vmem:[#allocation67_spill] sm:$0xff] %v9238_v22  ;;  %12007 = vst [vmem:[#allocation68_spill] sm:$0xff] %v9240_v49 }
 0x371   : > { %v9242_v32 = vpop.f32.mrf.mxu0  ;;  %v9244_v34 = vpop.f32.mrf.mxu1 }
 0x372   : > { %12008 = vst [vmem:[#allocation69_spill] sm:$0xff] %v9242_v32  ;;  %12009 = vst [vmem:[#allocation70_spill] sm:$0xff] %v9244_v34  ;;  %v4348_v34 = vpop.permute.xlu0 %4347 }
 0x373   : > { %v9246_v19 = vpop.f32.mrf.mxu0  ;;  %v9248_v3 = vpop.f32.mrf.mxu1 }
 0x374   : > { %12010 = vst [vmem:[#allocation71_spill] sm:$0xff] %v9246_v19  ;;  %12011 = vst [vmem:[#allocation72_spill] sm:$0xff] %v9248_v3  ;;  %v9268_v3 = vpop.permute.xlu1 %4349 }
 0x375   : > { %v9250_v51 = vpop.f32.mrf.mxu0  ;;  %v9252_v23 = vpop.f32.mrf.mxu1 }
 0x376   : > { %12012 = vst [vmem:[#allocation73_spill] sm:$0xff] %v9250_v51  ;;  %12013 = vst [vmem:[#allocation74_spill] sm:$0xff] %v9252_v23 }
 0x377   : > { %v9256_v29 = vpop.f32.mrf.mxu0  ;;  %v9258_v22 = vpop.f32.mrf.mxu1 }
 0x378   : > { %12015 = vst [vmem:[#allocation76_spill] sm:$0xff] %v9256_v29  ;;  %12016 = vst [vmem:[#allocation77_spill] sm:$0xff] %v9258_v22  ;;  %v9278_v22 = vpop.permute.xlu0 %4351  ;;  %v9284_v24 = vpop.permute.xlu1 %4379 }
 0x379   : > { %v9260_v49 = vpop.f32.mrf.mxu0  ;;  %v9262_v32 = vpop.f32.mrf.mxu1  ;;  %12023 = vst [vmem:[#allocation84_spill] sm:$0xff] %v9278_v22 }
 0x37a   : > { %12017 = vst [vmem:[#allocation78_spill] sm:$0xff] %v9260_v49  ;;  %12018 = vst [vmem:[#allocation79_spill] sm:$0xff] %v9262_v32 }
 0x37b   : > { %v9264_v17 = vpop.f32.mrf.mxu0  ;;  %v9266_v19 = vpop.f32.mrf.mxu1 }
 0x37c   : > { %12019 = vst [vmem:[#allocation80_spill] sm:$0xff] %v9266_v19  ;;  %v9289_v19 = vsel %vm3936_vm15, %v8942_v58, %v8928_v48  ;;  %v9313_v58 = vsel %vm4053_vm3, %v9017_v47, %v9001_v1  ;;  %vm4353_vm15 = vcmask 539648   ;;  %v9333_v47 = vsel %vm1225_vm11, %v9087_v61, %v9076_v18 }
 0x37d   : > { %v9270_v51 = vpop.f32.mrf.mxu0  ;;  %v9272_v23 = vpop.f32.mrf.mxu1  ;;  %12026 = vst [vmem:[#allocation87_spill] sm:$0xff] %v9289_v19  ;;  %12030 = vst [vmem:[#allocation91_spill] sm:$0xff] %v9313_v58  ;;  %v9354_v61 = vsel %vm1354_vm9, %v9117_v62, %v9125_v63  ;;  %v9366_v18 = vsel %vm1612_vm6, %v4318_v30, %v4320_v11  ;;  %v9374_v62 = vsel %vm4353_vm15, %v4348_v34, %v9268_v3  ;;  %vm4519_vm9 = vcmask 375808  }
 0x37e   : > { %12020 = vst [vmem:[#allocation81_spill] sm:$0xff] %v9272_v23  ;;  %v9294_v23 = vsel %vm3963_vm0, %v8940_v26, %v8968_v6  ;;  %v9318_v26 = vsel %vm4083_vm4, %v9014_v20, %v9043_v57  ;;  %12034 = vst [vmem:[#allocation95_spill] sm:$0xff] %v9333_v47  ;;  %v9338_v20 = vsel %vm4203_vm13, %v9085_v16, %v9103_v28  ;;  %v9356_v16 = vpop.permute.xlu0 %4381  ;;  %v9382_v30 = vpop.permute.xlu1 %4383  ;;  %vm4387_vm4 = vcmask 408576  }
 0x37f   : > { %v9274_v35 = vpop.f32.mrf.mxu0  ;;  %v9276_v29 = vpop.f32.mrf.mxu1  ;;  %12027 = vst [vmem:[#allocation88_spill] sm:$0xff] %v9294_v23  ;;  %12031 = vst [vmem:[#allocation92_spill] sm:$0xff] %v9318_v26  ;;  %v9361_v28 = vsel %vm1483_vm8, %v9130_v10, %v9236_v33  ;;  %v3199_v63 = vadd.f32 %v9160_v46, %v8810_v27  ;;  %v3201_v33 = vadd.f32 %v9164_v38, %v8810_v27  ;;  %vm4585_vm11 = vcmask 236544  }
 0x380   : > { %12021 = vst [vmem:[#allocation82_spill] sm:$0xff] %v9274_v35  ;;  %12022 = vst [vmem:[#allocation83_spill] sm:$0xff] %v9276_v29  ;;  %v9299_v29 = vsel %vm3993_vm1, %v8977_v37, %v8966_v13  ;;  %v9308_v35 = vsel %vm4023_vm2, %v8975_v50, %v9003_v4  ;;  %v9323_v37 = vsel %vm966_vm7, %v9052_v60, %v9041_v44  ;;  %v3915_v4 = vlaneseq }
 0x381   : > { %v9280_v49 = vpop.f32.mrf.mxu0  ;;  %v9282_v32 = vpop.f32.mrf.mxu1  ;;  %12028 = vst [vmem:[#allocation89_spill] sm:$0xff] %v9299_v29  ;;  %12029 = vst [vmem:[#allocation90_spill] sm:$0xff] %v9308_v35  ;;  %v9328_v50 = vsel %vm1096_vm5, %v9050_v52, %v9078_v8  ;;  %v3195_v60 = vadd.f32 %v9156_v7, %v8770_v36  ;;  %v3197_v52 = vadd.f32 %v9158_v45, %v8770_v36  ;;  %v12070_v35 = vld [vmem:[#allocation14_spill] sm:$0xff]  ;;  %v12072_v29 = vld [vmem:[#allocation61_spill] sm:$0xff]  ;;  %vm12103_vm5 = vcmask 392192  }
 0x382   : > { %12024 = vst [vmem:[#allocation85_spill] sm:$0xff] %v9280_v49  ;;  %12025 = vst [vmem:[#allocation86_spill] sm:$0xff] %v9282_v32  ;;  %v9349_v8 = vsel %vm4233_vm10, %v9109_v25, %v9106_v9  ;;  %v9370_v25 = vsel %vm1612_vm6, %v4320_v11, %v9254_v0  ;;  %v3205_v11 = vadd.f32 %v9168_v42, %v8786_v40  ;;  %vm12119_vm7 = vcmask 384000  }
 0x383   : > { %v9301_v49 = vpop.f32.mrf.mxu0  ;;  %v9303_v32 = vpop.f32.mrf.mxu1  ;;  %12032 = vst [vmem:[#allocation93_spill] sm:$0xff] %v9323_v37  ;;  %12033 = vst [vmem:[#allocation94_spill] sm:$0xff] %v9328_v50  ;;  %v3308_v10 = vadd.f32 %v9162_v56, %v3195_v60  ;;  %v3310_v9 = vadd.f32 %v9166_v41, %v3197_v52  ;;  %v3207_v0 = vadd.f32 %v9172_v39, %v8786_v40  ;;  %v12066_v50 = vld [vmem:[#allocation58_spill] sm:$0xff]  ;;  %vm4552_vm10 = vcmask 244736  }
 0x384   : > { %12035 = vst [vmem:[#allocation96_spill] sm:$0xff] %v9338_v20  ;;  %12036 = vst [vmem:[#allocation97_spill] sm:$0xff] %v9349_v8  ;;  %v3209_v34 = vadd.f32 %v9176_v43, %v8831_v53  ;;  %v3312_v56 = vadd.f32 %v9170_v12, %v3199_v63  ;;  %v3314_v38 = vadd.f32 %v9174_v15, %v3201_v33  ;;  %v12043_v33 = vld [vmem:[#allocation10_spill] sm:$0xff]  ;;  %v12044_v12 = vld [vmem:[#allocation44_spill] sm:$0xff]  ;;  %vm4618_vm13 = vcmask 228352  }
 0x385   : > { %v9340_v57 = vpop.f32.mrf.mxu1  ;;  %v3420_v1 = vpop.f32.mrf.mxu0  ;;  %12037 = vst [vmem:[#allocation98_spill] sm:$0xff] %v9354_v61  ;;  %12038 = vst [vmem:[#allocation99_spill] sm:$0xff] %v9361_v28  ;;  %v3211_v41 = vadd.f32 %v9180_v55, %v8831_v53  ;;  %v3215_v60 = vadd.f32 %v9184_v14, %v8802_v21  ;;  %v3318_v42 = vadd.f32 %v9178_v5, %v3205_v11  ;;  %v12045_v55 = vld [vmem:[#allocation45_spill] sm:$0xff]  ;;  %v3916_v28 = vshrl.u32 %v3915_v4, 7  ;;  %v12055_v4 = vld [vmem:[#allocation12_spill] sm:$0xff] }
 0x386   : > { %12039 = vst [vmem:[#allocation100_spill] sm:$0xff] %v9366_v18  ;;  %12040 = vst [vmem:[#allocation101_spill] sm:$0xff] %v9370_v25  ;;  %v3320_v39 = vadd.f32 %v9182_v31, %v3207_v0  ;;  %v3322_v52 = vadd.f32 %v9186_v59, %v3209_v34  ;;  %v3217_v43 = vadd.f32 %v9188_v2, %v8802_v21  ;;  %v9409_v5 = vpop.permute.xlu0 %4385  ;;  %v12047_v0 = vld [vmem:[#allocation46_spill] sm:$0xff]  ;;  %v12048_v59 = vld [vmem:[#allocation47_spill] sm:$0xff]  ;;  %vm4651_vm0 = vcmask 220160  }
 0x387   : > { %v9363_v7 = vpop.f32.mrf.mxu1  ;;  %v3422_v45 = vpop.f32.mrf.mxu0  ;;  %12041 = vst [vmem:[#allocation102_spill] sm:$0xff] %v9374_v62  ;;  %12042 = vst [vmem:[#allocation103_spill] sm:$0xff] %v9382_v30  ;;  %v3324_v63 = vadd.f32 %v9190_v54, %v3211_v41  ;;  %v3219_v15 = vadd.f32 %v12044_v12, %v12043_v33  ;;  %v9405_v48 = vadd.f32 %v12045_v55, %v3215_v60  ;;  %v12049_v2 = vld [vmem:[#allocation8_spill] sm:$0xff]  ;;  %v12051_v12 = vld [vmem:[#allocation49_spill] sm:$0xff]  ;;  %v9457_v20 = vsub.s32 1, %v3916_v28 }
 0x388   : > { %12046 = vst [vmem:[#allocation44_spill] sm:$0xff] %v9409_v5  ;;  %v3221_v31 = vadd.f32 %v12047_v0, %v12043_v33  ;;  %v9414_v11 = vadd.f32 %v12048_v59, %v3217_v43  ;;  %v12050_v34 = vld [vmem:[#allocation48_spill] sm:$0xff]  ;;  %v9421_v60 = vadd.f32 %v3420_v1, %v3308_v10  ;;  %v9430_v43 = vpop.permute.xlu1 %4412  ;;  %v12053_v55 = vld [vmem:[#allocation50_spill] sm:$0xff]  ;;  %v12054_v59 = vld [vmem:[#allocation51_spill] sm:$0xff]  ;;  %v9442_v5 = vadd.f32 %v3422_v45, %v3310_v9 }
 0x389   : > { %v3424_v44 = vpop.f32.mrf.mxu0  ;;  %v6787_v46 = vpop.f32.mrf.mxu1  ;;  %v3225_v25 = vadd.f32 %v12050_v34, %v12049_v2  ;;  %v9419_v61 = vadd.f32 %v12051_v12, %v3219_v15  ;;  %v3227_v0 = vadd.f32 %v12053_v55, %v12049_v2  ;;  %v12056_v15 = vld [vmem:[#allocation52_spill] sm:$0xff]  ;;  %v12057_v1 = vld [vmem:[#allocation53_spill] sm:$0xff]  ;;  %12061 = vst [vmem:[#allocation47_spill] sm:$0xff] %v9457_v20  ;;  %v9494_v19 = vsub.s32 4, %v3916_v28  ;;  %vm12108_vm6 = vmmov %vm12103_vm5 }
 0x38a   : > { %v9435_v34 = vadd.f32 %v12054_v59, %v3221_v31  ;;  %v3229_v12 = vadd.f32 %v12056_v15, %v12055_v4  ;;  %v12058_v31 = vld [vmem:[#allocation54_spill] sm:$0xff]  ;;  %v12059_v59 = vld [vmem:[#allocation55_spill] sm:$0xff]  ;;  %v9459_v9 = vadd.f32 %v3424_v44, %v3312_v56  ;;  %v9474_v56 = vsub.s32 3, %v3916_v28  ;;  %v12099_v21 = vld [vmem:[#allocation77_spill] sm:$0xff] }
 0x38b   : > { %v3426_v13 = vpop.f32.mrf.mxu0  ;;  %v6788_v6 = vpop.f32.mrf.mxu1  ;;  %v9440_v10 = vadd.f32 %v12057_v1, %v3225_v25  ;;  %v3231_v55 = vadd.f32 %v12058_v31, %v12055_v4  ;;  %v9453_v8 = vadd.f32 %v12059_v59, %v3227_v0  ;;  %v9455_v1 = vsub.s32 0, %v3916_v28  ;;  %v12064_v31 = vld [vmem:[#allocation56_spill] sm:$0xff]  ;;  %v12065_v59 = vld [vmem:[#allocation57_spill] sm:$0xff]  ;;  %12073 = vst [vmem:[#allocation51_spill] sm:$0xff] %v9494_v19  ;;  %vm12122_vm8 = vmmov %vm12119_vm7 }
 0x38c   : > { %v9407_v14 = vadd.f32 %v6788_v6, %v6787_v46  ;;  %v9428_v46 = vsel %vm4353_vm15, %v9268_v3, %v9278_v22  ;;  %v9470_v47 = vadd.f32 %v12065_v59, %v3229_v12  ;;  %12067 = vst [vmem:[#allocation49_spill] sm:$0xff] %v9474_v56  ;;  %v9476_v58 = vadd.f32 %v3426_v13, %v3314_v38  ;;  %v12069_v12 = vld [vmem:[#allocation59_spill] sm:$0xff]  ;;  %vm12499_vm2 = vmmov %vm12119_vm7 }
 0x38d   : > { %v3430_v54 = vpop.f32.mrf.mxu0  ;;  %v6790_v41 = vpop.f32.mrf.mxu1  ;;  %12052 = vst [vmem:[#allocation45_spill] sm:$0xff] %v9428_v46  ;;  %12060 = vst [vmem:[#allocation46_spill] sm:$0xff] %v9455_v1  ;;  %v9487_v59 = vadd.f32 %v12069_v12, %v3231_v55  ;;  %v12075_v55 = vld [vmem:[#allocation62_spill] sm:$0xff]  ;;  %vm4684_vm1 = vcmask 211968  }
 0x38e   : > { %v9423_v6 = vadd.f32 %v3430_v54, %v3318_v42 }
 0x38f   : > { %v3432_v42 = vpop.f32.mrf.mxu0  ;;  %v6791_v54 = vpop.f32.mrf.mxu1 }
 0x390   : > { %v3793_v3 = vmax.f32 %v9421_v60, %v9423_v6  ;;  %v9446_v22 = vadd.f32 %v3432_v42, %v3320_v39  ;;  %v9448_v46 = vadd.f32 %v6791_v54, %v6790_v41  ;;  %v9465_v41 = vsub.s32 2, %v3916_v28  ;;  %v4415_v42 = vpop.permute.xlu0 %4414  ;;  %v12063_v54 = vld [vmem:[#allocation9_spill] sm:$0xff] }
 0x391   : > { %v3434_v15 = vpop.f32.mrf.mxu0  ;;  %v6793_v25 = vpop.f32.mrf.mxu1  ;;  %v3235_v0 = vadd.f32 %v12064_v31, %v12063_v54  ;;  %v3237_v37 = vadd.f32 %v12066_v50, %v12063_v54  ;;  %v12071_v50 = vld [vmem:[#allocation60_spill] sm:$0xff] }
 0x392   : > { %v3802_v45 = vmax.f32 %v9442_v5, %v9446_v22  ;;  %v9463_v39 = vadd.f32 %v3434_v15, %v3322_v52  ;;  %12062 = vst [vmem:[#allocation48_spill] sm:$0xff] %v9465_v41  ;;  %v9484_v31 = vpop.permute.xlu1 %4416  ;;  %v3239_v18 = vadd.f32 %v12071_v50, %v12070_v35  ;;  %v12077_v50 = vld [vmem:[#allocation11_spill] sm:$0xff]  ;;  %v9507_v41 = vsub.s32 6, %v3916_v28 }
 0x393   : > { %v3436_v26 = vpop.f32.mrf.mxu0  ;;  %v6794_v44 = vpop.f32.mrf.mxu1  ;;  %12068 = vst [vmem:[#allocation50_spill] sm:$0xff] %v9484_v31  ;;  %v9492_v23 = vadd.f32 %v12072_v29, %v3235_v0  ;;  %v12078_v29 = vld [vmem:[#allocation64_spill] sm:$0xff] }
 0x394   : > { %v3794_v52 = vmax.f32 %v9459_v9, %v9463_v39  ;;  %v9480_v15 = vadd.f32 %v3436_v26, %v3324_v63  ;;  %v9482_v62 = vadd.f32 %v6794_v44, %v6793_v25  ;;  %v9498_v63 = vsub.s32 5, %v3916_v28  ;;  %v12076_v44 = vld [vmem:[#allocation63_spill] sm:$0xff]  ;;  %12079 = vst [vmem:[#allocation53_spill] sm:$0xff] %v9507_v41  ;;  %v9514_v4 = vpop.permute.xlu0 %4418 }
 0x395   : > { %v3440_v13 = vpop.f32.mrf.mxu0  ;;  %v6796_v38 = vpop.f32.mrf.mxu1  ;;  %v3241_v25 = vadd.f32 %v12075_v55, %v12070_v35  ;;  %v9503_v12 = vadd.f32 %v12076_v44, %v3237_v37  ;;  %v3245_v0 = vadd.f32 %v12078_v29, %v12077_v50  ;;  %12081 = vst [vmem:[#allocation54_spill] sm:$0xff] %v9514_v4  ;;  %v12082_v55 = vld [vmem:[#allocation67_spill] sm:$0xff]  ;;  %v12083_v44 = vld [vmem:[#allocation68_spill] sm:$0xff]  ;;  %v9521_v29 = vsub.s32 7, %v3916_v28 }
 0x396   : > { %v3795_v56 = vmax.f32 %v3793_v3, %v3794_v52  ;;  %v3803_v26 = vmax.f32 %v9476_v58, %v9480_v15  ;;  %12074 = vst [vmem:[#allocation52_spill] sm:$0xff] %v9498_v63  ;;  %v12080_v3 = vld [vmem:[#allocation65_spill] sm:$0xff]  ;;  %v3247_v37 = vadd.f32 %v12082_v55, %v12077_v50  ;;  %v9526_v41 = vsel %vm4387_vm4, %v9284_v24, %v9356_v16  ;;  %v4446_v50 = vpop.permute.xlu1 %4445 }
 0x397   : > { %v3442_v20 = vpop.f32.mrf.mxu0  ;;  %v6797_v19 = vpop.f32.mrf.mxu1  ;;  %v9510_v52 = vadd.f32 %v12080_v3, %v3239_v18  ;;  %v9519_v35 = vadd.f32 %v12083_v44, %v3241_v25  ;;  %12084 = vst [vmem:[#allocation55_spill] sm:$0xff] %v9521_v29  ;;  %12085 = vst [vmem:[#allocation56_spill] sm:$0xff] %v9526_v41  ;;  %v12089_v25 = vld [vmem:[#allocation71_spill] sm:$0xff]  ;;  %v12090_v44 = vld [vmem:[#allocation72_spill] sm:$0xff]  ;;  %v9541_v24 = vsel %vm4387_vm4, %v9356_v16, %v9382_v30 }
 0x398   : > { %v3796_v1 = vrot.slane %v3795_v56, 4  ;;  %v3804_v54 = vmax.f32 %v3802_v45, %v3803_v26  ;;  %v9512_v63 = vadd.f32 %v6797_v19, %v6796_v38  ;;  %v12086_v45 = vld [vmem:[#allocation16_spill] sm:$0xff]  ;;  %v12087_v19 = vld [vmem:[#allocation69_spill] sm:$0xff]  ;;  %v12088_v26 = vld [vmem:[#allocation70_spill] sm:$0xff]  ;;  %v9536_v29 = vadd.f32 %v12090_v44, %v3247_v37  ;;  %12091 = vst [vmem:[#allocation57_spill] sm:$0xff] %v9541_v24 }
 0x399   : > { %v3444_v18 = vpop.f32.mrf.mxu0  ;;  %v6799_v3 = vpop.f32.mrf.mxu1  ;;  %v3249_v38 = vadd.f32 %v12087_v19, %v12086_v45  ;;  %v9531_v4 = vadd.f32 %v12088_v26, %v3245_v0  ;;  %v3251_v28 = vadd.f32 %v12089_v25, %v12086_v45  ;;  %v9545_v0 = vsel %vm1741_vm12, %v9430_v43, %v4415_v42  ;;  %v12095_v37 = vld [vmem:[#allocation13_spill] sm:$0xff]  ;;  %v12097_v45 = vld [vmem:[#allocation74_spill] sm:$0xff]  ;;  %v12098_v30 = vld [vmem:[#allocation76_spill] sm:$0xff] }
 0x39a   : > { %v3797_v2 = vmax.f32 %v3795_v56, %v3796_v1  ;;  %v3805_v55 = vrot.slane %v3804_v54, 4  ;;  %12092 = vst [vmem:[#allocation58_spill] sm:$0xff] %v9545_v0  ;;  %v9551_v26 = vsel %vm1741_vm12, %v4415_v42, %v9484_v31  ;;  %v12096_v25 = vld [vmem:[#allocation73_spill] sm:$0xff]  ;;  %v3257_v24 = vadd.f32 %v12098_v30, %v12095_v37 }
 0x39b   : > { %v3446_v41 = vpop.f32.mrf.mxu0  ;;  %v6800_v33 = vpop.f32.mrf.mxu1  ;;  %12094 = vst [vmem:[#allocation60_spill] sm:$0xff] %v9551_v26  ;;  %v3255_v44 = vadd.f32 %v12096_v25, %v12095_v37  ;;  %v9556_v16 = vadd.f32 %v12097_v45, %v3249_v38  ;;  %v9561_v43 = vadd.f32 %v12099_v21, %v3251_v28  ;;  %v12100_v31 = vld [vmem:[#allocation17_spill] sm:$0xff]  ;;  %v12101_v45 = vld [vmem:[#allocation78_spill] sm:$0xff]  ;;  %v12102_v26 = vld [vmem:[#allocation79_spill] sm:$0xff]  ;;  %v9575_v21 = vadd.f32 %v3442_v20, %v9414_v11 }
 0x39c   : > { %v3798_v1 = vrot.slane %v3797_v2, 2  ;;  %v3806_v56 = vmax.f32 %v3804_v54, %v3805_v55  ;;  %v9547_v19 = vadd.f32 %v6800_v33, %v6799_v3  ;;  %v9564_v55 = vadd.f32 %v3440_v13, %v9405_v48  ;;  %v4448_v25 = vpop.permute.xlu0 %4447  ;;  %v12106_v20 = vld [vmem:[#allocation80_spill] sm:$0xff] }
 0x39d   : > { %v3450_v0 = vpop.f32.mrf.mxu0  ;;  %v6802_v54 = vpop.f32.mrf.mxu1  ;;  %v3259_v38 = vadd.f32 %v12101_v45, %v12100_v31  ;;  %v9590_v11 = vadd.f32 %v12106_v20, %v3257_v24  ;;  %v12111_v20 = vld [vmem:[#allocation81_spill] sm:$0xff] }
 0x39e   : > { %12093 = vst [vmem:[#allocation59_spill] sm:$0xff] %v9547_v19  ;;  %v3799_v33 = vmax.f32 %v3797_v2, %v3798_v1  ;;  %v3807_v3 = vrot.slane %v3806_v56, 2  ;;  %v9567_v42 = vadd.f32 %v3450_v0, %v9440_v10  ;;  %v9572_v19 = vadd.f32 %v12102_v26, %v3255_v44  ;;  %v9585_v1 = vpop.permute.xlu1 %4449 }
 0x39f   : > { %v3452_v30 = vpop.f32.mrf.mxu0  ;;  %v6803_v28 = vpop.f32.mrf.mxu1  ;;  %v9578_v2 = vsel %vm12103_vm5, %v4446_v50, %v4448_v25  ;;  %12105 = vst [vmem:[#allocation62_spill] sm:$0xff] %v9585_v1  ;;  %v3261_v26 = vadd.f32 %v9264_v17, %v12100_v31  ;;  %12107 = vst [vmem:[#allocation63_spill] sm:$0xff] %v9590_v11  ;;  %v12110_v17 = vld [vmem:[#allocation15_spill] sm:$0xff] }
 0x3a0   : > { %12104 = vst [vmem:[#allocation61_spill] sm:$0xff] %v9578_v2  ;;  %v3800_v48 = vrot.slane %v3799_v33, 1  ;;  %v3808_v13 = vmax.f32 %v3806_v56, %v3807_v3  ;;  %v4703_v10 = vmax.f32 %v9564_v55, %v9567_v42  ;;  %v9583_v0 = vadd.f32 %v3452_v30, %v9453_v8 }
 0x3a1   : > { %v9592_v44 = vadd.f32 %v6803_v28, %v6802_v54  ;;  %v3454_v50 = vpop.f32.mrf.mxu0  ;;  %v6805_v45 = vpop.f32.mrf.mxu1  ;;  %v9596_v56 = vsel %vm12108_vm6, %v4448_v25, %v9585_v1  ;;  %v3265_v24 = vadd.f32 %v9270_v51, %v12110_v17  ;;  %v9606_v54 = vadd.f32 %v12111_v20, %v3259_v38  ;;  %v12113_v28 = vld [vmem:[#allocation82_spill] sm:$0xff] }
 0x3a2   : > { %12109 = vst [vmem:[#allocation64_spill] sm:$0xff] %v9596_v56  ;;  %v3801_v3 = vmax.f32 %v3799_v33, %v3800_v48  ;;  %v3809_v2 = vrot.slane %v3808_v13, 1  ;;  %v4712_v8 = vmax.f32 %v9575_v21, %v9583_v0  ;;  %v9601_v30 = vadd.f32 %v3454_v50, %v9470_v47  ;;  %v4479_v11 = vpop.permute.xlu1 %4478 }
 0x3a3   : > { %12112 = vst [vmem:[#allocation65_spill] sm:$0xff] %v9606_v54  ;;  %v3267_v31 = vadd.f32 %v12113_v28, %v12110_v17  ;;  %v9611_v25 = vadd.f32 %v3444_v18, %v9419_v61  ;;  %v3456_v33 = vpop.f32.mrf.mxu0  ;;  %v6806_v48 = vpop.f32.mrf.mxu1 }
 0x3a4   : > { %v3824_v1 = vsub.f32 %v9421_v60, %v3801_v3  ;;  %v3827_v56 = vsub.f32 %v9459_v9, %v3801_v3  ;;  %v3830_v47 = vsub.f32 %v9423_v6, %v3801_v3  ;;  %v3833_v50 = vsub.f32 %v9463_v39, %v3801_v3  ;;  %v9627_v6 = vpop.permute.xlu0 %4451 }
 0x3a5   : > { %v3810_v51 = vmax.f32 %v3808_v13, %v3809_v2  ;;  %v4704_v38 = vmax.f32 %v9611_v25, %v9601_v30  ;;  %v9620_v20 = vadd.f32 %v3456_v33, %v9487_v59  ;;  %v9622_v28 = vadd.f32 %v6806_v48, %v6805_v45  ;;  %v3460_v61 = vpop.f32.mrf.mxu0  ;;  %v6808_v18 = vpop.f32.mrf.mxu1  ;;  %12114 = vst [vmem:[#allocation67_spill] sm:$0xff] %v9627_v6  ;;  %v12117_v6 = vld [vmem:[#allocation85_spill] sm:$0xff] }
 0x3a6   : > { %v3836_v17 = vmul.f32 1.442695, %v3824_v1  ;;  %v3842_v37 = vmul.f32 1.442695, %v3827_v56  ;;  %v3848_v60 = vmul.f32 1.442695, %v3830_v47  ;;  %v9625_v9 = vadd.f32 %v3446_v41, %v9435_v34 }
 0x3a7   : > { %v3854_v39 = vmul.f32 1.442695, %v3833_v50  ;;  %v3825_v2 = vsub.f32 %v9442_v5, %v3810_v51  ;;  %v3828_v13 = vsub.f32 %v9476_v58, %v3810_v51  ;;  %v3831_v59 = vsub.f32 %v9446_v22, %v3810_v51  ;;  %v3462_v3 = vpop.f32.mrf.mxu0  ;;  %v6809_v45 = vpop.f32.mrf.mxu1  ;;  %v12115_v34 = vld [vmem:[#allocation83_spill] sm:$0xff] }
 0x3a8   : > { %7269 = vpow2.f32 %v3836_v17  ;;  %v3834_v33 = vsub.f32 %v9480_v15, %v3810_v51  ;;  %v4705_v1 = vmax.f32 %v4703_v10, %v4704_v38  ;;  %v4713_v56 = vmax.f32 %v9625_v9, %v9620_v20  ;;  %v12116_v58 = vld [vmem:[#allocation19_spill] sm:$0xff]  ;;  %v12118_v15 = vld [vmem:[#allocation86_spill] sm:$0xff] }
 0x3a9   : > { %v9636_v41 = vadd.f32 %v12115_v34, %v3261_v26  ;;  %7271 = vpow2.f32 %v3842_v37  ;;  %v3838_v48 = vmul.f32 1.442695, %v3825_v2  ;;  %v3844_v47 = vmul.f32 1.442695, %v3828_v13  ;;  %v3464_v5 = vpop.f32.mrf.mxu0  ;;  %v6811_v50 = vpop.f32.mrf.mxu1 }
 0x3aa   : > { %v3269_v22 = vadd.f32 %v12117_v6, %v12116_v58  ;;  %7273 = vpow2.f32 %v3848_v60  ;;  %v4706_v54 = vrot.slane %v4705_v1, 4  ;;  %v4714_v17 = vmax.f32 %v4712_v8, %v4713_v56  ;;  %v4481_v6 = vpop.permute.xlu0 %4480 }
 0x3ab   : > { %v9641_v10 = vadd.f32 %v12118_v15, %v3265_v24  ;;  %7275 = vpow2.f32 %v3854_v39  ;;  %v3850_v51 = vmul.f32 1.442695, %v3831_v59  ;;  %v9643_v38 = vadd.f32 %v6809_v45, %v6808_v18  ;;  %v3466_v26 = vpop.f32.mrf.mxu0  ;;  %v6812_v37 = vpop.f32.mrf.mxu1 }
 0x3ac   : > { %v3271_v2 = vadd.f32 %v9301_v49, %v12116_v58  ;;  %7277 = vpow2.f32 %v3838_v48  ;;  %v4707_v13 = vmax.f32 %v4705_v1, %v4706_v54  ;;  %v4715_v34 = vrot.slane %v4714_v17, 4 }
 0x3ad   : > { %v9648_v60 = vadd.f32 %v9303_v32, %v3267_v31  ;;  %7279 = vpow2.f32 %v3844_v47  ;;  %v3856_v8 = vmul.f32 1.442695, %v3834_v33  ;;  %v9650_v24 = vadd.f32 %v6812_v37, %v6811_v50  ;;  %v3470_v39 = vpop.f32.mrf.mxu0  ;;  %v6814_v59 = vpop.f32.mrf.mxu1 }
 0x3ae   : > { %v9653_v18 = vadd.f32 %v9340_v57, %v3269_v22  ;;  %v4708_v45 = vrot.slane %v4707_v13, 2  ;;  %v4716_v56 = vmax.f32 %v4714_v17, %v4715_v34  ;;  %v9656_v49 = vsel %vm12119_vm7, %v4479_v11, %v4481_v6  ;;  %v9672_v11 = vpop.permute.xlu1 %4482 }
 0x3af   : > { %12120 = vst [vmem:[#allocation68_spill] sm:$0xff] %v9656_v49  ;;  %7281 = vpow2.f32 %v3850_v51  ;;  %v9659_v54 = vadd.f32 %v3460_v61, %v9492_v23  ;;  %v9662_v32 = vadd.f32 %v3462_v3, %v9503_v12  ;;  %v9665_v31 = vadd.f32 %v3470_v39, %v9531_v4  ;;  %v3472_v33 = vpop.f32.mrf.mxu0  ;;  %v6815_v1 = vpop.f32.mrf.mxu1  ;;  %12121 = vst [vmem:[#allocation69_spill] sm:$0xff] %v9672_v11 }
 0x3b0   : > { %v4709_v48 = vmax.f32 %v4707_v13, %v4708_v45  ;;  %v4717_v57 = vrot.slane %v4716_v56, 2  ;;  %v9668_v47 = vadd.f32 %v3472_v33, %v9536_v29  ;;  %v9670_v50 = vadd.f32 %v6815_v1, %v6814_v59 }
 0x3b1   : > { %v9675_v23 = vadd.f32 %v9363_v7, %v3271_v2  ;;  %7283 = vpow2.f32 %v3856_v8  ;;  %v5279_v12 = vmax.f32 %v9659_v54, %v9665_v31  ;;  %v9681_v4 = vsel %vm12122_vm8, %v4481_v6, %v9672_v11  ;;  %v3474_v61 = vpop.f32.mrf.mxu0  ;;  %v6817_v3 = vpop.f32.mrf.mxu1 }
 0x3b2   : > { %12123 = vst [vmem:[#allocation70_spill] sm:$0xff] %v9681_v4  ;;  %v9685_v29 = vadd.f32 %v9407_v14, %v8770_v36  ;;  %v4710_v22 = vrot.slane %v4709_v48, 1  ;;  %v4718_v17 = vmax.f32 %v4716_v56, %v4717_v57  ;;  %v9691_v15 = vadd.f32 %v9448_v46, %v8810_v27  ;;  %v9703_v6 = vpop.permute.xlu0 %4484  ;;  %v12131_v57 = vld [vmem:[#allocation59_spill] sm:$0xff] }
 0x3b3   : > { %v9695_v51 = vadd.f32 %v9482_v62, %v8786_v40  ;;  %v9698_v37 = vadd.f32 %v3464_v5, %v9510_v52  ;;  %v9701_v2 = vadd.f32 %v3474_v61, %v9556_v16  ;;  %v3476_v36 = vpop.f32.mrf.mxu0  ;;  %v6818_v14 = vpop.f32.mrf.mxu1  ;;  %12127 = vst [vmem:[#allocation74_spill] sm:$0xff] %v9703_v6  ;;  %v9714_v40 = vadd.f32 %v9512_v63, %v8831_v53 }
 0x3b4   : > { %12124 = vst [vmem:[#allocation71_spill] sm:$0xff] %v9685_v29  ;;  %12125 = vst [vmem:[#allocation72_spill] sm:$0xff] %v9691_v15  ;;  %v4711_v13 = vmax.f32 %v4709_v48, %v4710_v22  ;;  %v4719_v34 = vrot.slane %v4718_v17, 1  ;;  %v9706_v8 = vadd.f32 %v3476_v36, %v9561_v43  ;;  %v9708_v27 = vadd.f32 %v6818_v14, %v6817_v3  ;;  %v4512_v22 = vpop.permute.xlu1 %4511  ;;  %v12139_v29 = vld [vmem:[#allocation8_spill] sm:$0xff] }
 0x3b5   : > { %12126 = vst [vmem:[#allocation73_spill] sm:$0xff] %v9695_v51  ;;  %v9710_v46 = vpop.eup %7269  ;;  %12128 = vst [vmem:[#allocation76_spill] sm:$0xff] %v9714_v40  ;;  %v9717_v62 = vadd.f32 %v3466_v26, %v9519_v35  ;;  %v5280_v52 = vmax.f32 %v9698_v37, %v9701_v2  ;;  %v9721_v16 = vpop.f32.mrf.mxu0  ;;  %v9781_v51 = vadd.f32 %v9622_v28, %v12139_v29 }
 0x3b6   : > { %v9723_v5 = vpop.f32.mrf.mxu1  ;;  %v9725_v43 = vpop.eup %7271  ;;  %v4734_v39 = vsub.f32 %v9564_v55, %v4711_v13  ;;  %v4737_v59 = vsub.f32 %v9611_v25, %v4711_v13  ;;  %v4740_v53 = vsub.f32 %v9567_v42, %v4711_v13  ;;  %v4743_v63 = vsub.f32 %v9601_v30, %v4711_v13  ;;  %v12130_v25 = vld [vmem:[#allocation7_spill] sm:$0xff] }
 0x3b7   : > { %v9731_v35 = vpop.eup %7273  ;;  %v3860_v26 = vadd.f32 %v9725_v43, %v9710_v46  ;;  %v4720_v45 = vmax.f32 %v4718_v17, %v4719_v34  ;;  %v5281_v56 = vmax.f32 %v5279_v12, %v5280_v52  ;;  %v5289_v33 = vmax.f32 %v9717_v62, %v9706_v8  ;;  %v9737_v1 = vpop.f32.mrf.mxu0  ;;  %12140 = vst [vmem:[#allocation83_spill] sm:$0xff] %v9781_v51 }
 0x3b8   : > { %v6821_v48 = vpop.f32.mrf.mxu1  ;;  %v9739_v55 = vpop.eup %7275  ;;  %v9743_v42 = vadd.f32 %v12131_v57, %v12130_v25  ;;  %v4746_v30 = vmul.f32 1.442695, %v4734_v39  ;;  %v4752_v61 = vmul.f32 1.442695, %v4737_v59  ;;  %v4758_v3 = vmul.f32 1.442695, %v4740_v53 }
 0x3b9   : > { %12129 = vst [vmem:[#allocation77_spill] sm:$0xff] %v9739_v55  ;;  %v9745_v36 = vpop.eup %7277  ;;  %v3861_v12 = vadd.f32 %v9731_v35, %v3860_v26  ;;  %v4764_v17 = vmul.f32 1.442695, %v4743_v63  ;;  %v4735_v14 = vsub.f32 %v9575_v21, %v4720_v45  ;;  %v4738_v13 = vsub.f32 %v9625_v9, %v4720_v45  ;;  %v9750_v34 = vpop.f32.mrf.mxu0 }
 0x3ba   : > { %12132 = vst [vmem:[#allocation78_spill] sm:$0xff] %v9743_v42  ;;  %v6823_v52 = vpop.f32.mrf.mxu1  ;;  %v9752_v7 = vpop.eup %7279  ;;  %7285 = vpow2.f32 %v4746_v30  ;;  %v4741_v39 = vsub.f32 %v9583_v0, %v4720_v45  ;;  %v4744_v59 = vsub.f32 %v9620_v20, %v4720_v45  ;;  %v5282_v53 = vrot.slane %v5281_v56, 4 }
 0x3bb   : > { %v4514_v25 = vpop.permute.xlu0 %4513  ;;  %v3862_v57 = vadd.f32 %v9739_v55, %v3861_v12  ;;  %v3869_v63 = vadd.f32 %v9752_v7, %v9745_v36  ;;  %7287 = vpow2.f32 %v4752_v61  ;;  %v4748_v21 = vmul.f32 1.442695, %v4735_v14  ;;  %v9759_v9 = vpop.f32.mrf.mxu0  ;;  %v12135_v14 = vld [vmem:[#allocation10_spill] sm:$0xff] }
 0x3bc   : > { %v6824_v26 = vpop.f32.mrf.mxu1  ;;  %v9761_v11 = vpop.eup %7281  ;;  %7289 = vpow2.f32 %v4758_v3  ;;  %v4754_v30 = vmul.f32 1.442695, %v4738_v13  ;;  %v4760_v6 = vmul.f32 1.442695, %v4741_v39  ;;  %v9764_v0 = vsel %vm4519_vm9, %v4512_v22, %v4514_v25 }
 0x3bd   : > { %12133 = vst [vmem:[#allocation79_spill] sm:$0xff] %v9764_v0  ;;  %v3863_v20 = vrot.slane %v3862_v57, 4  ;;  %v3870_v45 = vadd.f32 %v9761_v11, %v3869_v63  ;;  %7291 = vpow2.f32 %v4764_v17  ;;  %v5283_v12 = vmax.f32 %v5281_v56, %v5282_v53  ;;  %v3490_v42 = vpop.f32.mrf.mxu0  ;;  %v9776_v39 = vpop.permute.xlu1 %4515 }
 0x3be   : > { %v6826_v15 = vpop.f32.mrf.mxu1  ;;  %v9767_v61 = vpop.eup %7283  ;;  %v9771_v55 = vadd.f32 %v9592_v44, %v12135_v14  ;;  %7293 = vpow2.f32 %v4748_v21  ;;  %v4766_v3 = vmul.f32 1.442695, %v4744_v59  ;;  %v12137_v13 = vmax.f32 %v9662_v32, %v9668_v47  ;;  %12138 = vst [vmem:[#allocation82_spill] sm:$0xff] %v9776_v39 }
 0x3bf   : > { %12134 = vst [vmem:[#allocation80_spill] sm:$0xff] %v9767_v61  ;;  %v3864_v40 = vadd.f32 %v3863_v20, %v3862_v57  ;;  %v3871_v17 = vadd.f32 %v9767_v61, %v3870_v45  ;;  %7295 = vpow2.f32 %v4754_v30  ;;  %v5284_v56 = vrot.slane %v5283_v12, 2  ;;  %v3492_v53 = vpop.f32.mrf.mxu0 }
 0x3c0   : > { %12136 = vst [vmem:[#allocation81_spill] sm:$0xff] %v9771_v55  ;;  %v5290_v22 = vmax.f32 %v12137_v13, %v5289_v33  ;;  %v6827_v63 = vpop.f32.mrf.mxu1  ;;  %v9784_v59 = vadd.f32 %v6821_v48, %v9723_v5  ;;  %v9788_v33 = vsel %vm4519_vm9, %v4514_v25, %v9776_v39  ;;  %7297 = vpow2.f32 %v4760_v6 }
 0x3c1   : > { %12141 = vst [vmem:[#allocation19_spill] sm:$0xff] %v9788_v33  ;;  %v3865_v21 = vrot.slane %v3864_v40, 2  ;;  %v3872_v57 = vrot.slane %v3871_v17, 4  ;;  %v5285_v20 = vmax.f32 %v5283_v12, %v5284_v56  ;;  %v3494_v30 = vpop.f32.mrf.mxu0  ;;  %7299 = vpow2.f32 %v4766_v3  ;;  %v12143_v56 = vld [vmem:[#allocation63_spill] sm:$0xff] }
 0x3c2   : > { %v5291_v44 = vrot.slane %v5290_v22, 4  ;;  %v9790_v45 = vpop.f32.mrf.mxu1  ;;  %v9794_v28 = vadd.f32 %v9721_v16, %v9572_v19  ;;  %v9796_v29 = vadd.f32 %v6824_v26, %v6823_v52  ;;  %v9799_v25 = vadd.f32 %v3490_v42, %v9641_v10 }
 0x3c3   : > { %v3866_v5 = vadd.f32 %v3865_v21, %v3864_v40  ;;  %v3873_v48 = vadd.f32 %v3872_v57, %v3871_v17  ;;  %v5286_v13 = vrot.slane %v5285_v20, 1  ;;  %v9801_v39 = vpop.f32.mrf.mxu0  ;;  %v9807_v3 = vadd.f32 %v9737_v1, %v12143_v56  ;;  %v12147_v1 = vld [vmem:[#allocation65_spill] sm:$0xff]  ;;  %v4545_v57 = vpop.permute.xlu1 %4544 }
 0x3c4   : > { %v5292_v14 = vmax.f32 %v5290_v22, %v5291_v44  ;;  %12142 = vst [vmem:[#allocation85_spill] sm:$0xff] %v9799_v25  ;;  %v9803_v6 = vpop.f32.mrf.mxu1  ;;  %v9809_v22 = vpop.permute.xlu0 %4517  ;;  %v9812_v19 = vadd.f32 %v3492_v53, %v9648_v60  ;;  %v9814_v40 = vadd.f32 %v6827_v63, %v6826_v15  ;;  %v5855_v42 = vmax.f32 %v9794_v28, %v9799_v25 }
 0x3c5   : > { %12144 = vst [vmem:[#allocation86_spill] sm:$0xff] %v9807_v3  ;;  %12145 = vst [vmem:[#allocation7_spill] sm:$0xff] %v9809_v22  ;;  %v3867_v16 = vrot.slane %v3866_v5, 1  ;;  %v3874_v52 = vrot.slane %v3873_v48, 2  ;;  %v5287_v10 = vmax.f32 %v5285_v20, %v5286_v13  ;;  %v9820_v17 = vpop.f32.mrf.mxu0  ;;  %v9824_v21 = vadd.f32 %v9750_v34, %v12147_v1 }
 0x3c6   : > { %v5293_v12 = vrot.slane %v5292_v14, 2  ;;  %12146 = vst [vmem:[#allocation59_spill] sm:$0xff] %v9812_v19  ;;  %v9818_v26 = vpop.f32.mrf.mxu1  ;;  %v9829_v15 = vadd.f32 %v3494_v30, %v9653_v18 }
 0x3c7   : > { %12148 = vst [vmem:[#allocation10_spill] sm:$0xff] %v9824_v21  ;;  %v9831_v53 = vpop.eup %7285  ;;  %v9833_v63 = vadd.f32 %v3867_v16, %v3866_v5  ;;  %v3875_v20 = vadd.f32 %v3874_v52, %v3873_v48  ;;  %v5310_v13 = vsub.f32 %v9659_v54, %v5287_v10  ;;  %v5316_v56 = vsub.f32 %v9665_v31, %v5287_v10 }
 0x3c8   : > { %v5294_v44 = vmax.f32 %v5292_v14, %v5293_v12  ;;  %12149 = vst [vmem:[#allocation8_spill] sm:$0xff] %v9829_v15  ;;  %v5313_v14 = vsub.f32 %v9698_v37, %v5287_v10  ;;  %v9837_v12 = vpop.f32.mrf.mxu0  ;;  %v9839_v34 = vpop.eup %7287  ;;  %v5319_v1 = vsub.f32 %v9701_v2, %v5287_v10  ;;  %v5856_v18 = vmax.f32 %v9824_v21, %v9829_v15  ;;  %v12151_v2 = vld [vmem:[#allocation12_spill] sm:$0xff] }
 0x3c9   : > { %v9845_v30 = vpop.eup %7289  ;;  %7301 = vrcp.f32 %v9833_v63  ;;  %v3876_v5 = vrot.slane %v3875_v20, 1  ;;  %v4770_v54 = vadd.f32 %v9839_v34, %v9831_v53  ;;  %v5322_v37 = vmul.f32 1.442695, %v5310_v13  ;;  %v9850_v48 = vpop.f32.mrf.mxu1 }
 0x3ca   : > { %v5295_v60 = vrot.slane %v5294_v44, 1  ;;  %v9852_v16 = vpop.f32.mrf.mxu0  ;;  %v9854_v31 = vpop.eup %7291  ;;  %v9858_v52 = vadd.f32 %v9643_v38, %v12151_v2  ;;  %v5328_v10 = vmul.f32 1.442695, %v5313_v14  ;;  %v5857_v33 = vmax.f32 %v5855_v42, %v5856_v18 }
 0x3cb   : > { %12150 = vst [vmem:[#allocation63_spill] sm:$0xff] %v9854_v31  ;;  %v4547_v55 = vpop.permute.xlu0 %4546  ;;  %v9860_v51 = vpop.eup %7293  ;;  %v9862_v61 = vadd.f32 %v3876_v5, %v3875_v20  ;;  %v4771_v13 = vadd.f32 %v9845_v30, %v4770_v54  ;;  %7303 = vpow2.f32 %v5322_v37 }
 0x3cc   : > { %12152 = vst [vmem:[#allocation65_spill] sm:$0xff] %v9858_v52  ;;  %v5296_v22 = vmax.f32 %v5294_v44, %v5295_v60  ;;  %12153 = vst [vmem:[#allocation12_spill] sm:$0xff] %v9860_v51  ;;  %v9865_v0 = vpop.eup %7295  ;;  %7305 = vpow2.f32 %v5328_v10  ;;  %v9870_v44 = vpop.permute.xlu1 %4548  ;;  %v9886_v37 = vsel %vm4552_vm10, %v4545_v57, %v4547_v55  ;;  %v5858_v57 = vrot.slane %v5857_v33, 4 }
 0x3cd   : > { %12154 = vst [vmem:[#allocation104_spill] sm:$0xff] %v9865_v0  ;;  %12155 = vst [vmem:[#allocation105_spill] sm:$0xff] %v9870_v44  ;;  %7307 = vrcp.f32 %v9862_v61  ;;  %v4772_v60 = vadd.f32 %v9854_v31, %v4771_v13  ;;  %v4779_v20 = vadd.f32 %v9865_v0, %v9860_v51  ;;  %v9877_v18 = vpop.f32.mrf.mxu1  ;;  %v6855_v5 = vpop.f32.mrf.mxu0  ;;  %v9890_v2 = vsel %vm4552_vm10, %v4547_v55, %v9870_v44  ;;  %v12162_v13 = vld [vmem:[#allocation14_spill] sm:$0xff] }
 0x3ce   : > { %v5311_v4 = vsub.f32 %v9662_v32, %v5296_v22  ;;  %v5314_v38 = vsub.f32 %v9717_v62, %v5296_v22  ;;  %v5317_v14 = vsub.f32 %v9668_v47, %v5296_v22  ;;  %v5320_v42 = vsub.f32 %v9706_v8, %v5296_v22  ;;  %v9879_v54 = vpop.eup %7297  ;;  %v12157_v32 = vld [vmem:[#allocation9_spill] sm:$0xff]  ;;  %12159 = vst [vmem:[#allocation107_spill] sm:$0xff] %v9886_v37 }
 0x3cf   : > { %12156 = vst [vmem:[#allocation106_spill] sm:$0xff] %v9879_v54  ;;  %v9883_v62 = vadd.f32 %v9650_v24, %v12157_v32  ;;  %v5334_v47 = vmul.f32 1.442695, %v5316_v56  ;;  %12160 = vst [vmem:[#allocation108_spill] sm:$0xff] %v9890_v2  ;;  %v9892_v10 = vpop.eup %7299  ;;  %v4773_v8 = vrot.slane %v4772_v60, 4  ;;  %v4780_v22 = vadd.f32 %v9879_v54, %v4779_v20  ;;  %v9903_v32 = vpop.permute.xlu0 %4550  ;;  %v12226_v37 = vld [vmem:[#allocation41_spill] sm:$0xff] }
 0x3d0   : > { %12161 = vst [vmem:[#allocation109_spill] sm:$0xff] %v9892_v10  ;;  %v9897_v52 = vadd.f32 %v9670_v50, %v12162_v13  ;;  %v9901_v24 = vadd.f32 %v9759_v9, %v9636_v41  ;;  %v5340_v56 = vmul.f32 1.442695, %v5319_v1  ;;  %12165 = vst [vmem:[#allocation111_spill] sm:$0xff] %v9903_v32  ;;  %v9907_v55 = vadd.f32 %v9801_v39, %v9675_v23  ;;  %v12167_v13 = vld [vmem:[#allocation11_spill] sm:$0xff]  ;;  %v6888_v41 = vpop.f32.mrf.mxu1  ;;  %v9916_v9 = vpop.f32.mrf.mxu0 }
 0x3d1   : > { %12158 = vst [vmem:[#allocation9_spill] sm:$0xff] %v9883_v62  ;;  %v6831_v44 = vadd.f32 %v9803_v6, %v9790_v45  ;;  %v4774_v20 = vadd.f32 %v4773_v8, %v4772_v60  ;;  %v4781_v62 = vadd.f32 %v9892_v10, %v4780_v22  ;;  %v5324_v50 = vmul.f32 1.442695, %v5311_v4  ;;  %v4578_v39 = vpop.permute.xlu1 %4577  ;;  %v12169_v60 = vld [vmem:[#allocation16_spill] sm:$0xff] }
 0x3d2   : > { %12163 = vst [vmem:[#allocation14_spill] sm:$0xff] %v9897_v52  ;;  %12164 = vst [vmem:[#allocation110_spill] sm:$0xff] %v9901_v24  ;;  %v9914_v52 = vadd.f32 %v9708_v27, %v12167_v13  ;;  %7309 = vpow2.f32 %v5334_v47  ;;  %v5330_v1 = vmul.f32 1.442695, %v5314_v38  ;;  %v5859_v32 = vmax.f32 %v5857_v33, %v5858_v57  ;;  %v12172_v33 = vld [vmem:[#allocation13_spill] sm:$0xff]  ;;  %v6890_v13 = vpop.f32.mrf.mxu1 }
 0x3d3   : > { %12166 = vst [vmem:[#allocation112_spill] sm:$0xff] %v9907_v55  ;;  %v5865_v23 = vmax.f32 %v9901_v24, %v9907_v55  ;;  %v4775_v31 = vrot.slane %v4774_v20, 2  ;;  %v4782_v45 = vrot.slane %v4781_v62, 4  ;;  %v5336_v6 = vmul.f32 1.442695, %v5317_v14  ;;  %v6858_v14 = vpop.f32.mrf.mxu0 }
 0x3d4   : > { %12168 = vst [vmem:[#allocation11_spill] sm:$0xff] %v9914_v52  ;;  %v9922_v4 = vadd.f32 %v9784_v59, %v12169_v60  ;;  %7311 = vpow2.f32 %v5340_v56  ;;  %v5342_v27 = vmul.f32 1.442695, %v5320_v42  ;;  %v5860_v8 = vrot.slane %v5859_v32, 2  ;;  %v12174_v59 = vld [vmem:[#allocation17_spill] sm:$0xff] }
 0x3d5   : > { %v12171_v22 = vmax.f32 %v9807_v3, %v9812_v19  ;;  %v4783_v38 = vadd.f32 %v4782_v45, %v4781_v62  ;;  %7313 = vpow2.f32 %v5324_v50  ;;  %v9929_v57 = vadd.f32 %v9796_v29, %v12172_v33  ;;  %v4580_v45 = vpop.permute.xlu0 %4579  ;;  %v12219_v19 = vld [vmem:[#allocation33_spill] sm:$0xff] }
 0x3d6   : > { %12170 = vst [vmem:[#allocation16_spill] sm:$0xff] %v9922_v4  ;;  %v7302_v52 = vpop.eup %7301  ;;  %7315 = vpow2.f32 %v5330_v1  ;;  %v9933_v56 = vadd.f32 %v9814_v40, %v12174_v59  ;;  %v5861_v42 = vmax.f32 %v5859_v32, %v5860_v8  ;;  %v6834_v60 = vadd.f32 %v9850_v48, %v9818_v26  ;;  %v9946_v32 = vpop.permute.xlu1 %4581 }
 0x3d7   : > { %v5866_v47 = vmax.f32 %v12171_v22, %v5865_v23  ;;  %12173 = vst [vmem:[#allocation13_spill] sm:$0xff] %v9929_v57  ;;  %v3894_v62 = vmul.f32 %v7302_v52, %v9833_v63  ;;  %v4776_v50 = vadd.f32 %v4775_v31, %v4774_v20  ;;  %7317 = vpow2.f32 %v5336_v6  ;;  %v12176_v23 = vld [vmem:[#allocation15_spill] sm:$0xff]  ;;  %12180 = vst [vmem:[#allocation115_spill] sm:$0xff] %v9946_v32  ;;  %v6860_v20 = vpop.f32.mrf.mxu0 }
 0x3d8   : > { %12175 = vst [vmem:[#allocation17_spill] sm:$0xff] %v9933_v56  ;;  %v9939_v29 = vadd.f32 %v6831_v44, %v12176_v23  ;;  %v9941_v22 = vpop.eup %7303  ;;  %v4784_v33 = vrot.slane %v4783_v38, 2  ;;  %7319 = vpow2.f32 %v5342_v27  ;;  %v5862_v1 = vrot.slane %v5861_v42, 1  ;;  %v6891_v44 = vpop.f32.mrf.mxu1  ;;  %v12197_v56 = vld [vmem:[#allocation48_spill] sm:$0xff] }
 0x3d9   : > { %12178 = vst [vmem:[#allocation113_spill] sm:$0xff] %v9941_v22  ;;  %v9944_v40 = vsel %vm4585_vm11, %v4578_v39, %v4580_v45  ;;  %v9948_v8 = vpop.eup %7305  ;;  %v3897_v26 = vsub.f32 2.0, %v3894_v62  ;;  %v9952_v63 = vadd.f32 %v9837_v12, %v9820_v17  ;;  %v9956_v48 = vsel %vm4585_vm11, %v4580_v45, %v9946_v32 }
 0x3da   : > { %12177 = vst [vmem:[#allocation15_spill] sm:$0xff] %v9939_v29  ;;  %12179 = vst [vmem:[#allocation114_spill] sm:$0xff] %v9944_v40  ;;  %v9959_v31 = vadd.f32 %v6855_v5, %v9852_v16  ;;  %v7308_v39 = vpop.eup %7307  ;;  %v5346_v6 = vadd.f32 %v9948_v8, %v9941_v22  ;;  %v9963_v27 = vmax.f32 %v5861_v42, %v5862_v1  ;;  %v5867_v59 = vrot.slane %v5866_v47, 4  ;;  %v12195_v1 = vld [vmem:[#allocation46_spill] sm:$0xff]  ;;  %v12196_v42 = vld [vmem:[#allocation47_spill] sm:$0xff] }
 0x3db   : > { %12181 = vst [vmem:[#allocation116_spill] sm:$0xff] %v9948_v8  ;;  %12182 = vst [vmem:[#allocation117_spill] sm:$0xff] %v9952_v63  ;;  %v9966_v62 = vadd.f32 %v6834_v60, %v12116_v58  ;;  %v9968_v17 = vmul.f32 %v7302_v52, %v3897_v26  ;;  %v3895_v12 = vmul.f32 %v7308_v39, %v9862_v61  ;;  %v4777_v23 = vrot.slane %v4776_v50, 1  ;;  %v12223_v40 = vld [vmem:[#allocation88_spill] sm:$0xff] }
 0x3dc   : > { %12183 = vst [vmem:[#allocation118_spill] sm:$0xff] %v9956_v48  ;;  %12184 = vst [vmem:[#allocation119_spill] sm:$0xff] %v9959_v31  ;;  %v9972_v16 = vadd.f32 %v6888_v41, %v9877_v18  ;;  %v4785_v5 = vadd.f32 %v4784_v33, %v4783_v38  ;;  %v5886_v45 = vsub.f32 %v9794_v28, %v9963_v27  ;;  %v6893_v41 = vpop.f32.mrf.mxu1  ;;  %v6861_v28 = vpop.f32.mrf.mxu0  ;;  %v12209_v31 = vld [vmem:[#allocation55_spill] sm:$0xff] }
 0x3dd   : > { %12185 = vst [vmem:[#allocation120_spill] sm:$0xff] %v9963_v27  ;;  %12186 = vst [vmem:[#allocation121_spill] sm:$0xff] %v9966_v62  ;;  %v3903_v58 = vmul.f32 %v9710_v46, %v9968_v17  ;;  %v9984_v61 = vmul.f32 %v9725_v43, %v9968_v17  ;;  %v9988_v52 = vmul.f32 %v9731_v35, %v9968_v17  ;;  %v3898_v18 = vsub.f32 2.0, %v3895_v12  ;;  %v12205_v62 = vld [vmem:[#allocation51_spill] sm:$0xff]  ;;  %v12224_v27 = vld [vmem:[#allocation40_spill] sm:$0xff] }
 0x3de   : > { %12187 = vst [vmem:[#allocation122_spill] sm:$0xff] %v9968_v17  ;;  %12188 = vst [vmem:[#allocation123_spill] sm:$0xff] %v9972_v16  ;;  %v9992_v60 = vmax.f32 %v5866_v47, %v5867_v59  ;;  %v9995_v33 = vadd.f32 %v6858_v14, %v9916_v9  ;;  %v9997_v46 = vadd.f32 %v6891_v44, %v6890_v13  ;;  %v4786_v38 = vrot.slane %v4785_v5, 1  ;;  %v12201_v44 = vld [vmem:[#allocation20_spill] sm:$0xff] }
 0x3df   : > { %12189 = vst [vmem:[#allocation124_spill] sm:$0xff] %v9988_v52  ;;  %v9999_v26 = vpop.eup %7309  ;;  %v10001_v43 = vmul.f32 %v7308_v39, %v3898_v18  ;;  %v3918_v35 = vrot.slane %v3903_v58, %v12195_v1  ;;  %v3948_v12 = vrot.slane %v3903_v58, %v12196_v42  ;;  %v10005_v32 = vadd.f32 %v4777_v23, %v4776_v50  ;;  %v6894_v23 = vpop.f32.mrf.mxu1  ;;  %v12206_v16 = vld [vmem:[#allocation52_spill] sm:$0xff] }
 0x3e0   : > { %12190 = vst [vmem:[#allocation125_spill] sm:$0xff] %v9992_v60  ;;  %12191 = vst [vmem:[#allocation126_spill] sm:$0xff] %v9995_v33  ;;  %v3978_v4 = vrot.slane %v3903_v58, %v12197_v56  ;;  %v5347_v47 = vadd.f32 %v9999_v26, %v5346_v6  ;;  %v10009_v59 = vadd.f32 %v6861_v28, %v6860_v20  ;;  %v12203_v20 = vld [vmem:[#allocation21_spill] sm:$0xff] }
 0x3e1   : > { %12192 = vst [vmem:[#allocation127_spill] sm:$0xff] %v9997_v46  ;;  %12193 = vst [vmem:[#allocation128_spill] sm:$0xff] %v9999_v26  ;;  %v10011_v9 = vpop.eup %7311  ;;  %v10015_v13 = vmul.f32 %v9745_v36, %v10001_v43  ;;  %v10019_v14 = vmul.f32 %v9752_v7, %v10001_v43  ;;  %v10023_v50 = vmul.f32 %v9761_v11, %v10001_v43  ;;  %v12204_v28 = vld [vmem:[#allocation49_spill] sm:$0xff]  ;;  %7321 = vrcp.f32 %v10005_v32 }
 0x3e2   : > { %12194 = vst [vmem:[#allocation129_spill] sm:$0xff] %v10001_v43  ;;  %12198 = vst [vmem:[#allocation46_spill] sm:$0xff] %v10009_v59  ;;  %v3942_v39 = vmul.f32 %v12201_v44, %v3918_v35  ;;  %v10026_v6 = vpop.eup %7313  ;;  %v3969_v18 = vmul.f32 %v12203_v20, %v3948_v12  ;;  %v4008_v46 = vrot.slane %v3903_v58, %v12204_v28  ;;  %v12208_v7 = vld [vmem:[#allocation53_spill] sm:$0xff]  ;;  %v12211_v12 = vld [vmem:[#allocation24_spill] sm:$0xff]  ;;  %v10054_v35 = vmul.f32 1.442695, %v5886_v45 }
 0x3e3   : > { %12199 = vst [vmem:[#allocation48_spill] sm:$0xff] %v10011_v9  ;;  %12200 = vst [vmem:[#allocation130_spill] sm:$0xff] %v10023_v50  ;;  %v4038_v36 = vrot.slane %v3903_v58, %v12205_v62  ;;  %v4068_v57 = vrot.slane %v3903_v58, %v12206_v16  ;;  %v10032_v29 = vpop.eup %7315  ;;  %v4098_v10 = vrot.slane %v3903_v58, %v12208_v7 }
 0x3e4   : > { %12202 = vst [vmem:[#allocation131_spill] sm:$0xff] %v10026_v6  ;;  %12207 = vst [vmem:[#allocation49_spill] sm:$0xff] %v10032_v29  ;;  %v4128_v11 = vrot.slane %v3903_v58, %v12209_v31  ;;  %v10038_v43 = vpop.eup %7317  ;;  %v3972_v17 = vadd.f32 %v3969_v18, %v3942_v39  ;;  %v3999_v59 = vmul.f32 %v12211_v12, %v3978_v4  ;;  %v12215_v18 = vld [vmem:[#allocation25_spill] sm:$0xff] }
 0x3e5   : > { %12210 = vst [vmem:[#allocation51_spill] sm:$0xff] %v10038_v43  ;;  %v10041_v63 = vadd.f32 %v4786_v38, %v4785_v5  ;;  %v10043_v33 = vadd.f32 %v6894_v23, %v6893_v41  ;;  %v10045_v26 = vpop.eup %7319  ;;  %v4158_v8 = vrot.slane %v9984_v61, %v12195_v1  ;;  %v4188_v58 = vrot.slane %v9984_v61, %v12196_v42  ;;  %v12216_v5 = vld [vmem:[#allocation28_spill] sm:$0xff]  ;;  %v12217_v41 = vld [vmem:[#allocation29_spill] sm:$0xff] }
 0x3e6   : > { %12213 = vst [vmem:[#allocation53_spill] sm:$0xff] %v10045_v26  ;;  %v10052_v22 = vadd.f32 %v10011_v9, %v5347_v47  ;;  %12214 = vst [vmem:[#allocation55_spill] sm:$0xff] %v10054_v35  ;;  %v4002_v39 = vadd.f32 %v3999_v59, %v3972_v17  ;;  %v4029_v4 = vmul.f32 %v12215_v18, %v4008_v46  ;;  %v12220_v46 = vld [vmem:[#allocation36_spill] sm:$0xff]  ;;  %v12221_v59 = vld [vmem:[#allocation37_spill] sm:$0xff] }
 0x3e7   : > { %12212 = vst [vmem:[#allocation52_spill] sm:$0xff] %v10043_v33  ;;  %v4059_v38 = vmul.f32 %v12216_v5, %v4038_v36  ;;  %v4089_v23 = vmul.f32 %v12217_v41, %v4068_v57  ;;  %v12218_v33 = vld [vmem:[#allocation32_spill] sm:$0xff]  ;;  %v4149_v24 = vmul.f32 %v12219_v19, %v4128_v11  ;;  %v4218_v3 = vrot.slane %v9984_v61, %v12197_v56  ;;  %v12241_v19 = vld [vmem:[#allocation101_spill] sm:$0xff] }
 0x3e8   : > { %v4119_v55 = vmul.f32 %v12218_v33, %v4098_v10  ;;  %v4248_v47 = vrot.slane %v9984_v61, %v12204_v28  ;;  %v4032_v9 = vadd.f32 %v4029_v4, %v4002_v39  ;;  %v3922_v17 = vrot.slane %v10015_v13, %v12195_v1  ;;  %v12222_v4 = vld [vmem:[#allocation87_spill] sm:$0xff] }
 0x3e9   : > { %v3952_v45 = vrot.slane %v10015_v13, %v12196_v42  ;;  %v3982_v57 = vrot.slane %v10015_v13, %v12197_v56  ;;  %v4179_v10 = vmul.f32 %v12220_v46, %v4158_v8  ;;  %v4209_v36 = vmul.f32 %v12221_v59, %v4188_v58 }
 0x3ea   : > { %v4278_v11 = vrot.slane %v9984_v61, %v12205_v62  ;;  %v4308_v48 = vrot.slane %v9984_v61, %v12206_v16  ;;  %v4062_v39 = vadd.f32 %v4059_v38, %v4032_v9  ;;  %v3943_v15 = vmul.f32 %v12222_v4, %v3922_v17  ;;  %v12225_v38 = vld [vmem:[#allocation89_spill] sm:$0xff]  ;;  %v12228_v4 = vld [vmem:[#allocation100_spill] sm:$0xff] }
 0x3eb   : > { %v3970_v60 = vmul.f32 %v12223_v40, %v3952_v45  ;;  %v4012_v25 = vrot.slane %v10015_v13, %v12204_v28  ;;  %v4239_v21 = vmul.f32 %v12224_v27, %v4218_v3  ;;  %v4338_v8 = vrot.slane %v9984_v61, %v12208_v7  ;;  %v12227_v40 = vld [vmem:[#allocation43_spill] sm:$0xff]  ;;  %v12229_v27 = vld [vmem:[#allocation90_spill] sm:$0xff] }
 0x3ec   : > { %v4368_v58 = vrot.slane %v9984_v61, %v12209_v31  ;;  %v4042_v35 = vrot.slane %v10015_v13, %v12205_v62  ;;  %v4092_v2 = vadd.f32 %v4089_v23, %v4062_v39  ;;  %v4000_v17 = vmul.f32 %v12225_v38, %v3982_v57  ;;  %v12231_v57 = vld [vmem:[#allocation56_spill] sm:$0xff] }
 0x3ed   : > { %v3973_v9 = vadd.f32 %v3970_v60, %v3943_v15  ;;  %v4072_v45 = vrot.slane %v10015_v13, %v12206_v16  ;;  %v4269_v26 = vmul.f32 %v12226_v37, %v4248_v47  ;;  %v4299_v3 = vmul.f32 %v12227_v40, %v4278_v11  ;;  %v12230_v60 = vld [vmem:[#allocation102_spill] sm:$0xff]  ;;  %v12232_v47 = vld [vmem:[#allocation91_spill] sm:$0xff] }
 0x3ee   : > { %v4329_v54 = vmul.f32 %v12228_v4, %v4308_v48  ;;  %v4102_v0 = vrot.slane %v10015_v13, %v12208_v7  ;;  %v4122_v61 = vadd.f32 %v4119_v55, %v4092_v2  ;;  %v4030_v59 = vmul.f32 %v12229_v27, %v4012_v25  ;;  %v7322_v11 = vpop.eup %7321  ;;  %v12233_v2 = vld [vmem:[#allocation92_spill] sm:$0xff] }
 0x3ef   : > { %v4003_v51 = vadd.f32 %v4000_v17, %v3973_v9  ;;  %v4132_v15 = vrot.slane %v10015_v13, %v12209_v31  ;;  %v4359_v23 = vmul.f32 %v12230_v60, %v4338_v8  ;;  %v10101_v39 = vmul.f32 %v12231_v57, %v4368_v58  ;;  %v12234_v9 = vld [vmem:[#allocation93_spill] sm:$0xff]  ;;  %v12237_v27 = vld [vmem:[#allocation96_spill] sm:$0xff] }
 0x3f0   : > { %v4060_v38 = vmul.f32 %v12232_v47, %v4042_v35  ;;  %v4162_v48 = vrot.slane %v10019_v14, %v12195_v1  ;;  %v4152_v4 = vadd.f32 %v4149_v24, %v4122_v61  ;;  %v4090_v55 = vmul.f32 %v12233_v2, %v4072_v45  ;;  %v12235_v24 = vld [vmem:[#allocation94_spill] sm:$0xff]  ;;  %v12236_v45 = vld [vmem:[#allocation95_spill] sm:$0xff] }
 0x3f1   : > { %v4033_v40 = vadd.f32 %v4030_v59, %v4003_v51  ;;  %v4192_v25 = vrot.slane %v10019_v14, %v12196_v42  ;;  %v4120_v13 = vmul.f32 %v12234_v9, %v4102_v0  ;;  %v4222_v8 = vrot.slane %v10019_v14, %v12197_v56 }
 0x3f2   : > { %v4252_v58 = vrot.slane %v10019_v14, %v12204_v28  ;;  %v4282_v35 = vrot.slane %v10019_v14, %v12205_v62  ;;  %v4182_v17 = vadd.f32 %v4179_v10, %v4152_v4  ;;  %v4150_v51 = vmul.f32 %v12235_v24, %v4132_v15  ;;  %v12240_v24 = vld [vmem:[#allocation99_spill] sm:$0xff] }
 0x3f3   : > { %v4063_v47 = vadd.f32 %v4060_v38, %v4033_v40  ;;  %v4312_v59 = vrot.slane %v10019_v14, %v12206_v16  ;;  %v4180_v61 = vmul.f32 %v12236_v45, %v4162_v48  ;;  %v4342_v0 = vrot.slane %v10019_v14, %v12208_v7  ;;  %v12238_v40 = vld [vmem:[#allocation97_spill] sm:$0xff]  ;;  %v12239_v38 = vld [vmem:[#allocation98_spill] sm:$0xff] }
 0x3f4   : > { %v4372_v9 = vrot.slane %v10019_v14, %v12209_v31  ;;  %v4804_v2 = vmul.f32 %v7322_v11, %v10005_v32  ;;  %v4212_v57 = vadd.f32 %v4209_v36, %v4182_v17  ;;  %v4210_v10 = vmul.f32 %v12237_v27, %v4192_v25  ;;  %v12242_v14 = vld [vmem:[#allocation45_spill] sm:$0xff] }
 0x3f5   : > { %v4093_v60 = vadd.f32 %v4090_v55, %v4063_v47  ;;  %7323 = vrcp.f32 %v10041_v63  ;;  %v4240_v4 = vmul.f32 %v12238_v40, %v4222_v8  ;;  %v4270_v15 = vmul.f32 %v12239_v38, %v4252_v58  ;;  %v12243_v47 = vld [vmem:[#allocation57_spill] sm:$0xff] }
 0x3f6   : > { %v4300_v48 = vmul.f32 %v12240_v24, %v4282_v35  ;;  %v4807_v45 = vsub.f32 2.0, %v4804_v2  ;;  %v4242_v37 = vadd.f32 %v4239_v21, %v4212_v57  ;;  %v4330_v33 = vmul.f32 %v12241_v19, %v4312_v59 }
 0x3f7   : > { %v4123_v46 = vadd.f32 %v4120_v13, %v4093_v60  ;;  %v4403_v32 = vrot.slane %v9988_v52, %v12195_v1  ;;  %v4360_v36 = vmul.f32 %v12242_v14, %v4342_v0  ;;  %v10135_v55 = vmul.f32 %v12243_v47, %v4372_v9  ;;  %v12247_v0 = vld [vmem:[#allocation60_spill] sm:$0xff] }
 0x3f8   : > { %v4407_v25 = vrot.slane %v10023_v50, %v12195_v1  ;;  %v10139_v8 = vmul.f32 %v7322_v11, %v4807_v45  ;;  %v4272_v58 = vadd.f32 %v4269_v26, %v4242_v37  ;;  %v4436_v21 = vrot.slane %v9988_v52, %v12196_v42 }
 0x3f9   : > { %v4153_v35 = vadd.f32 %v4150_v51, %v4123_v46  ;;  %v5355_v60 = vadd.f32 %v10032_v29, %v10026_v6  ;;  %v4440_v37 = vrot.slane %v10023_v50, %v12196_v42  ;;  %v4469_v11 = vrot.slane %v9988_v52, %v12197_v56  ;;  %v12249_v6 = vld [vmem:[#allocation64_spill] sm:$0xff] }
 0x3fa   : > { %12244 = vst [vmem:[#allocation132_spill] sm:$0xff] %v10139_v8  ;;  %v4813_v57 = vmul.f32 %v9831_v53, %v10139_v8  ;;  %v10149_v2 = vmul.f32 %v9839_v34, %v10139_v8  ;;  %v10153_v9 = vmul.f32 %v9845_v30, %v10139_v8  ;;  %v4302_v26 = vadd.f32 %v4299_v3, %v4272_v58  ;;  %v12246_v53 = vld [vmem:[#allocation58_spill] sm:$0xff] }
 0x3fb   : > { %v4183_v46 = vadd.f32 %v4180_v61, %v4153_v35  ;;  %v10160_v13 = vadd.f32 %v10038_v43, %v5355_v60  ;;  %v4427_v17 = vmul.f32 %v12246_v53, %v4403_v32  ;;  %v4428_v8 = vmul.f32 %v12247_v0, %v4407_v25  ;;  %v12248_v35 = vld [vmem:[#allocation61_spill] sm:$0xff] }
 0x3fc   : > { %12245 = vst [vmem:[#allocation133_spill] sm:$0xff] %v10153_v9  ;;  %v4828_v34 = vrot.slane %v4813_v57, %v12195_v1  ;;  %v4843_v51 = vrot.slane %v4813_v57, %v12196_v42  ;;  %v4861_v30 = vrot.slane %v4813_v57, %v12197_v56  ;;  %v4332_v59 = vadd.f32 %v4329_v54, %v4302_v26 }
 0x3fd   : > { %v4213_v45 = vadd.f32 %v4210_v10, %v4183_v46  ;;  %v4879_v3 = vrot.slane %v4813_v57, %v12204_v28  ;;  %v4460_v60 = vmul.f32 %v12248_v35, %v4436_v21  ;;  %v4473_v32 = vrot.slane %v10023_v50, %v12197_v56 }
 0x3fe   : > { %v4837_v61 = vmul.f32 %v4828_v34, %v12201_v44  ;;  %v4852_v58 = vmul.f32 %v4843_v51, %v12203_v20  ;;  %v4362_v43 = vadd.f32 %v4359_v23, %v4332_v59  ;;  %v4461_v47 = vmul.f32 %v12249_v6, %v4440_v37  ;;  %v12272_v44 = vld [vmem:[#allocation93_spill] sm:$0xff] }
 0x3ff   : > { %v4243_v29 = vadd.f32 %v4240_v4, %v4213_v45  ;;  %v10175_v54 = vmul.f32 %v9656_v49, %v4469_v11  ;;  %v4870_v25 = vmul.f32 %v4861_v30, %v12211_v12  ;;  %v4897_v26 = vrot.slane %v4813_v57, %v12205_v62 }
 0x400   : > { %v4855_v10 = vadd.f32 %v4852_v58, %v4837_v61  ;;  %v5349_v46 = vrot.slane %v10052_v22, 4  ;;  %v4397_v34 = vadd.f32 %v10101_v39, %v4362_v43  ;;  %v4888_v51 = vmul.f32 %v4879_v3, %v12215_v18  ;;  %v12250_v3 = vld [vmem:[#allocation70_spill] sm:$0xff] }
 0x401   : > { %v4273_v21 = vadd.f32 %v4270_v15, %v4243_v29  ;;  %v4915_v23 = vrot.slane %v4813_v57, %v12206_v16  ;;  %v4933_v37 = vrot.slane %v4813_v57, %v12208_v7  ;;  %v4951_v11 = vrot.slane %v4813_v57, %v12209_v31 }
 0x402   : > { %v7324_v4 = vpop.eup %7323  ;;  %v4873_v59 = vadd.f32 %v4870_v25, %v4855_v10  ;;  %v4969_v30 = vrot.slane %v10149_v2, %v12195_v1  ;;  %v4430_v61 = vadd.f32 %v4427_v17, %v4397_v34  ;;  %v4987_v29 = vrot.slane %v10149_v2, %v12196_v42  ;;  %v12251_v34 = vld [vmem:[#allocation32_spill] sm:$0xff] }
 0x403   : > { %v4303_v45 = vadd.f32 %v4300_v48, %v4273_v21  ;;  %v4805_v58 = vmul.f32 %v7324_v4, %v10041_v63  ;;  %v4906_v39 = vmul.f32 %v4897_v26, %v12216_v5  ;;  %v5005_v15 = vrot.slane %v10149_v2, %v12197_v56  ;;  %v12252_v26 = vld [vmem:[#allocation33_spill] sm:$0xff] }
 0x404   : > { %v4891_v43 = vadd.f32 %v4888_v51, %v4873_v59  ;;  %v10194_v10 = vmul.f32 %v12250_v3, %v4473_v32  ;;  %v10197_v18 = vadd.f32 %v5349_v46, %v10052_v22  ;;  %v4924_v17 = vmul.f32 %v4915_v23, %v12217_v41  ;;  %v12254_v32 = vld [vmem:[#allocation36_spill] sm:$0xff] }
 0x405   : > { %v4333_v57 = vadd.f32 %v4330_v33, %v4303_v45  ;;  %v4808_v25 = vsub.f32 2.0, %v4805_v58  ;;  %v4942_v21 = vmul.f32 %v4933_v37, %v12251_v34  ;;  %v4960_v51 = vmul.f32 %v4951_v11, %v12252_v26  ;;  %v12255_v33 = vld [vmem:[#allocation37_spill] sm:$0xff]  ;;  %v12256_v22 = vld [vmem:[#allocation40_spill] sm:$0xff] }
 0x406   : > { %v4909_v48 = vadd.f32 %v4906_v39, %v4891_v43  ;;  %v4978_v12 = vmul.f32 %v4969_v30, %v12254_v32  ;;  %v4996_v45 = vmul.f32 %v4987_v29, %v12255_v33  ;;  %v5014_v46 = vmul.f32 %v5005_v15, %v12256_v22  ;;  %v12257_v11 = vld [vmem:[#allocation12_spill] sm:$0xff]  ;;  %v12259_v30 = vld [vmem:[#allocation106_spill] sm:$0xff]  ;;  %v12263_v32 = vld [vmem:[#allocation87_spill] sm:$0xff] }
 0x407   : > { %v4363_v59 = vadd.f32 %v4360_v36, %v4333_v57  ;;  %v10204_v5 = vmul.f32 %v7324_v4, %v4808_v25  ;;  %v5023_v63 = vrot.slane %v10149_v2, %v12204_v28  ;;  %v5041_v23 = vrot.slane %v10149_v2, %v12205_v62  ;;  %v12258_v4 = vld [vmem:[#allocation104_spill] sm:$0xff] }
 0x408   : > { %v4927_v58 = vadd.f32 %v4924_v17, %v4909_v48  ;;  %v5059_v15 = vrot.slane %v10149_v2, %v12206_v16  ;;  %v5077_v57 = vrot.slane %v10149_v2, %v12208_v7  ;;  %v4463_v25 = vadd.f32 %v4460_v60, %v4430_v61  ;;  %v12265_v26 = vld [vmem:[#allocation100_spill] sm:$0xff] }
 0x409   : > { %12253 = vst [vmem:[#allocation58_spill] sm:$0xff] %v10204_v5  ;;  %v4398_v37 = vadd.f32 %v10135_v55, %v4363_v59  ;;  %v4814_v36 = vmul.f32 %v12257_v11, %v10204_v5  ;;  %v10218_v43 = vmul.f32 %v12258_v4, %v10204_v5  ;;  %v10222_v29 = vmul.f32 %v12259_v30, %v10204_v5  ;;  %v12261_v4 = vld [vmem:[#allocation41_spill] sm:$0xff]  ;;  %v12262_v30 = vld [vmem:[#allocation43_spill] sm:$0xff]  ;;  %v12271_v41 = vld [vmem:[#allocation92_spill] sm:$0xff] }
 0x40a   : > { %v4945_v39 = vadd.f32 %v4942_v21, %v4927_v58  ;;  %v5032_v22 = vmul.f32 %v5023_v63, %v12261_v4  ;;  %v5050_v5 = vmul.f32 %v5041_v23, %v12262_v30  ;;  %v5095_v58 = vrot.slane %v10149_v2, %v12209_v31 }
 0x40b   : > { %12260 = vst [vmem:[#allocation12_spill] sm:$0xff] %v10222_v29  ;;  %v4431_v55 = vadd.f32 %v4428_v8, %v4398_v37  ;;  %v4832_v48 = vrot.slane %v4814_v36, %v12195_v1  ;;  %v4847_v17 = vrot.slane %v4814_v36, %v12196_v42  ;;  %v4865_v59 = vrot.slane %v4814_v36, %v12197_v56  ;;  %v12264_v8 = vld [vmem:[#allocation88_spill] sm:$0xff] }
 0x40c   : > { %v4963_v11 = vadd.f32 %v4960_v51, %v4945_v39  ;;  %v4883_v21 = vrot.slane %v4814_v36, %v12204_v28  ;;  %v5068_v34 = vmul.f32 %v5059_v15, %v12265_v26  ;;  %v5113_v51 = vrot.slane %v10153_v9, %v12195_v1  ;;  %v12266_v39 = vld [vmem:[#allocation89_spill] sm:$0xff] }
 0x40d   : > { %v4464_v33 = vadd.f32 %v4461_v47, %v4431_v55  ;;  %v4838_v60 = vmul.f32 %v4832_v48, %v12263_v32  ;;  %v4853_v61 = vmul.f32 %v4847_v17, %v12264_v8  ;;  %v5131_v63 = vrot.slane %v10153_v9, %v12196_v42  ;;  %v12267_v55 = vld [vmem:[#allocation90_spill] sm:$0xff] }
 0x40e   : > { %v4981_v37 = vadd.f32 %v4978_v12, %v4963_v11  ;;  %v4871_v30 = vmul.f32 %v4865_v59, %v12266_v39  ;;  %v4901_v4 = vrot.slane %v4814_v36, %v12205_v62  ;;  %v4919_v47 = vrot.slane %v4814_v36, %v12206_v16  ;;  %v12268_v39 = vld [vmem:[#allocation102_spill] sm:$0xff] }
 0x40f   : > { %v4856_v23 = vadd.f32 %v4853_v61, %v4838_v60  ;;  %v4889_v48 = vmul.f32 %v4883_v21, %v12267_v55  ;;  %v4937_v12 = vrot.slane %v4814_v36, %v12208_v7  ;;  %v4955_v15 = vrot.slane %v4814_v36, %v12209_v31  ;;  %v12270_v55 = vld [vmem:[#allocation91_spill] sm:$0xff] }
 0x410   : > { %v4999_v2 = vadd.f32 %v4996_v45, %v4981_v37  ;;  %v4973_v11 = vrot.slane %v10218_v43, %v12195_v1  ;;  %v4991_v60 = vrot.slane %v10218_v43, %v12196_v42  ;;  %v5009_v59 = vrot.slane %v10218_v43, %v12197_v56  ;;  %v12269_v45 = vld [vmem:[#allocation56_spill] sm:$0xff] }
 0x411   : > { %v4874_v17 = vadd.f32 %v4871_v30, %v4856_v23  ;;  %v5086_v8 = vmul.f32 %v5077_v57, %v12268_v39  ;;  %v5104_v37 = vmul.f32 %v5095_v58, %v12269_v45  ;;  %v5027_v21 = vrot.slane %v10218_v43, %v12204_v28  ;;  %v12274_v39 = vld [vmem:[#allocation95_spill] sm:$0xff] }
 0x412   : > { %v5017_v61 = vadd.f32 %v5014_v46, %v4999_v2  ;;  %v5122_v36 = vmul.f32 %v5113_v51, %v12246_v53  ;;  %v5140_v30 = vmul.f32 %v5131_v63, %v12248_v35  ;;  %v4907_v32 = vmul.f32 %v4901_v4, %v12270_v55  ;;  %v12273_v46 = vld [vmem:[#allocation94_spill] sm:$0xff] }
 0x413   : > { %v4892_v23 = vadd.f32 %v4889_v48, %v4874_v17  ;;  %v4925_v20 = vmul.f32 %v4919_v47, %v12271_v41  ;;  %v4943_v3 = vmul.f32 %v4937_v12, %v12272_v44  ;;  %v4961_v2 = vmul.f32 %v4955_v15, %v12273_v46  ;;  %v12275_v17 = vld [vmem:[#allocation53_spill] sm:$0xff] }
 0x414   : > { %v5035_v26 = vadd.f32 %v5032_v22, %v5017_v61  ;;  %v4979_v58 = vmul.f32 %v4973_v11, %v12274_v39  ;;  %v4997_v45 = vmul.f32 %v4991_v60, %v12237_v27  ;;  %v5015_v6 = vmul.f32 %v5009_v59, %v12238_v40 }
 0x415   : > { %v4910_v57 = vadd.f32 %v4907_v32, %v4892_v23  ;;  %v5033_v63 = vmul.f32 %v5027_v21, %v12239_v38  ;;  %v5045_v4 = vrot.slane %v10218_v43, %v12205_v62  ;;  %v5063_v22 = vrot.slane %v10218_v43, %v12206_v16 }
 0x416   : > { %v5053_v51 = vadd.f32 %v5050_v5, %v5035_v26  ;;  %v5081_v48 = vrot.slane %v10218_v43, %v12208_v7  ;;  %v4496_v32 = vadd.f32 %v10175_v54, %v4463_v25  ;;  %v4497_v12 = vadd.f32 %v10194_v10, %v4464_v33  ;;  %v12277_v10 = vld [vmem:[#allocation79_spill] sm:$0xff] }
 0x417   : > { %v4928_v47 = vadd.f32 %v4925_v20, %v4910_v57  ;;  %v5099_v5 = vrot.slane %v10218_v43, %v12209_v31  ;;  %v5351_v26 = vrot.slane %v10197_v18, 2  ;;  %v5357_v11 = vadd.f32 %v12275_v17, %v10160_v13 }
 0x418   : > { %v5071_v15 = vadd.f32 %v5068_v34, %v5053_v51  ;;  %v5117_v20 = vrot.slane %v10222_v29, %v12195_v1  ;;  %v5149_v59 = vrot.slane %v10153_v9, %v12197_v56  ;;  %v12276_v54 = vrot.slane %v9988_v52, %v12204_v28 }
 0x419   : > { %v4946_v60 = vadd.f32 %v4943_v3, %v4928_v47  ;;  %v5352_v25 = vadd.f32 %v5351_v26, %v10197_v18  ;;  %v5358_v61 = vrot.slane %v5357_v11, 4  ;;  %v5051_v3 = vmul.f32 %v5045_v4, %v12240_v24 }
 0x41a   : > { %v4526_v34 = vmul.f32 %v12277_v10, %v12276_v54  ;;  %v5089_v33 = vadd.f32 %v5086_v8, %v5071_v15  ;;  %v4506_v23 = vrot.slane %v10023_v50, %v12204_v28  ;;  %v5069_v51 = vmul.f32 %v5063_v22, %v12241_v19  ;;  %v12278_v15 = vld [vmem:[#allocation19_spill] sm:$0xff] }
 0x41b   : > { %v4964_v13 = vadd.f32 %v4961_v2, %v4946_v60  ;;  %v5353_v47 = vrot.slane %v5352_v25, 1  ;;  %v5359_v17 = vadd.f32 %v5358_v61, %v5357_v11  ;;  %v5158_v8 = vmul.f32 %v5149_v59, %v9656_v49  ;;  %v12280_v61 = vld [vmem:[#allocation57_spill] sm:$0xff] }
 0x41c   : > { %v4529_v21 = vadd.f32 %v4526_v34, %v4496_v32  ;;  %v5107_v57 = vadd.f32 %v5104_v37, %v5089_v33  ;;  %v4527_v43 = vmul.f32 %v12278_v15, %v4506_v23  ;;  %v4535_v18 = vrot.slane %v9988_v52, %v12205_v62 }
 0x41d   : > { %v4982_v54 = vadd.f32 %v4979_v58, %v4964_v13  ;;  %v10301_v26 = vadd.f32 %v5353_v47, %v5352_v25  ;;  %v5360_v4 = vrot.slane %v5359_v17, 2  ;;  %v5167_v32 = vrot.slane %v10153_v9, %v12204_v28  ;;  %v12279_v58 = vld [vmem:[#allocation107_spill] sm:$0xff] }
 0x41e   : > { %v5125_v2 = vadd.f32 %v5122_v36, %v5107_v57  ;;  %v4530_v60 = vadd.f32 %v4527_v43, %v4497_v12  ;;  %v5185_v22 = vrot.slane %v10153_v9, %v12205_v62  ;;  %v4559_v11 = vmul.f32 %v12279_v58, %v4535_v18  ;;  %v12281_v57 = vld [vmem:[#allocation108_spill] sm:$0xff] }
 0x41f   : > { %v5000_v37 = vadd.f32 %v4997_v45, %v4982_v54  ;;  %7325 = vrcp.f32 %v10301_v26  ;;  %v5361_v34 = vadd.f32 %v5360_v4, %v5359_v17  ;;  %v4539_v36 = vrot.slane %v10023_v50, %v12205_v62  ;;  %v12282_v54 = vld [vmem:[#allocation55_spill] sm:$0xff]  ;;  %v12283_v17 = vld [vmem:[#allocation10_spill] sm:$0xff]  ;;  %v12284_v18 = vld [vmem:[#allocation120_spill] sm:$0xff] }
 0x420   : > { %v5143_v59 = vadd.f32 %v5140_v30, %v5125_v2  ;;  %v5087_v25 = vmul.f32 %v5081_v48, %v12242_v14  ;;  %v5105_v13 = vmul.f32 %v5099_v5, %v12280_v61  ;;  %v4562_v23 = vadd.f32 %v4559_v11, %v4529_v21 }
 0x421   : > { %v5018_v33 = vadd.f32 %v5015_v6, %v5000_v37  ;;  %v5362_v12 = vrot.slane %v5361_v34, 1  ;;  %v5176_v43 = vmul.f32 %v5167_v32, %v12277_v10  ;;  %v4560_v47 = vmul.f32 %v12281_v57, %v4539_v36  ;;  %v12286_v6 = vld [vmem:[#allocation85_spill] sm:$0xff] }
 0x422   : > { %v5161_v45 = vadd.f32 %v5158_v8, %v5143_v59  ;;  %7327 = vpow2.f32 %v12282_v54  ;;  %v12285_v2 = vsub.f32 %v12283_v17, %v12284_v18  ;;  %v12287_v48 = vsub.f32 %v12286_v6, %v12284_v18  ;;  %v10329_v54 = vpop.permute.xlu0 %4583  ;;  %v12292_v6 = vld [vmem:[#allocation8_spill] sm:$0xff] }
 0x423   : > { %v5036_v30 = vadd.f32 %v5033_v63, %v5018_v33  ;;  %v10322_v5 = vadd.f32 %v5362_v12, %v5361_v34  ;;  %v5194_v8 = vmul.f32 %v5185_v22, %v12279_v58  ;;  %v4563_v11 = vadd.f32 %v4560_v47, %v4530_v60  ;;  %v12288_v63 = vld [vmem:[#allocation125_spill] sm:$0xff]  ;;  %12290 = vst [vmem:[#allocation104_spill] sm:$0xff] %v10329_v54  ;;  %v12295_v58 = vld [vmem:[#allocation86_spill] sm:$0xff] }
 0x424   : > { %v5904_v4 = vmul.f32 1.442695, %v12285_v2  ;;  %v5910_v37 = vmul.f32 1.442695, %v12287_v48  ;;  %v5179_v21 = vadd.f32 %v5176_v43, %v5161_v45  ;;  %v5123_v59 = vmul.f32 %v5117_v20, %v12247_v0  ;;  %v12291_v43 = vld [vmem:[#allocation114_spill] sm:$0xff]  ;;  %v4611_v2 = vpop.permute.xlu1 %4610 }
 0x425   : > { %v5054_v32 = vadd.f32 %v5051_v3, %v5036_v30  ;;  %v12289_v36 = vrot.slane %v12288_v63, 2  ;;  %v4568_v34 = vrot.slane %v9988_v52, %v12206_v16  ;;  %v5203_v22 = vrot.slane %v10153_v9, %v12206_v16 }
 0x426   : > { %7329 = vpow2.f32 %v5904_v4  ;;  %v5197_v17 = vadd.f32 %v5194_v8, %v5179_v21  ;;  %v4572_v20 = vrot.slane %v10023_v50, %v12206_v16  ;;  %v5153_v45 = vrot.slane %v10222_v29, %v12197_v56  ;;  %v12294_v21 = vld [vmem:[#allocation118_spill] sm:$0xff] }
 0x427   : > { %v5870_v33 = vmax.f32 %v12288_v63, %v12289_v36  ;;  %7331 = vrcp.f32 %v10322_v5  ;;  %v5072_v60 = vadd.f32 %v5069_v51, %v5054_v32  ;;  %v5171_v12 = vrot.slane %v10222_v29, %v12204_v28 }
 0x428   : > { %7333 = vpow2.f32 %v5910_v37  ;;  %v4592_v47 = vmul.f32 %v12291_v43, %v4568_v34  ;;  %v5212_v30 = vmul.f32 %v5203_v22, %v12291_v43  ;;  %v12293_v51 = vsub.f32 %v12292_v6, %v12284_v18  ;;  %v12296_v43 = vld [vmem:[#allocation110_spill] sm:$0xff]  ;;  %v4613_v18 = vpop.permute.xlu0 %4612  ;;  %v12298_v6 = vld [vmem:[#allocation64_spill] sm:$0xff] }
 0x429   : > { %v5871_v3 = vrot.slane %v5870_v33, 1  ;;  %v5090_v4 = vadd.f32 %v5087_v25, %v5072_v60  ;;  %v4593_v8 = vmul.f32 %v12294_v21, %v4572_v20  ;;  %v4601_v36 = vrot.slane %v9988_v52, %v12208_v7  ;;  %v12297_v60 = vld [vmem:[#allocation59_spill] sm:$0xff]  ;;  %v12335_v52 = vld [vmem:[#allocation102_spill] sm:$0xff] }
 0x42a   : > { %v5916_v48 = vmul.f32 1.442695, %v12293_v51  ;;  %v4595_v32 = vadd.f32 %v4592_v47, %v4562_v23  ;;  %v5215_v63 = vadd.f32 %v5212_v30, %v5197_v17  ;;  %v5221_v54 = vrot.slane %v10153_v9, %v12208_v7  ;;  %v12300_v17 = vld [vmem:[#allocation112_spill] sm:$0xff] }
 0x42b   : > { %v5872_v37 = vmax.f32 %v5870_v33, %v5871_v3  ;;  %v5108_v34 = vadd.f32 %v5105_v13, %v5090_v4  ;;  %v12299_v33 = vrot.slane %v10222_v29, %v12196_v42  ;;  %v4596_v20 = vadd.f32 %v4593_v8, %v4563_v11  ;;  %v12302_v4 = vld [vmem:[#allocation70_spill] sm:$0xff]  ;;  %v10370_v11 = vpop.permute.xlu1 %4614 }
 0x42c   : > { %v10361_v47 = vsel %vm4618_vm13, %v4611_v2, %v4613_v18  ;;  %v7326_v30 = vpop.eup %7325  ;;  %v5189_v51 = vrot.slane %v10222_v29, %v12205_v62  ;;  %12303 = vst [vmem:[#allocation55_spill] sm:$0xff] %v10370_v11  ;;  %7335 = vpow2.f32 %v5916_v48  ;;  %v5207_v48 = vrot.slane %v10222_v29, %v12206_v16 }
 0x42d   : > { %v5887_v22 = vsub.f32 %v12295_v58, %v5872_v37  ;;  %v5890_v25 = vsub.f32 %v12296_v43, %v5872_v37  ;;  %v5893_v0 = vsub.f32 %v12297_v60, %v5872_v37  ;;  %v5141_v23 = vmul.f32 %v12299_v33, %v12298_v6  ;;  %12301 = vst [vmem:[#allocation106_spill] sm:$0xff] %v10361_v47 }
 0x42e   : > { %v5896_v3 = vsub.f32 %v12300_v17, %v5872_v37  ;;  %v5126_v13 = vadd.f32 %v5123_v59, %v5108_v34  ;;  %v5159_v58 = vmul.f32 %v5153_v45, %v12302_v4  ;;  %v5177_v43 = vmul.f32 %v5171_v12, %v12278_v15  ;;  %v12340_v15 = vld [vmem:[#allocation88_spill] sm:$0xff] }
 0x42f   : > { %v5380_v60 = vmul.f32 %v7326_v30, %v10301_v26  ;;  %v5900_v61 = vmul.f32 1.442695, %v5887_v22  ;;  %v4625_v33 = vmul.f32 %v10361_v47, %v4601_v36  ;;  %v5230_v37 = vmul.f32 %v5221_v54, %v10361_v47  ;;  %v10378_v12 = vpop.eup %7327 }
 0x430   : > { %v5144_v2 = vadd.f32 %v5141_v23, %v5126_v13  ;;  %v4605_v59 = vrot.slane %v10023_v50, %v12208_v7  ;;  %v10376_v45 = vsel %vm4618_vm13, %v4613_v18, %v10370_v11  ;;  %12305 = vst [vmem:[#allocation120_spill] sm:$0xff] %v10378_v12  ;;  %v5906_v26 = vmul.f32 1.442695, %v5890_v25 }
 0x431   : > { %12304 = vst [vmem:[#allocation10_spill] sm:$0xff] %v10376_v45  ;;  %v5383_v8 = vsub.f32 2.0, %v5380_v60  ;;  %v10380_v34 = vadd.f32 %v4625_v33, %v4595_v32  ;;  %v10382_v36 = vadd.f32 %v5230_v37, %v5215_v63  ;;  %v5912_v22 = vmul.f32 1.442695, %v5893_v0  ;;  %v12312_v37 = vld [vmem:[#allocation113_spill] sm:$0xff] }
 0x432   : > { %v5162_v54 = vadd.f32 %v5159_v58, %v5144_v2  ;;  %v4626_v23 = vmul.f32 %v10376_v45, %v4605_v59  ;;  %v5195_v18 = vmul.f32 %v5189_v51, %v12281_v57  ;;  %7337 = vpow2.f32 %v5900_v61  ;;  %v12313_v2 = vld [vmem:[#allocation116_spill] sm:$0xff] }
 0x433   : > { %12306 = vst [vmem:[#allocation85_spill] sm:$0xff] %v10380_v34  ;;  %12307 = vst [vmem:[#allocation125_spill] sm:$0xff] %v10382_v36  ;;  %v10387_v17 = vpop.eup %7329  ;;  %v10389_v13 = vmul.f32 %v7326_v30, %v5383_v8  ;;  %v5918_v60 = vmul.f32 1.442695, %v5896_v3  ;;  %v5225_v0 = vrot.slane %v10222_v29, %v12208_v7  ;;  %7339 = vpow2.f32 %v5906_v26  ;;  %v12320_v26 = vld [vmem:[#allocation131_spill] sm:$0xff]  ;;  %v12327_v34 = vld [vmem:[#allocation33_spill] sm:$0xff] }
 0x434   : > { %12308 = vst [vmem:[#allocation8_spill] sm:$0xff] %v10387_v17  ;;  %v7332_v25 = vpop.eup %7331  ;;  %v5180_v32 = vadd.f32 %v5177_v43, %v5162_v54  ;;  %v5922_v63 = vadd.f32 %v10387_v17, %v10378_v12  ;;  %v10394_v58 = vadd.f32 %v4626_v23, %v4596_v20  ;;  %7341 = vpow2.f32 %v5912_v22 }
 0x435   : > { %12309 = vst [vmem:[#allocation86_spill] sm:$0xff] %v10389_v13  ;;  %v10398_v33 = vpop.eup %7333  ;;  %v5389_v30 = vmul.f32 %v12312_v37, %v10389_v13  ;;  %v10404_v51 = vmul.f32 %v12313_v2, %v10389_v13  ;;  %v5381_v61 = vmul.f32 %v7332_v25, %v10322_v5  ;;  %v10413_v43 = vmul.f32 %v5207_v48, %v12294_v21  ;;  %v12316_v48 = vld [vmem:[#allocation20_spill] sm:$0xff] }
 0x436   : > { %12310 = vst [vmem:[#allocation110_spill] sm:$0xff] %v10394_v58  ;;  %12311 = vst [vmem:[#allocation59_spill] sm:$0xff] %v10398_v33  ;;  %v10407_v3 = vadd.f32 %v5195_v18, %v5180_v32  ;;  %v10410_v20 = vadd.f32 %v10398_v33, %v5922_v63  ;;  %7343 = vpow2.f32 %v5918_v60  ;;  %v10420_v5 = vmul.f32 %v5225_v0, %v10376_v45  ;;  %v12317_v32 = vld [vmem:[#allocation21_spill] sm:$0xff]  ;;  %v12319_v33 = vld [vmem:[#allocation24_spill] sm:$0xff] }
 0x437   : > { %v5384_v59 = vsub.f32 2.0, %v5381_v61  ;;  %v5404_v8 = vrot.slane %v5389_v30, %v12195_v1  ;;  %v5419_v54 = vrot.slane %v5389_v30, %v12196_v42  ;;  %v5437_v23 = vrot.slane %v5389_v30, %v12197_v56  ;;  %v12318_v61 = vld [vmem:[#allocation128_spill] sm:$0xff] }
 0x438   : > { %v5455_v37 = vrot.slane %v5389_v30, %v12204_v28  ;;  %12314 = vst [vmem:[#allocation112_spill] sm:$0xff] %v10420_v5  ;;  %v5473_v2 = vrot.slane %v5389_v30, %v12205_v62  ;;  %v10431_v11 = vmul.f32 %v12318_v61, %v10389_v13  ;;  %v5491_v0 = vrot.slane %v5389_v30, %v12206_v16  ;;  %v12323_v13 = vld [vmem:[#allocation25_spill] sm:$0xff]  ;;  %v12324_v45 = vld [vmem:[#allocation28_spill] sm:$0xff]  ;;  %v12337_v5 = vld [vmem:[#allocation87_spill] sm:$0xff] }
 0x439   : > { %v10424_v22 = vmul.f32 %v7332_v25, %v5384_v59  ;;  %v5413_v18 = vmul.f32 %v5404_v8, %v12316_v48  ;;  %v5428_v63 = vmul.f32 %v5419_v54, %v12317_v32  ;;  %v5446_v60 = vmul.f32 %v5437_v23, %v12319_v33  ;;  %v12321_v59 = vld [vmem:[#allocation49_spill] sm:$0xff]  ;;  %v12322_v54 = vld [vmem:[#allocation51_spill] sm:$0xff]  ;;  %v10455_v12 = vpop.eup %7335  ;;  %v12334_v21 = vld [vmem:[#allocation100_spill] sm:$0xff] }
 0x43a   : > { %v5509_v17 = vrot.slane %v5389_v30, %v12208_v7  ;;  %v5527_v48 = vrot.slane %v5389_v30, %v12209_v31  ;;  %v5545_v23 = vrot.slane %v10404_v51, %v12195_v1  ;;  %v5563_v33 = vrot.slane %v10404_v51, %v12196_v42  ;;  %v12325_v30 = vld [vmem:[#allocation29_spill] sm:$0xff] }
 0x43b   : > { %12315 = vst [vmem:[#allocation113_spill] sm:$0xff] %v10424_v22  ;;  %v10438_v25 = vmul.f32 %v12320_v26, %v10424_v22  ;;  %v10442_v8 = vmul.f32 %v12321_v59, %v10424_v22  ;;  %v10446_v32 = vmul.f32 %v12322_v54, %v10424_v22  ;;  %v5431_v61 = vadd.f32 %v5428_v63, %v5413_v18  ;;  %v12326_v22 = vld [vmem:[#allocation32_spill] sm:$0xff]  ;;  %v12329_v18 = vld [vmem:[#allocation37_spill] sm:$0xff] }
 0x43c   : > { %v5581_v26 = vrot.slane %v10404_v51, %v12197_v56  ;;  %v5464_v58 = vmul.f32 %v5455_v37, %v12323_v13  ;;  %v5482_v54 = vmul.f32 %v5473_v2, %v12324_v45  ;;  %v5500_v63 = vmul.f32 %v5491_v0, %v12325_v30  ;;  %v12330_v30 = vld [vmem:[#allocation40_spill] sm:$0xff] }
 0x43d   : > { %v5449_v59 = vadd.f32 %v5446_v60, %v5431_v61  ;;  %v5518_v47 = vmul.f32 %v5509_v17, %v12326_v22  ;;  %v5599_v29 = vrot.slane %v10404_v51, %v12204_v28  ;;  %v5617_v50 = vrot.slane %v10404_v51, %v12205_v62  ;;  %v12328_v61 = vld [vmem:[#allocation36_spill] sm:$0xff] }
 0x43e   : > { %v5536_v60 = vmul.f32 %v5527_v48, %v12327_v34  ;;  %v5554_v37 = vmul.f32 %v5545_v23, %v12328_v61  ;;  %v5635_v2 = vrot.slane %v10404_v51, %v12206_v16  ;;  %v5572_v0 = vmul.f32 %v5563_v33, %v12329_v18  ;;  %v12331_v33 = vld [vmem:[#allocation41_spill] sm:$0xff] }
 0x43f   : > { %v5467_v36 = vadd.f32 %v5464_v58, %v5449_v59  ;;  %v10471_v45 = vpop.eup %7337  ;;  %v5590_v17 = vmul.f32 %v5581_v26, %v12330_v30  ;;  %v5653_v22 = vrot.slane %v10404_v51, %v12208_v7  ;;  %v5671_v13 = vrot.slane %v10404_v51, %v12209_v31  ;;  %v12332_v30 = vld [vmem:[#allocation43_spill] sm:$0xff] }
 0x440   : > { %v5689_v48 = vrot.slane %v10431_v11, %v12195_v1  ;;  %v5707_v23 = vrot.slane %v10431_v11, %v12196_v42  ;;  %v5408_v59 = vrot.slane %v10438_v25, %v12195_v1  ;;  %v10485_v61 = vpop.eup %7339  ;;  %v5608_v26 = vmul.f32 %v5599_v29, %v12331_v33 }
 0x441   : > { %v5485_v58 = vadd.f32 %v5482_v54, %v5467_v36  ;;  %v10489_v18 = vmul.f32 %v5617_v50, %v12332_v30  ;;  %v5725_v51 = vrot.slane %v10431_v11, %v12197_v56  ;;  %v5743_v36 = vrot.slane %v10431_v11, %v12204_v28  ;;  %v10495_v54 = vpop.eup %7341 }
 0x442   : > { %12333 = vst [vmem:[#allocation116_spill] sm:$0xff] %v10495_v54  ;;  %v10498_v9 = vmul.f32 %v5635_v2, %v12334_v21  ;;  %v10501_v57 = vmul.f32 %v5653_v22, %v12335_v52  ;;  %v5414_v29 = vmul.f32 %v5408_v59, %v12337_v5  ;;  %v5423_v50 = vrot.slane %v10438_v25, %v12196_v42  ;;  %v12339_v21 = vld [vmem:[#allocation56_spill] sm:$0xff] }
 0x443   : > { %v5503_v34 = vadd.f32 %v5500_v63, %v5485_v58  ;;  %v5441_v30 = vrot.slane %v10438_v25, %v12197_v56  ;;  %v5459_v33 = vrot.slane %v10438_v25, %v12204_v28  ;;  %v5477_v63 = vrot.slane %v10438_v25, %v12205_v62  ;;  %v10512_v58 = vpop.eup %7343 }
 0x444   : > { %12336 = vst [vmem:[#allocation128_spill] sm:$0xff] %v10501_v57  ;;  %12338 = vst [vmem:[#allocation131_spill] sm:$0xff] %v10512_v58  ;;  %v10515_v22 = vmul.f32 %v5671_v13, %v12339_v21  ;;  %v10518_v59 = vmul.f32 %v5689_v48, %v12246_v53  ;;  %v10521_v5 = vmul.f32 %v5707_v23, %v12248_v35  ;;  %v12341_v13 = vld [vmem:[#allocation89_spill] sm:$0xff] }
 0x445   : > { %v5521_v2 = vadd.f32 %v5518_v47, %v5503_v34  ;;  %v10524_v52 = vmul.f32 %v5725_v51, %v9656_v49  ;;  %v10527_v57 = vmul.f32 %v5743_v36, %v12277_v10  ;;  %v5429_v54 = vmul.f32 %v5423_v50, %v12340_v15  ;;  %v12342_v51 = vld [vmem:[#allocation90_spill] sm:$0xff] }
 0x446   : > { %v5495_v47 = vrot.slane %v10438_v25, %v12206_v16  ;;  %v5447_v21 = vmul.f32 %v5441_v30, %v12341_v13  ;;  %v5513_v48 = vrot.slane %v10438_v25, %v12208_v7  ;;  %v5531_v23 = vrot.slane %v10438_v25, %v12209_v31  ;;  %v12367_v10 = vld [vmem:[#allocation10_spill] sm:$0xff] }
 0x447   : > { %v5539_v34 = vadd.f32 %v5536_v60, %v5521_v2  ;;  %v5432_v35 = vadd.f32 %v5429_v54, %v5414_v29  ;;  %v5465_v49 = vmul.f32 %v5459_v33, %v12342_v51  ;;  %v5483_v36 = vmul.f32 %v5477_v63, %v12270_v55 }
 0x448   : > { %v5549_v50 = vrot.slane %v10442_v8, %v12195_v1  ;;  %v5567_v60 = vrot.slane %v10442_v8, %v12196_v42  ;;  %v5585_v30 = vrot.slane %v10442_v8, %v12197_v56  ;;  %v5603_v2 = vrot.slane %v10442_v8, %v12204_v28 }
 0x449   : > { %v5557_v15 = vadd.f32 %v5554_v37, %v5539_v34  ;;  %v5450_v13 = vadd.f32 %v5447_v21, %v5432_v35  ;;  %v5501_v25 = vmul.f32 %v5495_v47, %v12271_v41  ;;  %v5621_v33 = vrot.slane %v10442_v8, %v12205_v62  ;;  %v12357_v41 = vld [vmem:[#allocation118_spill] sm:$0xff] }
 0x44a   : > { %v5639_v54 = vrot.slane %v10442_v8, %v12206_v16  ;;  %v5519_v37 = vmul.f32 %v5513_v48, %v12272_v44  ;;  %v5537_v63 = vmul.f32 %v5531_v23, %v12273_v46  ;;  %v5555_v34 = vmul.f32 %v5549_v50, %v12274_v39 }
 0x44b   : > { %v5575_v29 = vadd.f32 %v5572_v0, %v5557_v15  ;;  %v5468_v55 = vadd.f32 %v5465_v49, %v5450_v13  ;;  %v5657_v51 = vrot.slane %v10442_v8, %v12208_v7  ;;  %v5675_v35 = vrot.slane %v10442_v8, %v12209_v31  ;;  %v12349_v46 = vld [vmem:[#allocation128_spill] sm:$0xff] }
 0x44c   : > { %v5693_v21 = vrot.slane %v10446_v32, %v12195_v1  ;;  %v5573_v15 = vmul.f32 %v5567_v60, %v12237_v27  ;;  %v5591_v0 = vmul.f32 %v5585_v30, %v12238_v40  ;;  %v10564_v48 = vmul.f32 %v5603_v2, %v12239_v38  ;;  %v12348_v38 = vld [vmem:[#allocation112_spill] sm:$0xff]  ;;  %v4644_v27 = vpop.permute.xlu1 %4643 }
 0x44d   : > { %v5593_v47 = vadd.f32 %v5590_v17, %v5575_v29  ;;  %v5486_v23 = vadd.f32 %v5483_v36, %v5468_v55  ;;  %v10567_v49 = vmul.f32 %v5621_v33, %v12240_v24  ;;  %v10570_v13 = vmul.f32 %v5639_v54, %v12241_v19  ;;  %v12343_v36 = vld [vmem:[#allocation57_spill] sm:$0xff]  ;;  %v12344_v33 = vld [vmem:[#allocation60_spill] sm:$0xff]  ;;  %v12347_v24 = vld [vmem:[#allocation19_spill] sm:$0xff] }
 0x44e   : > { %v5711_v8 = vrot.slane %v10446_v32, %v12196_v42  ;;  %v10575_v17 = vmul.f32 %v5657_v51, %v12242_v14  ;;  %v5729_v60 = vrot.slane %v10446_v32, %v12197_v56  ;;  %v5747_v30 = vrot.slane %v10446_v32, %v12204_v28  ;;  %v10591_v51 = vpop.f32.mrf.mxu0  ;;  %v12346_v19 = vld [vmem:[#allocation116_spill] sm:$0xff] }
 0x44f   : > { %v5611_v50 = vadd.f32 %v5608_v26, %v5593_v47  ;;  %v5504_v55 = vadd.f32 %v5501_v25, %v5486_v23  ;;  %v10582_v2 = vmul.f32 %v5675_v35, %v12343_v36  ;;  %v10585_v54 = vmul.f32 %v5693_v21, %v12344_v33  ;;  %v10589_v26 = vpop.permute.xlu0 %4616  ;;  %v10600_v21 = vpop.f32.mrf.mxu1 }
 0x450   : > { %v5924_v29 = vadd.f32 %v10455_v12, %v10410_v20  ;;  %12345 = vst [vmem:[#allocation49_spill] sm:$0xff] %v10589_v26  ;;  %v5761_v14 = vrot.slane %v10431_v11, %v12205_v62  ;;  %v5931_v25 = vadd.f32 %v10485_v61, %v10471_v45  ;;  %v5216_v35 = vadd.f32 %v10413_v43, %v10407_v3  ;;  %v10618_v39 = vpop.f32.mrf.mxu0 }
 0x451   : > { %v5629_v47 = vadd.f32 %v10489_v18, %v5611_v50  ;;  %v5522_v23 = vadd.f32 %v5519_v37, %v5504_v55  ;;  %v5765_v20 = vrot.slane %v10446_v32, %v12205_v62  ;;  %v5779_v33 = vrot.slane %v10431_v11, %v12206_v16 }
 0x452   : > { %v5925_v26 = vrot.slane %v5924_v29, 4  ;;  %v10608_v50 = vmul.f32 %v5711_v8, %v12298_v6  ;;  %v10611_v36 = vmul.f32 %v5729_v60, %v12302_v4  ;;  %v5932_v3 = vadd.f32 %v12346_v19, %v5931_v25  ;;  %v10625_v25 = vpop.f32.mrf.mxu1  ;;  %v12353_v4 = vld [vmem:[#allocation124_spill] sm:$0xff] }
 0x453   : > { %v5647_v18 = vadd.f32 %v10498_v9, %v5629_v47  ;;  %v5540_v43 = vadd.f32 %v5537_v63, %v5522_v23  ;;  %v10615_v37 = vmul.f32 %v5747_v30, %v12347_v24  ;;  %v5234_v40 = vadd.f32 %v12348_v38, %v5216_v35  ;;  %v12350_v47 = vld [vmem:[#allocation107_spill] sm:$0xff]  ;;  %v12351_v30 = vld [vmem:[#allocation108_spill] sm:$0xff]  ;;  %v12352_v38 = vld [vmem:[#allocation114_spill] sm:$0xff]  ;;  %v4646_v35 = vpop.permute.xlu0 %4645 }
 0x454   : > { %v5926_v55 = vadd.f32 %v5925_v26, %v5924_v29  ;;  %v5770_v8 = vmul.f32 %v5761_v14, %v12350_v47  ;;  %v5933_v6 = vadd.f32 %v10512_v58, %v5932_v3  ;;  %v5783_v60 = vrot.slane %v10446_v32, %v12206_v16 }
 0x455   : > { %v5665_v9 = vadd.f32 %v12349_v46, %v5647_v18  ;;  %v5558_v63 = vadd.f32 %v5555_v34, %v5540_v43  ;;  %v10628_v23 = vmul.f32 %v5765_v20, %v12351_v30  ;;  %v5788_v26 = vmul.f32 %v5779_v33, %v12352_v38  ;;  %v12355_v43 = vld [vmem:[#allocation133_spill] sm:$0xff] }
 0x456   : > { %v5927_v29 = vrot.slane %v5926_v55, 2  ;;  %v5934_v46 = vrot.slane %v5933_v6, 4  ;;  %v5797_v14 = vrot.slane %v10431_v11, %v12208_v7  ;;  %v10635_v18 = vsel %vm4651_vm0, %v4644_v27, %v4646_v35  ;;  %v12359_v38 = vld [vmem:[#allocation125_spill] sm:$0xff] }
 0x457   : > { %v5683_v24 = vadd.f32 %v10515_v22, %v5665_v9  ;;  %v5576_v3 = vadd.f32 %v5573_v15, %v5558_v63  ;;  %v12354_v34 = vrot.slane %v12353_v4, %v12209_v31  ;;  %v12356_v33 = vrot.slane %v12355_v43, %v12209_v31  ;;  %v10645_v22 = vpop.f32.mrf.mxu0 }
 0x458   : > { %v5928_v58 = vadd.f32 %v5927_v29, %v5926_v55  ;;  %v5935_v44 = vadd.f32 %v5934_v46, %v5933_v6  ;;  %v10649_v27 = vmul.f32 %v5783_v60, %v12357_v41  ;;  %v5801_v15 = vrot.slane %v10446_v32, %v12208_v7  ;;  %v6921_v55 = vpop.f32.mrf.mxu1  ;;  %v12358_v29 = vld [vmem:[#allocation85_spill] sm:$0xff]  ;;  %v12361_v60 = vld [vmem:[#allocation130_spill] sm:$0xff] }
 0x459   : > { %v4658_v20 = vmul.f32 %v10635_v18, %v12354_v34  ;;  %v5248_v30 = vmul.f32 %v12356_v33, %v10635_v18  ;;  %v5701_v9 = vadd.f32 %v10518_v59, %v5683_v24  ;;  %v5594_v4 = vadd.f32 %v5591_v0, %v5576_v3  ;;  %v10659_v33 = vpop.permute.xlu1 %4647  ;;  %v12364_v41 = vld [vmem:[#allocation106_spill] sm:$0xff] }
 0x45a   : > { %v5929_v63 = vrot.slane %v5928_v58, 1  ;;  %12360 = vst [vmem:[#allocation51_spill] sm:$0xff] %v10659_v33  ;;  %v5936_v6 = vrot.slane %v5935_v44, 2  ;;  %v5815_v59 = vrot.slane %v10431_v11, %v12209_v31  ;;  %v4638_v46 = vrot.slane %v12361_v60, %v12209_v31 }
 0x45b   : > { %v10654_v34 = vadd.f32 %v4658_v20, %v12358_v29  ;;  %v10657_v43 = vadd.f32 %v5248_v30, %v12359_v38  ;;  %v5719_v24 = vadd.f32 %v10521_v5, %v5701_v9  ;;  %v5612_v0 = vadd.f32 %v10564_v48, %v5594_v4  ;;  %v12362_v30 = vld [vmem:[#allocation12_spill] sm:$0xff]  ;;  %v10675_v29 = vpop.permute.xlu0 %4649  ;;  %v10677_v5 = vpop.f32.mrf.mxu0 }
 0x45c   : > { %v10667_v3 = vadd.f32 %v5929_v63, %v5928_v58  ;;  %v10671_v20 = vsel %vm4651_vm0, %v4646_v35, %v10659_v33  ;;  %v5243_v38 = vrot.slane %v12362_v30, %v12209_v31  ;;  %12363 = vst [vmem:[#allocation116_spill] sm:$0xff] %v10675_v29  ;;  %v5937_v9 = vadd.f32 %v5936_v6, %v5935_v44  ;;  %v3727_v58 = vpop.f32.mrf.mxu1  ;;  %v12365_v63 = vld [vmem:[#allocation73_spill] sm:$0xff]  ;;  %v12366_v30 = vld [vmem:[#allocation126_spill] sm:$0xff] }
 0x45d   : > { %v5737_v11 = vadd.f32 %v10524_v52, %v5719_v24  ;;  %v5806_v60 = vmul.f32 %v5797_v14, %v12364_v41  ;;  %v4659_v48 = vmul.f32 %v10671_v20, %v4638_v46  ;;  %v5630_v4 = vadd.f32 %v10567_v49, %v5612_v0  ;;  %v12368_v44 = vld [vmem:[#allocation110_spill] sm:$0xff]  ;;  %v4677_v0 = vpop.permute.xlu1 %4676 }
 0x45e   : > { %7345 = vrcp.f32 %v10667_v3  ;;  %v5249_v35 = vmul.f32 %v5243_v38, %v10671_v20  ;;  %v3639_v33 = vadd.f32 %v12366_v30, %v12365_v63  ;;  %v5938_v47 = vrot.slane %v5937_v9, 1  ;;  %v6869_v38 = vpop.f32.mrf.mxu0 }
 0x45f   : > { %v5755_v29 = vadd.f32 %v10527_v57, %v5737_v11  ;;  %v10689_v52 = vmul.f32 %v5801_v15, %v12367_v10  ;;  %v10692_v14 = vadd.f32 %v4659_v48, %v12368_v44  ;;  %v5648_v24 = vadd.f32 %v10570_v13, %v5630_v4  ;;  %v12370_v15 = vld [vmem:[#allocation71_spill] sm:$0xff]  ;;  %v12371_v11 = vld [vmem:[#allocation117_spill] sm:$0xff]  ;;  %v6922_v44 = vpop.f32.mrf.mxu1  ;;  %v12374_v4 = vld [vmem:[#allocation122_spill] sm:$0xff] }
 0x460   : > { %v5824_v49 = vmul.f32 %v5815_v59, %v10635_v18  ;;  %v10696_v6 = vadd.f32 %v5249_v35, %v5234_v40  ;;  %v10698_v46 = vadd.f32 %v6921_v55, %v3639_v33  ;;  %v10700_v30 = vadd.f32 %v5938_v47, %v5937_v9  ;;  %v12372_v59 = vld [vmem:[#allocation76_spill] sm:$0xff]  ;;  %v12373_v55 = vld [vmem:[#allocation46_spill] sm:$0xff]  ;;  %v12375_v35 = vld [vmem:[#allocation77_spill] sm:$0xff]  ;;  %v4679_v47 = vpop.permute.xlu0 %4678 }
 0x461   : > { %v5773_v63 = vadd.f32 %v5770_v8, %v5755_v29  ;;  %v5819_v57 = vrot.slane %v10446_v32, %v12209_v31  ;;  %v3631_v48 = vadd.f32 %v12371_v11, %v12370_v15  ;;  %v5666_v13 = vadd.f32 %v10575_v17, %v5648_v24  ;;  %v12378_v24 = vld [vmem:[#allocation132_spill] sm:$0xff]  ;;  %v12379_v11 = vld [vmem:[#allocation63_spill] sm:$0xff] }
 0x462   : > { %12369 = vst [vmem:[#allocation112_spill] sm:$0xff] %v10698_v46  ;;  %v3813_v40 = vsel %vm3135_vm14, %v10698_v46, -inf  ;;  %v3642_v33 = vadd.f32 %v12373_v55, %v12372_v59  ;;  %v3912_v8 = vmul.f32 %v12375_v35, %v12374_v4  ;;  %7347 = vrcp.f32 %v10700_v30  ;;  %v6870_v59 = vpop.f32.mrf.mxu0  ;;  %v12380_v35 = vld [vmem:[#allocation86_spill] sm:$0xff]  ;;  %v12381_v46 = vld [vmem:[#allocation48_spill] sm:$0xff] }
 0x463   : > { %v5791_v29 = vadd.f32 %v5788_v26, %v5773_v63  ;;  %v10714_v32 = vadd.f32 %v3727_v58, %v3631_v48  ;;  %v5684_v9 = vadd.f32 %v10582_v2, %v5666_v13  ;;  %v4822_v10 = vmul.f32 %v12379_v11, %v12378_v24  ;;  %v10733_v13 = vpop.permute.xlu1 %4680  ;;  %v12385_v11 = vld [vmem:[#allocation129_spill] sm:$0xff] }
 0x464   : > { %v10717_v15 = vadd.f32 %v6922_v44, %v3642_v33  ;;  %v4667_v17 = vrot.slane %v3912_v8, %v12195_v1  ;;  %v5398_v26 = vmul.f32 %v12381_v46, %v12380_v35  ;;  %v10727_v58 = vsel %vm4684_vm1, %v4677_v0, %v4679_v47  ;;  %12382 = vst [vmem:[#allocation133_spill] sm:$0xff] %v10733_v13  ;;  %v3730_v46 = vpop.f32.mrf.mxu1 }
 0x465   : > { %12376 = vst [vmem:[#allocation128_spill] sm:$0xff] %v10714_v32  ;;  %v5809_v55 = vadd.f32 %v5806_v60, %v5791_v29  ;;  %v3811_v4 = vsel %vm3135_vm14, %v10714_v32, -inf  ;;  %v5702_v2 = vadd.f32 %v10585_v54, %v5684_v9  ;;  %v5257_v44 = vrot.slane %v4822_v10, %v12195_v1  ;;  %v12384_v9 = vld [vmem:[#allocation119_spill] sm:$0xff]  ;;  %v12386_v10 = vld [vmem:[#allocation80_spill] sm:$0xff] }
 0x466   : > { %12377 = vst [vmem:[#allocation124_spill] sm:$0xff] %v10717_v15  ;;  %v3814_v63 = vmax.f32 %v3811_v4, %v3813_v40  ;;  %v3815_v48 = vsel %vm3135_vm14, %v10717_v15, -inf  ;;  %v5833_v33 = vrot.slane %v5398_v26, %v12195_v1  ;;  %v4691_v8 = vmul.f32 %v10727_v58, %v4667_v17  ;;  %v12383_v40 = vld [vmem:[#allocation72_spill] sm:$0xff]  ;;  %v12387_v17 = vld [vmem:[#allocation58_spill] sm:$0xff] }
 0x467   : > { %v5827_v60 = vadd.f32 %v5824_v49, %v5809_v55  ;;  %v6871_v29 = vadd.f32 %v6870_v59, %v6869_v38  ;;  %v5720_v0 = vadd.f32 %v10608_v50, %v5702_v2  ;;  %v5266_v54 = vmul.f32 %v5257_v44, %v10727_v58  ;;  %v12388_v50 = vld [vmem:[#allocation109_spill] sm:$0xff] }
 0x468   : > { %v3634_v24 = vadd.f32 %v12384_v9, %v12383_v40  ;;  %v3913_v4 = vmul.f32 %v12386_v10, %v12385_v11  ;;  %v4694_v49 = vadd.f32 %v4691_v8, %v10654_v34  ;;  %v5842_v55 = vmul.f32 %v5833_v33, %v10727_v58  ;;  %v6872_v40 = vpop.f32.mrf.mxu0  ;;  %v12390_v33 = vld [vmem:[#allocation113_spill] sm:$0xff]  ;;  %v12392_v10 = vld [vmem:[#allocation83_spill] sm:$0xff] }
 0x469   : > { %v10748_v38 = vsel %vm4684_vm1, %v4679_v47, %v10733_v13  ;;  %v4823_v59 = vmul.f32 %v12388_v50, %v12387_v17  ;;  %v5738_v35 = vadd.f32 %v10611_v36, %v5720_v0  ;;  %v5269_v26 = vadd.f32 %v5266_v54, %v10657_v43  ;;  %v12391_v8 = vld [vmem:[#allocation53_spill] sm:$0xff]  ;;  %v6925_v50 = vpop.f32.mrf.mxu1 }
 0x46a   : > { %v10754_v2 = vadd.f32 %v3730_v46, %v3634_v24  ;;  %v4671_v44 = vrot.slane %v3913_v4, %v12195_v1  ;;  %v10757_v34 = vadd.f32 %v5842_v55, %v5827_v60  ;;  %v5399_v11 = vmul.f32 %v12391_v8, %v12390_v33 }
 0x46b   : > { %v7346_v9 = vpop.eup %7345  ;;  %v5261_v47 = vrot.slane %v4823_v59, %v12195_v1  ;;  %v3655_v36 = vadd.f32 %v6871_v29, %v12392_v10  ;;  %v5756_v43 = vadd.f32 %v10615_v37, %v5738_v35  ;;  %v6865_v54 = vadd.f32 %v10618_v39, %v10591_v51  ;;  %v6873_v59 = vpop.f32.mrf.mxu0  ;;  %v12397_v10 = vld [vmem:[#allocation8_spill] sm:$0xff] }
 0x46c   : > { %12389 = vst [vmem:[#allocation85_spill] sm:$0xff] %v10754_v2  ;;  %v5956_v46 = vmul.f32 %v7346_v9, %v10667_v3  ;;  %v3812_v0 = vsel %vm3135_vm14, %v10754_v2, -inf  ;;  %v4692_v60 = vmul.f32 %v10748_v38, %v4671_v44  ;;  %v10776_v24 = vadd.f32 %v10625_v25, %v10600_v21  ;;  %v12426_v2 = vld [vmem:[#allocation107_spill] sm:$0xff] }
 0x46d   : > { %v3816_v4 = vmax.f32 %v3812_v0, %v3815_v48  ;;  %v5267_v55 = vmul.f32 %v5261_v47, %v10748_v38  ;;  %v5774_v29 = vadd.f32 %v10628_v23, %v5756_v43  ;;  %v10781_v3 = vmul.f32 %v5819_v57, %v10671_v20 }
 0x46e   : > { %12393 = vst [vmem:[#allocation125_spill] sm:$0xff] %v10776_v24  ;;  %v5959_v37 = vsub.f32 2.0, %v5956_v46  ;;  %v4695_v17 = vadd.f32 %v4692_v60, %v10692_v14  ;;  %v5837_v51 = vrot.slane %v5399_v11, %v12195_v1  ;;  %v10786_v21 = vadd.f32 %v6925_v50, %v3655_v36  ;;  %v12398_v36 = vld [vmem:[#allocation59_spill] sm:$0xff]  ;;  %v12402_v50 = vld [vmem:[#allocation21_spill] sm:$0xff] }
 0x46f   : > { %v3817_v35 = vmax.f32 %v3814_v63, %v3816_v4  ;;  %v5270_v39 = vadd.f32 %v5267_v55, %v10696_v6  ;;  %v7348_v25 = vpop.eup %7347  ;;  %v5792_v23 = vadd.f32 %v10649_v27, %v5774_v29  ;;  %v10791_v57 = vadd.f32 %v10677_v5, %v10645_v22  ;;  %v12396_v6 = vld [vmem:[#allocation120_spill] sm:$0xff]  ;;  %v3743_v4 = vpop.f32.mrf.mxu1  ;;  %v12400_v55 = vld [vmem:[#allocation65_spill] sm:$0xff]  ;;  %v12423_v24 = vld [vmem:[#allocation87_spill] sm:$0xff] }
 0x470   : > { %12394 = vst [vmem:[#allocation130_spill] sm:$0xff] %v10786_v21  ;;  %v5962_v48 = vmul.f32 %v7346_v9, %v5959_v37  ;;  %v4699_v44 = vcombine.low %v4694_v49, %v4695_v17  ;;  %v5957_v14 = vmul.f32 %v7348_v25, %v10700_v30  ;;  %v6874_v33 = vadd.f32 %v6873_v59, %v6872_v40  ;;  %v12399_v40 = vld [vmem:[#allocation78_spill] sm:$0xff]  ;;  %v12401_v37 = vld [vmem:[#allocation20_spill] sm:$0xff] }
 0x471   : > { %12395 = vst [vmem:[#allocation12_spill] sm:$0xff] %v10791_v57  ;;  %v3818_v47 = vrot.slane %v3817_v35, 4  ;;  %v5274_v63 = vcombine.low %v5269_v26, %v5270_v39  ;;  %v10800_v9 = vadd.f32 %v10689_v52, %v5792_v23  ;;  %v10811_v5 = vmul.f32 %v5837_v51, %v10748_v38 }
 0x472   : > { %v5965_v8 = vmul.f32 %v12396_v6, %v5962_v48  ;;  %v5968_v11 = vmul.f32 %v12397_v10, %v5962_v48  ;;  %v10797_v43 = vmul.f32 %v12398_v36, %v5962_v48  ;;  %4701 = vst [vmem:[%s10803_s8] sm:$0xff] %v4699_v44  ;;  %v5960_v22 = vsub.f32 2.0, %v5957_v14  ;;  %v12403_v44 = vld [vmem:[#allocation24_spill] sm:$0xff] }
 0x473   : > { %v10807_v27 = vmul.f32 %v10455_v12, %v5962_v48  ;;  %6745 = vst [vmem:[%s10803_s8 + $0xc] sm:$0xff] %v5274_v63  ;;  %v10815_v30 = vsel %vm3135_vm14, %v10786_v21, -inf  ;;  %v3647_v46 = vadd.f32 %v6865_v54, %v12399_v40  ;;  %v10824_v60 = vmax.f32 %v3817_v35, %v3818_v47 }
 0x474   : > { %v5980_v52 = vrot.slane %v5965_v8, %v12195_v1  ;;  %v5995_v49 = vrot.slane %v5965_v8, %v12196_v42  ;;  %v6013_v26 = vrot.slane %v5965_v8, %v12197_v56  ;;  %v10821_v0 = vmul.f32 %v7348_v25, %v5960_v22 }
 0x475   : > { %v6031_v12 = vrot.slane %v5965_v8, %v12204_v28  ;;  %v10827_v29 = vadd.f32 %v6874_v33, %v12400_v55  ;;  %v6049_v39 = vrot.slane %v5965_v8, %v12205_v62  ;;  %v6067_v51 = vrot.slane %v5965_v8, %v12206_v16  ;;  %v12408_v55 = vld [vmem:[#allocation33_spill] sm:$0xff] }
 0x476   : > { %v5989_v17 = vmul.f32 %v5980_v52, %v12401_v37  ;;  %v6004_v59 = vmul.f32 %v5995_v49, %v12402_v50  ;;  %v10835_v54 = vmul.f32 %v10471_v45, %v10821_v0  ;;  %v10839_v35 = vmul.f32 %v10485_v61, %v10821_v0  ;;  %v12405_v49 = vld [vmem:[#allocation28_spill] sm:$0xff] }
 0x477   : > { %v10843_v25 = vmul.f32 %v12346_v19, %v10821_v0  ;;  %v6085_v48 = vrot.slane %v5965_v8, %v12208_v7  ;;  %v6022_v14 = vmul.f32 %v6013_v26, %v12403_v44  ;;  %v6103_v47 = vrot.slane %v5965_v8, %v12209_v31  ;;  %v12404_v19 = vld [vmem:[#allocation25_spill] sm:$0xff]  ;;  %v12409_v50 = vld [vmem:[#allocation36_spill] sm:$0xff] }
 0x478   : > { %v6007_v23 = vadd.f32 %v6004_v59, %v5989_v17  ;;  %v10848_v63 = vadd.f32 %v3743_v4, %v3647_v46  ;;  %v6121_v45 = vrot.slane %v5968_v11, %v12195_v1  ;;  %v6139_v33 = vrot.slane %v5968_v11, %v12196_v42  ;;  %v12406_v8 = vld [vmem:[#allocation29_spill] sm:$0xff]  ;;  %v12407_v46 = vld [vmem:[#allocation32_spill] sm:$0xff] }
 0x479   : > { %v6157_v61 = vrot.slane %v5968_v11, %v12197_v56  ;;  %v6175_v6 = vrot.slane %v5968_v11, %v12204_v28  ;;  %v6040_v36 = vmul.f32 %v6031_v12, %v12404_v19  ;;  %v6193_v22 = vrot.slane %v5968_v11, %v12205_v62  ;;  %v12410_v44 = vld [vmem:[#allocation37_spill] sm:$0xff]  ;;  %v12411_v12 = vld [vmem:[#allocation40_spill] sm:$0xff] }
 0x47a   : > { %v6025_v10 = vadd.f32 %v6022_v14, %v6007_v23  ;;  %v6211_v52 = vrot.slane %v5968_v11, %v12206_v16  ;;  %v6058_v26 = vmul.f32 %v6049_v39, %v12405_v49  ;;  %v6076_v40 = vmul.f32 %v6067_v51, %v12406_v8  ;;  %v12412_v19 = vld [vmem:[#allocation41_spill] sm:$0xff]  ;;  %v12413_v49 = vld [vmem:[#allocation43_spill] sm:$0xff] }
 0x47b   : > { %v6094_v4 = vmul.f32 %v6085_v48, %v12407_v46  ;;  %v6112_v37 = vmul.f32 %v6103_v47, %v12408_v55  ;;  %v6130_v59 = vmul.f32 %v6121_v45, %v12409_v50  ;;  %v6148_v21 = vmul.f32 %v6139_v33, %v12410_v44 }
 0x47c   : > { %v6043_v17 = vadd.f32 %v6040_v36, %v6025_v10  ;;  %v6229_v23 = vrot.slane %v5968_v11, %v12208_v7  ;;  %v6166_v14 = vmul.f32 %v6157_v61, %v12411_v12  ;;  %v10866_v13 = vmul.f32 %v6175_v6, %v12412_v19  ;;  %v12414_v10 = vld [vmem:[#allocation100_spill] sm:$0xff]  ;;  %v12415_v36 = vld [vmem:[#allocation102_spill] sm:$0xff]  ;;  %v12417_v19 = vld [vmem:[#allocation61_spill] sm:$0xff] }
 0x47d   : > { %v6247_v39 = vrot.slane %v5968_v11, %v12209_v31  ;;  %v6265_v51 = vrot.slane %v10797_v43, %v12195_v1  ;;  %v10872_v47 = vmul.f32 %v6193_v22, %v12413_v49  ;;  %v10875_v45 = vmul.f32 %v6211_v52, %v12414_v10  ;;  %v10888_v22 = vpop.f32.mrf.mxu1  ;;  %v12416_v52 = vld [vmem:[#allocation56_spill] sm:$0xff] }
 0x47e   : > { %v6061_v48 = vadd.f32 %v6058_v26, %v6043_v17  ;;  %v6283_v33 = vrot.slane %v10797_v43, %v12196_v42  ;;  %v10880_v61 = vmul.f32 %v6229_v23, %v12415_v36  ;;  %v6301_v6 = vrot.slane %v10797_v43, %v12197_v56  ;;  %v12419_v49 = vld [vmem:[#allocation68_spill] sm:$0xff]  ;;  %v12421_v36 = vld [vmem:[#allocation79_spill] sm:$0xff] }
 0x47f   : > { %v6319_v11 = vrot.slane %v10797_v43, %v12204_v28  ;;  %v6337_v26 = vrot.slane %v10797_v43, %v12205_v62  ;;  %v10891_v46 = vmul.f32 %v6247_v39, %v12416_v52  ;;  %v10894_v55 = vmul.f32 %v6265_v51, %v12246_v53 }
 0x480   : > { %v6079_v8 = vadd.f32 %v6076_v40, %v6061_v48  ;;  %v6355_v17 = vrot.slane %v10797_v43, %v12206_v16  ;;  %v5984_v50 = vrot.slane %v10835_v54, %v12195_v1  ;;  %v5999_v44 = vrot.slane %v10835_v54, %v12196_v42  ;;  %v10913_v48 = vpop.f32.mrf.mxu0 }
 0x481   : > { %v6017_v23 = vrot.slane %v10835_v54, %v12197_v56  ;;  %v6035_v40 = vrot.slane %v10835_v54, %v12204_v28  ;;  %v10907_v39 = vmul.f32 %v6283_v33, %v12417_v19  ;;  %v6053_v53 = vrot.slane %v10835_v54, %v12205_v62  ;;  %v10923_v33 = vpop.f32.mrf.mxu1 }
 0x482   : > { %v6097_v12 = vadd.f32 %v6094_v4, %v6079_v8  ;;  %v6071_v51 = vrot.slane %v10835_v54, %v12206_v16  ;;  %v10916_v10 = vmul.f32 %v6301_v6, %v12419_v49  ;;  %v10919_v52 = vmul.f32 %v6319_v11, %v12421_v36  ;;  %v12424_v4 = vld [vmem:[#allocation88_spill] sm:$0xff]  ;;  %12425 = vst [vmem:[#allocation110_spill] sm:$0xff] %v10923_v33  ;;  %v12431_v36 = vld [vmem:[#allocation90_spill] sm:$0xff] }
 0x483   : > { %12418 = vst [vmem:[#allocation106_spill] sm:$0xff] %v10907_v39  ;;  %v5990_v15 = vmul.f32 %v5984_v50, %v12423_v24  ;;  %v6005_v8 = vmul.f32 %v5999_v44, %v12424_v4  ;;  %v10926_v32 = vmul.f32 %v6337_v26, %v12426_v2  ;;  %v12428_v39 = vld [vmem:[#allocation114_spill] sm:$0xff]  ;;  %v6089_v6 = vrot.slane %v10835_v54, %v12208_v7  ;;  %v12432_v44 = vld [vmem:[#allocation91_spill] sm:$0xff] }
 0x484   : > { %12420 = vst [vmem:[#allocation73_spill] sm:$0xff] %v10916_v10  ;;  %12422 = vst [vmem:[#allocation126_spill] sm:$0xff] %v10919_v52  ;;  %v6115_v19 = vadd.f32 %v6112_v37, %v6097_v12  ;;  %v10929_v57 = vmul.f32 %v6355_v17, %v12428_v39  ;;  %v12430_v10 = vld [vmem:[#allocation89_spill] sm:$0xff]  ;;  %v6041_v52 = vmul.f32 %v6035_v40, %v12431_v36  ;;  %v12433_v12 = vld [vmem:[#allocation92_spill] sm:$0xff]  ;;  %v10941_v17 = vpop.f32.mrf.mxu0 }
 0x485   : > { %12427 = vst [vmem:[#allocation71_spill] sm:$0xff] %v10926_v32  ;;  %v6008_v49 = vadd.f32 %v6005_v8, %v5990_v15  ;;  %v6023_v11 = vmul.f32 %v6017_v23, %v12430_v10  ;;  %v6107_v24 = vrot.slane %v10835_v54, %v12209_v31  ;;  %v6059_v37 = vmul.f32 %v6053_v53, %v12432_v44  ;;  %v12435_v53 = vld [vmem:[#allocation93_spill] sm:$0xff]  ;;  %v12436_v10 = vld [vmem:[#allocation94_spill] sm:$0xff] }
 0x486   : > { %12429 = vst [vmem:[#allocation117_spill] sm:$0xff] %v10929_v57  ;;  %v6133_v50 = vadd.f32 %v6130_v59, %v6115_v19  ;;  %v6077_v2 = vmul.f32 %v6071_v51, %v12433_v12  ;;  %v6125_v26 = vrot.slane %v10839_v35, %v12195_v1  ;;  %v6143_v15 = vrot.slane %v10839_v35, %v12196_v42  ;;  %v10949_v59 = vpop.f32.mrf.mxu1  ;;  %v12437_v12 = vld [vmem:[#allocation95_spill] sm:$0xff]  ;;  %v12440_v57 = vld [vmem:[#allocation98_spill] sm:$0xff] }
 0x487   : > { %v6026_v39 = vadd.f32 %v6023_v11, %v6008_v49  ;;  %v6161_v23 = vrot.slane %v10839_v35, %v12197_v56  ;;  %v6179_v54 = vrot.slane %v10839_v35, %v12204_v28  ;;  %12434 = vst [vmem:[#allocation76_spill] sm:$0xff] %v10949_v59  ;;  %v6095_v51 = vmul.f32 %v6089_v6, %v12435_v53 }
 0x488   : > { %v6151_v40 = vadd.f32 %v6148_v21, %v6133_v50  ;;  %v6113_v4 = vmul.f32 %v6107_v24, %v12436_v10  ;;  %v6197_v8 = vrot.slane %v10839_v35, %v12205_v62  ;;  %v6215_v49 = vrot.slane %v10839_v35, %v12206_v16  ;;  %v6878_v50 = vpop.f32.mrf.mxu0  ;;  %v12439_v10 = vld [vmem:[#allocation97_spill] sm:$0xff]  ;;  %v10969_v33 = vpop.f32.mrf.mxu1 }
 0x489   : > { %v6044_v19 = vadd.f32 %v6041_v52, %v6026_v39  ;;  %v6233_v11 = vrot.slane %v10839_v35, %v12208_v7  ;;  %v6251_v36 = vrot.slane %v10839_v35, %v12209_v31  ;;  %v6131_v21 = vmul.f32 %v6125_v26, %v12437_v12  ;;  %v12438_v39 = vld [vmem:[#allocation96_spill] sm:$0xff] }
 0x48a   : > { %v6169_v44 = vadd.f32 %v6166_v14, %v6151_v40  ;;  %v6269_v6 = vrot.slane %v10843_v25, %v12195_v1  ;;  %v6287_v24 = vrot.slane %v10843_v25, %v12196_v42  ;;  %v6149_v53 = vmul.f32 %v6143_v15, %v12438_v39  ;;  %v12441_v14 = vld [vmem:[#allocation99_spill] sm:$0xff]  ;;  %v12442_v40 = vld [vmem:[#allocation101_spill] sm:$0xff] }
 0x48b   : > { %v6062_v52 = vadd.f32 %v6059_v37, %v6044_v19  ;;  %v6167_v59 = vmul.f32 %v6161_v23, %v12439_v10  ;;  %v6185_v32 = vmul.f32 %v6179_v54, %v12440_v57  ;;  %v10973_v26 = vmul.f32 %v6197_v8, %v12441_v14  ;;  %v12443_v19 = vld [vmem:[#allocation45_spill] sm:$0xff]  ;;  %v12445_v54 = vld [vmem:[#allocation60_spill] sm:$0xff]  ;;  %v12447_v10 = vld [vmem:[#allocation70_spill] sm:$0xff] }
 0x48c   : > { %v6187_v35 = vadd.f32 %v10866_v13, %v6169_v44  ;;  %v10976_v12 = vmul.f32 %v6215_v49, %v12442_v40  ;;  %v6305_v42 = vrot.slane %v10843_v25, %v12197_v56  ;;  %v10981_v15 = vmul.f32 %v6233_v11, %v12443_v19  ;;  %v12444_v23 = vld [vmem:[#allocation57_spill] sm:$0xff]  ;;  %v12446_v49 = vld [vmem:[#allocation64_spill] sm:$0xff] }
 0x48d   : > { %v6080_v37 = vadd.f32 %v6077_v2, %v6062_v52  ;;  %v10984_v39 = vmul.f32 %v6251_v36, %v12444_v23  ;;  %v6323_v57 = vrot.slane %v10843_v25, %v12204_v28  ;;  %v10990_v8 = vmul.f32 %v6269_v6, %v12445_v54  ;;  %v6879_v52 = vpop.f32.mrf.mxu0 }
 0x48e   : > { %v6205_v13 = vadd.f32 %v10872_v47, %v6187_v35  ;;  %v10993_v44 = vmul.f32 %v6287_v24, %v12446_v49  ;;  %v6341_v2 = vrot.slane %v10843_v25, %v12205_v62  ;;  %v10998_v14 = vmul.f32 %v6305_v42, %v12447_v10  ;;  %v11004_v35 = vpop.f32.mrf.mxu1  ;;  %v12448_v24 = vld [vmem:[#allocation19_spill] sm:$0xff] }
 0x48f   : > { %v6098_v11 = vadd.f32 %v6095_v51, %v6080_v37  ;;  %v6359_v36 = vrot.slane %v10843_v25, %v12206_v16  ;;  %v6373_v47 = vrot.slane %v10797_v43, %v12208_v7  ;;  %v11008_v40 = vmul.f32 %v6323_v57, %v12448_v24  ;;  %v12449_v49 = vld [vmem:[#allocation131_spill] sm:$0xff] }
 0x490   : > { %v6223_v6 = vadd.f32 %v10875_v45, %v6205_v13  ;;  %v6377_v19 = vrot.slane %v10843_v25, %v12208_v7  ;;  %v6391_v42 = vrot.slane %v10797_v43, %v12209_v31  ;;  %v5828_v37 = vadd.f32 %v10781_v3, %v10800_v9  ;;  %v3762_v10 = vpop.f32.mrf.mxu1 }
 0x491   : > { %v6116_v51 = vadd.f32 %v6113_v4, %v6098_v11  ;;  %v6395_v23 = vrot.slane %v10843_v25, %v12209_v31  ;;  %v6409_v54 = vrot.slane %v10807_v27, %v12195_v1  ;;  %v3820_v13 = vrot.slane %v10824_v60, 2  ;;  %v6881_v4 = vpop.f32.mrf.mxu0 }
 0x492   : > { %v6241_v45 = vadd.f32 %v10880_v61, %v6223_v6  ;;  %v11022_v57 = vmul.f32 %v6391_v42, %v10635_v18  ;;  %v5975_v43 = vmul.f32 %v12449_v49, %v10821_v0  ;;  %v5846_v27 = vadd.f32 %v10811_v5, %v5828_v37 }
 0x493   : > { %v6134_v11 = vadd.f32 %v6131_v21, %v6116_v51  ;;  %v11028_v3 = vmul.f32 %v6395_v23, %v10671_v20  ;;  %v11031_v9 = vmul.f32 %v6409_v54, %v10727_v58  ;;  %v3821_v61 = vmax.f32 %v10824_v60, %v3820_v13  ;;  %v6882_v51 = vpop.f32.mrf.mxu0  ;;  %v12453_v13 = vld [vmem:[#allocation9_spill] sm:$0xff] }
 0x494   : > { %v6259_v18 = vadd.f32 %v10891_v46, %v6241_v45  ;;  %v6413_v6 = vrot.slane %v5975_v43, %v12195_v1  ;;  %v4721_v0 = vsel %vm3135_vm14, %v10848_v63, -inf  ;;  %v5850_v20 = vcombine.low %v10757_v34, %v5846_v27  ;;  %v12450_v34 = vld [vmem:[#allocation81_spill] sm:$0xff] }
 0x495   : > { %v6152_v21 = vadd.f32 %v6149_v53, %v6134_v11  ;;  %v4724_v24 = vmax.f32 %v4721_v0, %v10815_v30  ;;  %v11043_v58 = vadd.f32 %v10888_v22, %v10827_v29  ;;  %v3822_v42 = vrot.slane %v3821_v61, 1  ;;  %v12451_v30 = vld [vmem:[#allocation12_spill] sm:$0xff]  ;;  %v6933_v29 = vpop.f32.mrf.mxu1  ;;  %v12452_v22 = vld [vmem:[#allocation106_spill] sm:$0xff]  ;;  %v12456_v11 = vld [vmem:[#allocation73_spill] sm:$0xff] }
 0x496   : > { %v6277_v5 = vadd.f32 %v10894_v55, %v6259_v18  ;;  %v11047_v46 = vmul.f32 %v6413_v6, %v10748_v38  ;;  %v6877_v60 = vadd.f32 %v10941_v17, %v10913_v48  ;;  %v6382_v53 = vmul.f32 %v6373_v47, %v12364_v41  ;;  %6747 = vst [vmem:[%s10803_s8 + $0x18] sm:$0xff] %v5850_v20  ;;  %v12454_v48 = vld [vmem:[#allocation110_spill] sm:$0xff]  ;;  %v12457_v18 = vld [vmem:[#allocation128_spill] sm:$0xff] }
 0x497   : > { %v6170_v37 = vadd.f32 %v6167_v59, %v6152_v21  ;;  %v3650_v23 = vadd.f32 %v12451_v30, %v12450_v34  ;;  %v6880_v54 = vadd.f32 %v6879_v52, %v6878_v50  ;;  %v3823_v55 = vmax.f32 %v3821_v61, %v3822_v42  ;;  %v12455_v41 = vld [vmem:[#allocation14_spill] sm:$0xff]  ;;  %v12458_v52 = vld [vmem:[#allocation85_spill] sm:$0xff]  ;;  %v12459_v0 = vld [vmem:[#allocation112_spill] sm:$0xff] }
 0x498   : > { %v6295_v45 = vadd.f32 %v12452_v22, %v6277_v5  ;;  %v4725_v38 = vsel %vm3135_vm14, %v11043_v58, -inf  ;;  %v3663_v49 = vadd.f32 %v6877_v60, %v12453_v13  ;;  %v6883_v59 = vadd.f32 %v6882_v51, %v6881_v4  ;;  %v12460_v20 = vld [vmem:[#allocation124_spill] sm:$0xff]  ;;  %v6884_v4 = vpop.f32.mrf.mxu0  ;;  %v3775_v60 = vpop.f32.mrf.mxu1  ;;  %v12461_v51 = vld [vmem:[#allocation126_spill] sm:$0xff] }
 0x499   : > { %v6188_v43 = vadd.f32 %v6185_v32, %v6170_v37  ;;  %v11060_v17 = vadd.f32 %v12454_v48, %v3650_v23  ;;  %v3666_v47 = vadd.f32 %v6880_v54, %v12455_v41  ;;  %v3826_v50 = vsub.f32 %v12457_v18, %v3823_v55  ;;  %v12463_v13 = vld [vmem:[#allocation52_spill] sm:$0xff] }
 0x49a   : > { %v6313_v27 = vadd.f32 %v12456_v11, %v6295_v45  ;;  %v3829_v6 = vsub.f32 %v12458_v52, %v3823_v55  ;;  %v3832_v61 = vsub.f32 %v12459_v0, %v3823_v55  ;;  %v3835_v5 = vsub.f32 %v12460_v20, %v3823_v55 }
 0x49b   : > { %v6206_v21 = vadd.f32 %v10973_v26, %v6188_v43  ;;  %v4722_v32 = vsel %vm3135_vm14, %v11060_v17, -inf  ;;  %v11072_v42 = vadd.f32 %v10969_v33, %v3663_v49  ;;  %v3840_v34 = vmul.f32 1.442695, %v3826_v50  ;;  %v12462_v26 = vld [vmem:[#allocation15_spill] sm:$0xff]  ;;  %v6934_v50 = vpop.f32.mrf.mxu1 }
 0x49c   : > { %v6331_v37 = vadd.f32 %v12461_v51, %v6313_v27  ;;  %v3846_v30 = vmul.f32 1.442695, %v3829_v6  ;;  %v3852_v23 = vmul.f32 1.442695, %v3832_v61  ;;  %v3858_v22 = vmul.f32 1.442695, %v3835_v5 }
 0x49d   : > { %v6224_v54 = vadd.f32 %v10976_v12, %v6206_v21  ;;  %v4726_v45 = vmax.f32 %v4722_v32, %v4725_v38  ;;  %v3687_v55 = vadd.f32 %v12463_v13, %v12462_v26  ;;  %v12464_v43 = vld [vmem:[#allocation71_spill] sm:$0xff]  ;;  %7349 = vpow2.f32 %v3840_v34  ;;  %v6885_v12 = vpop.f32.mrf.mxu0  ;;  %v12466_v38 = vld [vmem:[#allocation117_spill] sm:$0xff]  ;;  %v12467_v6 = vld [vmem:[#allocation76_spill] sm:$0xff] }
 0x49e   : > { %v6349_v48 = vadd.f32 %v12464_v43, %v6331_v37  ;;  %v5297_v33 = vsel %vm3135_vm14, %v11072_v42, -inf  ;;  %v12465_v49 = vld [vmem:[#allocation11_spill] sm:$0xff]  ;;  %7351 = vpow2.f32 %v3846_v30  ;;  %v11089_v61 = vadd.f32 %v3762_v10, %v3666_v47  ;;  %v12468_v5 = vld [vmem:[#allocation13_spill] sm:$0xff]  ;;  %v4683_v37 = vpop.permute.xlu0 %4682 }
 0x49f   : > { %v3671_v41 = vadd.f32 %v6883_v59, %v12465_v49  ;;  %v6242_v11 = vadd.f32 %v10981_v15, %v6224_v54  ;;  %v4727_v27 = vmax.f32 %v4724_v24, %v4726_v45  ;;  %v11083_v18 = vadd.f32 %v6933_v29, %v3687_v55  ;;  %v12469_v32 = vld [vmem:[#allocation123_spill] sm:$0xff]  ;;  %v12470_v30 = vld [vmem:[#allocation121_spill] sm:$0xff]  ;;  %v3778_v54 = vpop.f32.mrf.mxu1  ;;  %v12472_v45 = vld [vmem:[#allocation16_spill] sm:$0xff] }
 0x4a0   : > { %v6367_v52 = vadd.f32 %v12466_v38, %v6349_v48  ;;  %7353 = vpow2.f32 %v3852_v23  ;;  %v6886_v20 = vadd.f32 %v6885_v12, %v6884_v4  ;;  %v3679_v51 = vadd.f32 %v12469_v32, %v12468_v5  ;;  %v12473_v13 = vld [vmem:[#allocation17_spill] sm:$0xff]  ;;  %v12474_v4 = vld [vmem:[#allocation127_spill] sm:$0xff] }
 0x4a1   : > { %v11087_v0 = vadd.f32 %v12467_v6, %v3671_v41  ;;  %v6260_v21 = vadd.f32 %v10984_v39, %v6242_v11  ;;  %7355 = vpow2.f32 %v3858_v22  ;;  %v4728_v59 = vrot.slane %v4727_v27, 4  ;;  %v12471_v39 = vld [vmem:[#allocation125_spill] sm:$0xff] }
 0x4a2   : > { %v5875_v15 = vsel %vm3135_vm14, %v11083_v18, -inf  ;;  %v6385_v24 = vadd.f32 %v6382_v53, %v6367_v52  ;;  %v3690_v23 = vadd.f32 %v12471_v39, %v12470_v30  ;;  %v3674_v53 = vadd.f32 %v6886_v20, %v12472_v45  ;;  %v12479_v45 = vld [vmem:[#allocation130_spill] sm:$0xff] }
 0x4a3   : > { %v5299_v29 = vsel %vm3135_vm14, %v11087_v0, -inf  ;;  %v6278_v34 = vadd.f32 %v10990_v8, %v6260_v21  ;;  %v4729_v10 = vmax.f32 %v4727_v27, %v4728_v59  ;;  %v11103_v26 = vadd.f32 %v3775_v60, %v3679_v51  ;;  %v12475_v8 = vld [vmem:[#allocation133_spill] sm:$0xff] }
 0x4a4   : > { %v5300_v47 = vmax.f32 %v5297_v33, %v5299_v29  ;;  %v6403_v22 = vadd.f32 %v11022_v57, %v6385_v24  ;;  %v3682_v55 = vadd.f32 %v12474_v4, %v12473_v13  ;;  %v11108_v49 = vadd.f32 %v6934_v50, %v3690_v23 }
 0x4a5   : > { %v6296_v43 = vadd.f32 %v10993_v44, %v6278_v34  ;;  %v4730_v48 = vrot.slane %v4729_v10, 2  ;;  %v11112_v33 = vsel %vm4684_vm1, %v12475_v8, %v4683_v37  ;;  %v11116_v57 = vadd.f32 %v11004_v35, %v3674_v53  ;;  %v12476_v44 = vld [vmem:[#allocation108_spill] sm:$0xff]  ;;  %v12478_v34 = vld [vmem:[#allocation10_spill] sm:$0xff] }
 0x4a6   : > { %v6421_v41 = vadd.f32 %v11031_v9, %v6403_v22  ;;  %v5873_v60 = vsel %vm3135_vm14, %v11103_v26, -inf  ;;  %v11120_v11 = vadd.f32 %v3778_v54, %v3682_v55  ;;  %v6347_v12 = vmul.f32 %v6341_v2, %v12476_v44  ;;  %v12477_v2 = vld [vmem:[#allocation118_spill] sm:$0xff] }
 0x4a7   : > { %v6314_v27 = vadd.f32 %v10998_v14, %v6296_v43  ;;  %v4731_v50 = vmax.f32 %v4729_v10, %v4730_v48  ;;  %v5876_v38 = vmax.f32 %v5873_v60, %v5875_v15  ;;  %v5298_v9 = vsel %vm3135_vm14, %v11089_v61, -inf }
 0x4a8   : > { %v5301_v35 = vsel %vm3135_vm14, %v11116_v57, -inf  ;;  %v5877_v52 = vsel %vm3135_vm14, %v11108_v49, -inf  ;;  %v5874_v6 = vsel %vm3135_vm14, %v11120_v11, -inf  ;;  %v6365_v15 = vmul.f32 %v6359_v36, %v12477_v2 }
 0x4a9   : > { %v6332_v14 = vadd.f32 %v11008_v40, %v6314_v27  ;;  %v4732_v21 = vrot.slane %v4731_v50, 1  ;;  %v5302_v59 = vmax.f32 %v5298_v9, %v5301_v35  ;;  %v5878_v24 = vmax.f32 %v5874_v6, %v5877_v52 }
 0x4aa   : > { %v11140_v29 = vpop.eup %7349  ;;  %v6383_v40 = vmul.f32 %v6377_v19, %v12478_v34 }
 0x4ab   : > { %v6350_v20 = vadd.f32 %v6347_v12, %v6332_v14  ;;  %v4733_v5 = vmax.f32 %v4731_v50, %v4732_v21  ;;  %v5303_v32 = vmax.f32 %v5300_v47, %v5302_v59  ;;  %v5879_v51 = vmax.f32 %v5876_v38, %v5878_v24  ;;  %v11142_v37 = vpop.eup %7351 }
 0x4ac   : > { %v3878_v10 = vsel %vm3135_vm14, %v11140_v29, 0.0  ;;  %v3879_v36 = vsel %vm3135_vm14, %v11142_v37, 0.0 }
 0x4ad   : > { %v11150_v30 = vpop.eup %7353  ;;  %v6368_v39 = vadd.f32 %v6365_v15, %v6350_v20  ;;  %v4736_v23 = vsub.f32 %v10848_v63, %v4733_v5  ;;  %v4739_v47 = vsub.f32 %v11060_v17, %v4733_v5  ;;  %v3880_v22 = vadd.f32 %v3879_v36, %v3878_v10 }
 0x4ae   : > { %v11156_v54 = vpop.eup %7355  ;;  %v4742_v53 = vsub.f32 %v12479_v45, %v4733_v5  ;;  %v4745_v25 = vsub.f32 %v11043_v58, %v4733_v5  ;;  %v3881_v13 = vsel %vm3135_vm14, %v11150_v30, 0.0  ;;  %v5304_v60 = vrot.slane %v5303_v32, 4 }
 0x4af   : > { %v6386_v19 = vadd.f32 %v6383_v40, %v6368_v39  ;;  %v4750_v4 = vmul.f32 1.442695, %v4736_v23  ;;  %v4756_v55 = vmul.f32 1.442695, %v4739_v47  ;;  %v3882_v43 = vadd.f32 %v3881_v13, %v3880_v22 }
 0x4b0   : > { %v4762_v48 = vmul.f32 1.442695, %v4742_v53  ;;  %v4768_v8 = vmul.f32 1.442695, %v4745_v25  ;;  %v3883_v17 = vsel %vm3135_vm14, %v11156_v54, 0.0  ;;  %v5880_v27 = vrot.slane %v5879_v51, 4 }
 0x4b1   : > { %v6404_v63 = vadd.f32 %v11028_v3, %v6386_v19  ;;  %7357 = vpow2.f32 %v4750_v4  ;;  %v3884_v44 = vadd.f32 %v3883_v17, %v3882_v43  ;;  %v5305_v58 = vmax.f32 %v5303_v32, %v5304_v60 }
 0x4b2   : > { %7359 = vpow2.f32 %v4756_v55  ;;  %v5881_v50 = vmax.f32 %v5879_v51, %v5880_v27 }
 0x4b3   : > { %v6422_v12 = vadd.f32 %v11047_v46, %v6404_v63  ;;  %7361 = vpow2.f32 %v4762_v48  ;;  %v3885_v38 = vrot.slane %v3884_v44, 4  ;;  %v5306_v9 = vrot.slane %v5305_v58, 2 }
 0x4b4   : > { %7363 = vpow2.f32 %v4768_v8  ;;  %v5882_v52 = vrot.slane %v5881_v50, 2 }
 0x4b5   : > { %v6426_v35 = vcombine.low %v6421_v41, %v6422_v12  ;;  %v3886_v6 = vadd.f32 %v3885_v38, %v3884_v44  ;;  %v5307_v3 = vmax.f32 %v5305_v58, %v5306_v9 }
 0x4b6   : > { %v5883_v14 = vmax.f32 %v5881_v50, %v5882_v52 }
 0x4b7   : > { %6749 = vst [vmem:[%s10803_s8 + $0x24] sm:$0xff] %v6426_v35  ;;  %v3887_v21 = vrot.slane %v3886_v6, 2  ;;  %v5308_v59 = vrot.slane %v5307_v3, 1 }
 0x4b8   : > { %v5884_v24 = vrot.slane %v5883_v14, 1 }
 0x4b9   : > { %v3888_v2 = vadd.f32 %v3887_v21, %v3886_v6  ;;  %v5309_v15 = vmax.f32 %v5307_v3, %v5308_v59 }
 0x4ba   : > { %v5885_v20 = vmax.f32 %v5883_v14, %v5884_v24 }
 0x4bb   : > { %v3889_v5 = vrot.slane %v3888_v2, 1  ;;  %v5312_v46 = vsub.f32 %v11072_v42, %v5309_v15  ;;  %v5315_v32 = vsub.f32 %v11089_v61, %v5309_v15  ;;  %v5318_v51 = vsub.f32 %v11087_v0, %v5309_v15 }
 0x4bc   : > { %v5321_v41 = vsub.f32 %v11116_v57, %v5309_v15  ;;  %v5888_v34 = vsub.f32 %v11103_v26, %v5885_v20  ;;  %v5891_v40 = vsub.f32 %v11120_v11, %v5885_v20  ;;  %v5894_v10 = vsub.f32 %v11083_v18, %v5885_v20 }
 0x4bd   : > { %v3890_v36 = vadd.f32 %v3889_v5, %v3888_v2  ;;  %v5326_v23 = vmul.f32 1.442695, %v5312_v46  ;;  %v5332_v47 = vmul.f32 1.442695, %v5315_v32  ;;  %v5897_v0 = vsub.f32 %v11108_v49, %v5885_v20 }
 0x4be   : > { %v11174_v39 = vpop.eup %7357  ;;  %v5338_v57 = vmul.f32 1.442695, %v5318_v51  ;;  %v5902_v45 = vmul.f32 1.442695, %v5888_v34  ;;  %v5908_v25 = vmul.f32 1.442695, %v5891_v40 }
 0x4bf   : > { %v11176_v22 = vpop.eup %7359  ;;  %v4788_v42 = vsel %vm3135_vm14, %v11174_v39, 0.0  ;;  %7365 = vrcp.f32 %v3890_v36  ;;  %v5914_v13 = vmul.f32 1.442695, %v5894_v10  ;;  %v5920_v4 = vmul.f32 1.442695, %v5897_v0  ;;  %v12487_v0 = vld [vmem:[#allocation23_spill] sm:$0xff] }
 0x4c0   : > { %v11181_v61 = vpop.eup %7361  ;;  %v4789_v26 = vsel %vm3135_vm14, %v11176_v22, 0.0  ;;  %7367 = vpow2.f32 %v5326_v23  ;;  %v5344_v43 = vmul.f32 1.442695, %v5321_v41 }
 0x4c1   : > { %v11185_v18 = vpop.eup %7363  ;;  %v4790_v11 = vadd.f32 %v4789_v26, %v4788_v42  ;;  %v4791_v53 = vsel %vm3135_vm14, %v11181_v61, 0.0  ;;  %7369 = vpow2.f32 %v5332_v47  ;;  %v12486_v47 = vld [vmem:[#allocation18_spill] sm:$0xff] }
 0x4c2   : > { %v4793_v49 = vsel %vm3135_vm14, %v11185_v18, 0.0  ;;  %7371 = vpow2.f32 %v5338_v57 }
 0x4c3   : > { %v4792_v19 = vadd.f32 %v4791_v53, %v4790_v11  ;;  %7373 = vpow2.f32 %v5902_v45 }
 0x4c4   : > { %7375 = vpow2.f32 %v5908_v25  ;;  %v12488_v25 = vld [vmem:[#allocation22_spill] sm:$0xff] }
 0x4c5   : > { %v4794_v55 = vadd.f32 %v4793_v49, %v4792_v19  ;;  %7377 = vpow2.f32 %v5914_v13  ;;  %v12489_v49 = vld [vmem:[#allocation44_spill] sm:$0xff] }
 0x4c6   : > { %7379 = vpow2.f32 %v5920_v4  ;;  %v12490_v4 = vld [vmem:[#allocation103_spill] sm:$0xff] }
 0x4c7   : > { %v4795_v48 = vrot.slane %v4794_v55, 4  ;;  %7381 = vpow2.f32 %v5344_v43  ;;  %v12491_v43 = vld [vmem:[#allocation54_spill] sm:$0xff] }
 0x4c9   : > { %v4796_v8 = vadd.f32 %v4795_v48, %v4794_v55  ;;  %v11251_v55 = vsel %vm4387_vm4, %v12490_v4, %v12489_v49  ;;  %v12492_v48 = vld [vmem:[#allocation50_spill] sm:$0xff]  ;;  %v12510_v49 = vld [vmem:[#allocation55_spill] sm:$0xff] }
 0x4cb   : > { %v4797_v60 = vrot.slane %v4796_v8, 2 }
 0x4cc   : > { %v7366_v63 = vpop.eup %7365 }
 0x4cd   : > { %v4798_v17 = vadd.f32 %v4797_v60, %v4796_v8  ;;  %v11191_v27 = vpop.eup %7367  ;;  %v3896_v44 = vmul.f32 %v7366_v63, %v3890_v36  ;;  %v11256_v8 = vsel %vm1741_vm12, %v12492_v48, %v12491_v43  ;;  %vm12538_vm12 = vcmask 519168  }
 0x4ce   : > { %12480 = vst [vmem:[#allocation46_spill] sm:$0xff] %v11191_v27  ;;  %v11193_v58 = vpop.eup %7369  ;;  %v5364_v50 = vsel %vm3135_vm14, %v11191_v27, 0.0  ;;  %vm12548_vm3 = vmmov %vm12538_vm12 }
 0x4cf   : > { %12481 = vst [vmem:[#allocation122_spill] sm:$0xff] %v11193_v58  ;;  %v4799_v12 = vrot.slane %v4798_v17, 1  ;;  %v3899_v38 = vsub.f32 2.0, %v3896_v44  ;;  %v5365_v9 = vsel %vm3135_vm14, %v11193_v58, 0.0  ;;  %v11199_v35 = vpop.eup %7371  ;;  %v12494_v44 = vld [vmem:[#allocation62_spill] sm:$0xff]  ;;  %vm12550_vm15 = vmmov %vm12548_vm3 }
 0x4d0   : > { %12482 = vst [vmem:[#allocation77_spill] sm:$0xff] %v11199_v35  ;;  %v5366_v6 = vadd.f32 %v5365_v9, %v5364_v50  ;;  %v11201_v3 = vpop.eup %7373  ;;  %v5367_v32 = vsel %vm3135_vm14, %v11199_v35, 0.0  ;;  %vm12551_vm4 = vmmov %vm12548_vm3 }
 0x4d1   : > { %v4800_v52 = vadd.f32 %v4799_v12, %v4798_v17  ;;  %v3902_v14 = vmul.f32 %v7366_v63, %v3899_v38  ;;  %v11203_v21 = vpop.eup %7375  ;;  %v5940_v59 = vsel %vm3135_vm14, %v11201_v3, 0.0  ;;  %v12493_v17 = vld [vmem:[#allocation67_spill] sm:$0xff] }
 0x4d2   : > { %v11207_v24 = vpop.eup %7377  ;;  %v5941_v5 = vsel %vm3135_vm14, %v11203_v21, 0.0  ;;  %v5368_v36 = vadd.f32 %v5367_v32, %v5366_v6  ;;  %v12496_v38 = vld [vmem:[#allocation27_spill] sm:$0xff] }
 0x4d3   : > { %7383 = vrcp.f32 %v4800_v52  ;;  %v11210_v2 = vmul.f32 %v11140_v29, %v3902_v14  ;;  %v11213_v15 = vmul.f32 %v11142_v37, %v3902_v14  ;;  %v11216_v20 = vmul.f32 %v11150_v30, %v3902_v14  ;;  %v11220_v46 = vpop.eup %7379  ;;  %v12484_v30 = vld [vmem:[#allocation47_spill] sm:$0xff] }
 0x4d4   : > { %12483 = vst [vmem:[#allocation132_spill] sm:$0xff] %v11220_v46  ;;  %v5942_v51 = vadd.f32 %v5941_v5, %v5940_v59  ;;  %v11225_v41 = vmul.f32 %v11156_v54, %v3902_v14  ;;  %v5943_v29 = vsel %vm3135_vm14, %v11207_v24, 0.0  ;;  %v11235_v10 = vpop.eup %7381  ;;  %v5945_v54 = vsel %vm3135_vm14, %v11220_v46, 0.0  ;;  %v12497_v14 = vld [vmem:[#allocation74_spill] sm:$0xff]  ;;  %v12498_v59 = vld [vmem:[#allocation69_spill] sm:$0xff]  ;;  %v12500_v32 = vld [vmem:[#allocation7_spill] sm:$0xff] }
 0x4d5   : > { %v3926_v37 = vrot.slane %v11210_v2, %v12195_v1  ;;  %v3956_v34 = vrot.slane %v11210_v2, %v12484_v30  ;;  %v3986_v40 = vrot.slane %v11210_v2, %v12197_v56  ;;  %12485 = vst [vmem:[#allocation63_spill] sm:$0xff] %v11235_v10  ;;  %v4016_v57 = vrot.slane %v11210_v2, %v12204_v28 }
 0x4d6   : > { %v5944_v23 = vadd.f32 %v5943_v29, %v5942_v51  ;;  %v5369_v45 = vsel %vm3135_vm14, %v11235_v10, 0.0  ;;  %v4046_v13 = vrot.slane %v11210_v2, %v12205_v62  ;;  %vm12495_vm14 = vmmov %vm12103_vm5  ;;  %v4076_v6 = vrot.slane %v11210_v2, %v12206_v16  ;;  %v12501_v51 = vld [vmem:[#allocation82_spill] sm:$0xff] }
 0x4d7   : > { %v3944_v42 = vmul.f32 %v12486_v47, %v3926_v37  ;;  %v3971_v26 = vmul.f32 %v12487_v0, %v3956_v34  ;;  %v4001_v19 = vmul.f32 %v12488_v25, %v3986_v40  ;;  %v5370_v60 = vadd.f32 %v5369_v45, %v5368_v36  ;;  %v12502_v37 = vld [vmem:[#allocation111_spill] sm:$0xff]  ;;  %v12503_v34 = vld [vmem:[#allocation105_spill] sm:$0xff]  ;;  %v12518_v10 = vld [vmem:[#allocation38_spill] sm:$0xff] }
 0x4d8   : > { %v5946_v11 = vadd.f32 %v5945_v54, %v5944_v23  ;;  %v11261_v12 = vsel %vm12495_vm14, %v12494_v44, %v12493_v17  ;;  %v4031_v9 = vmul.f32 %v12496_v38, %v4016_v57  ;;  %v11269_v5 = vsel %vm12499_vm2, %v12498_v59, %v12497_v14  ;;  %v12505_v23 = vld [vmem:[#allocation104_spill] sm:$0xff]  ;;  %v12506_v54 = vld [vmem:[#allocation115_spill] sm:$0xff]  ;;  %v12508_v57 = vld [vmem:[#allocation26_spill] sm:$0xff] }
 0x4d9   : > { %v3974_v53 = vadd.f32 %v3971_v26, %v3944_v42  ;;  %v11274_v29 = vsel %vm4519_vm9, %v12501_v51, %v12500_v32  ;;  %v11279_v40 = vsel %vm4552_vm10, %v12503_v34, %v12502_v37  ;;  %v11284_v42 = vsel %vm4585_vm11, %v12506_v54, %v12505_v23  ;;  %v12511_v17 = vld [vmem:[#allocation116_spill] sm:$0xff]  ;;  %v12512_v44 = vld [vmem:[#allocation51_spill] sm:$0xff]  ;;  %v12514_v54 = vld [vmem:[#allocation30_spill] sm:$0xff] }
 0x4da   : > { %v5947_v63 = vrot.slane %v5946_v11, 4  ;;  %12504 = vst [vmem:[#allocation86_spill] sm:$0xff] %v11279_v40  ;;  %12507 = vst [vmem:[#allocation48_spill] sm:$0xff] %v11284_v42  ;;  %v4061_v45 = vmul.f32 %v12508_v57, %v4046_v13  ;;  %v5371_v43 = vrot.slane %v5370_v60, 4  ;;  %v4136_v59 = vrot.slane %v11210_v2, %v12209_v31 }
 0x4db   : > { %v4004_v50 = vadd.f32 %v4001_v19, %v3974_v53  ;;  %v4106_v53 = vrot.slane %v11210_v2, %v12208_v7  ;;  %v12509_v19 = vld [vmem:[#allocation49_spill] sm:$0xff]  ;;  %v4166_v37 = vrot.slane %v11213_v15, %v12195_v1  ;;  %v4226_v2 = vrot.slane %v11213_v15, %v12197_v56 }
 0x4dc   : > { %v5948_v36 = vadd.f32 %v5947_v63, %v5946_v11  ;;  %v11292_v4 = vsel %vm4618_vm13, %v12510_v49, %v12509_v19  ;;  %v4376_v11 = vrot.slane %v11213_v15, %v12209_v31  ;;  %v4196_v49 = vrot.slane %v11213_v15, %v12484_v30 }
 0x4dd   : > { %v4034_v26 = vadd.f32 %v4031_v9, %v4004_v50  ;;  %v11299_v50 = vsel %vm4651_vm0, %v12512_v44, %v12511_v17  ;;  %v12513_v9 = vld [vmem:[#allocation31_spill] sm:$0xff]  ;;  %v4121_v19 = vmul.f32 %v12514_v54, %v4106_v53  ;;  %v4609_v53 = vrot.slane %v11216_v20, %v12208_v7 }
 0x4de   : > { %v5949_v48 = vrot.slane %v5948_v36, 2  ;;  %v4091_v14 = vmul.f32 %v12513_v9, %v4076_v6  ;;  %v11307_v34 = vmul.f32 %v11251_v55, %v4376_v11  ;;  %v4477_v6 = vrot.slane %v11216_v20, %v12197_v56 }
 0x4df   : > { %v4064_v13 = vadd.f32 %v4061_v45, %v4034_v26  ;;  %v11314_v45 = vadd.f32 %v5371_v43, %v5370_v60  ;;  %v4256_v60 = vrot.slane %v11213_v15, %v12204_v28  ;;  %v4211_v35 = vmul.f32 %v12518_v10, %v4196_v49 }
 0x4e0   : > { %v7384_v63 = vpop.eup %7383  ;;  %v5950_v51 = vadd.f32 %v5949_v48, %v5948_v36  ;;  %v12515_v48 = vld [vmem:[#allocation35_spill] sm:$0xff]  ;;  %v11320_v17 = vmul.f32 %v11269_v5, %v4477_v6  ;;  %v4286_v49 = vrot.slane %v11213_v15, %v12205_v62 }
 0x4e1   : > { %v4806_v32 = vmul.f32 %v7384_v63, %v4800_v52  ;;  %v4094_v23 = vadd.f32 %v4091_v14, %v4064_v13  ;;  %v4151_v11 = vmul.f32 %v12515_v48, %v4136_v59  ;;  %v12517_v14 = vld [vmem:[#allocation34_spill] sm:$0xff]  ;;  %v4642_v59 = vrot.slane %v11216_v20, %v12209_v31 }
 0x4e2   : > { %v5951_v52 = vrot.slane %v5950_v51, 1  ;;  %12516 = vst [vmem:[#allocation72_spill] sm:$0xff] %v11320_v17 }
 0x4e3   : > { %v4809_v26 = vsub.f32 2.0, %v4806_v32  ;;  %v4124_v36 = vadd.f32 %v4121_v19, %v4094_v23  ;;  %v4181_v32 = vmul.f32 %v12517_v14, %v4166_v37  ;;  %v11331_v23 = vmul.f32 %v11292_v4, %v4609_v53  ;;  %v12522_v53 = vld [vmem:[#allocation42_spill] sm:$0xff] }
 0x4e4   : > { %v11324_v13 = vadd.f32 %v5951_v52, %v5950_v51  ;;  %v11348_v6 = vmul.f32 %v11299_v50, %v4642_v59 }
 0x4e5   : > { %v4812_v44 = vmul.f32 %v7384_v63, %v4809_v26  ;;  %v4154_v43 = vadd.f32 %v4151_v11, %v4124_v36  ;;  %12519 = vst [vmem:[#allocation119_spill] sm:$0xff] %v11331_v23 }
 0x4e6   : > { %7385 = vrcp.f32 %v11324_v13  ;;  %12520 = vst [vmem:[#allocation129_spill] sm:$0xff] %v11348_v6  ;;  %v4510_v6 = vrot.slane %v11216_v20, %v12204_v28 }
 0x4e7   : > { %v11336_v19 = vmul.f32 %v11174_v39, %v4812_v44  ;;  %v11339_v63 = vmul.f32 %v11176_v22, %v4812_v44  ;;  %v11342_v51 = vmul.f32 %v11181_v61, %v4812_v44  ;;  %v4184_v37 = vadd.f32 %v4181_v32, %v4154_v43  ;;  %v12521_v39 = vld [vmem:[#allocation39_spill] sm:$0xff] }
 0x4e8   : > { %v11351_v26 = vmul.f32 %v11185_v18, %v4812_v44  ;;  %v4241_v52 = vmul.f32 %v12521_v39, %v4226_v2  ;;  %v4271_v32 = vmul.f32 %v12522_v53, %v4256_v60  ;;  %v4316_v43 = vrot.slane %v11213_v15, %v12206_v16 }
 0x4e9   : > { %v4836_v22 = vrot.slane %v11336_v19, %v12195_v1  ;;  %v4851_v61 = vrot.slane %v11336_v19, %v12484_v30  ;;  %v4869_v36 = vrot.slane %v11336_v19, %v12197_v56  ;;  %v4214_v11 = vadd.f32 %v4211_v35, %v4184_v37  ;;  %v12523_v35 = vld [vmem:[#allocation66_spill] sm:$0xff] }
 0x4ea   : > { %v4346_v18 = vrot.slane %v11213_v15, %v12208_v7  ;;  %v4411_v2 = vrot.slane %v11216_v20, %v12195_v1  ;;  %v4887_v58 = vrot.slane %v11336_v19, %v12204_v28  ;;  %v4301_v37 = vmul.f32 %v12523_v35, %v4286_v49 }
 0x4eb   : > { %v4839_v44 = vmul.f32 %v4836_v22, %v12486_v47  ;;  %v4854_v59 = vmul.f32 %v4851_v61, %v12487_v0  ;;  %v4244_v27 = vadd.f32 %v4241_v52, %v4214_v11  ;;  %v4444_v60 = vrot.slane %v11216_v20, %v12484_v30  ;;  %v12524_v47 = vld [vmem:[#allocation75_spill] sm:$0xff]  ;;  %v12525_v11 = vld [vmem:[#allocation84_spill] sm:$0xff] }
 0x4ec   : > { %v4543_v15 = vrot.slane %v11216_v20, %v12205_v62  ;;  %v4872_v22 = vmul.f32 %v4869_v36, %v12488_v25  ;;  %v4905_v61 = vrot.slane %v11336_v19, %v12205_v62  ;;  %v4331_v52 = vmul.f32 %v12524_v47, %v4316_v43 }
 0x4ed   : > { %v4857_v23 = vadd.f32 %v4854_v59, %v4839_v44  ;;  %v4274_v0 = vadd.f32 %v4271_v32, %v4244_v27  ;;  %v4361_v49 = vmul.f32 %v12525_v11, %v4346_v18  ;;  %v4576_v35 = vrot.slane %v11216_v20, %v12206_v16 }
 0x4ee   : > { %v4429_v53 = vmul.f32 %v11256_v8, %v4411_v2  ;;  %v4890_v17 = vmul.f32 %v4887_v58, %v12496_v38  ;;  %v4923_v44 = vrot.slane %v11336_v19, %v12206_v16  ;;  %v4462_v59 = vmul.f32 %v11261_v12, %v4444_v60 }
 0x4ef   : > { %v4875_v46 = vadd.f32 %v4872_v22, %v4857_v23  ;;  %v4304_v36 = vadd.f32 %v4301_v37, %v4274_v0  ;;  %v4528_v27 = vmul.f32 %v11274_v29, %v4510_v6  ;;  %v4941_v32 = vrot.slane %v11336_v19, %v12208_v7 }
 0x4f0   : > { %v4561_v43 = vmul.f32 %v11279_v40, %v4543_v15  ;;  %v4908_v20 = vmul.f32 %v4905_v61, %v12508_v57  ;;  %v5103_v23 = vrot.slane %v11339_v63, %v12209_v31  ;;  %v11398_v2 = vmul.f32 %v11284_v42, %v4576_v35 }
 0x4f1   : > { %v4893_v18 = vadd.f32 %v4890_v17, %v4875_v46  ;;  %v4334_v58 = vadd.f32 %v4331_v52, %v4304_v36  ;;  %v4675_v0 = vrot.slane %v11225_v41, %v12195_v1  ;;  %v5157_v6 = vrot.slane %v11342_v51, %v12197_v56 }
 0x4f2   : > { %v4926_v60 = vmul.f32 %v4923_v44, %v12513_v9  ;;  %v4959_v46 = vrot.slane %v11336_v19, %v12209_v31  ;;  %v11408_v17 = vmul.f32 %v5103_v23, %v11251_v55  ;;  %v4944_v35 = vmul.f32 %v4941_v32, %v12514_v54 }
 0x4f3   : > { %v4911_v37 = vadd.f32 %v4908_v20, %v4893_v18  ;;  %v7386_v15 = vpop.eup %7385  ;;  %v4364_v22 = vadd.f32 %v4361_v49, %v4334_v58  ;;  %v4977_v61 = vrot.slane %v11339_v63, %v12195_v1  ;;  %v11414_v41 = vmul.f32 %v5157_v6, %v11269_v5 }
 0x4f4   : > { %v5958_v52 = vmul.f32 %v7386_v15, %v11324_v13  ;;  %v4995_v44 = vrot.slane %v11339_v63, %v12484_v30  ;;  %v5013_v19 = vrot.slane %v11339_v63, %v12197_v56  ;;  %v5031_v49 = vrot.slane %v11339_v63, %v12204_v28 }
 0x4f5   : > { %v4929_v36 = vadd.f32 %v4926_v60, %v4911_v37  ;;  %v4399_v18 = vadd.f32 %v11307_v34, %v4364_v22  ;;  %v5229_v32 = vrot.slane %v11342_v51, %v12208_v7  ;;  %v5247_v20 = vrot.slane %v11342_v51, %v12209_v31 }
 0x4f6   : > { %v5961_v23 = vsub.f32 2.0, %v5958_v52  ;;  %v4962_v58 = vmul.f32 %v4959_v46, %v12515_v48  ;;  %v5049_v6 = vrot.slane %v11339_v63, %v12205_v62  ;;  %v4980_v60 = vmul.f32 %v4977_v61, %v12517_v14 }
 0x4f7   : > { %v4947_v13 = vadd.f32 %v4944_v35, %v4929_v36  ;;  %v4432_v37 = vadd.f32 %v4429_v53, %v4399_v18  ;;  %v11433_v34 = vmul.f32 %v5229_v32, %v11292_v4  ;;  %v11436_v22 = vmul.f32 %v5247_v20, %v11299_v50  ;;  %v12528_v20 = vld [vmem:[#allocation72_spill] sm:$0xff] }
 0x4f8   : > { %v5964_v42 = vmul.f32 %v7386_v15, %v5961_v23  ;;  %v5265_v52 = vrot.slane %v11351_v26, %v12195_v1  ;;  %v5373_v35 = vrot.slane %v11314_v45, 2  ;;  %v4998_v36 = vmul.f32 %v4995_v44, %v12518_v10  ;;  %v12529_v44 = vld [vmem:[#allocation132_spill] sm:$0xff] }
 0x4f9   : > { %12526 = vst [vmem:[#allocation80_spill] sm:$0xff] %v11433_v34  ;;  %12527 = vst [vmem:[#allocation58_spill] sm:$0xff] %v11436_v22  ;;  %v4965_v40 = vadd.f32 %v4962_v58, %v4947_v13  ;;  %v4465_v46 = vadd.f32 %v4462_v59, %v4432_v37  ;;  %v5016_v53 = vmul.f32 %v5013_v19, %v12521_v39  ;;  %v12531_v58 = vld [vmem:[#allocation42_spill] sm:$0xff] }
 0x4fa   : > { %v11444_v61 = vmul.f32 %v11112_v33, %v4675_v0  ;;  %v11447_v18 = vmul.f32 %v11201_v3, %v5964_v42  ;;  %v11450_v32 = vmul.f32 %v11203_v21, %v5964_v42  ;;  %v11453_v15 = vmul.f32 %v11207_v24, %v5964_v42 }
 0x4fb   : > { %v4983_v26 = vadd.f32 %v4980_v60, %v4965_v40  ;;  %v4498_v23 = vadd.f32 %v12528_v20, %v4465_v46  ;;  %v5374_v59 = vadd.f32 %v5373_v35, %v11314_v45  ;;  %v11458_v13 = vmul.f32 %v12529_v44, %v5964_v42  ;;  %v12533_v46 = vld [vmem:[#allocation23_spill] sm:$0xff]  ;;  %v12534_v44 = vld [vmem:[#allocation66_spill] sm:$0xff] }
 0x4fc   : > { %v11461_v0 = vmul.f32 %v5265_v52, %v11112_v33  ;;  %v5988_v3 = vrot.slane %v11447_v18, %v12195_v1  ;;  %v6003_v21 = vrot.slane %v11447_v18, %v12484_v30  ;;  %v6021_v24 = vrot.slane %v11447_v18, %v12197_v56  ;;  %v12532_v52 = vld [vmem:[#allocation18_spill] sm:$0xff] }
 0x4fd   : > { %v5001_v19 = vadd.f32 %v4998_v36, %v4983_v26  ;;  %v4531_v40 = vadd.f32 %v4528_v27, %v4498_v23  ;;  %v5034_v37 = vmul.f32 %v5031_v49, %v12531_v58  ;;  %v5067_v42 = vrot.slane %v11339_v63, %v12206_v16 }
 0x4fe   : > { %12530 = vst [vmem:[#allocation109_spill] sm:$0xff] %v11461_v0  ;;  %v5375_v45 = vrot.slane %v5374_v59, 1  ;;  %v5991_v35 = vmul.f32 %v5988_v3, %v12532_v52  ;;  %v6006_v36 = vmul.f32 %v6003_v21, %v12533_v46  ;;  %v6039_v26 = vrot.slane %v11447_v18, %v12204_v28 }
 0x4ff   : > { %v5019_v60 = vadd.f32 %v5016_v53, %v5001_v19  ;;  %v4564_v20 = vadd.f32 %v4561_v43, %v4531_v40  ;;  %v5052_v0 = vmul.f32 %v5049_v6, %v12534_v44  ;;  %v5085_v27 = vrot.slane %v11339_v63, %v12208_v7 }
 0x500   : > { %v5376_v23 = vadd.f32 %v5375_v45, %v5374_v59  ;;  %v6009_v22 = vadd.f32 %v6006_v36, %v5991_v35  ;;  %v6024_v34 = vmul.f32 %v6021_v24, %v12488_v25  ;;  %v6057_v53 = vrot.slane %v11447_v18, %v12205_v62  ;;  %v12535_v59 = vld [vmem:[#allocation119_spill] sm:$0xff] }
 0x501   : > { %v5037_v49 = vadd.f32 %v5034_v37, %v5019_v60  ;;  %v4597_v19 = vadd.f32 %v11398_v2, %v4564_v20  ;;  %v5070_v3 = vmul.f32 %v5067_v42, %v12524_v47  ;;  %v6042_v6 = vmul.f32 %v6039_v26, %v12496_v38 }
 0x502   : > { %7387 = vrcp.f32 %v5376_v23  ;;  %v6027_v43 = vadd.f32 %v6024_v34, %v6009_v22  ;;  %v6075_v63 = vrot.slane %v11447_v18, %v12206_v16  ;;  %v5088_v37 = vmul.f32 %v5085_v27, %v12525_v11  ;;  %v12536_v22 = vld [vmem:[#allocation129_spill] sm:$0xff] }
 0x503   : > { %v5055_v21 = vadd.f32 %v5052_v0, %v5037_v49  ;;  %v4630_v40 = vadd.f32 %v12535_v59, %v4597_v19  ;;  %v5121_v24 = vrot.slane %v11342_v51, %v12195_v1  ;;  %v5139_v2 = vrot.slane %v11342_v51, %v12484_v30 }
 0x504   : > { %v6045_v42 = vadd.f32 %v6042_v6, %v6027_v43  ;;  %v6060_v0 = vmul.f32 %v6057_v53, %v12508_v57  ;;  %v6093_v34 = vrot.slane %v11447_v18, %v12208_v7  ;;  %v6078_v26 = vmul.f32 %v6075_v63, %v12513_v9 }
 0x505   : > { %v5073_v45 = vadd.f32 %v5070_v3, %v5055_v21  ;;  %v4663_v60 = vadd.f32 %v12536_v22, %v4630_v40  ;;  %v6111_v20 = vrot.slane %v11447_v18, %v12209_v31  ;;  %v5124_v27 = vmul.f32 %v5121_v24, %v11256_v8 }
 0x506   : > { %v6063_v36 = vadd.f32 %v6060_v0, %v6045_v42  ;;  %v5175_v49 = vrot.slane %v11342_v51, %v12204_v28  ;;  %v6129_v53 = vrot.slane %v11450_v32, %v12195_v1  ;;  %v6255_v19 = vrot.slane %v11450_v32, %v12209_v31 }
 0x507   : > { %v5091_v35 = vadd.f32 %v5088_v37, %v5073_v45  ;;  %v5142_v21 = vmul.f32 %v5139_v2, %v11261_v12  ;;  %v6096_v6 = vmul.f32 %v6093_v34, %v12514_v54  ;;  %v5193_v18 = vrot.slane %v11342_v51, %v12205_v62 }
 0x508   : > { %v6081_v43 = vadd.f32 %v6078_v26, %v6063_v36  ;;  %v6147_v63 = vrot.slane %v11450_v32, %v12484_v30  ;;  %v11515_v59 = vmul.f32 %v6255_v19, %v11251_v55  ;;  %v6309_v40 = vrot.slane %v11453_v15, %v12197_v56 }
 0x509   : > { %v5109_v3 = vadd.f32 %v11408_v17, %v5091_v35  ;;  %v5211_v17 = vrot.slane %v11342_v51, %v12206_v16  ;;  %v6114_v2 = vmul.f32 %v6111_v20, %v12515_v48  ;;  %v5178_v45 = vmul.f32 %v5175_v49, %v11274_v29 }
 0x50a   : > { %v6099_v24 = vadd.f32 %v6096_v6, %v6081_v43  ;;  %v6132_v42 = vmul.f32 %v6129_v53, %v12517_v14  ;;  %v6165_v0 = vrot.slane %v11450_v32, %v12197_v56  ;;  %v11527_v34 = vmul.f32 %v6309_v40, %v11269_v5  ;;  %v12537_v6 = vld [vmem:[#allocation86_spill] sm:$0xff] }
 0x50b   : > { %v5127_v37 = vadd.f32 %v5124_v27, %v5109_v3  ;;  %v6381_v36 = vrot.slane %v11453_v15, %v12208_v7  ;;  %v6399_v51 = vrot.slane %v11453_v15, %v12209_v31  ;;  %v6150_v26 = vmul.f32 %v6147_v63, %v12518_v10 }
 0x50c   : > { %v6117_v35 = vadd.f32 %v6114_v2, %v6099_v24  ;;  %v6183_v20 = vrot.slane %v11450_v32, %v12204_v28  ;;  %v6417_v27 = vrot.slane %v11458_v13, %v12195_v1  ;;  %v4696_v49 = vadd.f32 %v11444_v61, %v4663_v60 }
 0x50d   : > { %v5145_v22 = vadd.f32 %v5142_v21, %v5127_v37  ;;  %v11541_v21 = vmul.f32 %v6381_v36, %v11292_v4  ;;  %v11544_v43 = vmul.f32 %v6399_v51, %v11299_v50  ;;  %v5196_v63 = vmul.f32 %v5193_v18, %v12537_v6 }
 0x50e   : > { %v6135_v3 = vadd.f32 %v6132_v42, %v6117_v35  ;;  %4702 = vst.msk [vmem:[%s10803_s8 + $0x8] sm:$0xf] %vm12538_vm12, %v4696_v49  ;;  %v11550_v37 = vmul.f32 %v6417_v27, %v11112_v33  ;;  %v6168_v60 = vmul.f32 %v6165_v0, %v12521_v39  ;;  %v12540_v42 = vld [vmem:[#allocation48_spill] sm:$0xff]  ;;  %v6186_v18 = vmul.f32 %v6183_v20, %v12531_v58  ;;  %v12541_v49 = vld [vmem:[#allocation46_spill] sm:$0xff] }
 0x50f   : > { %v7388_v53 = vpop.eup %7387  ;;  %v5163_v19 = vadd.f32 %v11414_v41, %v5145_v22  ;;  %v6201_v41 = vrot.slane %v11450_v32, %v12205_v62  ;;  %v5214_v22 = vmul.f32 %v5211_v17, %v12540_v42  ;;  %v12543_v0 = vld [vmem:[#allocation80_spill] sm:$0xff]  ;;  %v12544_v20 = vld [vmem:[#allocation58_spill] sm:$0xff] }
 0x510   : > { %v5382_v40 = vmul.f32 %v7388_v53, %v5376_v23  ;;  %12539 = vst [vmem:[#allocation113_spill] sm:$0xff] %v11550_v37  ;;  %v6153_v61 = vadd.f32 %v6150_v26, %v6135_v3  ;;  %v12542_v26 = vld [vmem:[#allocation122_spill] sm:$0xff] }
 0x511   : > { %v5181_v13 = vadd.f32 %v5178_v45, %v5163_v19  ;;  %v6204_v27 = vmul.f32 %v6201_v41, %v12534_v44 }
 0x512   : > { %v5385_v24 = vsub.f32 2.0, %v5382_v40  ;;  %v6171_v35 = vadd.f32 %v6168_v60, %v6153_v61 }
 0x513   : > { %v5199_v2 = vadd.f32 %v5196_v63, %v5181_v13 }
 0x514   : > { %v5388_v23 = vmul.f32 %v7388_v53, %v5385_v24  ;;  %v6189_v51 = vadd.f32 %v6186_v18, %v6171_v35  ;;  %v6219_v18 = vrot.slane %v11450_v32, %v12206_v16 }
 0x515   : > { %v5217_v36 = vadd.f32 %v5214_v22, %v5199_v2  ;;  %v12545_v22 = vld [vmem:[#allocation77_spill] sm:$0xff] }
 0x516   : > { %v5391_v45 = vmul.f32 %v12541_v49, %v5388_v23  ;;  %v11560_v19 = vmul.f32 %v12542_v26, %v5388_v23  ;;  %v6207_v37 = vadd.f32 %v6204_v27, %v6189_v51  ;;  %v11573_v35 = vmul.f32 %v12545_v22, %v5388_v23  ;;  %v12546_v49 = vld [vmem:[#allocation63_spill] sm:$0xff] }
 0x517   : > { %v5235_v3 = vadd.f32 %v12543_v0, %v5217_v36  ;;  %v6237_v27 = vrot.slane %v11450_v32, %v12208_v7 }
 0x518   : > { %v5412_v63 = vrot.slane %v5391_v45, %v12195_v1  ;;  %v5427_v17 = vrot.slane %v5391_v45, %v12484_v30  ;;  %v5445_v40 = vrot.slane %v5391_v45, %v12197_v56  ;;  %v5463_v60 = vrot.slane %v5391_v45, %v12204_v28 }
 0x519   : > { %v5253_v53 = vadd.f32 %v12544_v20, %v5235_v3  ;;  %v5481_v2 = vrot.slane %v5391_v45, %v12205_v62  ;;  %v5679_v3 = vrot.slane %v11560_v19, %v12209_v31 }
 0x51a   : > { %v5415_v13 = vmul.f32 %v5412_v63, %v12532_v52  ;;  %v5430_v61 = vmul.f32 %v5427_v17, %v12533_v46  ;;  %v5448_v24 = vmul.f32 %v5445_v40, %v12488_v25  ;;  %v5466_v51 = vmul.f32 %v5463_v60, %v12496_v38 }
 0x51b   : > { %v5499_v52 = vrot.slane %v5391_v45, %v12206_v16  ;;  %v5517_v46 = vrot.slane %v5391_v45, %v12208_v7  ;;  %v5400_v25 = vmul.f32 %v12546_v49, %v5388_v23  ;;  %v5484_v0 = vmul.f32 %v5481_v2, %v12508_v57 }
 0x51c   : > { %v5433_v41 = vadd.f32 %v5430_v61, %v5415_v13  ;;  %v5535_v63 = vrot.slane %v5391_v45, %v12209_v31  ;;  %v5733_v38 = vrot.slane %v11573_v35, %v12197_v56  ;;  %v6222_v17 = vmul.f32 %v6219_v18, %v12524_v47 }
 0x51d   : > { %v5502_v20 = vmul.f32 %v5499_v52, %v12513_v9  ;;  %v5682_v32 = vmul.f32 %v5679_v3, %v11251_v55  ;;  %v6273_v23 = vrot.slane %v11453_v15, %v12195_v1  ;;  %v5520_v57 = vmul.f32 %v5517_v46, %v12514_v54 }
 0x51e   : > { %v5451_v36 = vadd.f32 %v5448_v24, %v5433_v41  ;;  %v5553_v13 = vrot.slane %v11560_v19, %v12195_v1  ;;  %v11598_v45 = vmul.f32 %v5733_v38, %v11269_v5  ;;  %v6240_v61 = vmul.f32 %v6237_v27, %v12525_v11  ;;  %v12547_v5 = vld [vmem:[#allocation109_spill] sm:$0xff] }
 0x51f   : > { %v5805_v9 = vrot.slane %v11573_v35, %v12208_v7  ;;  %v5823_v55 = vrot.slane %v11573_v35, %v12209_v31  ;;  %v5841_v41 = vrot.slane %v5400_v25, %v12195_v1  ;;  %v5538_v54 = vmul.f32 %v5535_v63, %v12515_v48 }
 0x520   : > { %v5469_v26 = vadd.f32 %v5466_v51, %v5451_v36  ;;  %v5571_v24 = vrot.slane %v11560_v19, %v12484_v30  ;;  %v6225_v2 = vadd.f32 %v6222_v17, %v6207_v37  ;;  %v5271_v22 = vadd.f32 %v12547_v5, %v5253_v53 }
 0x521   : > { %v5808_v36 = vmul.f32 %v5805_v9, %v11292_v4  ;;  %v11612_v51 = vmul.f32 %v5823_v55, %v11299_v50  ;;  %v11615_v52 = vmul.f32 %v5841_v41, %v11112_v33  ;;  %v6291_v46 = vrot.slane %v11453_v15, %v12484_v30 }
 0x522   : > { %v5487_v40 = vadd.f32 %v5484_v0, %v5469_v26  ;;  %v6243_v31 = vadd.f32 %v6240_v61, %v6225_v2  ;;  %6746 = vst.msk [vmem:[%s10803_s8 + $0x14] sm:$0xf] %vm12548_vm3, %v5271_v22  ;;  %v5556_v37 = vmul.f32 %v5553_v13, %v12517_v14  ;;  %v5589_v53 = vrot.slane %v11560_v19, %v12197_v56 }
 0x523   : > { %v6276_v50 = vmul.f32 %v6273_v23, %v11256_v8  ;;  %v5574_v33 = vmul.f32 %v5571_v24, %v12518_v10  ;;  %v5607_v49 = vrot.slane %v11560_v19, %v12204_v28  ;;  %v6294_v26 = vmul.f32 %v6291_v46, %v11261_v12 }
 0x524   : > { %v5505_v60 = vadd.f32 %v5502_v20, %v5487_v40  ;;  %v6261_v4 = vadd.f32 %v11515_v59, %v6243_v31  ;;  %v6327_v0 = vrot.slane %v11453_v15, %v12204_v28  ;;  %v5592_v3 = vmul.f32 %v5589_v53, %v12521_v39 }
 0x525   : > { %v5625_v56 = vrot.slane %v11560_v19, %v12205_v62  ;;  %v6345_v63 = vrot.slane %v11453_v15, %v12205_v62  ;;  %v5610_v38 = vmul.f32 %v5607_v49, %v12531_v58  ;;  %v5643_v17 = vrot.slane %v11560_v19, %v12206_v16 }
 0x526   : > { %v5523_v18 = vadd.f32 %v5520_v57, %v5505_v60  ;;  %v6279_v25 = vadd.f32 %v6276_v50, %v6261_v4  ;;  %v6330_v20 = vmul.f32 %v6327_v0, %v11274_v29  ;;  %v6363_v39 = vrot.slane %v11453_v15, %v12206_v16 }
 0x527   : > { %v5628_v57 = vmul.f32 %v5625_v56, %v12534_v44  ;;  %v5661_v13 = vrot.slane %v11560_v19, %v12208_v7  ;;  %v6348_v60 = vmul.f32 %v6345_v63, %v12537_v6  ;;  %v5646_v9 = vmul.f32 %v5643_v17, %v12524_v47 }
 0x528   : > { %v5541_v48 = vadd.f32 %v5538_v54, %v5523_v18  ;;  %v6297_v59 = vadd.f32 %v6294_v26, %v6279_v25  ;;  %v5697_v15 = vrot.slane %v11573_v35, %v12195_v1  ;;  %v5715_v7 = vrot.slane %v11573_v35, %v12484_v30 }
 0x529   : > { %v5664_v54 = vmul.f32 %v5661_v13, %v12525_v11  ;;  %v5751_v1 = vrot.slane %v11573_v35, %v12204_v28  ;;  %v12549_v11 = vld [vmem:[#allocation113_spill] sm:$0xff]  ;;  %v5769_v30 = vrot.slane %v11573_v35, %v12205_v62 }
 0x52a   : > { %v5559_v27 = vadd.f32 %v5556_v37, %v5541_v48  ;;  %v6315_v40 = vadd.f32 %v11527_v34, %v6297_v59  ;;  %v6366_v34 = vmul.f32 %v6363_v39, %v12540_v42  ;;  %v5700_v47 = vmul.f32 %v5697_v15, %v11256_v8 }
 0x52b   : > { %v5718_v18 = vmul.f32 %v5715_v7, %v11261_v12  ;;  %v5787_v12 = vrot.slane %v11573_v35, %v12206_v16  ;;  %v5772_v28 = vmul.f32 %v5769_v30, %v12537_v6 }
 0x52c   : > { %v5577_v14 = vadd.f32 %v5574_v33, %v5559_v27  ;;  %v6333_v61 = vadd.f32 %v6330_v20, %v6315_v40 }
 0x52d   : > { %v5790_v48 = vmul.f32 %v5787_v12, %v12540_v42 }
 0x52e   : > { %v5595_v10 = vadd.f32 %v5592_v3, %v5577_v14  ;;  %v6351_v55 = vadd.f32 %v6348_v60, %v6333_v61 }
 0x530   : > { %v5613_v23 = vadd.f32 %v5610_v38, %v5595_v10  ;;  %v6369_v44 = vadd.f32 %v6366_v34, %v6351_v55 }
 0x532   : > { %v5631_v58 = vadd.f32 %v5628_v57, %v5613_v23  ;;  %v6387_v19 = vadd.f32 %v11541_v21, %v6369_v44  ;;  %v5754_v21 = vmul.f32 %v5751_v1, %v11274_v29 }
 0x534   : > { %v5649_v41 = vadd.f32 %v5646_v9, %v5631_v58  ;;  %v6405_v5 = vadd.f32 %v11544_v43, %v6387_v19 }
 0x536   : > { %v5667_v24 = vadd.f32 %v5664_v54, %v5649_v41  ;;  %v6423_v31 = vadd.f32 %v12549_v11, %v6405_v5 }
 0x538   : > { %v5685_v2 = vadd.f32 %v5682_v32, %v5667_v24  ;;  %6750 = vst.msk [vmem:[%s10803_s8 + $0x2c] sm:$0xf] %vm12550_vm15, %v6423_v31 }
 0x53a   : > { %v5703_v22 = vadd.f32 %v5700_v47, %v5685_v2 }
 0x53c   : > { %v5721_v46 = vadd.f32 %v5718_v18, %v5703_v22 }
 0x53e   : > { %v5739_v8 = vadd.f32 %v11598_v45, %v5721_v46 }
 0x540   : > { %v5757_v43 = vadd.f32 %v5754_v21, %v5739_v8 }
 0x542   : > { %v5775_v32 = vadd.f32 %v5772_v28, %v5757_v43 }
 0x544   : > { %v5793_v37 = vadd.f32 %v5790_v48, %v5775_v32 }
 0x546   : > { %v5811_v62 = vadd.f32 %v5808_v36, %v5793_v37 }
 0x548   : > { %v5829_v53 = vadd.f32 %v11612_v51, %v5811_v62 }
 0x54a   : > { %v5847_v16 = vadd.f32 %v11615_v52, %v5829_v53 }
 0x54c   : > { %6748 = vst.msk [vmem:[%s10803_s8 + $0x20] sm:$0xf] %vm12551_vm4, %v5847_v16 }
 0x54d   : > { %7407 = shalt.err (!%p7404_p3)
}
 0x54e   : > { %s7408_s23 = scalar_lea.hbm %s11681_s15, 768  ;;  %s7412_s6 = scalar_lea.hbm %s11732_s5, 1536 }
 0x54f   : > { %p7409_p4 = scmp.ne.s32.totalorder %s11681_s15, %s7408_s23  ;;  %p7413_p9 = scmp.lt.s32.totalorder %s11681_s15, %s11732_s5 }
 0x550   : > { %p7414_p10 = scmp.lt.s32.totalorder %s7412_s6, %s7408_s23 }
 0x551   : > { %p7410_p7 = pnand %p7409_p4, %p7554_p5 }
 0x552   : > { %p7415_p11 = por %p7414_p10, %p7413_p9 }
 0x553   : > { %p7411_p8 = pneg %p7410_p7 }
 0x555   : > { %p7416_p12 = pnand %p7415_p11, %p7411_p8 }
 0x557   : > { %7419 = shalt.err (!%p7416_p12)
}
 0x558   : > { %s7484_s8 = smov 192   ;;  %s7485_s12 = smov 12  }
 0x559   : > { %6953 = dma.vmem_to_hbm [thread:$0]  (%p7554_p5), %s11675_s25, 768, %s11681_s15, %s11687_s17, %s7484_s8, %s7484_s8, %s7485_s12  }
 0x55a PF: > { %p6959_p13 = scmp.ge.s32.totalorder %s7454_s21, 2  ;;  %s6460_s9 = sand.u32 1, %s7442_s18  }
 0x55b   : > { %s6461_s10 = scalar_lea.sflag [#allocation5], %s6460_s9 }
 0x55c   : > { %p6956_p0 = pnand %p6959_p13, %p7558_p6 }
 0x55e   : > { %p6957_p1 = pneg %p6956_p0 }
 0x560   : > { %7437 = dma.done.wait (%p6957_p1), %s6461_s10, 768  }
 0x561   : > { %7439 = vsyncadd (%p6957_p1), %s6461_s10, 4294966528  ;;  %p15_p2 = scmp.ge.s32.totalorder %s7541_s24, 4   ;;  %s12552_s18 = smov %s7446_s19 }
 0x562   : > { %s12553_s19 = smov %s7450_s20  ;;  %s12554_s20 = smov %s7552_s27 }
 0x563   : > { %s12555_s21 = smov %s7541_s24  ;;  %17 = sbr.rel (!%p15_p2) target bundleno = 3 (0x3), region = 78 }
 0x568   :  { %6466 = vsyncpa [#allocation5], 1 }
 0x569   :  { %6468 = vsyncpa [#allocation5 + $0x1], 1 }

</bundles_post_ra>
